<compile_context>
chip_gen: v5e
topology: v5e:2x2
jax: 0.10.0
libtpu: 0.0.40
codegen_flags: <defaults>
</compile_context>

<pallas_src>
import functools
import math

import jax
import jax.numpy as jnp
from jax.experimental import pallas as pl
from jax.experimental.pallas import tpu as pltpu


_PALLAS_MIN_M = 128        # below this, GEMMs go to XLA (tiny-GEMM bypass)
_PALLAS_MIN_N = 16         # tiny-Cout layers bypass Pallas (perf review)
_K_ALIGN = 16              # bf16 sublane packing
_VMEM_BUDGET = 12 << 20    # conservative per-call budget (v7x has 64 MiB VMEM)


def _round_up(x, m):
    return x + (-x) % m


def _use_pallas(m, n):
    return m >= _PALLAS_MIN_M and n >= _PALLAS_MIN_N


# ----------------------------------------------------------------------------
# Pallas kernels
# ----------------------------------------------------------------------------

def _act_in_kernel(y, act):
    if act == "swish":
        # exp + approx reciprocal live on the EUP slot (cheap vs. VALU divide).
        return y * pl.reciprocal(1.0 + jnp.exp(-y), approx=True)
    if act == "sigmoid":
        return 1.0 / (1.0 + jnp.exp(-y))     # exact (feeds log in the BCE)
    return y


def _mm_bias_act_kernel(a_ref, b_ref, c_ref, o_ref, *, act):
    """o = act(a @ b + bias); bf16 operands, f32 accumulation, fused epilogue."""
    acc = jnp.dot(a_ref[...], b_ref[...], preferred_element_type=jnp.float32)
    o_ref[...] = _act_in_kernel(acc + c_ref[...], act)


def _mm_stats_kernel(a_ref, b_ref, o_ref, st_ref):
    """o = a @ b; rows 0/1 of the 8-row stats block get per-channel sum and
    sum-of-squares so BatchNorm statistics need no extra pass over o."""
    acc = jnp.dot(a_ref[...], b_ref[...], preferred_element_type=jnp.float32)
    o_ref[...] = acc
    st_ref[...] = jnp.zeros_like(st_ref)
    st_ref[0:1, :] = jnp.sum(acc, axis=0, keepdims=True)
    st_ref[1:2, :] = jnp.sum(acc * acc, axis=0, keepdims=True)


def _affine_act_kernel(x_ref, s_ref, c_ref, o_ref, *, act):
    """o = act(x * scale + shift) with per-channel scale/shift (BN apply)."""
    o_ref[...] = _act_in_kernel(x_ref[...] * s_ref[...] + c_ref[...], act)


# ----------------------------------------------------------------------------
# Kernel wrappers
# ----------------------------------------------------------------------------

def _act_jnp(y, act):
    if act == "swish":
        return y * jax.nn.sigmoid(y)
    if act == "sigmoid":
        return jax.nn.sigmoid(y)
    return y


def _swish(y):
    return y * jax.nn.sigmoid(y)


def _prep_a(a, kp):
    a = a.astype(jnp.bfloat16)
    k = a.shape[1]
    if kp != k:
        a = jnp.pad(a, ((0, 0), (0, kp - k)))
    return a


def _pick_tm(mp, kp, n):
    tm = 128
    for cand in (512, 256):
        # keep >= 2 parallel M blocks when possible (v7x has 2 TensorCores)
        if mp % cand == 0 and mp // cand >= 2:
            tm = cand
            break
    # double-buffered bf16 input tiles + f32 output tile must stay under budget
    while tm > 128 and 2 * (tm * kp + kp * n) * 2 + 2 * tm * n * 4 > _VMEM_BUDGET:
        tm //= 2
    return tm


def matmul_bias_act(a, w, bias, act="none"):
    """act(a @ w + bias).  a: (M, K) float; w: (Kp, N) bf16 packed; bias: (N,)."""
    m = a.shape[0]
    kp, n = w.shape
    if bias is None:
        bias = jnp.zeros((n,), jnp.float32)
    a = _prep_a(a, kp)
    if not _use_pallas(m, n):
        y = jnp.dot(a, w, preferred_element_type=jnp.float32)
        return _act_jnp(y + bias, act)
    mp = _round_up(m, 128)
    if mp != m:
        a = jnp.pad(a, ((0, mp - m), (0, 0)))
    tm = _pick_tm(mp, kp, n)
    out = pl.pallas_call(
        functools.partial(_mm_bias_act_kernel, act=act),
        out_shape=jax.ShapeDtypeStruct((mp, n), jnp.float32),
        grid_spec=pltpu.PrefetchScalarGridSpec(
            num_scalar_prefetch=0,
            grid=(mp // tm,),
            in_specs=[pl.BlockSpec((tm, kp), lambda i: (i, 0)),
                      pl.BlockSpec((kp, n), lambda i: (0, 0)),
                      pl.BlockSpec((1, n), lambda i: (0, 0))],
            out_specs=pl.BlockSpec((tm, n), lambda i: (i, 0))),
        compiler_params=pltpu.CompilerParams(
            dimension_semantics=("parallel",)),
    )(a, w, bias.astype(jnp.float32).reshape(1, n))
    return out[:m] if mp != m else out


def matmul_stats(a, w):
    """(a @ w, per-channel sum, per-channel sum of squares).  No bias: every
    conv using this path is followed by batch-stat BatchNorm which is exactly
    invariant to a per-channel constant."""
    m = a.shape[0]
    kp, n = w.shape
    a = _prep_a(a, kp)
    if not _use_pallas(m, n):
        y = jnp.dot(a, w, preferred_element_type=jnp.float32)
        return y, jnp.sum(y, axis=0), jnp.sum(y * y, axis=0)
    mp = _round_up(m, 128)
    if mp != m:
        a = jnp.pad(a, ((0, mp - m), (0, 0)))
    tm = _pick_tm(mp, kp, n)
    nm = mp // tm
    out, st = pl.pallas_call(
        _mm_stats_kernel,
        out_shape=(jax.ShapeDtypeStruct((mp, n), jnp.float32),
                   jax.ShapeDtypeStruct((nm * 8, n), jnp.float32)),
        grid_spec=pltpu.PrefetchScalarGridSpec(
            num_scalar_prefetch=0,
            grid=(nm,),
            in_specs=[pl.BlockSpec((tm, kp), lambda i: (i, 0)),
                      pl.BlockSpec((kp, n), lambda i: (0, 0))],
            out_specs=[pl.BlockSpec((tm, n), lambda i: (i, 0)),
                       pl.BlockSpec((8, n), lambda i: (i, 0))]),
        compiler_params=pltpu.CompilerParams(
            dimension_semantics=("parallel",)),
    )(a, w)
    s1 = jnp.sum(st[0::8], axis=0)
    s2 = jnp.sum(st[1::8], axis=0)
    return (out[:m] if mp != m else out), s1, s2


def affine_act(x2d, scale, shift, act):
    """act(x * scale + shift), per-channel scale/shift.  x2d: (M, N) f32."""
    m, n = x2d.shape
    if not _use_pallas(m, n):
        return _act_jnp(x2d * scale + shift, act)
    mp = _round_up(m, 128)
    x_p = jnp.pad(x2d, ((0, mp - m), (0, 0))) if mp != m else x2d
    tm = _pick_tm(mp, 0, n)
    out = pl.pallas_call(
        functools.partial(_affine_act_kernel, act=act),
        out_shape=jax.ShapeDtypeStruct((mp, n), jnp.float32),
        grid_spec=pltpu.PrefetchScalarGridSpec(
            num_scalar_prefetch=0,
            grid=(mp // tm,),
            in_specs=[pl.BlockSpec((tm, n), lambda i: (i, 0)),
                      pl.BlockSpec((1, n), lambda i: (0, 0)),
                      pl.BlockSpec((1, n), lambda i: (0, 0))],
            out_specs=pl.BlockSpec((tm, n), lambda i: (i, 0))),
        compiler_params=pltpu.CompilerParams(
            dimension_semantics=("parallel",)),
    )(x_p, scale.astype(jnp.float32).reshape(1, n),
      shift.astype(jnp.float32).reshape(1, n))
    return out[:m] if mp != m else out


# ----------------------------------------------------------------------------
# Conv / layer primitives (glue in JAX, heavy math in the kernels above)
# ----------------------------------------------------------------------------

def _im2col(x, kh, kw, stride, padding):
    # TODO(synk): taps are still materialized via im2col (in bf16) instead of
    # being folded into the K axis of the Pallas grid with in-kernel halos.
    b, h, w_, c = x.shape
    x = x.astype(jnp.bfloat16)
    if padding:
        x = jnp.pad(x, ((0, 0), (padding, padding), (padding, padding), (0, 0)))
    ho = (h + 2 * padding - kh) // stride + 1
    wo = (w_ + 2 * padding - kw) // stride + 1
    cols = []
    for dy in range(kh):
        for dx in range(kw):
            cols.append(x[:, dy:dy + stride * ho:stride,
                          dx:dx + stride * wo:stride, :])
    a = jnp.concatenate(cols, axis=-1).reshape(b * ho * wo, kh * kw * c)
    return a, ho, wo


def conv2d(x, p, kh, kw, act="none", stride=1, padding=0):
    """Conv + bias + activation, fused into the GEMM epilogue."""
    b, h, w_, cin = x.shape
    assert _round_up(kh * kw * cin, _K_ALIGN) == p["w"].shape[0]
    if kh == 1 and kw == 1 and stride == 1 and padding == 0:
        a, ho, wo = x.reshape(b * h * w_, cin), h, w_
    else:
        a, ho, wo = _im2col(x, kh, kw, stride, padding)
    y = matmul_bias_act(a, p["w"], p["b"], act)
    return y.reshape(b, ho, wo, p["w"].shape[1])


def conv2d_bn_act(x, p, bn, act, kh, kw, stride=1, padding=0, eps=1e-5):
    """Conv -> training-mode BatchNorm2d (batch stats, biased var) -> act.

    Conv bias is dropped (cancelled exactly by the batch-stat BN); the channel
    sums for mean/var come out of the GEMM epilogue, so the conv output is only
    touched by the final BN-apply pass."""
    b, h, w_, cin = x.shape
    assert _round_up(kh * kw * cin, _K_ALIGN) == p["w"].shape[0]
    if kh == 1 and kw == 1 and stride == 1 and padding == 0:
        a, ho, wo = x.reshape(b * h * w_, cin), h, w_
    else:
        a, ho, wo = _im2col(x, kh, kw, stride, padding)
    y, s1, s2 = matmul_stats(a, p["w"])
    cnt = a.shape[0]
    mean = s1 / cnt
    var = jnp.maximum(s2 / cnt - mean * mean, 0.0)
    scale = bn["g"] / jnp.sqrt(var + eps)
    shift = bn["b"] - mean * scale
    y = affine_act(y, scale, shift, act)
    return y.reshape(b, ho, wo, p["w"].shape[1])


def upsample_forward(p, x, eps=1e-5):
    """UpsampleBlock: ConvTranspose2d(3, s2, p1, op1) + BatchNorm + Swish.

    Subpixel/phase decomposition: a single GEMM over 2x2 input patches yields
    all four output phases (no zero-dilated input), phases are interleaved
    afterwards.  The deconv bias is dropped (cancelled by the batch-stat BN)."""
    b, h, w_, cin = x.shape
    cout = p["bn"]["g"].shape[0]
    assert _round_up(4 * cin, _K_ALIGN) == p["w"].shape[0]
    xb = jnp.pad(x.astype(jnp.bfloat16), ((0, 0), (0, 1), (0, 1), (0, 0)))
    cols = [xb[:, dy:dy + h, dx:dx + w_, :] for dy in (0, 1) for dx in (0, 1)]
    a = jnp.concatenate(cols, axis=-1).reshape(b * h * w_, 4 * cin)
    y, s1, s2 = matmul_stats(a, p["w"])            # (B*H*W, 4*cout), phase-major
    cnt = b * h * w_ * 4
    mean = s1.reshape(4, cout).sum(axis=0) / cnt
    var = jnp.maximum(s2.reshape(4, cout).sum(axis=0) / cnt - mean * mean, 0.0)
    scale = p["bn"]["g"] / jnp.sqrt(var + eps)
    shift = p["bn"]["b"] - mean * scale
    y = affine_act(y, jnp.tile(scale, 4), jnp.tile(shift, 4), "swish")
    y = y.reshape(b, h, w_, 2, 2, cout).transpose(0, 1, 3, 2, 4, 5)
    return y.reshape(b, 2 * h, 2 * w_, cout)


def se_forward(p, x):
    """SELayer: avg-pool -> Linear -> ReLU -> Linear -> sigmoid -> scale.
    Tiny GEMMs (M = batch) stay in XLA per the perf review."""
    b, _, _, c = x.shape
    y = jnp.mean(x, axis=(1, 2))                   # AdaptiveAvgPool2d(1)
    if p["w1"] is None:
        # channel // 16 == 0: Linear(C,0) -> ReLU -> Linear(0,C) -> sigmoid == 0.5
        scale = jnp.full((b, c), 0.5, x.dtype)
    else:
        h = jnp.maximum(jnp.dot(y, p["w1"]), 0.0)
        scale = jax.nn.sigmoid(jnp.dot(h, p["w2"]))
    return x * scale[:, None, None, :]


# ----------------------------------------------------------------------------
# Blocks mirroring the PyTorch modules
# ----------------------------------------------------------------------------

def convblock_forward(p, x):                       # ConvBlock
    x = conv2d(x, p["c1"], 3, 3, padding=1)
    x = conv2d_bn_act(x, p["c2"], p["bn1"], "swish", 1, 1)
    x = conv2d_bn_act(x, p["c3"], p["bn2"], "swish", 3, 3, stride=2, padding=1)
    return x


def resblock_forward(p, x):                        # (Encoder)ResidualBlock
    h = conv2d(x, p["c1"], 5, 5, padding=2)
    h = conv2d_bn_act(h, p["c2"], p["bn"], "swish", 1, 1)
    h = conv2d(h, p["c3"], 3, 3, padding=1)
    h = se_forward(p["se"], h)
    return x + 0.1 * h


def dec_resblock_forward(p, x):                    # DecoderResidualBlock
    h = conv2d_bn_act(x, p["c1"], p["bn1"], "swish", 1, 1)
    # grouped 5x5 folded into one block-diagonal GEMM weight
    h = conv2d_bn_act(h, p["c2"], p["bn2"], "swish", 5, 5, padding=2)
    h = conv2d_bn_act(h, p["c3"], p["bn3"], "none", 1, 1)
    h = se_forward(p["se"], h)
    return x + 0.1 * h


def encoder_forward(p, x):
    xs = []
    for block, res in zip(p["blocks"], p["res"]):
        for cb in block:
            x = convblock_forward(cb, x)
        x = resblock_forward(res, x)
        xs.append(x)
    h = _swish(xs[-1])
    h = conv2d(h, p["cond"], 1, 1)                 # 1x1 spatial -> XLA fallback
    mu, log_var = jnp.split(h, 2, axis=-1)
    return mu, log_var, xs[:-1][::-1]


def kl_std(mu, log_var):
    loss = -0.5 * jnp.sum(1.0 + log_var - mu ** 2 - jnp.exp(log_var),
                          axis=(1, 2, 3))
    return jnp.mean(loss)


def kl_delta(dmu, dlv, mu, lv):
    loss = -0.5 * jnp.sum(1.0 + dlv - dmu ** 2 / jnp.exp(lv) - jnp.exp(dlv),
                          axis=(1, 2, 3))
    return jnp.mean(loss)


def decoder_forward(p, z, xs, rng):
    decoder_out = jnp.zeros_like(z)
    kl_losses = []
    n = len(p["res"])
    for i in range(n):
        h = jnp.concatenate([decoder_out, z], axis=-1)
        for ub in p["blocks"][i]:
            h = upsample_forward(ub, h)
        decoder_out = dec_resblock_forward(p["res"][i], h)
        if i == n - 1:
            break
        cz = p["cond_z"][i]
        c = resblock_forward(cz["res"], decoder_out)
        c = conv2d(_swish(c), cz["conv"], 1, 1)
        mu, log_var = jnp.split(c, 2, axis=-1)

        cxz = p["cond_xz"][i]
        d = jnp.concatenate([xs[i], decoder_out], axis=-1)
        d = resblock_forward(cxz["res"], d)
        d = conv2d(d, cxz["c1"], 1, 1, act="swish")   # conv+bias+swish fused
        d = conv2d(d, cxz["c2"], 1, 1)
        delta_mu, delta_log_var = jnp.split(d, 2, axis=-1)
        kl_losses.append(kl_delta(delta_mu, delta_log_var, mu, log_var))
        mu = mu + delta_mu
        log_var = log_var + delta_log_var

        rng, sub = jax.random.split(rng)
        z = mu + jax.random.normal(sub, mu.shape, mu.dtype) * jnp.exp(0.5 * log_var)

    r = resblock_forward(p["recon"]["res"], decoder_out)
    x_hat = conv2d(r, p["recon"]["conv"], 1, 1, act="sigmoid")  # sigmoid fused
    return x_hat, kl_losses


def hierarchical_vae_forward(params, x_nchw, rng):
    x = jnp.transpose(x_nchw, (0, 2, 3, 1))                    # NCHW -> NHWC
    mu, log_var, xs = encoder_forward(params["enc"], x)
    rng, sub = jax.random.split(rng)
    z = mu + jax.random.normal(sub, mu.shape, mu.dtype) * jnp.exp(0.5 * log_var)
    x_hat, kl_losses = decoder_forward(params["dec"], z, xs, rng)

    # recon loss: per-sample mean BCE fed to the Barron adaptive loss at its
    # init point (alpha = 1, scale = 1) -> Charbonnier sqrt(v^2 + 1) - 1.
    logp = jnp.maximum(jnp.log(x_hat), -100.0)
    log1mp = jnp.maximum(jnp.log(1.0 - x_hat), -100.0)
    bce = -(x * logp + (1.0 - x) * log1mp)
    per_sample = jnp.mean(bce, axis=(1, 2, 3))[:, None]
    # TODO(synk): robust_loss_pytorch AdaptiveLossFunction NLL adds a
    # data-independent log-partition constant log(Z(alpha)*scale); omitted.
    recon_loss = jnp.mean(jnp.sqrt(per_sample * per_sample + 1.0) - 1.0)

    kl_loss = kl_std(mu, log_var)
    return jnp.transpose(x_hat, (0, 3, 1, 2)), recon_loss, [kl_loss] + kl_losses


# ----------------------------------------------------------------------------
# Deterministic synthetic parameter initialization (weights packed once here)
# ----------------------------------------------------------------------------

class KeyGen:
    def __init__(self, seed):
        self._base = jax.random.PRNGKey(seed)
        self._i = 0

    def __call__(self):
        self._i += 1
        return jax.random.fold_in(self._base, self._i)


def _pack_weight(w2d):
    """(K, N) f32 -> (Kp, N) bf16 GEMM weight, K padded to a multiple of 16."""
    k, n = w2d.shape
    assert n <= 512, "pad N at init for wider layers"
    kp = _round_up(k, _K_ALIGN)
    if kp != k:
        w2d = jnp.pad(w2d, ((0, kp - k), (0, 0)))
    return w2d.astype(jnp.bfloat16)


def init_bn(c):
    return {"g": jnp.ones((c,), jnp.float32), "b": jnp.zeros((c,), jnp.float32)}


def init_conv(kg, kh, kw, cin, cout):
    fan_in = kh * kw * cin
    w = jax.random.normal(kg(), (kh, kw, cin, cout), jnp.float32) / math.sqrt(fan_in)
    b = jax.random.normal(kg(), (cout,), jnp.float32) * 0.01
    return {"w": _pack_weight(w.reshape(fan_in, cout)), "b": b}


def init_grouped_conv(kg, k, dim, groups):
    """Grouped conv packed as a single block-diagonal GEMM weight."""
    gd = dim * groups
    fan_in = k * k * dim
    w = jax.random.normal(kg(), (k * k, dim, gd), jnp.float32) / math.sqrt(fan_in)
    b = jax.random.normal(kg(), (gd,), jnp.float32) * 0.01   # cancelled by BN
    mask = jnp.repeat(jnp.eye(groups, dtype=jnp.float32), dim, axis=1)  # (g, gd)
    wbd = jnp.einsum("tcn,gn->tgcn", w, mask).reshape(k * k * gd, gd)
    return {"w": _pack_weight(wbd), "b": b}


def init_upsample(kg, cin, cout):
    """ConvTranspose2d(3, s2, p1, op1) packed as a subpixel (2x2-patch) GEMM.
    (Weights are synthetic and stored directly in forward-conv layout.)"""
    w = jax.random.normal(kg(), (3, 3, cin, cout), jnp.float32) / math.sqrt(9 * cin)
    wc = jnp.zeros((4 * cin, 4 * cout), jnp.float32)
    # (patch tap dy,dx) feeding (output phase a,b) with deconv tap (ty,tx)
    entries = [(0, 0, 0, 0, 1, 1),
               (0, 0, 0, 1, 1, 0), (0, 1, 0, 1, 1, 2),
               (0, 0, 1, 0, 0, 1), (1, 0, 1, 0, 2, 1),
               (0, 0, 1, 1, 0, 0), (0, 1, 1, 1, 0, 2),
               (1, 0, 1, 1, 2, 0), (1, 1, 1, 1, 2, 2)]
    for dy, dx, a, b_, ty, tx in entries:
        r0, c0 = (dy * 2 + dx) * cin, (a * 2 + b_) * cout
        wc = wc.at[r0:r0 + cin, c0:c0 + cout].set(w[ty, tx])
    return {"w": _pack_weight(wc), "bn": init_bn(cout)}


def init_se(kg, dim, reduction=16):
    hidden = dim // reduction
    if hidden == 0:
        return {"w1": None, "w2": None}
    w1 = jax.random.normal(kg(), (dim, hidden), jnp.float32) / math.sqrt(dim)
    w2 = jax.random.normal(kg(), (hidden, dim), jnp.float32) / math.sqrt(hidden)
    return {"w1": w1, "w2": w2}


def init_convblock(kg, cin, cout):
    return {"c1": init_conv(kg, 3, 3, cin, cout),
            "c2": init_conv(kg, 1, 1, cout, cout // 2),
            "bn1": init_bn(cout // 2),
            "c3": init_conv(kg, 3, 3, cout // 2, cout),
            "bn2": init_bn(cout)}


def init_resblock(kg, dim):
    return {"c1": init_conv(kg, 5, 5, dim, dim),
            "c2": init_conv(kg, 1, 1, dim, dim),
            "bn": init_bn(dim),
            "c3": init_conv(kg, 3, 3, dim, dim),
            "se": init_se(kg, dim)}


def init_dec_resblock(kg, dim, n_group):
    gd = n_group * dim
    return {"c1": init_conv(kg, 1, 1, dim, gd),
            "bn1": init_bn(gd),
            "c2": init_grouped_conv(kg, 5, dim, n_group),
            "bn2": init_bn(gd),
            "c3": init_conv(kg, 1, 1, gd, dim),
            "bn3": init_bn(dim),
            "se": init_se(kg, dim)}


def init_hvae_params(z_dim, channels, seed=0):
    kg = KeyGen(seed)
    enc = {
        "blocks": [
            [init_convblock(kg, channels, z_dim // 16),
             init_convblock(kg, z_dim // 16, z_dim // 8)],
            [init_convblock(kg, z_dim // 8, z_dim // 4),
             init_convblock(kg, z_dim // 4, z_dim // 2)],
            [init_convblock(kg, z_dim // 2, z_dim)],
        ],
        "res": [init_resblock(kg, z_dim // 8),
                init_resblock(kg, z_dim // 2),
                init_resblock(kg, z_dim)],
        "cond": init_conv(kg, 1, 1, z_dim, z_dim * 2),
    }
    dec = {
        "blocks": [
            [init_upsample(kg, z_dim * 2, z_dim // 2)],
            [init_upsample(kg, z_dim, z_dim // 4),
             init_upsample(kg, z_dim // 4, z_dim // 8)],
            [init_upsample(kg, z_dim // 4, z_dim // 16),
             init_upsample(kg, z_dim // 16, z_dim // 32)],
        ],
        "res": [init_dec_resblock(kg, z_dim // 2, 4),
                init_dec_resblock(kg, z_dim // 8, 2),
                init_dec_resblock(kg, z_dim // 32, 1)],
        "cond_z": [
            {"res": init_resblock(kg, z_dim // 2),
             "conv": init_conv(kg, 1, 1, z_dim // 2, z_dim)},
            {"res": init_resblock(kg, z_dim // 8),
             "conv": init_conv(kg, 1, 1, z_dim // 8, z_dim // 4)},
        ],
        "cond_xz": [
            {"res": init_resblock(kg, z_dim),
             "c1": init_conv(kg, 1, 1, z_dim, z_dim // 2),
             "c2": init_conv(kg, 1, 1, z_dim // 2, z_dim)},
            {"res": init_resblock(kg, z_dim // 4),
             "c1": init_conv(kg, 1, 1, z_dim // 4, z_dim // 8),
             "c2": init_conv(kg, 1, 1, z_dim // 8, z_dim // 4)},
        ],
        "recon": {"res": init_resblock(kg, z_dim // 32),
                  "conv": init_conv(kg, 1, 1, z_dim // 32, channels)},
    }
    return {"enc": enc, "dec": dec}


# ----------------------------------------------------------------------------
# Main
# ----------------------------------------------------------------------------

if __name__ == "__main__":
    B, C, H, W = 2, 3, 32, 32     # img_dim must be divisible by 32
    z_dim = 128

    key = jax.random.PRNGKey(0)
    k_x, k_fwd = jax.random.split(key)
    x = jax.random.uniform(k_x, (B, C, H, W), jnp.float32)   # in [0,1] for BCE

    params = init_hvae_params(z_dim, channels=C, seed=0)

    fwd = jax.jit(hierarchical_vae_forward)
    x_hat, recon_loss, kl_losses = fwd(params, x, k_fwd)
    jax.block_until_ready((x_hat, recon_loss, kl_losses))

    assert x_hat.shape == (B, C, H, W)
    assert recon_loss.shape == ()
    assert len(kl_losses) == 3 and all(l.shape == () for l in kl_losses)
    print("KERNEL_OK")
</pallas_src>

<mosaic_0001>
module attributes {stable_mosaic.version = 11 : i64} {
  func.func @_mm_bias_act_kernel(%arg0: i32, %arg1: memref<256x80xbf16, #tpu.memory_space<vmem>>, %arg2: memref<80x16xbf16, #tpu.memory_space<vmem>>, %arg3: memref<1x16xf32, #tpu.memory_space<vmem>>, %arg4: memref<256x16xf32, #tpu.memory_space<vmem>>) attributes {dimension_semantics = [#tpu.dimension_semantics<parallel>], iteration_bounds = array<i64: 2>, scalar_prefetch = 0 : i64, scratch_operands = 0 : i64, tpu.core_type = #tpu.core_type<tc>, window_params = [{transform_indices = @transform_0, window_bounds = array<i64: 256, 80>}, {pipeline_mode = #tpu.pipeline_mode<synchronous>, transform_indices = @transform_1, window_bounds = array<i64: 80, 16>}, {pipeline_mode = #tpu.pipeline_mode<synchronous>, transform_indices = @transform_2, window_bounds = array<i64: 1, 16>}, {transform_indices = @transform_3, window_bounds = array<i64: 256, 16>}]} {
    %c0 = arith.constant 0 : index
    %c0_0 = arith.constant 0 : index
    %0 = vector.load %arg1[%c0, %c0_0] : memref<256x80xbf16, #tpu.memory_space<vmem>>, vector<256x80xbf16>
    %c0_1 = arith.constant 0 : index
    %c0_2 = arith.constant 0 : index
    %1 = vector.load %arg2[%c0_1, %c0_2] : memref<80x16xbf16, #tpu.memory_space<vmem>>, vector<80x16xbf16>
    %cst = arith.constant dense<0.000000e+00> : vector<256x16xf32>
    %2 = tpu.matmul %0, %1, %cst {dimension_numbers = #tpu.dot_dimension_numbers<[1], [0], [0], [1], [0, 0, 1, 1], [], []>} : vector<256x80xbf16>, vector<80x16xbf16>, vector<256x16xf32> -> vector<256x16xf32>
    %c0_3 = arith.constant 0 : index
    %c0_4 = arith.constant 0 : index
    %3 = vector.load %arg3[%c0_3, %c0_4] : memref<1x16xf32, #tpu.memory_space<vmem>>, vector<1x16xf32>
    %4 = vector.broadcast %3 : vector<1x16xf32> to vector<256x16xf32>
    %5 = arith.addf %2, %4 : vector<256x16xf32>
    %c0_5 = arith.constant 0 : index
    %c0_6 = arith.constant 0 : index
    %6 = vector.load %arg4[%c0_5, %c0_6] : memref<256x16xf32, #tpu.memory_space<vmem>>, vector<256x16xf32>
    tpu.vector_store %arg4[%c0_5, %c0_6], %5 {strides = array<i32>} : memref<256x16xf32, #tpu.memory_space<vmem>>, vector<256x16xf32>,
    return
  }
  func.func @transform_0(%arg0: i32) -> (i32, i32) {
    %c0_i32 = arith.constant 0 : i32
    %c0_i32_0 = arith.constant 0 : i32
    return %arg0, %c0_i32 : i32, i32
  }
  func.func @transform_1(%arg0: i32) -> (i32, i32) {
    %c0_i32 = arith.constant 0 : i32
    %c0_i32_0 = arith.constant 0 : i32
    %c0_i32_1 = arith.constant 0 : i32
    return %c0_i32, %c0_i32_0 : i32, i32
  }
  func.func @transform_2(%arg0: i32) -> (i32, i32) {
    %c0_i32 = arith.constant 0 : i32
    %c0_i32_0 = arith.constant 0 : i32
    %c0_i32_1 = arith.constant 0 : i32
    return %c0_i32, %c0_i32_0 : i32, i32
  }
  func.func @transform_3(%arg0: i32) -> (i32, i32) {
    %c0_i32 = arith.constant 0 : i32
    %c0_i32_0 = arith.constant 0 : i32
    return %arg0, %c0_i32 : i32, i32
  }
}

module attributes {stable_mosaic.version = 11 : i64} {
  func.func @_affine_act_kernel(%arg0: i32, %arg1: memref<128x16xf32, #tpu.memory_space<vmem>>, %arg2: memref<1x16xf32, #tpu.memory_space<vmem>>, %arg3: memref<1x16xf32, #tpu.memory_space<vmem>>, %arg4: memref<128x16xf32, #tpu.memory_space<vmem>>) attributes {dimension_semantics = [#tpu.dimension_semantics<parallel>], iteration_bounds = array<i64: 1>, scalar_prefetch = 0 : i64, scratch_operands = 0 : i64, tpu.core_type = #tpu.core_type<tc>, window_params = [{transform_indices = @transform_0, window_bounds = array<i64: 128, 16>}, {pipeline_mode = #tpu.pipeline_mode<synchronous>, transform_indices = @transform_1, window_bounds = array<i64: 1, 16>}, {pipeline_mode = #tpu.pipeline_mode<synchronous>, transform_indices = @transform_2, window_bounds = array<i64: 1, 16>}, {transform_indices = @transform_3, window_bounds = array<i64: 128, 16>}]} {
    %c0 = arith.constant 0 : index
    %c0_0 = arith.constant 0 : index
    %0 = vector.load %arg1[%c0, %c0_0] : memref<128x16xf32, #tpu.memory_space<vmem>>, vector<128x16xf32>
    %c0_1 = arith.constant 0 : index
    %c0_2 = arith.constant 0 : index
    %1 = vector.load %arg2[%c0_1, %c0_2] : memref<1x16xf32, #tpu.memory_space<vmem>>, vector<1x16xf32>
    %2 = vector.broadcast %1 : vector<1x16xf32> to vector<128x16xf32>
    %3 = arith.mulf %0, %2 : vector<128x16xf32>
    %c0_3 = arith.constant 0 : index
    %c0_4 = arith.constant 0 : index
    %4 = vector.load %arg3[%c0_3, %c0_4] : memref<1x16xf32, #tpu.memory_space<vmem>>, vector<1x16xf32>
    %5 = vector.broadcast %4 : vector<1x16xf32> to vector<128x16xf32>
    %6 = arith.addf %3, %5 : vector<128x16xf32>
    %cst = arith.constant 0.000000e+00 : f32
    %7 = vector.broadcast %cst : f32 to vector<128x16xf32>
    %8 = arith.subf %7, %6 : vector<128x16xf32>
    %9 = math.exp %8 : vector<128x16xf32>
    %cst_5 = arith.constant 1.000000e+00 : f32
    %10 = vector.broadcast %cst_5 : f32 to vector<128x16xf32>
    %11 = arith.addf %10, %9 : vector<128x16xf32>
    %12 = tpu.reciprocal %11 {approx = true} : vector<128x16xf32> -> vector<128x16xf32>
    %13 = arith.mulf %6, %12 : vector<128x16xf32>
    %c0_6 = arith.constant 0 : index
    %c0_7 = arith.constant 0 : index
    %14 = vector.load %arg4[%c0_6, %c0_7] : memref<128x16xf32, #tpu.memory_space<vmem>>, vector<128x16xf32>
    tpu.vector_store %arg4[%c0_6, %c0_7], %13 {strides = array<i32>} : memref<128x16xf32, #tpu.memory_space<vmem>>, vector<128x16xf32>,
    return
  }
  func.func @transform_0(%arg0: i32) -> (i32, i32) {
    %c0_i32 = arith.constant 0 : i32
    %c0_i32_0 = arith.constant 0 : i32
    return %arg0, %c0_i32 : i32, i32
  }
  func.func @transform_1(%arg0: i32) -> (i32, i32) {
    %c0_i32 = arith.constant 0 : i32
    %c0_i32_0 = arith.constant 0 : i32
    %c0_i32_1 = arith.constant 0 : i32
    return %c0_i32, %c0_i32_0 : i32, i32
  }
  func.func @transform_2(%arg0: i32) -> (i32, i32) {
    %c0_i32 = arith.constant 0 : i32
    %c0_i32_0 = arith.constant 0 : i32
    %c0_i32_1 = arith.constant 0 : i32
    return %c0_i32, %c0_i32_0 : i32, i32
  }
  func.func @transform_3(%arg0: i32) -> (i32, i32) {
    %c0_i32 = arith.constant 0 : i32
    %c0_i32_0 = arith.constant 0 : i32
    return %arg0, %c0_i32 : i32, i32
  }
}

module attributes {stable_mosaic.version = 11 : i64} {
  func.func @_mm_stats_kernel(%arg0: i32, %arg1: memref<128x80xbf16, #tpu.memory_space<vmem>>, %arg2: memref<80x16xbf16, #tpu.memory_space<vmem>>, %arg3: memref<128x16xf32, #tpu.memory_space<vmem>>, %arg4: memref<8x16xf32, #tpu.memory_space<vmem>>) attributes {dimension_semantics = [#tpu.dimension_semantics<parallel>], iteration_bounds = array<i64: 1>, scalar_prefetch = 0 : i64, scratch_operands = 0 : i64, tpu.core_type = #tpu.core_type<tc>, window_params = [{transform_indices = @transform_0, window_bounds = array<i64: 128, 80>}, {pipeline_mode = #tpu.pipeline_mode<synchronous>, transform_indices = @transform_1, window_bounds = array<i64: 80, 16>}, {transform_indices = @transform_2, window_bounds = array<i64: 128, 16>}, {transform_indices = @transform_3, window_bounds = array<i64: 8, 16>}]} {
    %c0 = arith.constant 0 : index
    %c0_0 = arith.constant 0 : index
    %0 = vector.load %arg1[%c0, %c0_0] : memref<128x80xbf16, #tpu.memory_space<vmem>>, vector<128x80xbf16>
    %c0_1 = arith.constant 0 : index
    %c0_2 = arith.constant 0 : index
    %1 = vector.load %arg2[%c0_1, %c0_2] : memref<80x16xbf16, #tpu.memory_space<vmem>>, vector<80x16xbf16>
    %cst = arith.constant dense<0.000000e+00> : vector<128x16xf32>
    %2 = tpu.matmul %0, %1, %cst {dimension_numbers = #tpu.dot_dimension_numbers<[1], [0], [0], [1], [0, 0, 1, 1], [], []>} : vector<128x80xbf16>, vector<80x16xbf16>, vector<128x16xf32> -> vector<128x16xf32>
    %c0_3 = arith.constant 0 : index
    %c0_4 = arith.constant 0 : index
    %3 = vector.load %arg3[%c0_3, %c0_4] : memref<128x16xf32, #tpu.memory_space<vmem>>, vector<128x16xf32>
    tpu.vector_store %arg3[%c0_3, %c0_4], %2 {strides = array<i32>} : memref<128x16xf32, #tpu.memory_space<vmem>>, vector<128x16xf32>,
    %cst_5 = arith.constant 0.000000e+00 : f32
    %4 = vector.broadcast %cst_5 : f32 to vector<8x16xf32>
    %c0_6 = arith.constant 0 : index
    %c0_7 = arith.constant 0 : index
    %5 = vector.load %arg4[%c0_6, %c0_7] : memref<8x16xf32, #tpu.memory_space<vmem>>, vector<8x16xf32>
    tpu.vector_store %arg4[%c0_6, %c0_7], %4 {strides = array<i32>} : memref<8x16xf32, #tpu.memory_space<vmem>>, vector<8x16xf32>,
    %cst_8 = arith.constant dense<0.000000e+00> : vector<16xf32>
    %6 = vector.multi_reduction <add>, %2, %cst_8 [0] : vector<128x16xf32> to vector<16xf32>
    %7 = vector.shape_cast %6 : vector<16xf32> to vector<1x16xf32>
    %c0_9 = arith.constant 0 : index
    %c0_10 = arith.constant 0 : index
    %8 = vector.load %arg4[%c0_9, %c0_10] : memref<8x16xf32, #tpu.memory_space<vmem>>, vector<1x16xf32>
    tpu.vector_store %arg4[%c0_9, %c0_10], %7 {strides = array<i32>} : memref<8x16xf32, #tpu.memory_space<vmem>>, vector<1x16xf32>,
    %9 = arith.mulf %2, %2 : vector<128x16xf32>
    %cst_11 = arith.constant dense<0.000000e+00> : vector<16xf32>
    %10 = vector.multi_reduction <add>, %9, %cst_11 [0] : vector<128x16xf32> to vector<16xf32>
    %11 = vector.shape_cast %10 : vector<16xf32> to vector<1x16xf32>
    %c1 = arith.constant 1 : index
    %c0_12 = arith.constant 0 : index
    %12 = vector.load %arg4[%c1, %c0_12] : memref<8x16xf32, #tpu.memory_space<vmem>>, vector<1x16xf32>
    tpu.vector_store %arg4[%c1, %c0_12], %11 {strides = array<i32>} : memref<8x16xf32, #tpu.memory_space<vmem>>, vector<1x16xf32>,
    return
  }
  func.func @transform_0(%arg0: i32) -> (i32, i32) {
    %c0_i32 = arith.constant 0 : i32
    %c0_i32_0 = arith.constant 0 : i32
    return %arg0, %c0_i32 : i32, i32
  }
  func.func @transform_1(%arg0: i32) -> (i32, i32) {
    %c0_i32 = arith.constant 0 : i32
    %c0_i32_0 = arith.constant 0 : i32
    %c0_i32_1 = arith.constant 0 : i32
    return %c0_i32, %c0_i32_0 : i32, i32
  }
  func.func @transform_2(%arg0: i32) -> (i32, i32) {
    %c0_i32 = arith.constant 0 : i32
    %c0_i32_0 = arith.constant 0 : i32
    return %arg0, %c0_i32 : i32, i32
  }
  func.func @transform_3(%arg0: i32) -> (i32, i32) {
    %c0_i32 = arith.constant 0 : i32
    %c0_i32_0 = arith.constant 0 : i32
    return %arg0, %c0_i32 : i32, i32
  }
}

module attributes {stable_mosaic.version = 11 : i64} {
  func.func @_mm_bias_act_kernel(%arg0: i32, %arg1: memref<128x400xbf16, #tpu.memory_space<vmem>>, %arg2: memref<400x16xbf16, #tpu.memory_space<vmem>>, %arg3: memref<1x16xf32, #tpu.memory_space<vmem>>, %arg4: memref<128x16xf32, #tpu.memory_space<vmem>>) attributes {dimension_semantics = [#tpu.dimension_semantics<parallel>], iteration_bounds = array<i64: 1>, scalar_prefetch = 0 : i64, scratch_operands = 0 : i64, tpu.core_type = #tpu.core_type<tc>, window_params = [{transform_indices = @transform_0, window_bounds = array<i64: 128, 400>}, {pipeline_mode = #tpu.pipeline_mode<synchronous>, transform_indices = @transform_1, window_bounds = array<i64: 400, 16>}, {pipeline_mode = #tpu.pipeline_mode<synchronous>, transform_indices = @transform_2, window_bounds = array<i64: 1, 16>}, {transform_indices = @transform_3, window_bounds = array<i64: 128, 16>}]} {
    %c0 = arith.constant 0 : index
    %c0_0 = arith.constant 0 : index
    %0 = vector.load %arg1[%c0, %c0_0] : memref<128x400xbf16, #tpu.memory_space<vmem>>, vector<128x400xbf16>
    %c0_1 = arith.constant 0 : index
    %c0_2 = arith.constant 0 : index
    %1 = vector.load %arg2[%c0_1, %c0_2] : memref<400x16xbf16, #tpu.memory_space<vmem>>, vector<400x16xbf16>
    %cst = arith.constant dense<0.000000e+00> : vector<128x16xf32>
    %2 = tpu.matmul %0, %1, %cst {dimension_numbers = #tpu.dot_dimension_numbers<[1], [0], [0], [1], [0, 0, 1, 1], [], []>} : vector<128x400xbf16>, vector<400x16xbf16>, vector<128x16xf32> -> vector<128x16xf32>
    %c0_3 = arith.constant 0 : index
    %c0_4 = arith.constant 0 : index
    %3 = vector.load %arg3[%c0_3, %c0_4] : memref<1x16xf32, #tpu.memory_space<vmem>>, vector<1x16xf32>
    %4 = vector.broadcast %3 : vector<1x16xf32> to vector<128x16xf32>
    %5 = arith.addf %2, %4 : vector<128x16xf32>
    %c0_5 = arith.constant 0 : index
    %c0_6 = arith.constant 0 : index
    %6 = vector.load %arg4[%c0_5, %c0_6] : memref<128x16xf32, #tpu.memory_space<vmem>>, vector<128x16xf32>
    tpu.vector_store %arg4[%c0_5, %c0_6], %5 {strides = array<i32>} : memref<128x16xf32, #tpu.memory_space<vmem>>, vector<128x16xf32>,
    return
  }
  func.func @transform_0(%arg0: i32) -> (i32, i32) {
    %c0_i32 = arith.constant 0 : i32
    %c0_i32_0 = arith.constant 0 : i32
    return %arg0, %c0_i32 : i32, i32
  }
  func.func @transform_1(%arg0: i32) -> (i32, i32) {
    %c0_i32 = arith.constant 0 : i32
    %c0_i32_0 = arith.constant 0 : i32
    %c0_i32_1 = arith.constant 0 : i32
    return %c0_i32, %c0_i32_0 : i32, i32
  }
  func.func @transform_2(%arg0: i32) -> (i32, i32) {
    %c0_i32 = arith.constant 0 : i32
    %c0_i32_0 = arith.constant 0 : i32
    %c0_i32_1 = arith.constant 0 : i32
    return %c0_i32, %c0_i32_0 : i32, i32
  }
  func.func @transform_3(%arg0: i32) -> (i32, i32) {
    %c0_i32 = arith.constant 0 : i32
    %c0_i32_0 = arith.constant 0 : i32
    return %arg0, %c0_i32 : i32, i32
  }
}

module attributes {stable_mosaic.version = 11 : i64} {
  func.func @_mm_stats_kernel(%arg0: i32, %arg1: memref<128x16xbf16, #tpu.memory_space<vmem>>, %arg2: memref<16x16xbf16, #tpu.memory_space<vmem>>, %arg3: memref<128x16xf32, #tpu.memory_space<vmem>>, %arg4: memref<8x16xf32, #tpu.memory_space<vmem>>) attributes {dimension_semantics = [#tpu.dimension_semantics<parallel>], iteration_bounds = array<i64: 1>, scalar_prefetch = 0 : i64, scratch_operands = 0 : i64, tpu.core_type = #tpu.core_type<tc>, window_params = [{transform_indices = @transform_0, window_bounds = array<i64: 128, 16>}, {pipeline_mode = #tpu.pipeline_mode<synchronous>, transform_indices = @transform_1, window_bounds = array<i64: 16, 16>}, {transform_indices = @transform_2, window_bounds = array<i64: 128, 16>}, {transform_indices = @transform_3, window_bounds = array<i64: 8, 16>}]} {
    %c0 = arith.constant 0 : index
    %c0_0 = arith.constant 0 : index
    %0 = vector.load %arg1[%c0, %c0_0] : memref<128x16xbf16, #tpu.memory_space<vmem>>, vector<128x16xbf16>
    %c0_1 = arith.constant 0 : index
    %c0_2 = arith.constant 0 : index
    %1 = vector.load %arg2[%c0_1, %c0_2] : memref<16x16xbf16, #tpu.memory_space<vmem>>, vector<16x16xbf16>
    %cst = arith.constant dense<0.000000e+00> : vector<128x16xf32>
    %2 = tpu.matmul %0, %1, %cst {dimension_numbers = #tpu.dot_dimension_numbers<[1], [0], [0], [1], [0, 0, 1, 1], [], []>} : vector<128x16xbf16>, vector<16x16xbf16>, vector<128x16xf32> -> vector<128x16xf32>
    %c0_3 = arith.constant 0 : index
    %c0_4 = arith.constant 0 : index
    %3 = vector.load %arg3[%c0_3, %c0_4] : memref<128x16xf32, #tpu.memory_space<vmem>>, vector<128x16xf32>
    tpu.vector_store %arg3[%c0_3, %c0_4], %2 {strides = array<i32>} : memref<128x16xf32, #tpu.memory_space<vmem>>, vector<128x16xf32>,
    %cst_5 = arith.constant 0.000000e+00 : f32
    %4 = vector.broadcast %cst_5 : f32 to vector<8x16xf32>
    %c0_6 = arith.constant 0 : index
    %c0_7 = arith.constant 0 : index
    %5 = vector.load %arg4[%c0_6, %c0_7] : memref<8x16xf32, #tpu.memory_space<vmem>>, vector<8x16xf32>
    tpu.vector_store %arg4[%c0_6, %c0_7], %4 {strides = array<i32>} : memref<8x16xf32, #tpu.memory_space<vmem>>, vector<8x16xf32>,
    %cst_8 = arith.constant dense<0.000000e+00> : vector<16xf32>
    %6 = vector.multi_reduction <add>, %2, %cst_8 [0] : vector<128x16xf32> to vector<16xf32>
    %7 = vector.shape_cast %6 : vector<16xf32> to vector<1x16xf32>
    %c0_9 = arith.constant 0 : index
    %c0_10 = arith.constant 0 : index
    %8 = vector.load %arg4[%c0_9, %c0_10] : memref<8x16xf32, #tpu.memory_space<vmem>>, vector<1x16xf32>
    tpu.vector_store %arg4[%c0_9, %c0_10], %7 {strides = array<i32>} : memref<8x16xf32, #tpu.memory_space<vmem>>, vector<1x16xf32>,
    %9 = arith.mulf %2, %2 : vector<128x16xf32>
    %cst_11 = arith.constant dense<0.000000e+00> : vector<16xf32>
    %10 = vector.multi_reduction <add>, %9, %cst_11 [0] : vector<128x16xf32> to vector<16xf32>
    %11 = vector.shape_cast %10 : vector<16xf32> to vector<1x16xf32>
    %c1 = arith.constant 1 : index
    %c0_12 = arith.constant 0 : index
    %12 = vector.load %arg4[%c1, %c0_12] : memref<8x16xf32, #tpu.memory_space<vmem>>, vector<1x16xf32>
    tpu.vector_store %arg4[%c1, %c0_12], %11 {strides = array<i32>} : memref<8x16xf32, #tpu.memory_space<vmem>>, vector<1x16xf32>,
    return
  }
  func.func @transform_0(%arg0: i32) -> (i32, i32) {
    %c0_i32 = arith.constant 0 : i32
    %c0_i32_0 = arith.constant 0 : i32
    return %arg0, %c0_i32 : i32, i32
  }
  func.func @transform_1(%arg0: i32) -> (i32, i32) {
    %c0_i32 = arith.constant 0 : i32
    %c0_i32_0 = arith.constant 0 : i32
    %c0_i32_1 = arith.constant 0 : i32
    return %c0_i32, %c0_i32_0 : i32, i32
  }
  func.func @transform_2(%arg0: i32) -> (i32, i32) {
    %c0_i32 = arith.constant 0 : i32
    %c0_i32_0 = arith.constant 0 : i32
    return %arg0, %c0_i32 : i32, i32
  }
  func.func @transform_3(%arg0: i32) -> (i32, i32) {
    %c0_i32 = arith.constant 0 : i32
    %c0_i32_0 = arith.constant 0 : i32
    return %arg0, %c0_i32 : i32, i32
  }
}

module attributes {stable_mosaic.version = 11 : i64} {
  func.func @_mm_bias_act_kernel(%arg0: i32, %arg1: memref<128x144xbf16, #tpu.memory_space<vmem>>, %arg2: memref<144x16xbf16, #tpu.memory_space<vmem>>, %arg3: memref<1x16xf32, #tpu.memory_space<vmem>>, %arg4: memref<128x16xf32, #tpu.memory_space<vmem>>) attributes {dimension_semantics = [#tpu.dimension_semantics<parallel>], iteration_bounds = array<i64: 1>, scalar_prefetch = 0 : i64, scratch_operands = 0 : i64, tpu.core_type = #tpu.core_type<tc>, window_params = [{transform_indices = @transform_0, window_bounds = array<i64: 128, 144>}, {pipeline_mode = #tpu.pipeline_mode<synchronous>, transform_indices = @transform_1, window_bounds = array<i64: 144, 16>}, {pipeline_mode = #tpu.pipeline_mode<synchronous>, transform_indices = @transform_2, window_bounds = array<i64: 1, 16>}, {transform_indices = @transform_3, window_bounds = array<i64: 128, 16>}]} {
    %c0 = arith.constant 0 : index
    %c0_0 = arith.constant 0 : index
    %0 = vector.load %arg1[%c0, %c0_0] : memref<128x144xbf16, #tpu.memory_space<vmem>>, vector<128x144xbf16>
    %c0_1 = arith.constant 0 : index
    %c0_2 = arith.constant 0 : index
    %1 = vector.load %arg2[%c0_1, %c0_2] : memref<144x16xbf16, #tpu.memory_space<vmem>>, vector<144x16xbf16>
    %cst = arith.constant dense<0.000000e+00> : vector<128x16xf32>
    %2 = tpu.matmul %0, %1, %cst {dimension_numbers = #tpu.dot_dimension_numbers<[1], [0], [0], [1], [0, 0, 1, 1], [], []>} : vector<128x144xbf16>, vector<144x16xbf16>, vector<128x16xf32> -> vector<128x16xf32>
    %c0_3 = arith.constant 0 : index
    %c0_4 = arith.constant 0 : index
    %3 = vector.load %arg3[%c0_3, %c0_4] : memref<1x16xf32, #tpu.memory_space<vmem>>, vector<1x16xf32>
    %4 = vector.broadcast %3 : vector<1x16xf32> to vector<128x16xf32>
    %5 = arith.addf %2, %4 : vector<128x16xf32>
    %c0_5 = arith.constant 0 : index
    %c0_6 = arith.constant 0 : index
    %6 = vector.load %arg4[%c0_5, %c0_6] : memref<128x16xf32, #tpu.memory_space<vmem>>, vector<128x16xf32>
    tpu.vector_store %arg4[%c0_5, %c0_6], %5 {strides = array<i32>} : memref<128x16xf32, #tpu.memory_space<vmem>>, vector<128x16xf32>,
    return
  }
  func.func @transform_0(%arg0: i32) -> (i32, i32) {
    %c0_i32 = arith.constant 0 : i32
    %c0_i32_0 = arith.constant 0 : i32
    return %arg0, %c0_i32 : i32, i32
  }
  func.func @transform_1(%arg0: i32) -> (i32, i32) {
    %c0_i32 = arith.constant 0 : i32
    %c0_i32_0 = arith.constant 0 : i32
    %c0_i32_1 = arith.constant 0 : i32
    return %c0_i32, %c0_i32_0 : i32, i32
  }
  func.func @transform_2(%arg0: i32) -> (i32, i32) {
    %c0_i32 = arith.constant 0 : i32
    %c0_i32_0 = arith.constant 0 : i32
    %c0_i32_1 = arith.constant 0 : i32
    return %c0_i32, %c0_i32_0 : i32, i32
  }
  func.func @transform_3(%arg0: i32) -> (i32, i32) {
    %c0_i32 = arith.constant 0 : i32
    %c0_i32_0 = arith.constant 0 : i32
    return %arg0, %c0_i32 : i32, i32
  }
}

module attributes {stable_mosaic.version = 11 : i64} {
  func.func @_mm_bias_act_kernel(%arg0: i32, %arg1: memref<128x144xbf16, #tpu.memory_space<vmem>>, %arg2: memref<144x32xbf16, #tpu.memory_space<vmem>>, %arg3: memref<1x32xf32, #tpu.memory_space<vmem>>, %arg4: memref<128x32xf32, #tpu.memory_space<vmem>>) attributes {dimension_semantics = [#tpu.dimension_semantics<parallel>], iteration_bounds = array<i64: 1>, scalar_prefetch = 0 : i64, scratch_operands = 0 : i64, tpu.core_type = #tpu.core_type<tc>, window_params = [{transform_indices = @transform_0, window_bounds = array<i64: 128, 144>}, {pipeline_mode = #tpu.pipeline_mode<synchronous>, transform_indices = @transform_1, window_bounds = array<i64: 144, 32>}, {pipeline_mode = #tpu.pipeline_mode<synchronous>, transform_indices = @transform_2, window_bounds = array<i64: 1, 32>}, {transform_indices = @transform_3, window_bounds = array<i64: 128, 32>}]} {
    %c0 = arith.constant 0 : index
    %c0_0 = arith.constant 0 : index
    %0 = vector.load %arg1[%c0, %c0_0] : memref<128x144xbf16, #tpu.memory_space<vmem>>, vector<128x144xbf16>
    %c0_1 = arith.constant 0 : index
    %c0_2 = arith.constant 0 : index
    %1 = vector.load %arg2[%c0_1, %c0_2] : memref<144x32xbf16, #tpu.memory_space<vmem>>, vector<144x32xbf16>
    %cst = arith.constant dense<0.000000e+00> : vector<128x32xf32>
    %2 = tpu.matmul %0, %1, %cst {dimension_numbers = #tpu.dot_dimension_numbers<[1], [0], [0], [1], [0, 0, 1, 1], [], []>} : vector<128x144xbf16>, vector<144x32xbf16>, vector<128x32xf32> -> vector<128x32xf32>
    %c0_3 = arith.constant 0 : index
    %c0_4 = arith.constant 0 : index
    %3 = vector.load %arg3[%c0_3, %c0_4] : memref<1x32xf32, #tpu.memory_space<vmem>>, vector<1x32xf32>
    %4 = vector.broadcast %3 : vector<1x32xf32> to vector<128x32xf32>
    %5 = arith.addf %2, %4 : vector<128x32xf32>
    %c0_5 = arith.constant 0 : index
    %c0_6 = arith.constant 0 : index
    %6 = vector.load %arg4[%c0_5, %c0_6] : memref<128x32xf32, #tpu.memory_space<vmem>>, vector<128x32xf32>
    tpu.vector_store %arg4[%c0_5, %c0_6], %5 {strides = array<i32>} : memref<128x32xf32, #tpu.memory_space<vmem>>, vector<128x32xf32>,
    return
  }
  func.func @transform_0(%arg0: i32) -> (i32, i32) {
    %c0_i32 = arith.constant 0 : i32
    %c0_i32_0 = arith.constant 0 : i32
    return %arg0, %c0_i32 : i32, i32
  }
  func.func @transform_1(%arg0: i32) -> (i32, i32) {
    %c0_i32 = arith.constant 0 : i32
    %c0_i32_0 = arith.constant 0 : i32
    %c0_i32_1 = arith.constant 0 : i32
    return %c0_i32, %c0_i32_0 : i32, i32
  }
  func.func @transform_2(%arg0: i32) -> (i32, i32) {
    %c0_i32 = arith.constant 0 : i32
    %c0_i32_0 = arith.constant 0 : i32
    %c0_i32_1 = arith.constant 0 : i32
    return %c0_i32, %c0_i32_0 : i32, i32
  }
  func.func @transform_3(%arg0: i32) -> (i32, i32) {
    %c0_i32 = arith.constant 0 : i32
    %c0_i32_0 = arith.constant 0 : i32
    return %arg0, %c0_i32 : i32, i32
  }
}

module attributes {stable_mosaic.version = 11 : i64} {
  func.func @_mm_stats_kernel(%arg0: i32, %arg1: memref<128x32xbf16, #tpu.memory_space<vmem>>, %arg2: memref<32x16xbf16, #tpu.memory_space<vmem>>, %arg3: memref<128x16xf32, #tpu.memory_space<vmem>>, %arg4: memref<8x16xf32, #tpu.memory_space<vmem>>) attributes {dimension_semantics = [#tpu.dimension_semantics<parallel>], iteration_bounds = array<i64: 1>, scalar_prefetch = 0 : i64, scratch_operands = 0 : i64, tpu.core_type = #tpu.core_type<tc>, window_params = [{transform_indices = @transform_0, window_bounds = array<i64: 128, 32>}, {pipeline_mode = #tpu.pipeline_mode<synchronous>, transform_indices = @transform_1, window_bounds = array<i64: 32, 16>}, {transform_indices = @transform_2, window_bounds = array<i64: 128, 16>}, {transform_indices = @transform_3, window_bounds = array<i64: 8, 16>}]} {
    %c0 = arith.constant 0 : index
    %c0_0 = arith.constant 0 : index
    %0 = vector.load %arg1[%c0, %c0_0] : memref<128x32xbf16, #tpu.memory_space<vmem>>, vector<128x32xbf16>
    %c0_1 = arith.constant 0 : index
    %c0_2 = arith.constant 0 : index
    %1 = vector.load %arg2[%c0_1, %c0_2] : memref<32x16xbf16, #tpu.memory_space<vmem>>, vector<32x16xbf16>
    %cst = arith.constant dense<0.000000e+00> : vector<128x16xf32>
    %2 = tpu.matmul %0, %1, %cst {dimension_numbers = #tpu.dot_dimension_numbers<[1], [0], [0], [1], [0, 0, 1, 1], [], []>} : vector<128x32xbf16>, vector<32x16xbf16>, vector<128x16xf32> -> vector<128x16xf32>
    %c0_3 = arith.constant 0 : index
    %c0_4 = arith.constant 0 : index
    %3 = vector.load %arg3[%c0_3, %c0_4] : memref<128x16xf32, #tpu.memory_space<vmem>>, vector<128x16xf32>
    tpu.vector_store %arg3[%c0_3, %c0_4], %2 {strides = array<i32>} : memref<128x16xf32, #tpu.memory_space<vmem>>, vector<128x16xf32>,
    %cst_5 = arith.constant 0.000000e+00 : f32
    %4 = vector.broadcast %cst_5 : f32 to vector<8x16xf32>
    %c0_6 = arith.constant 0 : index
    %c0_7 = arith.constant 0 : index
    %5 = vector.load %arg4[%c0_6, %c0_7] : memref<8x16xf32, #tpu.memory_space<vmem>>, vector<8x16xf32>
    tpu.vector_store %arg4[%c0_6, %c0_7], %4 {strides = array<i32>} : memref<8x16xf32, #tpu.memory_space<vmem>>, vector<8x16xf32>,
    %cst_8 = arith.constant dense<0.000000e+00> : vector<16xf32>
    %6 = vector.multi_reduction <add>, %2, %cst_8 [0] : vector<128x16xf32> to vector<16xf32>
    %7 = vector.shape_cast %6 : vector<16xf32> to vector<1x16xf32>
    %c0_9 = arith.constant 0 : index
    %c0_10 = arith.constant 0 : index
    %8 = vector.load %arg4[%c0_9, %c0_10] : memref<8x16xf32, #tpu.memory_space<vmem>>, vector<1x16xf32>
    tpu.vector_store %arg4[%c0_9, %c0_10], %7 {strides = array<i32>} : memref<8x16xf32, #tpu.memory_space<vmem>>, vector<1x16xf32>,
    %9 = arith.mulf %2, %2 : vector<128x16xf32>
    %cst_11 = arith.constant dense<0.000000e+00> : vector<16xf32>
    %10 = vector.multi_reduction <add>, %9, %cst_11 [0] : vector<128x16xf32> to vector<16xf32>
    %11 = vector.shape_cast %10 : vector<16xf32> to vector<1x16xf32>
    %c1 = arith.constant 1 : index
    %c0_12 = arith.constant 0 : index
    %12 = vector.load %arg4[%c1, %c0_12] : memref<8x16xf32, #tpu.memory_space<vmem>>, vector<1x16xf32>
    tpu.vector_store %arg4[%c1, %c0_12], %11 {strides = array<i32>} : memref<8x16xf32, #tpu.memory_space<vmem>>, vector<1x16xf32>,
    return
  }
  func.func @transform_0(%arg0: i32) -> (i32, i32) {
    %c0_i32 = arith.constant 0 : i32
    %c0_i32_0 = arith.constant 0 : i32
    return %arg0, %c0_i32 : i32, i32
  }
  func.func @transform_1(%arg0: i32) -> (i32, i32) {
    %c0_i32 = arith.constant 0 : i32
    %c0_i32_0 = arith.constant 0 : i32
    %c0_i32_1 = arith.constant 0 : i32
    return %c0_i32, %c0_i32_0 : i32, i32
  }
  func.func @transform_2(%arg0: i32) -> (i32, i32) {
    %c0_i32 = arith.constant 0 : i32
    %c0_i32_0 = arith.constant 0 : i32
    return %arg0, %c0_i32 : i32, i32
  }
  func.func @transform_3(%arg0: i32) -> (i32, i32) {
    %c0_i32 = arith.constant 0 : i32
    %c0_i32_0 = arith.constant 0 : i32
    return %arg0, %c0_i32 : i32, i32
  }
}

module attributes {stable_mosaic.version = 11 : i64} {
  func.func @_mm_stats_kernel(%arg0: i32, %arg1: memref<128x16xbf16, #tpu.memory_space<vmem>>, %arg2: memref<16x32xbf16, #tpu.memory_space<vmem>>, %arg3: memref<128x32xf32, #tpu.memory_space<vmem>>, %arg4: memref<8x32xf32, #tpu.memory_space<vmem>>) attributes {dimension_semantics = [#tpu.dimension_semantics<parallel>], iteration_bounds = array<i64: 1>, scalar_prefetch = 0 : i64, scratch_operands = 0 : i64, tpu.core_type = #tpu.core_type<tc>, window_params = [{transform_indices = @transform_0, window_bounds = array<i64: 128, 16>}, {pipeline_mode = #tpu.pipeline_mode<synchronous>, transform_indices = @transform_1, window_bounds = array<i64: 16, 32>}, {transform_indices = @transform_2, window_bounds = array<i64: 128, 32>}, {transform_indices = @transform_3, window_bounds = array<i64: 8, 32>}]} {
    %c0 = arith.constant 0 : index
    %c0_0 = arith.constant 0 : index
    %0 = vector.load %arg1[%c0, %c0_0] : memref<128x16xbf16, #tpu.memory_space<vmem>>, vector<128x16xbf16>
    %c0_1 = arith.constant 0 : index
    %c0_2 = arith.constant 0 : index
    %1 = vector.load %arg2[%c0_1, %c0_2] : memref<16x32xbf16, #tpu.memory_space<vmem>>, vector<16x32xbf16>
    %cst = arith.constant dense<0.000000e+00> : vector<128x32xf32>
    %2 = tpu.matmul %0, %1, %cst {dimension_numbers = #tpu.dot_dimension_numbers<[1], [0], [0], [1], [0, 0, 1, 1], [], []>} : vector<128x16xbf16>, vector<16x32xbf16>, vector<128x32xf32> -> vector<128x32xf32>
    %c0_3 = arith.constant 0 : index
    %c0_4 = arith.constant 0 : index
    %3 = vector.load %arg3[%c0_3, %c0_4] : memref<128x32xf32, #tpu.memory_space<vmem>>, vector<128x32xf32>
    tpu.vector_store %arg3[%c0_3, %c0_4], %2 {strides = array<i32>} : memref<128x32xf32, #tpu.memory_space<vmem>>, vector<128x32xf32>,
    %cst_5 = arith.constant 0.000000e+00 : f32
    %4 = vector.broadcast %cst_5 : f32 to vector<8x32xf32>
    %c0_6 = arith.constant 0 : index
    %c0_7 = arith.constant 0 : index
    %5 = vector.load %arg4[%c0_6, %c0_7] : memref<8x32xf32, #tpu.memory_space<vmem>>, vector<8x32xf32>
    tpu.vector_store %arg4[%c0_6, %c0_7], %4 {strides = array<i32>} : memref<8x32xf32, #tpu.memory_space<vmem>>, vector<8x32xf32>,
    %cst_8 = arith.constant dense<0.000000e+00> : vector<32xf32>
    %6 = vector.multi_reduction <add>, %2, %cst_8 [0] : vector<128x32xf32> to vector<32xf32>
    %7 = vector.shape_cast %6 : vector<32xf32> to vector<1x32xf32>
    %c0_9 = arith.constant 0 : index
    %c0_10 = arith.constant 0 : index
    %8 = vector.load %arg4[%c0_9, %c0_10] : memref<8x32xf32, #tpu.memory_space<vmem>>, vector<1x32xf32>
    tpu.vector_store %arg4[%c0_9, %c0_10], %7 {strides = array<i32>} : memref<8x32xf32, #tpu.memory_space<vmem>>, vector<1x32xf32>,
    %9 = arith.mulf %2, %2 : vector<128x32xf32>
    %cst_11 = arith.constant dense<0.000000e+00> : vector<32xf32>
    %10 = vector.multi_reduction <add>, %9, %cst_11 [0] : vector<128x32xf32> to vector<32xf32>
    %11 = vector.shape_cast %10 : vector<32xf32> to vector<1x32xf32>
    %c1 = arith.constant 1 : index
    %c0_12 = arith.constant 0 : index
    %12 = vector.load %arg4[%c1, %c0_12] : memref<8x32xf32, #tpu.memory_space<vmem>>, vector<1x32xf32>
    tpu.vector_store %arg4[%c1, %c0_12], %11 {strides = array<i32>} : memref<8x32xf32, #tpu.memory_space<vmem>>, vector<1x32xf32>,
    return
  }
  func.func @transform_0(%arg0: i32) -> (i32, i32) {
    %c0_i32 = arith.constant 0 : i32
    %c0_i32_0 = arith.constant 0 : i32
    return %arg0, %c0_i32 : i32, i32
  }
  func.func @transform_1(%arg0: i32) -> (i32, i32) {
    %c0_i32 = arith.constant 0 : i32
    %c0_i32_0 = arith.constant 0 : i32
    %c0_i32_1 = arith.constant 0 : i32
    return %c0_i32, %c0_i32_0 : i32, i32
  }
  func.func @transform_2(%arg0: i32) -> (i32, i32) {
    %c0_i32 = arith.constant 0 : i32
    %c0_i32_0 = arith.constant 0 : i32
    return %arg0, %c0_i32 : i32, i32
  }
  func.func @transform_3(%arg0: i32) -> (i32, i32) {
    %c0_i32 = arith.constant 0 : i32
    %c0_i32_0 = arith.constant 0 : i32
    return %arg0, %c0_i32 : i32, i32
  }
}

module attributes {stable_mosaic.version = 11 : i64} {
  func.func @_affine_act_kernel(%arg0: i32, %arg1: memref<128x32xf32, #tpu.memory_space<vmem>>, %arg2: memref<1x32xf32, #tpu.memory_space<vmem>>, %arg3: memref<1x32xf32, #tpu.memory_space<vmem>>, %arg4: memref<128x32xf32, #tpu.memory_space<vmem>>) attributes {dimension_semantics = [#tpu.dimension_semantics<parallel>], iteration_bounds = array<i64: 1>, scalar_prefetch = 0 : i64, scratch_operands = 0 : i64, tpu.core_type = #tpu.core_type<tc>, window_params = [{transform_indices = @transform_0, window_bounds = array<i64: 128, 32>}, {pipeline_mode = #tpu.pipeline_mode<synchronous>, transform_indices = @transform_1, window_bounds = array<i64: 1, 32>}, {pipeline_mode = #tpu.pipeline_mode<synchronous>, transform_indices = @transform_2, window_bounds = array<i64: 1, 32>}, {transform_indices = @transform_3, window_bounds = array<i64: 128, 32>}]} {
    %c0 = arith.constant 0 : index
    %c0_0 = arith.constant 0 : index
    %0 = vector.load %arg1[%c0, %c0_0] : memref<128x32xf32, #tpu.memory_space<vmem>>, vector<128x32xf32>
    %c0_1 = arith.constant 0 : index
    %c0_2 = arith.constant 0 : index
    %1 = vector.load %arg2[%c0_1, %c0_2] : memref<1x32xf32, #tpu.memory_space<vmem>>, vector<1x32xf32>
    %2 = vector.broadcast %1 : vector<1x32xf32> to vector<128x32xf32>
    %3 = arith.mulf %0, %2 : vector<128x32xf32>
    %c0_3 = arith.constant 0 : index
    %c0_4 = arith.constant 0 : index
    %4 = vector.load %arg3[%c0_3, %c0_4] : memref<1x32xf32, #tpu.memory_space<vmem>>, vector<1x32xf32>
    %5 = vector.broadcast %4 : vector<1x32xf32> to vector<128x32xf32>
    %6 = arith.addf %3, %5 : vector<128x32xf32>
    %cst = arith.constant 0.000000e+00 : f32
    %7 = vector.broadcast %cst : f32 to vector<128x32xf32>
    %8 = arith.subf %7, %6 : vector<128x32xf32>
    %9 = math.exp %8 : vector<128x32xf32>
    %cst_5 = arith.constant 1.000000e+00 : f32
    %10 = vector.broadcast %cst_5 : f32 to vector<128x32xf32>
    %11 = arith.addf %10, %9 : vector<128x32xf32>
    %12 = tpu.reciprocal %11 {approx = true} : vector<128x32xf32> -> vector<128x32xf32>
    %13 = arith.mulf %6, %12 : vector<128x32xf32>
    %c0_6 = arith.constant 0 : index
    %c0_7 = arith.constant 0 : index
    %14 = vector.load %arg4[%c0_6, %c0_7] : memref<128x32xf32, #tpu.memory_space<vmem>>, vector<128x32xf32>
    tpu.vector_store %arg4[%c0_6, %c0_7], %13 {strides = array<i32>} : memref<128x32xf32, #tpu.memory_space<vmem>>, vector<128x32xf32>,
    return
  }
  func.func @transform_0(%arg0: i32) -> (i32, i32) {
    %c0_i32 = arith.constant 0 : i32
    %c0_i32_0 = arith.constant 0 : i32
    return %arg0, %c0_i32 : i32, i32
  }
  func.func @transform_1(%arg0: i32) -> (i32, i32) {
    %c0_i32 = arith.constant 0 : i32
    %c0_i32_0 = arith.constant 0 : i32
    %c0_i32_1 = arith.constant 0 : i32
    return %c0_i32, %c0_i32_0 : i32, i32
  }
  func.func @transform_2(%arg0: i32) -> (i32, i32) {
    %c0_i32 = arith.constant 0 : i32
    %c0_i32_0 = arith.constant 0 : i32
    %c0_i32_1 = arith.constant 0 : i32
    return %c0_i32, %c0_i32_0 : i32, i32
  }
  func.func @transform_3(%arg0: i32) -> (i32, i32) {
    %c0_i32 = arith.constant 0 : i32
    %c0_i32_0 = arith.constant 0 : i32
    return %arg0, %c0_i32 : i32, i32
  }
}

module attributes {stable_mosaic.version = 11 : i64} {
  func.func @_affine_act_kernel(%arg0: i32, %arg1: memref<128x16xf32, #tpu.memory_space<vmem>>, %arg2: memref<1x16xf32, #tpu.memory_space<vmem>>, %arg3: memref<1x16xf32, #tpu.memory_space<vmem>>, %arg4: memref<128x16xf32, #tpu.memory_space<vmem>>) attributes {dimension_semantics = [#tpu.dimension_semantics<parallel>], iteration_bounds = array<i64: 1>, scalar_prefetch = 0 : i64, scratch_operands = 0 : i64, tpu.core_type = #tpu.core_type<tc>, window_params = [{transform_indices = @transform_0, window_bounds = array<i64: 128, 16>}, {pipeline_mode = #tpu.pipeline_mode<synchronous>, transform_indices = @transform_1, window_bounds = array<i64: 1, 16>}, {pipeline_mode = #tpu.pipeline_mode<synchronous>, transform_indices = @transform_2, window_bounds = array<i64: 1, 16>}, {transform_indices = @transform_3, window_bounds = array<i64: 128, 16>}]} {
    %c0 = arith.constant 0 : index
    %c0_0 = arith.constant 0 : index
    %0 = vector.load %arg1[%c0, %c0_0] : memref<128x16xf32, #tpu.memory_space<vmem>>, vector<128x16xf32>
    %c0_1 = arith.constant 0 : index
    %c0_2 = arith.constant 0 : index
    %1 = vector.load %arg2[%c0_1, %c0_2] : memref<1x16xf32, #tpu.memory_space<vmem>>, vector<1x16xf32>
    %2 = vector.broadcast %1 : vector<1x16xf32> to vector<128x16xf32>
    %3 = arith.mulf %0, %2 : vector<128x16xf32>
    %c0_3 = arith.constant 0 : index
    %c0_4 = arith.constant 0 : index
    %4 = vector.load %arg3[%c0_3, %c0_4] : memref<1x16xf32, #tpu.memory_space<vmem>>, vector<1x16xf32>
    %5 = vector.broadcast %4 : vector<1x16xf32> to vector<128x16xf32>
    %6 = arith.addf %3, %5 : vector<128x16xf32>
    %c0_5 = arith.constant 0 : index
    %c0_6 = arith.constant 0 : index
    %7 = vector.load %arg4[%c0_5, %c0_6] : memref<128x16xf32, #tpu.memory_space<vmem>>, vector<128x16xf32>
    tpu.vector_store %arg4[%c0_5, %c0_6], %6 {strides = array<i32>} : memref<128x16xf32, #tpu.memory_space<vmem>>, vector<128x16xf32>,
    return
  }
  func.func @transform_0(%arg0: i32) -> (i32, i32) {
    %c0_i32 = arith.constant 0 : i32
    %c0_i32_0 = arith.constant 0 : i32
    return %arg0, %c0_i32 : i32, i32
  }
  func.func @transform_1(%arg0: i32) -> (i32, i32) {
    %c0_i32 = arith.constant 0 : i32
    %c0_i32_0 = arith.constant 0 : i32
    %c0_i32_1 = arith.constant 0 : i32
    return %c0_i32, %c0_i32_0 : i32, i32
  }
  func.func @transform_2(%arg0: i32) -> (i32, i32) {
    %c0_i32 = arith.constant 0 : i32
    %c0_i32_0 = arith.constant 0 : i32
    %c0_i32_1 = arith.constant 0 : i32
    return %c0_i32, %c0_i32_0 : i32, i32
  }
  func.func @transform_3(%arg0: i32) -> (i32, i32) {
    %c0_i32 = arith.constant 0 : i32
    %c0_i32_0 = arith.constant 0 : i32
    return %arg0, %c0_i32 : i32, i32
  }
}

module attributes {stable_mosaic.version = 11 : i64} {
  func.func @_mm_stats_kernel(%arg0: i32, %arg1: memref<128x800xbf16, #tpu.memory_space<vmem>>, %arg2: memref<800x32xbf16, #tpu.memory_space<vmem>>, %arg3: memref<128x32xf32, #tpu.memory_space<vmem>>, %arg4: memref<8x32xf32, #tpu.memory_space<vmem>>) attributes {dimension_semantics = [#tpu.dimension_semantics<parallel>], iteration_bounds = array<i64: 1>, scalar_prefetch = 0 : i64, scratch_operands = 0 : i64, tpu.core_type = #tpu.core_type<tc>, window_params = [{transform_indices = @transform_0, window_bounds = array<i64: 128, 800>}, {pipeline_mode = #tpu.pipeline_mode<synchronous>, transform_indices = @transform_1, window_bounds = array<i64: 800, 32>}, {transform_indices = @transform_2, window_bounds = array<i64: 128, 32>}, {transform_indices = @transform_3, window_bounds = array<i64: 8, 32>}]} {
    %c0 = arith.constant 0 : index
    %c0_0 = arith.constant 0 : index
    %0 = vector.load %arg1[%c0, %c0_0] : memref<128x800xbf16, #tpu.memory_space<vmem>>, vector<128x800xbf16>
    %c0_1 = arith.constant 0 : index
    %c0_2 = arith.constant 0 : index
    %1 = vector.load %arg2[%c0_1, %c0_2] : memref<800x32xbf16, #tpu.memory_space<vmem>>, vector<800x32xbf16>
    %cst = arith.constant dense<0.000000e+00> : vector<128x32xf32>
    %2 = tpu.matmul %0, %1, %cst {dimension_numbers = #tpu.dot_dimension_numbers<[1], [0], [0], [1], [0, 0, 1, 1], [], []>} : vector<128x800xbf16>, vector<800x32xbf16>, vector<128x32xf32> -> vector<128x32xf32>
    %c0_3 = arith.constant 0 : index
    %c0_4 = arith.constant 0 : index
    %3 = vector.load %arg3[%c0_3, %c0_4] : memref<128x32xf32, #tpu.memory_space<vmem>>, vector<128x32xf32>
    tpu.vector_store %arg3[%c0_3, %c0_4], %2 {strides = array<i32>} : memref<128x32xf32, #tpu.memory_space<vmem>>, vector<128x32xf32>,
    %cst_5 = arith.constant 0.000000e+00 : f32
    %4 = vector.broadcast %cst_5 : f32 to vector<8x32xf32>
    %c0_6 = arith.constant 0 : index
    %c0_7 = arith.constant 0 : index
    %5 = vector.load %arg4[%c0_6, %c0_7] : memref<8x32xf32, #tpu.memory_space<vmem>>, vector<8x32xf32>
    tpu.vector_store %arg4[%c0_6, %c0_7], %4 {strides = array<i32>} : memref<8x32xf32, #tpu.memory_space<vmem>>, vector<8x32xf32>,
    %cst_8 = arith.constant dense<0.000000e+00> : vector<32xf32>
    %6 = vector.multi_reduction <add>, %2, %cst_8 [0] : vector<128x32xf32> to vector<32xf32>
    %7 = vector.shape_cast %6 : vector<32xf32> to vector<1x32xf32>
    %c0_9 = arith.constant 0 : index
    %c0_10 = arith.constant 0 : index
    %8 = vector.load %arg4[%c0_9, %c0_10] : memref<8x32xf32, #tpu.memory_space<vmem>>, vector<1x32xf32>
    tpu.vector_store %arg4[%c0_9, %c0_10], %7 {strides = array<i32>} : memref<8x32xf32, #tpu.memory_space<vmem>>, vector<1x32xf32>,
    %9 = arith.mulf %2, %2 : vector<128x32xf32>
    %cst_11 = arith.constant dense<0.000000e+00> : vector<32xf32>
    %10 = vector.multi_reduction <add>, %9, %cst_11 [0] : vector<128x32xf32> to vector<32xf32>
    %11 = vector.shape_cast %10 : vector<32xf32> to vector<1x32xf32>
    %c1 = arith.constant 1 : index
    %c0_12 = arith.constant 0 : index
    %12 = vector.load %arg4[%c1, %c0_12] : memref<8x32xf32, #tpu.memory_space<vmem>>, vector<1x32xf32>
    tpu.vector_store %arg4[%c1, %c0_12], %11 {strides = array<i32>} : memref<8x32xf32, #tpu.memory_space<vmem>>, vector<1x32xf32>,
    return
  }
  func.func @transform_0(%arg0: i32) -> (i32, i32) {
    %c0_i32 = arith.constant 0 : i32
    %c0_i32_0 = arith.constant 0 : i32
    return %arg0, %c0_i32 : i32, i32
  }
  func.func @transform_1(%arg0: i32) -> (i32, i32) {
    %c0_i32 = arith.constant 0 : i32
    %c0_i32_0 = arith.constant 0 : i32
    %c0_i32_1 = arith.constant 0 : i32
    return %c0_i32, %c0_i32_0 : i32, i32
  }
  func.func @transform_2(%arg0: i32) -> (i32, i32) {
    %c0_i32 = arith.constant 0 : i32
    %c0_i32_0 = arith.constant 0 : i32
    return %arg0, %c0_i32 : i32, i32
  }
  func.func @transform_3(%arg0: i32) -> (i32, i32) {
    %c0_i32 = arith.constant 0 : i32
    %c0_i32_0 = arith.constant 0 : i32
    return %arg0, %c0_i32 : i32, i32
  }
}

module attributes {stable_mosaic.version = 11 : i64} {
  func.func @_mm_bias_act_kernel(%arg0: i32, %arg1: memref<128x800xbf16, #tpu.memory_space<vmem>>, %arg2: memref<800x32xbf16, #tpu.memory_space<vmem>>, %arg3: memref<1x32xf32, #tpu.memory_space<vmem>>, %arg4: memref<128x32xf32, #tpu.memory_space<vmem>>) attributes {dimension_semantics = [#tpu.dimension_semantics<parallel>], iteration_bounds = array<i64: 1>, scalar_prefetch = 0 : i64, scratch_operands = 0 : i64, tpu.core_type = #tpu.core_type<tc>, window_params = [{transform_indices = @transform_0, window_bounds = array<i64: 128, 800>}, {pipeline_mode = #tpu.pipeline_mode<synchronous>, transform_indices = @transform_1, window_bounds = array<i64: 800, 32>}, {pipeline_mode = #tpu.pipeline_mode<synchronous>, transform_indices = @transform_2, window_bounds = array<i64: 1, 32>}, {transform_indices = @transform_3, window_bounds = array<i64: 128, 32>}]} {
    %c0 = arith.constant 0 : index
    %c0_0 = arith.constant 0 : index
    %0 = vector.load %arg1[%c0, %c0_0] : memref<128x800xbf16, #tpu.memory_space<vmem>>, vector<128x800xbf16>
    %c0_1 = arith.constant 0 : index
    %c0_2 = arith.constant 0 : index
    %1 = vector.load %arg2[%c0_1, %c0_2] : memref<800x32xbf16, #tpu.memory_space<vmem>>, vector<800x32xbf16>
    %cst = arith.constant dense<0.000000e+00> : vector<128x32xf32>
    %2 = tpu.matmul %0, %1, %cst {dimension_numbers = #tpu.dot_dimension_numbers<[1], [0], [0], [1], [0, 0, 1, 1], [], []>} : vector<128x800xbf16>, vector<800x32xbf16>, vector<128x32xf32> -> vector<128x32xf32>
    %c0_3 = arith.constant 0 : index
    %c0_4 = arith.constant 0 : index
    %3 = vector.load %arg3[%c0_3, %c0_4] : memref<1x32xf32, #tpu.memory_space<vmem>>, vector<1x32xf32>
    %4 = vector.broadcast %3 : vector<1x32xf32> to vector<128x32xf32>
    %5 = arith.addf %2, %4 : vector<128x32xf32>
    %c0_5 = arith.constant 0 : index
    %c0_6 = arith.constant 0 : index
    %6 = vector.load %arg4[%c0_5, %c0_6] : memref<128x32xf32, #tpu.memory_space<vmem>>, vector<128x32xf32>
    tpu.vector_store %arg4[%c0_5, %c0_6], %5 {strides = array<i32>} : memref<128x32xf32, #tpu.memory_space<vmem>>, vector<128x32xf32>,
    return
  }
  func.func @transform_0(%arg0: i32) -> (i32, i32) {
    %c0_i32 = arith.constant 0 : i32
    %c0_i32_0 = arith.constant 0 : i32
    return %arg0, %c0_i32 : i32, i32
  }
  func.func @transform_1(%arg0: i32) -> (i32, i32) {
    %c0_i32 = arith.constant 0 : i32
    %c0_i32_0 = arith.constant 0 : i32
    %c0_i32_1 = arith.constant 0 : i32
    return %c0_i32, %c0_i32_0 : i32, i32
  }
  func.func @transform_2(%arg0: i32) -> (i32, i32) {
    %c0_i32 = arith.constant 0 : i32
    %c0_i32_0 = arith.constant 0 : i32
    %c0_i32_1 = arith.constant 0 : i32
    return %c0_i32, %c0_i32_0 : i32, i32
  }
  func.func @transform_3(%arg0: i32) -> (i32, i32) {
    %c0_i32 = arith.constant 0 : i32
    %c0_i32_0 = arith.constant 0 : i32
    return %arg0, %c0_i32 : i32, i32
  }
}

module attributes {stable_mosaic.version = 11 : i64} {
  func.func @_mm_stats_kernel(%arg0: i32, %arg1: memref<128x32xbf16, #tpu.memory_space<vmem>>, %arg2: memref<32x32xbf16, #tpu.memory_space<vmem>>, %arg3: memref<128x32xf32, #tpu.memory_space<vmem>>, %arg4: memref<8x32xf32, #tpu.memory_space<vmem>>) attributes {dimension_semantics = [#tpu.dimension_semantics<parallel>], iteration_bounds = array<i64: 1>, scalar_prefetch = 0 : i64, scratch_operands = 0 : i64, tpu.core_type = #tpu.core_type<tc>, window_params = [{transform_indices = @transform_0, window_bounds = array<i64: 128, 32>}, {pipeline_mode = #tpu.pipeline_mode<synchronous>, transform_indices = @transform_1, window_bounds = array<i64: 32, 32>}, {transform_indices = @transform_2, window_bounds = array<i64: 128, 32>}, {transform_indices = @transform_3, window_bounds = array<i64: 8, 32>}]} {
    %c0 = arith.constant 0 : index
    %c0_0 = arith.constant 0 : index
    %0 = vector.load %arg1[%c0, %c0_0] : memref<128x32xbf16, #tpu.memory_space<vmem>>, vector<128x32xbf16>
    %c0_1 = arith.constant 0 : index
    %c0_2 = arith.constant 0 : index
    %1 = vector.load %arg2[%c0_1, %c0_2] : memref<32x32xbf16, #tpu.memory_space<vmem>>, vector<32x32xbf16>
    %cst = arith.constant dense<0.000000e+00> : vector<128x32xf32>
    %2 = tpu.matmul %0, %1, %cst {dimension_numbers = #tpu.dot_dimension_numbers<[1], [0], [0], [1], [0, 0, 1, 1], [], []>} : vector<128x32xbf16>, vector<32x32xbf16>, vector<128x32xf32> -> vector<128x32xf32>
    %c0_3 = arith.constant 0 : index
    %c0_4 = arith.constant 0 : index
    %3 = vector.load %arg3[%c0_3, %c0_4] : memref<128x32xf32, #tpu.memory_space<vmem>>, vector<128x32xf32>
    tpu.vector_store %arg3[%c0_3, %c0_4], %2 {strides = array<i32>} : memref<128x32xf32, #tpu.memory_space<vmem>>, vector<128x32xf32>,
    %cst_5 = arith.constant 0.000000e+00 : f32
    %4 = vector.broadcast %cst_5 : f32 to vector<8x32xf32>
    %c0_6 = arith.constant 0 : index
    %c0_7 = arith.constant 0 : index
    %5 = vector.load %arg4[%c0_6, %c0_7] : memref<8x32xf32, #tpu.memory_space<vmem>>, vector<8x32xf32>
    tpu.vector_store %arg4[%c0_6, %c0_7], %4 {strides = array<i32>} : memref<8x32xf32, #tpu.memory_space<vmem>>, vector<8x32xf32>,
    %cst_8 = arith.constant dense<0.000000e+00> : vector<32xf32>
    %6 = vector.multi_reduction <add>, %2, %cst_8 [0] : vector<128x32xf32> to vector<32xf32>
    %7 = vector.shape_cast %6 : vector<32xf32> to vector<1x32xf32>
    %c0_9 = arith.constant 0 : index
    %c0_10 = arith.constant 0 : index
    %8 = vector.load %arg4[%c0_9, %c0_10] : memref<8x32xf32, #tpu.memory_space<vmem>>, vector<1x32xf32>
    tpu.vector_store %arg4[%c0_9, %c0_10], %7 {strides = array<i32>} : memref<8x32xf32, #tpu.memory_space<vmem>>, vector<1x32xf32>,
    %9 = arith.mulf %2, %2 : vector<128x32xf32>
    %cst_11 = arith.constant dense<0.000000e+00> : vector<32xf32>
    %10 = vector.multi_reduction <add>, %9, %cst_11 [0] : vector<128x32xf32> to vector<32xf32>
    %11 = vector.shape_cast %10 : vector<32xf32> to vector<1x32xf32>
    %c1 = arith.constant 1 : index
    %c0_12 = arith.constant 0 : index
    %12 = vector.load %arg4[%c1, %c0_12] : memref<8x32xf32, #tpu.memory_space<vmem>>, vector<1x32xf32>
    tpu.vector_store %arg4[%c1, %c0_12], %11 {strides = array<i32>} : memref<8x32xf32, #tpu.memory_space<vmem>>, vector<1x32xf32>,
    return
  }
  func.func @transform_0(%arg0: i32) -> (i32, i32) {
    %c0_i32 = arith.constant 0 : i32
    %c0_i32_0 = arith.constant 0 : i32
    return %arg0, %c0_i32 : i32, i32
  }
  func.func @transform_1(%arg0: i32) -> (i32, i32) {
    %c0_i32 = arith.constant 0 : i32
    %c0_i32_0 = arith.constant 0 : i32
    %c0_i32_1 = arith.constant 0 : i32
    return %c0_i32, %c0_i32_0 : i32, i32
  }
  func.func @transform_2(%arg0: i32) -> (i32, i32) {
    %c0_i32 = arith.constant 0 : i32
    %c0_i32_0 = arith.constant 0 : i32
    return %arg0, %c0_i32 : i32, i32
  }
  func.func @transform_3(%arg0: i32) -> (i32, i32) {
    %c0_i32 = arith.constant 0 : i32
    %c0_i32_0 = arith.constant 0 : i32
    return %arg0, %c0_i32 : i32, i32
  }
}

module attributes {stable_mosaic.version = 11 : i64} {
  func.func @_mm_bias_act_kernel(%arg0: i32, %arg1: memref<128x288xbf16, #tpu.memory_space<vmem>>, %arg2: memref<288x32xbf16, #tpu.memory_space<vmem>>, %arg3: memref<1x32xf32, #tpu.memory_space<vmem>>, %arg4: memref<128x32xf32, #tpu.memory_space<vmem>>) attributes {dimension_semantics = [#tpu.dimension_semantics<parallel>], iteration_bounds = array<i64: 1>, scalar_prefetch = 0 : i64, scratch_operands = 0 : i64, tpu.core_type = #tpu.core_type<tc>, window_params = [{transform_indices = @transform_0, window_bounds = array<i64: 128, 288>}, {pipeline_mode = #tpu.pipeline_mode<synchronous>, transform_indices = @transform_1, window_bounds = array<i64: 288, 32>}, {pipeline_mode = #tpu.pipeline_mode<synchronous>, transform_indices = @transform_2, window_bounds = array<i64: 1, 32>}, {transform_indices = @transform_3, window_bounds = array<i64: 128, 32>}]} {
    %c0 = arith.constant 0 : index
    %c0_0 = arith.constant 0 : index
    %0 = vector.load %arg1[%c0, %c0_0] : memref<128x288xbf16, #tpu.memory_space<vmem>>, vector<128x288xbf16>
    %c0_1 = arith.constant 0 : index
    %c0_2 = arith.constant 0 : index
    %1 = vector.load %arg2[%c0_1, %c0_2] : memref<288x32xbf16, #tpu.memory_space<vmem>>, vector<288x32xbf16>
    %cst = arith.constant dense<0.000000e+00> : vector<128x32xf32>
    %2 = tpu.matmul %0, %1, %cst {dimension_numbers = #tpu.dot_dimension_numbers<[1], [0], [0], [1], [0, 0, 1, 1], [], []>} : vector<128x288xbf16>, vector<288x32xbf16>, vector<128x32xf32> -> vector<128x32xf32>
    %c0_3 = arith.constant 0 : index
    %c0_4 = arith.constant 0 : index
    %3 = vector.load %arg3[%c0_3, %c0_4] : memref<1x32xf32, #tpu.memory_space<vmem>>, vector<1x32xf32>
    %4 = vector.broadcast %3 : vector<1x32xf32> to vector<128x32xf32>
    %5 = arith.addf %2, %4 : vector<128x32xf32>
    %c0_5 = arith.constant 0 : index
    %c0_6 = arith.constant 0 : index
    %6 = vector.load %arg4[%c0_5, %c0_6] : memref<128x32xf32, #tpu.memory_space<vmem>>, vector<128x32xf32>
    tpu.vector_store %arg4[%c0_5, %c0_6], %5 {strides = array<i32>} : memref<128x32xf32, #tpu.memory_space<vmem>>, vector<128x32xf32>,
    return
  }
  func.func @transform_0(%arg0: i32) -> (i32, i32) {
    %c0_i32 = arith.constant 0 : i32
    %c0_i32_0 = arith.constant 0 : i32
    return %arg0, %c0_i32 : i32, i32
  }
  func.func @transform_1(%arg0: i32) -> (i32, i32) {
    %c0_i32 = arith.constant 0 : i32
    %c0_i32_0 = arith.constant 0 : i32
    %c0_i32_1 = arith.constant 0 : i32
    return %c0_i32, %c0_i32_0 : i32, i32
  }
  func.func @transform_2(%arg0: i32) -> (i32, i32) {
    %c0_i32 = arith.constant 0 : i32
    %c0_i32_0 = arith.constant 0 : i32
    %c0_i32_1 = arith.constant 0 : i32
    return %c0_i32, %c0_i32_0 : i32, i32
  }
  func.func @transform_3(%arg0: i32) -> (i32, i32) {
    %c0_i32 = arith.constant 0 : i32
    %c0_i32_0 = arith.constant 0 : i32
    return %arg0, %c0_i32 : i32, i32
  }
}

module attributes {stable_mosaic.version = 11 : i64} {
  func.func @_mm_bias_act_kernel(%arg0: i32, %arg1: memref<128x144xbf16, #tpu.memory_space<vmem>>, %arg2: memref<144x16xbf16, #tpu.memory_space<vmem>>, %arg3: memref<1x16xf32, #tpu.memory_space<vmem>>, %arg4: memref<128x16xf32, #tpu.memory_space<vmem>>) attributes {dimension_semantics = [#tpu.dimension_semantics<parallel>], iteration_bounds = array<i64: 1>, scalar_prefetch = 0 : i64, scratch_operands = 0 : i64, tpu.core_type = #tpu.core_type<tc>, window_params = [{transform_indices = @transform_0, window_bounds = array<i64: 128, 144>}, {pipeline_mode = #tpu.pipeline_mode<synchronous>, transform_indices = @transform_1, window_bounds = array<i64: 144, 16>}, {pipeline_mode = #tpu.pipeline_mode<synchronous>, transform_indices = @transform_2, window_bounds = array<i64: 1, 16>}, {transform_indices = @transform_3, window_bounds = array<i64: 128, 16>}]} {
    %c0 = arith.constant 0 : index
    %c0_0 = arith.constant 0 : index
    %0 = vector.load %arg1[%c0, %c0_0] : memref<128x144xbf16, #tpu.memory_space<vmem>>, vector<128x144xbf16>
    %c0_1 = arith.constant 0 : index
    %c0_2 = arith.constant 0 : index
    %1 = vector.load %arg2[%c0_1, %c0_2] : memref<144x16xbf16, #tpu.memory_space<vmem>>, vector<144x16xbf16>
    %cst = arith.constant dense<0.000000e+00> : vector<128x16xf32>
    %2 = tpu.matmul %0, %1, %cst {dimension_numbers = #tpu.dot_dimension_numbers<[1], [0], [0], [1], [0, 0, 1, 1], [], []>} : vector<128x144xbf16>, vector<144x16xbf16>, vector<128x16xf32> -> vector<128x16xf32>
    %c0_3 = arith.constant 0 : index
    %c0_4 = arith.constant 0 : index
    %3 = vector.load %arg3[%c0_3, %c0_4] : memref<1x16xf32, #tpu.memory_space<vmem>>, vector<1x16xf32>
    %4 = vector.broadcast %3 : vector<1x16xf32> to vector<128x16xf32>
    %5 = arith.addf %2, %4 : vector<128x16xf32>
    %c0_5 = arith.constant 0 : index
    %c0_6 = arith.constant 0 : index
    %6 = vector.load %arg4[%c0_5, %c0_6] : memref<128x16xf32, #tpu.memory_space<vmem>>, vector<128x16xf32>
    tpu.vector_store %arg4[%c0_5, %c0_6], %5 {strides = array<i32>} : memref<128x16xf32, #tpu.memory_space<vmem>>, vector<128x16xf32>,
    return
  }
  func.func @transform_0(%arg0: i32) -> (i32, i32) {
    %c0_i32 = arith.constant 0 : i32
    %c0_i32_0 = arith.constant 0 : i32
    return %arg0, %c0_i32 : i32, i32
  }
  func.func @transform_1(%arg0: i32) -> (i32, i32) {
    %c0_i32 = arith.constant 0 : i32
    %c0_i32_0 = arith.constant 0 : i32
    %c0_i32_1 = arith.constant 0 : i32
    return %c0_i32, %c0_i32_0 : i32, i32
  }
  func.func @transform_2(%arg0: i32) -> (i32, i32) {
    %c0_i32 = arith.constant 0 : i32
    %c0_i32_0 = arith.constant 0 : i32
    %c0_i32_1 = arith.constant 0 : i32
    return %c0_i32, %c0_i32_0 : i32, i32
  }
  func.func @transform_3(%arg0: i32) -> (i32, i32) {
    %c0_i32 = arith.constant 0 : i32
    %c0_i32_0 = arith.constant 0 : i32
    return %arg0, %c0_i32 : i32, i32
  }
}

module attributes {stable_mosaic.version = 11 : i64} {
  func.func @_mm_bias_act_kernel(%arg0: i32, %arg1: memref<128x400xbf16, #tpu.memory_space<vmem>>, %arg2: memref<400x16xbf16, #tpu.memory_space<vmem>>, %arg3: memref<1x16xf32, #tpu.memory_space<vmem>>, %arg4: memref<128x16xf32, #tpu.memory_space<vmem>>) attributes {dimension_semantics = [#tpu.dimension_semantics<parallel>], iteration_bounds = array<i64: 1>, scalar_prefetch = 0 : i64, scratch_operands = 0 : i64, tpu.core_type = #tpu.core_type<tc>, window_params = [{transform_indices = @transform_0, window_bounds = array<i64: 128, 400>}, {pipeline_mode = #tpu.pipeline_mode<synchronous>, transform_indices = @transform_1, window_bounds = array<i64: 400, 16>}, {pipeline_mode = #tpu.pipeline_mode<synchronous>, transform_indices = @transform_2, window_bounds = array<i64: 1, 16>}, {transform_indices = @transform_3, window_bounds = array<i64: 128, 16>}]} {
    %c0 = arith.constant 0 : index
    %c0_0 = arith.constant 0 : index
    %0 = vector.load %arg1[%c0, %c0_0] : memref<128x400xbf16, #tpu.memory_space<vmem>>, vector<128x400xbf16>
    %c0_1 = arith.constant 0 : index
    %c0_2 = arith.constant 0 : index
    %1 = vector.load %arg2[%c0_1, %c0_2] : memref<400x16xbf16, #tpu.memory_space<vmem>>, vector<400x16xbf16>
    %cst = arith.constant dense<0.000000e+00> : vector<128x16xf32>
    %2 = tpu.matmul %0, %1, %cst {dimension_numbers = #tpu.dot_dimension_numbers<[1], [0], [0], [1], [0, 0, 1, 1], [], []>} : vector<128x400xbf16>, vector<400x16xbf16>, vector<128x16xf32> -> vector<128x16xf32>
    %c0_3 = arith.constant 0 : index
    %c0_4 = arith.constant 0 : index
    %3 = vector.load %arg3[%c0_3, %c0_4] : memref<1x16xf32, #tpu.memory_space<vmem>>, vector<1x16xf32>
    %4 = vector.broadcast %3 : vector<1x16xf32> to vector<128x16xf32>
    %5 = arith.addf %2, %4 : vector<128x16xf32>
    %c0_5 = arith.constant 0 : index
    %c0_6 = arith.constant 0 : index
    %6 = vector.load %arg4[%c0_5, %c0_6] : memref<128x16xf32, #tpu.memory_space<vmem>>, vector<128x16xf32>
    tpu.vector_store %arg4[%c0_5, %c0_6], %5 {strides = array<i32>} : memref<128x16xf32, #tpu.memory_space<vmem>>, vector<128x16xf32>,
    return
  }
  func.func @transform_0(%arg0: i32) -> (i32, i32) {
    %c0_i32 = arith.constant 0 : i32
    %c0_i32_0 = arith.constant 0 : i32
    return %arg0, %c0_i32 : i32, i32
  }
  func.func @transform_1(%arg0: i32) -> (i32, i32) {
    %c0_i32 = arith.constant 0 : i32
    %c0_i32_0 = arith.constant 0 : i32
    %c0_i32_1 = arith.constant 0 : i32
    return %c0_i32, %c0_i32_0 : i32, i32
  }
  func.func @transform_2(%arg0: i32) -> (i32, i32) {
    %c0_i32 = arith.constant 0 : i32
    %c0_i32_0 = arith.constant 0 : i32
    %c0_i32_1 = arith.constant 0 : i32
    return %c0_i32, %c0_i32_0 : i32, i32
  }
  func.func @transform_3(%arg0: i32) -> (i32, i32) {
    %c0_i32 = arith.constant 0 : i32
    %c0_i32_0 = arith.constant 0 : i32
    return %arg0, %c0_i32 : i32, i32
  }
}

module attributes {stable_mosaic.version = 11 : i64} {
  func.func @_mm_bias_act_kernel(%arg0: i32, %arg1: memref<128x32xbf16, #tpu.memory_space<vmem>>, %arg2: memref<32x16xbf16, #tpu.memory_space<vmem>>, %arg3: memref<1x16xf32, #tpu.memory_space<vmem>>, %arg4: memref<128x16xf32, #tpu.memory_space<vmem>>) attributes {dimension_semantics = [#tpu.dimension_semantics<parallel>], iteration_bounds = array<i64: 1>, scalar_prefetch = 0 : i64, scratch_operands = 0 : i64, tpu.core_type = #tpu.core_type<tc>, window_params = [{transform_indices = @transform_0, window_bounds = array<i64: 128, 32>}, {pipeline_mode = #tpu.pipeline_mode<synchronous>, transform_indices = @transform_1, window_bounds = array<i64: 32, 16>}, {pipeline_mode = #tpu.pipeline_mode<synchronous>, transform_indices = @transform_2, window_bounds = array<i64: 1, 16>}, {transform_indices = @transform_3, window_bounds = array<i64: 128, 16>}]} {
    %c0 = arith.constant 0 : index
    %c0_0 = arith.constant 0 : index
    %0 = vector.load %arg1[%c0, %c0_0] : memref<128x32xbf16, #tpu.memory_space<vmem>>, vector<128x32xbf16>
    %c0_1 = arith.constant 0 : index
    %c0_2 = arith.constant 0 : index
    %1 = vector.load %arg2[%c0_1, %c0_2] : memref<32x16xbf16, #tpu.memory_space<vmem>>, vector<32x16xbf16>
    %cst = arith.constant dense<0.000000e+00> : vector<128x16xf32>
    %2 = tpu.matmul %0, %1, %cst {dimension_numbers = #tpu.dot_dimension_numbers<[1], [0], [0], [1], [0, 0, 1, 1], [], []>} : vector<128x32xbf16>, vector<32x16xbf16>, vector<128x16xf32> -> vector<128x16xf32>
    %c0_3 = arith.constant 0 : index
    %c0_4 = arith.constant 0 : index
    %3 = vector.load %arg3[%c0_3, %c0_4] : memref<1x16xf32, #tpu.memory_space<vmem>>, vector<1x16xf32>
    %4 = vector.broadcast %3 : vector<1x16xf32> to vector<128x16xf32>
    %5 = arith.addf %2, %4 : vector<128x16xf32>
    %cst_5 = arith.constant 0.000000e+00 : f32
    %6 = vector.broadcast %cst_5 : f32 to vector<128x16xf32>
    %7 = arith.subf %6, %5 : vector<128x16xf32>
    %8 = math.exp %7 : vector<128x16xf32>
    %cst_6 = arith.constant 1.000000e+00 : f32
    %9 = vector.broadcast %cst_6 : f32 to vector<128x16xf32>
    %10 = arith.addf %9, %8 : vector<128x16xf32>
    %11 = tpu.reciprocal %10 {approx = true} : vector<128x16xf32> -> vector<128x16xf32>
    %12 = arith.mulf %5, %11 : vector<128x16xf32>
    %c0_7 = arith.constant 0 : index
    %c0_8 = arith.constant 0 : index
    %13 = vector.load %arg4[%c0_7, %c0_8] : memref<128x16xf32, #tpu.memory_space<vmem>>, vector<128x16xf32>
    tpu.vector_store %arg4[%c0_7, %c0_8], %12 {strides = array<i32>} : memref<128x16xf32, #tpu.memory_space<vmem>>, vector<128x16xf32>,
    return
  }
  func.func @transform_0(%arg0: i32) -> (i32, i32) {
    %c0_i32 = arith.constant 0 : i32
    %c0_i32_0 = arith.constant 0 : i32
    return %arg0, %c0_i32 : i32, i32
  }
  func.func @transform_1(%arg0: i32) -> (i32, i32) {
    %c0_i32 = arith.constant 0 : i32
    %c0_i32_0 = arith.constant 0 : i32
    %c0_i32_1 = arith.constant 0 : i32
    return %c0_i32, %c0_i32_0 : i32, i32
  }
  func.func @transform_2(%arg0: i32) -> (i32, i32) {
    %c0_i32 = arith.constant 0 : i32
    %c0_i32_0 = arith.constant 0 : i32
    %c0_i32_1 = arith.constant 0 : i32
    return %c0_i32, %c0_i32_0 : i32, i32
  }
  func.func @transform_3(%arg0: i32) -> (i32, i32) {
    %c0_i32 = arith.constant 0 : i32
    %c0_i32_0 = arith.constant 0 : i32
    return %arg0, %c0_i32 : i32, i32
  }
}

module attributes {stable_mosaic.version = 11 : i64} {
  func.func @_mm_bias_act_kernel(%arg0: i32, %arg1: memref<128x16xbf16, #tpu.memory_space<vmem>>, %arg2: memref<16x32xbf16, #tpu.memory_space<vmem>>, %arg3: memref<1x32xf32, #tpu.memory_space<vmem>>, %arg4: memref<128x32xf32, #tpu.memory_space<vmem>>) attributes {dimension_semantics = [#tpu.dimension_semantics<parallel>], iteration_bounds = array<i64: 1>, scalar_prefetch = 0 : i64, scratch_operands = 0 : i64, tpu.core_type = #tpu.core_type<tc>, window_params = [{transform_indices = @transform_0, window_bounds = array<i64: 128, 16>}, {pipeline_mode = #tpu.pipeline_mode<synchronous>, transform_indices = @transform_1, window_bounds = array<i64: 16, 32>}, {pipeline_mode = #tpu.pipeline_mode<synchronous>, transform_indices = @transform_2, window_bounds = array<i64: 1, 32>}, {transform_indices = @transform_3, window_bounds = array<i64: 128, 32>}]} {
    %c0 = arith.constant 0 : index
    %c0_0 = arith.constant 0 : index
    %0 = vector.load %arg1[%c0, %c0_0] : memref<128x16xbf16, #tpu.memory_space<vmem>>, vector<128x16xbf16>
    %c0_1 = arith.constant 0 : index
    %c0_2 = arith.constant 0 : index
    %1 = vector.load %arg2[%c0_1, %c0_2] : memref<16x32xbf16, #tpu.memory_space<vmem>>, vector<16x32xbf16>
    %cst = arith.constant dense<0.000000e+00> : vector<128x32xf32>
    %2 = tpu.matmul %0, %1, %cst {dimension_numbers = #tpu.dot_dimension_numbers<[1], [0], [0], [1], [0, 0, 1, 1], [], []>} : vector<128x16xbf16>, vector<16x32xbf16>, vector<128x32xf32> -> vector<128x32xf32>
    %c0_3 = arith.constant 0 : index
    %c0_4 = arith.constant 0 : index
    %3 = vector.load %arg3[%c0_3, %c0_4] : memref<1x32xf32, #tpu.memory_space<vmem>>, vector<1x32xf32>
    %4 = vector.broadcast %3 : vector<1x32xf32> to vector<128x32xf32>
    %5 = arith.addf %2, %4 : vector<128x32xf32>
    %c0_5 = arith.constant 0 : index
    %c0_6 = arith.constant 0 : index
    %6 = vector.load %arg4[%c0_5, %c0_6] : memref<128x32xf32, #tpu.memory_space<vmem>>, vector<128x32xf32>
    tpu.vector_store %arg4[%c0_5, %c0_6], %5 {strides = array<i32>} : memref<128x32xf32, #tpu.memory_space<vmem>>, vector<128x32xf32>,
    return
  }
  func.func @transform_0(%arg0: i32) -> (i32, i32) {
    %c0_i32 = arith.constant 0 : i32
    %c0_i32_0 = arith.constant 0 : i32
    return %arg0, %c0_i32 : i32, i32
  }
  func.func @transform_1(%arg0: i32) -> (i32, i32) {
    %c0_i32 = arith.constant 0 : i32
    %c0_i32_0 = arith.constant 0 : i32
    %c0_i32_1 = arith.constant 0 : i32
    return %c0_i32, %c0_i32_0 : i32, i32
  }
  func.func @transform_2(%arg0: i32) -> (i32, i32) {
    %c0_i32 = arith.constant 0 : i32
    %c0_i32_0 = arith.constant 0 : i32
    %c0_i32_1 = arith.constant 0 : i32
    return %c0_i32, %c0_i32_0 : i32, i32
  }
  func.func @transform_3(%arg0: i32) -> (i32, i32) {
    %c0_i32 = arith.constant 0 : i32
    %c0_i32_0 = arith.constant 0 : i32
    return %arg0, %c0_i32 : i32, i32
  }
}

module attributes {stable_mosaic.version = 11 : i64} {
  func.func @_mm_stats_kernel(%arg0: i32, %arg1: memref<128x128xbf16, #tpu.memory_space<vmem>>, %arg2: memref<128x32xbf16, #tpu.memory_space<vmem>>, %arg3: memref<128x32xf32, #tpu.memory_space<vmem>>, %arg4: memref<8x32xf32, #tpu.memory_space<vmem>>) attributes {dimension_semantics = [#tpu.dimension_semantics<parallel>], iteration_bounds = array<i64: 1>, scalar_prefetch = 0 : i64, scratch_operands = 0 : i64, tpu.core_type = #tpu.core_type<tc>, window_params = [{transform_indices = @transform_0, window_bounds = array<i64: 128, 128>}, {pipeline_mode = #tpu.pipeline_mode<synchronous>, transform_indices = @transform_1, window_bounds = array<i64: 128, 32>}, {transform_indices = @transform_2, window_bounds = array<i64: 128, 32>}, {transform_indices = @transform_3, window_bounds = array<i64: 8, 32>}]} {
    %c0 = arith.constant 0 : index
    %c0_0 = arith.constant 0 : index
    %0 = vector.load %arg1[%c0, %c0_0] : memref<128x128xbf16, #tpu.memory_space<vmem>>, vector<128x128xbf16>
    %c0_1 = arith.constant 0 : index
    %c0_2 = arith.constant 0 : index
    %1 = vector.load %arg2[%c0_1, %c0_2] : memref<128x32xbf16, #tpu.memory_space<vmem>>, vector<128x32xbf16>
    %cst = arith.constant dense<0.000000e+00> : vector<128x32xf32>
    %2 = tpu.matmul %0, %1, %cst {dimension_numbers = #tpu.dot_dimension_numbers<[1], [0], [0], [1], [0, 0, 1, 1], [], []>} : vector<128x128xbf16>, vector<128x32xbf16>, vector<128x32xf32> -> vector<128x32xf32>
    %c0_3 = arith.constant 0 : index
    %c0_4 = arith.constant 0 : index
    %3 = vector.load %arg3[%c0_3, %c0_4] : memref<128x32xf32, #tpu.memory_space<vmem>>, vector<128x32xf32>
    tpu.vector_store %arg3[%c0_3, %c0_4], %2 {strides = array<i32>} : memref<128x32xf32, #tpu.memory_space<vmem>>, vector<128x32xf32>,
    %cst_5 = arith.constant 0.000000e+00 : f32
    %4 = vector.broadcast %cst_5 : f32 to vector<8x32xf32>
    %c0_6 = arith.constant 0 : index
    %c0_7 = arith.constant 0 : index
    %5 = vector.load %arg4[%c0_6, %c0_7] : memref<8x32xf32, #tpu.memory_space<vmem>>, vector<8x32xf32>
    tpu.vector_store %arg4[%c0_6, %c0_7], %4 {strides = array<i32>} : memref<8x32xf32, #tpu.memory_space<vmem>>, vector<8x32xf32>,
    %cst_8 = arith.constant dense<0.000000e+00> : vector<32xf32>
    %6 = vector.multi_reduction <add>, %2, %cst_8 [0] : vector<128x32xf32> to vector<32xf32>
    %7 = vector.shape_cast %6 : vector<32xf32> to vector<1x32xf32>
    %c0_9 = arith.constant 0 : index
    %c0_10 = arith.constant 0 : index
    %8 = vector.load %arg4[%c0_9, %c0_10] : memref<8x32xf32, #tpu.memory_space<vmem>>, vector<1x32xf32>
    tpu.vector_store %arg4[%c0_9, %c0_10], %7 {strides = array<i32>} : memref<8x32xf32, #tpu.memory_space<vmem>>, vector<1x32xf32>,
    %9 = arith.mulf %2, %2 : vector<128x32xf32>
    %cst_11 = arith.constant dense<0.000000e+00> : vector<32xf32>
    %10 = vector.multi_reduction <add>, %9, %cst_11 [0] : vector<128x32xf32> to vector<32xf32>
    %11 = vector.shape_cast %10 : vector<32xf32> to vector<1x32xf32>
    %c1 = arith.constant 1 : index
    %c0_12 = arith.constant 0 : index
    %12 = vector.load %arg4[%c1, %c0_12] : memref<8x32xf32, #tpu.memory_space<vmem>>, vector<1x32xf32>
    tpu.vector_store %arg4[%c1, %c0_12], %11 {strides = array<i32>} : memref<8x32xf32, #tpu.memory_space<vmem>>, vector<1x32xf32>,
    return
  }
  func.func @transform_0(%arg0: i32) -> (i32, i32) {
    %c0_i32 = arith.constant 0 : i32
    %c0_i32_0 = arith.constant 0 : i32
    return %arg0, %c0_i32 : i32, i32
  }
  func.func @transform_1(%arg0: i32) -> (i32, i32) {
    %c0_i32 = arith.constant 0 : i32
    %c0_i32_0 = arith.constant 0 : i32
    %c0_i32_1 = arith.constant 0 : i32
    return %c0_i32, %c0_i32_0 : i32, i32
  }
  func.func @transform_2(%arg0: i32) -> (i32, i32) {
    %c0_i32 = arith.constant 0 : i32
    %c0_i32_0 = arith.constant 0 : i32
    return %arg0, %c0_i32 : i32, i32
  }
  func.func @transform_3(%arg0: i32) -> (i32, i32) {
    %c0_i32 = arith.constant 0 : i32
    %c0_i32_0 = arith.constant 0 : i32
    return %arg0, %c0_i32 : i32, i32
  }
}

module attributes {stable_mosaic.version = 11 : i64} {
  func.func @_mm_stats_kernel(%arg0: i32, %arg1: memref<256x32xbf16, #tpu.memory_space<vmem>>, %arg2: memref<32x16xbf16, #tpu.memory_space<vmem>>, %arg3: memref<256x16xf32, #tpu.memory_space<vmem>>, %arg4: memref<8x16xf32, #tpu.memory_space<vmem>>) attributes {dimension_semantics = [#tpu.dimension_semantics<parallel>], iteration_bounds = array<i64: 2>, scalar_prefetch = 0 : i64, scratch_operands = 0 : i64, tpu.core_type = #tpu.core_type<tc>, window_params = [{transform_indices = @transform_0, window_bounds = array<i64: 256, 32>}, {pipeline_mode = #tpu.pipeline_mode<synchronous>, transform_indices = @transform_1, window_bounds = array<i64: 32, 16>}, {transform_indices = @transform_2, window_bounds = array<i64: 256, 16>}, {transform_indices = @transform_3, window_bounds = array<i64: 8, 16>}]} {
    %c0 = arith.constant 0 : index
    %c0_0 = arith.constant 0 : index
    %0 = vector.load %arg1[%c0, %c0_0] : memref<256x32xbf16, #tpu.memory_space<vmem>>, vector<256x32xbf16>
    %c0_1 = arith.constant 0 : index
    %c0_2 = arith.constant 0 : index
    %1 = vector.load %arg2[%c0_1, %c0_2] : memref<32x16xbf16, #tpu.memory_space<vmem>>, vector<32x16xbf16>
    %cst = arith.constant dense<0.000000e+00> : vector<256x16xf32>
    %2 = tpu.matmul %0, %1, %cst {dimension_numbers = #tpu.dot_dimension_numbers<[1], [0], [0], [1], [0, 0, 1, 1], [], []>} : vector<256x32xbf16>, vector<32x16xbf16>, vector<256x16xf32> -> vector<256x16xf32>
    %c0_3 = arith.constant 0 : index
    %c0_4 = arith.constant 0 : index
    %3 = vector.load %arg3[%c0_3, %c0_4] : memref<256x16xf32, #tpu.memory_space<vmem>>, vector<256x16xf32>
    tpu.vector_store %arg3[%c0_3, %c0_4], %2 {strides = array<i32>} : memref<256x16xf32, #tpu.memory_space<vmem>>, vector<256x16xf32>,
    %cst_5 = arith.constant 0.000000e+00 : f32
    %4 = vector.broadcast %cst_5 : f32 to vector<8x16xf32>
    %c0_6 = arith.constant 0 : index
    %c0_7 = arith.constant 0 : index
    %5 = vector.load %arg4[%c0_6, %c0_7] : memref<8x16xf32, #tpu.memory_space<vmem>>, vector<8x16xf32>
    tpu.vector_store %arg4[%c0_6, %c0_7], %4 {strides = array<i32>} : memref<8x16xf32, #tpu.memory_space<vmem>>, vector<8x16xf32>,
    %cst_8 = arith.constant dense<0.000000e+00> : vector<16xf32>
    %6 = vector.multi_reduction <add>, %2, %cst_8 [0] : vector<256x16xf32> to vector<16xf32>
    %7 = vector.shape_cast %6 : vector<16xf32> to vector<1x16xf32>
    %c0_9 = arith.constant 0 : index
    %c0_10 = arith.constant 0 : index
    %8 = vector.load %arg4[%c0_9, %c0_10] : memref<8x16xf32, #tpu.memory_space<vmem>>, vector<1x16xf32>
    tpu.vector_store %arg4[%c0_9, %c0_10], %7 {strides = array<i32>} : memref<8x16xf32, #tpu.memory_space<vmem>>, vector<1x16xf32>,
    %9 = arith.mulf %2, %2 : vector<256x16xf32>
    %cst_11 = arith.constant dense<0.000000e+00> : vector<16xf32>
    %10 = vector.multi_reduction <add>, %9, %cst_11 [0] : vector<256x16xf32> to vector<16xf32>
    %11 = vector.shape_cast %10 : vector<16xf32> to vector<1x16xf32>
    %c1 = arith.constant 1 : index
    %c0_12 = arith.constant 0 : index
    %12 = vector.load %arg4[%c1, %c0_12] : memref<8x16xf32, #tpu.memory_space<vmem>>, vector<1x16xf32>
    tpu.vector_store %arg4[%c1, %c0_12], %11 {strides = array<i32>} : memref<8x16xf32, #tpu.memory_space<vmem>>, vector<1x16xf32>,
    return
  }
  func.func @transform_0(%arg0: i32) -> (i32, i32) {
    %c0_i32 = arith.constant 0 : i32
    %c0_i32_0 = arith.constant 0 : i32
    return %arg0, %c0_i32 : i32, i32
  }
  func.func @transform_1(%arg0: i32) -> (i32, i32) {
    %c0_i32 = arith.constant 0 : i32
    %c0_i32_0 = arith.constant 0 : i32
    %c0_i32_1 = arith.constant 0 : i32
    return %c0_i32, %c0_i32_0 : i32, i32
  }
  func.func @transform_2(%arg0: i32) -> (i32, i32) {
    %c0_i32 = arith.constant 0 : i32
    %c0_i32_0 = arith.constant 0 : i32
    return %arg0, %c0_i32 : i32, i32
  }
  func.func @transform_3(%arg0: i32) -> (i32, i32) {
    %c0_i32 = arith.constant 0 : i32
    %c0_i32_0 = arith.constant 0 : i32
    return %arg0, %c0_i32 : i32, i32
  }
}

module attributes {stable_mosaic.version = 11 : i64} {
  func.func @_affine_act_kernel(%arg0: i32, %arg1: memref<256x16xf32, #tpu.memory_space<vmem>>, %arg2: memref<1x16xf32, #tpu.memory_space<vmem>>, %arg3: memref<1x16xf32, #tpu.memory_space<vmem>>, %arg4: memref<256x16xf32, #tpu.memory_space<vmem>>) attributes {dimension_semantics = [#tpu.dimension_semantics<parallel>], iteration_bounds = array<i64: 2>, scalar_prefetch = 0 : i64, scratch_operands = 0 : i64, tpu.core_type = #tpu.core_type<tc>, window_params = [{transform_indices = @transform_0, window_bounds = array<i64: 256, 16>}, {pipeline_mode = #tpu.pipeline_mode<synchronous>, transform_indices = @transform_1, window_bounds = array<i64: 1, 16>}, {pipeline_mode = #tpu.pipeline_mode<synchronous>, transform_indices = @transform_2, window_bounds = array<i64: 1, 16>}, {transform_indices = @transform_3, window_bounds = array<i64: 256, 16>}]} {
    %c0 = arith.constant 0 : index
    %c0_0 = arith.constant 0 : index
    %0 = vector.load %arg1[%c0, %c0_0] : memref<256x16xf32, #tpu.memory_space<vmem>>, vector<256x16xf32>
    %c0_1 = arith.constant 0 : index
    %c0_2 = arith.constant 0 : index
    %1 = vector.load %arg2[%c0_1, %c0_2] : memref<1x16xf32, #tpu.memory_space<vmem>>, vector<1x16xf32>
    %2 = vector.broadcast %1 : vector<1x16xf32> to vector<256x16xf32>
    %3 = arith.mulf %0, %2 : vector<256x16xf32>
    %c0_3 = arith.constant 0 : index
    %c0_4 = arith.constant 0 : index
    %4 = vector.load %arg3[%c0_3, %c0_4] : memref<1x16xf32, #tpu.memory_space<vmem>>, vector<1x16xf32>
    %5 = vector.broadcast %4 : vector<1x16xf32> to vector<256x16xf32>
    %6 = arith.addf %3, %5 : vector<256x16xf32>
    %cst = arith.constant 0.000000e+00 : f32
    %7 = vector.broadcast %cst : f32 to vector<256x16xf32>
    %8 = arith.subf %7, %6 : vector<256x16xf32>
    %9 = math.exp %8 : vector<256x16xf32>
    %cst_5 = arith.constant 1.000000e+00 : f32
    %10 = vector.broadcast %cst_5 : f32 to vector<256x16xf32>
    %11 = arith.addf %10, %9 : vector<256x16xf32>
    %12 = tpu.reciprocal %11 {approx = true} : vector<256x16xf32> -> vector<256x16xf32>
    %13 = arith.mulf %6, %12 : vector<256x16xf32>
    %c0_6 = arith.constant 0 : index
    %c0_7 = arith.constant 0 : index
    %14 = vector.load %arg4[%c0_6, %c0_7] : memref<256x16xf32, #tpu.memory_space<vmem>>, vector<256x16xf32>
    tpu.vector_store %arg4[%c0_6, %c0_7], %13 {strides = array<i32>} : memref<256x16xf32, #tpu.memory_space<vmem>>, vector<256x16xf32>,
    return
  }
  func.func @transform_0(%arg0: i32) -> (i32, i32) {
    %c0_i32 = arith.constant 0 : i32
    %c0_i32_0 = arith.constant 0 : i32
    return %arg0, %c0_i32 : i32, i32
  }
  func.func @transform_1(%arg0: i32) -> (i32, i32) {
    %c0_i32 = arith.constant 0 : i32
    %c0_i32_0 = arith.constant 0 : i32
    %c0_i32_1 = arith.constant 0 : i32
    return %c0_i32, %c0_i32_0 : i32, i32
  }
  func.func @transform_2(%arg0: i32) -> (i32, i32) {
    %c0_i32 = arith.constant 0 : i32
    %c0_i32_0 = arith.constant 0 : i32
    %c0_i32_1 = arith.constant 0 : i32
    return %c0_i32, %c0_i32_0 : i32, i32
  }
  func.func @transform_3(%arg0: i32) -> (i32, i32) {
    %c0_i32 = arith.constant 0 : i32
    %c0_i32_0 = arith.constant 0 : i32
    return %arg0, %c0_i32 : i32, i32
  }
}

</mosaic_0001>

<bundles_post_ra>
// kernel: hierarchical_vae_forward.33
= control target key start
LH: loop header
LB: loop body
LE: loop exit
PB: predicated region body
PF: predicated region fallthrough
CT: control target
= control target key end

     0   :  { %s742_s12 = smov 0   ;;  %s915_s0 = inlined_call_operand.vmem [shape: bf16[512,80], index: 0, kind: input, shape index: {}]   ;;  %s916_s1 = inlined_call_operand.vmem [shape: bf16[80,16], index: 1, kind: input, shape index: {}]   ;;  %s917_s2 = inlined_call_operand.vmem [shape: f32[1,16], index: 2, kind: input, shape index: {}]   ;;  %s918_s3 = inlined_call_operand.vmem [shape: f32[512,16], index: 3, kind: output, shape index: {}]  }
   0x1 LB: > { %s558_s13 = sadd.s32 4294967295, %s720_s12   ;;  %p562_p0 = scmp.ge.s32.totalorder %s720_s12, 1  ;;  %s720_s12 = sphi %s742_s12, %s13_s12  }
   0x2   : > { %p138_p1 = scmp.lt.s32.totalorder %s720_s12, 3 }
   0x4   : > { %p139_p2 = pnand %p562_p0, %p138_p1 }
   0x5   : > { %s563_s16 = sshll.u32 (!%p139_p2), %s558_s13, 5 }
   0x6   : > { %142 = sbr.rel (%p139_p2) target bundleno = 224 (0xe0), region = 32  ;;  %p163_p3 = scmp.lt.s32.totalorder (!%p139_p2), %s563_s16, 63 }
   0xb   : > { %v689_v0 = vld [vmem:[%s916_s1 + $0x20] sm:$0xff]  ;;  %v688_v1 = vld [vmem:[%s916_s1 + $0x18] sm:$0xff]  ;;  %v687_v2 = vld [vmem:[%s916_s1 + $0x10] sm:$0xff]  ;;  %s920_s16 = smov (!%p163_p3, %s563_s16), 63  ;;  %vm331_vm0 = vcmask 654336   ;;  %vm469_vm1 = vcmask 130048  }
   0xc   : > { %383 = vmatpush.bf16.msra.mxu0 %v689_v0  ;;  %690 = vmatpush.bf16.msra.mxu1 %v689_v0  ;;  %v686_v3 = vld [vmem:[%s916_s1 + $0x8] sm:$0xff]  ;;  %s564_s23 = sshll.u32 %s920_s16, 2  ;;  %v685_v4 = vld [vmem:[%s916_s1] sm:$0xff]  ;;  %s566_s29 = sshll.u32 %s920_s16, 3 }
   0xd   : > { %691 = vmatpush.bf16.msra.mxu2 %v689_v0  ;;  %692 = vmatpush.bf16.msra.mxu3 %v689_v0  ;;  %s771_s28 = scalar_lea.vmem %s915_s0, %s564_s23  ;;  %v809_v21 = vld [vmem:[%s917_s2] ss:$0 sm:$0xff]  ;;  %s814_s7 = scalar_lea.vmem %s918_s3, %s566_s29 }
   0xe   : > { %v669_v5 = vld [vmem:[%s771_s28] sm:$0xff]  ;;  %v670_v9 = vld [vmem:[%s771_s28 + $0x8] sm:$0xff]  ;;  %v671_v13 = vld [vmem:[%s771_s28 + $0x10] sm:$0xff] }
   0xf   : > { %v673_v6 = vld [vmem:[%s771_s28 + $0x20] sm:$0xff]  ;;  %v674_v10 = vld [vmem:[%s771_s28 + $0x28] sm:$0xff]  ;;  %v675_v14 = vld [vmem:[%s771_s28 + $0x30] sm:$0xff] }
  0x10   : > { %384 = vmatpush.bf16.msra.mxu0 %v688_v1  ;;  %693 = vmatpush.bf16.msra.mxu1 %v688_v1  ;;  %v677_v7 = vld [vmem:[%s771_s28 + $0x40] sm:$0xff]  ;;  %v678_v11 = vld [vmem:[%s771_s28 + $0x48] sm:$0xff]  ;;  %v679_v15 = vld [vmem:[%s771_s28 + $0x50] sm:$0xff] }
  0x11   : > { %694 = vmatpush.bf16.msra.mxu2 %v688_v1  ;;  %695 = vmatpush.bf16.msra.mxu3 %v688_v1  ;;  %v681_v8 = vld [vmem:[%s771_s28 + $0x60] sm:$0xff]  ;;  %v682_v12 = vld [vmem:[%s771_s28 + $0x68] sm:$0xff]  ;;  %v683_v16 = vld [vmem:[%s771_s28 + $0x70] sm:$0xff] }
  0x12   : > { %v672_v17 = vld [vmem:[%s771_s28 + $0x18] sm:$0xff] }
  0x13   : > { %v676_v18 = vld [vmem:[%s771_s28 + $0x38] sm:$0xff] }
  0x14   : > { %385 = vmatpush.bf16.msra.mxu0 %v687_v2  ;;  %696 = vmatpush.bf16.msra.mxu1 %v687_v2  ;;  %v680_v19 = vld [vmem:[%s771_s28 + $0x58] sm:$0xff] }
  0x15   : > { %697 = vmatpush.bf16.msra.mxu2 %v687_v2  ;;  %698 = vmatpush.bf16.msra.mxu3 %v687_v2  ;;  %v684_v20 = vld [vmem:[%s771_s28 + $0x78] sm:$0xff] }
  0x18   : > { %386 = vmatpush.bf16.msra.mxu0 %v686_v3  ;;  %699 = vmatpush.bf16.msra.mxu1 %v686_v3 }
  0x19   : > { %700 = vmatpush.bf16.msra.mxu2 %v686_v3  ;;  %701 = vmatpush.bf16.msra.mxu3 %v686_v3 }
  0x1c   : > { %387 = vmatpush.bf16.msra.mxu0 %v685_v4  ;;  %702 = vmatpush.bf16.msra.mxu1 %v685_v4 }
  0x1d   : > { %703 = vmatpush.bf16.msra.mxu2 %v685_v4  ;;  %704 = vmatpush.bf16.msra.mxu3 %v685_v4 }
  0x1f   : > { %651 = vmatmul.msk.bf16.vlgmr.msra.gmra.mxu0 %vm331_vm0, %v669_v5  ;;  %655 = vmatmul.msk.bf16.vlgmr.msra.gmra.mxu1 %vm331_vm0, %v673_v6 }
  0x20   : > { %659 = vmatmul.msk.bf16.vlgmr.msra.gmra.mxu2 %vm331_vm0, %v677_v7  ;;  %663 = vmatmul.msk.bf16.vlgmr.msra.gmra.mxu3 %vm331_vm0, %v681_v8 }
  0x2f   : > { %652 = vmatmul.msk.bf16.gmra.mxu0 %vm331_vm0, %v670_v9  ;;  %656 = vmatmul.msk.bf16.gmra.mxu1 %vm331_vm0, %v674_v10 }
  0x30   : > { %660 = vmatmul.msk.bf16.gmra.mxu2 %vm331_vm0, %v678_v11  ;;  %664 = vmatmul.msk.bf16.gmra.mxu3 %vm331_vm0, %v682_v12 }
  0x3f   : > { %653 = vmatmul.msk.bf16.gmra.mxu0 %vm331_vm0, %v671_v13  ;;  %657 = vmatmul.msk.bf16.gmra.mxu1 %vm331_vm0, %v675_v14 }
  0x40   : > { %661 = vmatmul.msk.bf16.gmra.mxu2 %vm331_vm0, %v679_v15  ;;  %665 = vmatmul.msk.bf16.gmra.mxu3 %vm331_vm0, %v683_v16 }
  0x4f   : > { %654 = vmatmul.msk.bf16.gmra.mxu0 %vm331_vm0, %v672_v17  ;;  %658 = vmatmul.msk.bf16.gmra.mxu1 %vm331_vm0, %v676_v18 }
  0x50   : > { %662 = vmatmul.msk.bf16.gmra.mxu2 %vm331_vm0, %v680_v19  ;;  %666 = vmatmul.msk.bf16.gmra.mxu3 %vm331_vm0, %v684_v20 }
  0x9c   : > { %v389_v22 = vpop.f32.mrf.mxu0  ;;  %v409_v23 = vpop.f32.mrf.mxu1 }
  0x9d   : > { %v390_v24 = vadd.f32 %v809_v21, %v389_v22  ;;  %v410_v25 = vadd.f32 %v809_v21, %v409_v23 }
  0x9f   : > { %470 = vst.msk [vmem:[%s814_s7] sm:$0xff] %vm469_vm1, %v390_v24 }
  0xa0   : > { %478 = vst.msk [vmem:[%s814_s7 + $0x40] sm:$0xff] %vm469_vm1, %v410_v25 }
  0xa3   : > { %v429_v26 = vpop.f32.mrf.mxu2  ;;  %v449_v27 = vpop.f32.mrf.mxu3 }
  0xa4   : > { %v430_v28 = vadd.f32 %v809_v21, %v429_v26  ;;  %v450_v29 = vadd.f32 %v809_v21, %v449_v27  ;;  %v391_v30 = vpop.f32.mrf.mxu0  ;;  %v411_v31 = vpop.f32.mrf.mxu1 }
  0xa5   : > { %v392_v32 = vadd.f32 %v809_v21, %v391_v30  ;;  %v412_v33 = vadd.f32 %v809_v21, %v411_v31 }
  0xa6   : > { %486 = vst.msk [vmem:[%s814_s7 + $0x80] sm:$0xff] %vm469_vm1, %v430_v28 }
  0xa7   : > { %494 = vst.msk [vmem:[%s814_s7 + $0xc0] sm:$0xff] %vm469_vm1, %v450_v29 }
  0xa8   : > { %471 = vst.msk [vmem:[%s814_s7 + $0x8] sm:$0xff] %vm469_vm1, %v392_v32 }
  0xa9   : > { %479 = vst.msk [vmem:[%s814_s7 + $0x48] sm:$0xff] %vm469_vm1, %v412_v33 }
  0xab   : > { %v431_v34 = vpop.f32.mrf.mxu2  ;;  %v451_v35 = vpop.f32.mrf.mxu3 }
  0xac   : > { %v432_v36 = vadd.f32 %v809_v21, %v431_v34  ;;  %v452_v37 = vadd.f32 %v809_v21, %v451_v35  ;;  %v394_v38 = vpop.f32.mrf.mxu0  ;;  %v414_v39 = vpop.f32.mrf.mxu1 }
  0xad   : > { %v395_v40 = vadd.f32 %v809_v21, %v394_v38  ;;  %v415_v41 = vadd.f32 %v809_v21, %v414_v39 }
  0xae   : > { %487 = vst.msk [vmem:[%s814_s7 + $0x88] sm:$0xff] %vm469_vm1, %v432_v36 }
  0xaf   : > { %495 = vst.msk [vmem:[%s814_s7 + $0xc8] sm:$0xff] %vm469_vm1, %v452_v37 }
  0xb0   : > { %472 = vst.msk [vmem:[%s814_s7 + $0x10] sm:$0xff] %vm469_vm1, %v395_v40 }
  0xb1   : > { %480 = vst.msk [vmem:[%s814_s7 + $0x50] sm:$0xff] %vm469_vm1, %v415_v41 }
  0xb3   : > { %v434_v42 = vpop.f32.mrf.mxu2  ;;  %v454_v43 = vpop.f32.mrf.mxu3 }
  0xb4   : > { %v435_v44 = vadd.f32 %v809_v21, %v434_v42  ;;  %v455_v45 = vadd.f32 %v809_v21, %v454_v43  ;;  %v396_v46 = vpop.f32.mrf.mxu0  ;;  %v416_v47 = vpop.f32.mrf.mxu1 }
  0xb5   : > { %v397_v48 = vadd.f32 %v809_v21, %v396_v46  ;;  %v417_v49 = vadd.f32 %v809_v21, %v416_v47 }
  0xb6   : > { %488 = vst.msk [vmem:[%s814_s7 + $0x90] sm:$0xff] %vm469_vm1, %v435_v44 }
  0xb7   : > { %496 = vst.msk [vmem:[%s814_s7 + $0xd0] sm:$0xff] %vm469_vm1, %v455_v45 }
  0xb8   : > { %473 = vst.msk [vmem:[%s814_s7 + $0x18] sm:$0xff] %vm469_vm1, %v397_v48 }
  0xb9   : > { %481 = vst.msk [vmem:[%s814_s7 + $0x58] sm:$0xff] %vm469_vm1, %v417_v49 }
  0xbb   : > { %v436_v50 = vpop.f32.mrf.mxu2  ;;  %v456_v51 = vpop.f32.mrf.mxu3 }
  0xbc   : > { %v437_v52 = vadd.f32 %v809_v21, %v436_v50  ;;  %v457_v53 = vadd.f32 %v809_v21, %v456_v51  ;;  %v399_v54 = vpop.f32.mrf.mxu0  ;;  %v419_v55 = vpop.f32.mrf.mxu1 }
  0xbd   : > { %v400_v56 = vadd.f32 %v809_v21, %v399_v54  ;;  %v420_v57 = vadd.f32 %v809_v21, %v419_v55 }
  0xbe   : > { %489 = vst.msk [vmem:[%s814_s7 + $0x98] sm:$0xff] %vm469_vm1, %v437_v52 }
  0xbf   : > { %497 = vst.msk [vmem:[%s814_s7 + $0xd8] sm:$0xff] %vm469_vm1, %v457_v53 }
  0xc0   : > { %474 = vst.msk [vmem:[%s814_s7 + $0x20] sm:$0xff] %vm469_vm1, %v400_v56 }
  0xc1   : > { %482 = vst.msk [vmem:[%s814_s7 + $0x60] sm:$0xff] %vm469_vm1, %v420_v57 }
  0xc3   : > { %v439_v58 = vpop.f32.mrf.mxu2  ;;  %v459_v59 = vpop.f32.mrf.mxu3 }
  0xc4   : > { %v440_v60 = vadd.f32 %v809_v21, %v439_v58  ;;  %v460_v61 = vadd.f32 %v809_v21, %v459_v59  ;;  %v401_v62 = vpop.f32.mrf.mxu0  ;;  %v421_v63 = vpop.f32.mrf.mxu1 }
  0xc5   : > { %v402_v0 = vadd.f32 %v809_v21, %v401_v62  ;;  %v422_v1 = vadd.f32 %v809_v21, %v421_v63 }
  0xc6   : > { %490 = vst.msk [vmem:[%s814_s7 + $0xa0] sm:$0xff] %vm469_vm1, %v440_v60 }
  0xc7   : > { %498 = vst.msk [vmem:[%s814_s7 + $0xe0] sm:$0xff] %vm469_vm1, %v460_v61 }
  0xc8   : > { %475 = vst.msk [vmem:[%s814_s7 + $0x28] sm:$0xff] %vm469_vm1, %v402_v0 }
  0xc9   : > { %483 = vst.msk [vmem:[%s814_s7 + $0x68] sm:$0xff] %vm469_vm1, %v422_v1 }
  0xcb   : > { %v441_v2 = vpop.f32.mrf.mxu2  ;;  %v461_v3 = vpop.f32.mrf.mxu3 }
  0xcc   : > { %v442_v4 = vadd.f32 %v809_v21, %v441_v2  ;;  %v462_v5 = vadd.f32 %v809_v21, %v461_v3  ;;  %v404_v6 = vpop.f32.mrf.mxu0  ;;  %v424_v7 = vpop.f32.mrf.mxu1 }
  0xcd   : > { %v405_v8 = vadd.f32 %v809_v21, %v404_v6  ;;  %v425_v9 = vadd.f32 %v809_v21, %v424_v7 }
  0xce   : > { %491 = vst.msk [vmem:[%s814_s7 + $0xa8] sm:$0xff] %vm469_vm1, %v442_v4 }
  0xcf   : > { %499 = vst.msk [vmem:[%s814_s7 + $0xe8] sm:$0xff] %vm469_vm1, %v462_v5 }
  0xd0   : > { %476 = vst.msk [vmem:[%s814_s7 + $0x30] sm:$0xff] %vm469_vm1, %v405_v8 }
  0xd1   : > { %484 = vst.msk [vmem:[%s814_s7 + $0x70] sm:$0xff] %vm469_vm1, %v425_v9 }
  0xd3   : > { %v444_v10 = vpop.f32.mrf.mxu2  ;;  %v464_v11 = vpop.f32.mrf.mxu3 }
  0xd4   : > { %v445_v12 = vadd.f32 %v809_v21, %v444_v10  ;;  %v465_v13 = vadd.f32 %v809_v21, %v464_v11  ;;  %v406_v14 = vpop.f32.mrf.mxu0  ;;  %v426_v15 = vpop.f32.mrf.mxu1 }
  0xd5   : > { %v407_v16 = vadd.f32 %v809_v21, %v406_v14  ;;  %v427_v17 = vadd.f32 %v809_v21, %v426_v15 }
  0xd6   : > { %492 = vst.msk [vmem:[%s814_s7 + $0xb0] sm:$0xff] %vm469_vm1, %v445_v12 }
  0xd7   : > { %500 = vst.msk [vmem:[%s814_s7 + $0xf0] sm:$0xff] %vm469_vm1, %v465_v13 }
  0xd8   : > { %477 = vst.msk [vmem:[%s814_s7 + $0x38] sm:$0xff] %vm469_vm1, %v407_v16 }
  0xd9   : > { %485 = vst.msk [vmem:[%s814_s7 + $0x78] sm:$0xff] %vm469_vm1, %v427_v17 }
  0xdb   : > { %v446_v18 = vpop.f32.mrf.mxu2  ;;  %v466_v19 = vpop.f32.mrf.mxu3 }
  0xdc   : > { %v447_v20 = vadd.f32 %v809_v21, %v446_v18  ;;  %v467_v22 = vadd.f32 %v809_v21, %v466_v19 }
  0xde   : > { %493 = vst.msk [vmem:[%s814_s7 + $0xb8] sm:$0xff] %vm469_vm1, %v447_v20 }
  0xdf   : > { %501 = vst.msk [vmem:[%s814_s7 + $0xf8] sm:$0xff] %vm469_vm1, %v467_v22 }
  0xe0 PF: > { %s13_s12 = sadd.s32 1, %s720_s12  }
  0xe1   : > { %p10_p4 = scmp.ge.s32.totalorder %s13_s12, 4  }
  0xe3   :  { %12 = sbr.rel (!%p10_p4) target bundleno = 1 (0x1), region = 62 }

// kernel: hierarchical_vae_forward.35
= control target key start
LH: loop header
LB: loop body
LE: loop exit
PB: predicated region body
PF: predicated region fallthrough
CT: control target
= control target key end

     0   :  { %vm166_vm0 = vcmask 130048   ;;  %s491_s0 = inlined_call_operand.vmem [shape: f32[128,16], index: 0, kind: input, shape index: {}]   ;;  %s492_s1 = inlined_call_operand.vmem [shape: f32[1,16], index: 1, kind: input, shape index: {}]   ;;  %s493_s2 = inlined_call_operand.vmem [shape: f32[1,16], index: 2, kind: input, shape index: {}]   ;;  %s494_s3 = inlined_call_operand.vmem [shape: f32[128,16], index: 3, kind: output, shape index: {}]  }
   0x1   :  { %v14_v0 = vld [vmem:[%s491_s0] sm:$0xff]  ;;  %v15_v3 = vld [vmem:[%s491_s0 + $0x8] sm:$0xff]  ;;  %v16_v6 = vld [vmem:[%s491_s0 + $0x10] sm:$0xff] }
   0x2   :  { %v279_v1 = vld [vmem:[%s492_s1] ss:$0 sm:$0xff]  ;;  %v17_v7 = vld [vmem:[%s491_s0 + $0x18] sm:$0xff]  ;;  %v19_v12 = vld [vmem:[%s491_s0 + $0x28] sm:$0xff] }
   0x3   :  { %v284_v2 = vld [vmem:[%s493_s2] ss:$0 sm:$0xff]  ;;  %v34_v4 = vmul.f32 %v279_v1, %v14_v0  ;;  %v35_v5 = vmul.f32 %v279_v1, %v15_v3  ;;  %v36_v9 = vmul.f32 %v279_v1, %v16_v6  ;;  %v37_v10 = vmul.f32 %v279_v1, %v17_v7  ;;  %v20_v13 = vld [vmem:[%s491_s0 + $0x30] sm:$0xff]  ;;  %v21_v14 = vld [vmem:[%s491_s0 + $0x38] sm:$0xff] }
   0x4   :  { %v18_v8 = vld [vmem:[%s491_s0 + $0x20] sm:$0xff]  ;;  %v39_v17 = vmul.f32 %v279_v1, %v19_v12  ;;  %v40_v18 = vmul.f32 %v279_v1, %v20_v13  ;;  %v41_v22 = vmul.f32 %v279_v1, %v21_v14  ;;  %v23_v32 = vld [vmem:[%s491_s0 + $0x48] sm:$0xff]  ;;  %v24_v42 = vld [vmem:[%s491_s0 + $0x50] sm:$0xff] }
   0x5   :  { %v38_v11 = vmul.f32 %v279_v1, %v18_v8  ;;  %v313_v15 = vadd.f32 %v284_v2, %v34_v4  ;;  %v316_v16 = vadd.f32 %v284_v2, %v35_v5  ;;  %v321_v19 = vadd.f32 %v284_v2, %v36_v9  ;;  %v22_v27 = vld [vmem:[%s491_s0 + $0x40] sm:$0xff]  ;;  %v25_v46 = vld [vmem:[%s491_s0 + $0x58] sm:$0xff]  ;;  %v27_v52 = vld [vmem:[%s491_s0 + $0x68] sm:$0xff] }
   0x6   :  { %v324_v20 = vadd.f32 %v284_v2, %v37_v10  ;;  %v333_v25 = vadd.f32 %v284_v2, %v39_v17  ;;  %v336_v26 = vadd.f32 %v284_v2, %v40_v18  ;;  %v345_v31 = vadd.f32 %v284_v2, %v41_v22  ;;  %v26_v47 = vld [vmem:[%s491_s0 + $0x60] sm:$0xff]  ;;  %v28_v59 = vld [vmem:[%s491_s0 + $0x70] sm:$0xff]  ;;  %v29_v63 = vld [vmem:[%s491_s0 + $0x78] sm:$0xff] }
   0x7   :  { %v327_v21 = vadd.f32 %v284_v2, %v38_v11  ;;  %v70_v23 = vsub.f32 0.0, %v313_v15  ;;  %v71_v24 = vsub.f32 0.0, %v316_v16  ;;  %v72_v28 = vsub.f32 0.0, %v321_v19 }
   0x8   :  { %v73_v29 = vsub.f32 0.0, %v324_v20  ;;  %v75_v35 = vsub.f32 0.0, %v333_v25  ;;  %v76_v36 = vsub.f32 0.0, %v336_v26  ;;  %v42_v39 = vmul.f32 %v279_v1, %v22_v27 }
   0x9   :  { %v74_v30 = vsub.f32 0.0, %v327_v21  ;;  %v86_v33 = vmul.f32 1.442695, %v70_v23  ;;  %v88_v34 = vmul.f32 1.442695, %v71_v24  ;;  %v77_v41 = vsub.f32 0.0, %v345_v31 }
   0xa   :  { %v90_v37 = vmul.f32 1.442695, %v72_v28  ;;  %v92_v38 = vmul.f32 1.442695, %v73_v29  ;;  %v96_v43 = vmul.f32 1.442695, %v75_v35  ;;  %v358_v44 = vadd.f32 %v284_v2, %v42_v39 }
   0xb   :  { %189 = vpow2.f32 %v86_v33  ;;  %v94_v40 = vmul.f32 1.442695, %v74_v30  ;;  %v43_v45 = vmul.f32 %v279_v1, %v23_v32  ;;  %v98_v48 = vmul.f32 1.442695, %v76_v36 }
   0xc   :  { %191 = vpow2.f32 %v88_v34  ;;  %v100_v49 = vmul.f32 1.442695, %v77_v41  ;;  %v78_v50 = vsub.f32 0.0, %v358_v44  ;;  %v44_v51 = vmul.f32 %v279_v1, %v24_v42 }
   0xd   :  { %193 = vpow2.f32 %v90_v37  ;;  %v45_v53 = vmul.f32 %v279_v1, %v25_v46  ;;  %v46_v54 = vmul.f32 %v279_v1, %v26_v47  ;;  %v375_v56 = vadd.f32 %v284_v2, %v43_v45 }
   0xe   :  { %195 = vpow2.f32 %v92_v38  ;;  %v102_v55 = vmul.f32 1.442695, %v78_v50  ;;  %v47_v58 = vmul.f32 %v279_v1, %v27_v52  ;;  %v382_v62 = vadd.f32 %v284_v2, %v44_v51 }
   0xf   :  { %197 = vpow2.f32 %v94_v40  ;;  %v388_v4 = vadd.f32 %v284_v2, %v45_v53  ;;  %v391_v5 = vadd.f32 %v284_v2, %v46_v54  ;;  %v79_v8 = vsub.f32 0.0, %v375_v56 }
  0x10   :  { %199 = vpow2.f32 %v96_v43  ;;  %v48_v9 = vmul.f32 %v279_v1, %v28_v59  ;;  %v396_v12 = vadd.f32 %v284_v2, %v47_v58  ;;  %v49_v13 = vmul.f32 %v279_v1, %v29_v63 }
  0x11   :  { %v190_v57 = vpop.eup %189  ;;  %201 = vpow2.f32 %v98_v48  ;;  %v80_v18 = vsub.f32 0.0, %v382_v62  ;;  %v81_v27 = vsub.f32 0.0, %v388_v4  ;;  %v82_v30 = vsub.f32 0.0, %v391_v5 }
  0x12   :  { %v192_v60 = vpop.eup %191  ;;  %v118_v61 = vadd.f32 1.0, %v190_v57  ;;  %203 = vpow2.f32 %v100_v49  ;;  %v401_v22 = vadd.f32 %v284_v2, %v48_v9  ;;  %v405_v28 = vadd.f32 %v284_v2, %v49_v13 }
  0x13   :  { %v194_v0 = vpop.eup %193  ;;  %v119_v3 = vadd.f32 1.0, %v192_v60  ;;  %205 = vpow2.f32 %v102_v55  ;;  %v104_v34 = vmul.f32 1.442695, %v79_v8  ;;  %v83_v35 = vsub.f32 0.0, %v396_v12 }
  0x14   :  { %v196_v6 = vpop.eup %195  ;;  %207 = vrcp.f32 %v118_v61  ;;  %v120_v7 = vadd.f32 1.0, %v194_v0  ;;  %v106_v38 = vmul.f32 1.442695, %v80_v18  ;;  %v84_v39 = vsub.f32 0.0, %v401_v22 }
  0x15   :  { %v198_v10 = vpop.eup %197  ;;  %209 = vrcp.f32 %v119_v3  ;;  %v121_v11 = vadd.f32 1.0, %v196_v6  ;;  %v108_v41 = vmul.f32 1.442695, %v81_v27  ;;  %v85_v42 = vsub.f32 0.0, %v405_v28 }
  0x16   :  { %v200_v14 = vpop.eup %199  ;;  %211 = vrcp.f32 %v120_v7  ;;  %v122_v17 = vadd.f32 1.0, %v198_v10  ;;  %v110_v46 = vmul.f32 1.442695, %v82_v30  ;;  %v112_v49 = vmul.f32 1.442695, %v83_v35 }
  0x17   :  { %v202_v23 = vpop.eup %201  ;;  %213 = vrcp.f32 %v121_v11  ;;  %v123_v24 = vadd.f32 1.0, %v200_v14  ;;  %v114_v50 = vmul.f32 1.442695, %v84_v39  ;;  %v116_v52 = vmul.f32 1.442695, %v85_v42 }
  0x18   :  { %v204_v29 = vpop.eup %203  ;;  %215 = vrcp.f32 %v122_v17  ;;  %v124_v1 = vadd.f32 1.0, %v202_v23 }
  0x19   :  { %v206_v32 = vpop.eup %205  ;;  %217 = vrcp.f32 %v123_v24  ;;  %v125_v33 = vadd.f32 1.0, %v204_v29 }
  0x1a   :  { %v208_v36 = vpop.eup %207  ;;  %219 = vrcp.f32 %v124_v1  ;;  %v126_v37 = vadd.f32 1.0, %v206_v32 }
  0x1b   :  { %v210_v2 = vpop.eup %209  ;;  %v150_v40 = vmul.f32 %v208_v36, %v313_v15  ;;  %221 = vrcp.f32 %v125_v33 }
  0x1c   :  { %v212_v43 = vpop.eup %211  ;;  %v151_v45 = vmul.f32 %v210_v2, %v316_v16  ;;  %223 = vrcp.f32 %v126_v37 }
  0x1d   :  { %v214_v47 = vpop.eup %213  ;;  %167 = vst.msk [vmem:[%s494_s3] sm:$0xff] %vm166_vm0, %v150_v40  ;;  %v152_v48 = vmul.f32 %v212_v43, %v321_v19  ;;  %225 = vpow2.f32 %v104_v34 }
  0x1e   :  { %v216_v15 = vpop.eup %215  ;;  %168 = vst.msk [vmem:[%s494_s3 + $0x8] sm:$0xff] %vm166_vm0, %v151_v45  ;;  %v153_v16 = vmul.f32 %v214_v47, %v324_v20  ;;  %227 = vpow2.f32 %v106_v38 }
  0x1f   :  { %v218_v51 = vpop.eup %217  ;;  %169 = vst.msk [vmem:[%s494_s3 + $0x10] sm:$0xff] %vm166_vm0, %v152_v48  ;;  %v154_v19 = vmul.f32 %v216_v15, %v327_v21  ;;  %229 = vpow2.f32 %v108_v41 }
  0x20   :  { %v220_v53 = vpop.eup %219  ;;  %170 = vst.msk [vmem:[%s494_s3 + $0x18] sm:$0xff] %vm166_vm0, %v153_v16  ;;  %v155_v20 = vmul.f32 %v218_v51, %v333_v25  ;;  %231 = vpow2.f32 %v110_v46 }
  0x21   :  { %v222_v54 = vpop.eup %221  ;;  %171 = vst.msk [vmem:[%s494_s3 + $0x20] sm:$0xff] %vm166_vm0, %v154_v19  ;;  %v156_v55 = vmul.f32 %v220_v53, %v336_v26  ;;  %233 = vpow2.f32 %v112_v49 }
  0x22   :  { %v224_v21 = vpop.eup %223  ;;  %172 = vst.msk [vmem:[%s494_s3 + $0x28] sm:$0xff] %vm166_vm0, %v155_v20  ;;  %v157_v57 = vmul.f32 %v222_v54, %v345_v31  ;;  %235 = vpow2.f32 %v114_v50 }
  0x23   :  { %v226_v25 = vpop.eup %225  ;;  %173 = vst.msk [vmem:[%s494_s3 + $0x30] sm:$0xff] %vm166_vm0, %v156_v55  ;;  %v158_v58 = vmul.f32 %v224_v21, %v358_v44  ;;  %237 = vpow2.f32 %v116_v52 }
  0x24   :  { %v228_v26 = vpop.eup %227  ;;  %174 = vst.msk [vmem:[%s494_s3 + $0x38] sm:$0xff] %vm166_vm0, %v157_v57  ;;  %v127_v59 = vadd.f32 1.0, %v226_v25 }
  0x25   :  { %v230_v60 = vpop.eup %229  ;;  %175 = vst.msk [vmem:[%s494_s3 + $0x40] sm:$0xff] %vm166_vm0, %v158_v58  ;;  %v128_v31 = vadd.f32 1.0, %v228_v26 }
  0x26   :  { %v232_v61 = vpop.eup %231  ;;  %239 = vrcp.f32 %v127_v59  ;;  %v129_v63 = vadd.f32 1.0, %v230_v60 }
  0x27   :  { %v234_v0 = vpop.eup %233  ;;  %241 = vrcp.f32 %v128_v31  ;;  %v130_v44 = vadd.f32 1.0, %v232_v61 }
  0x28   :  { %v236_v3 = vpop.eup %235  ;;  %243 = vrcp.f32 %v129_v63  ;;  %v131_v6 = vadd.f32 1.0, %v234_v0 }
  0x29   :  { %v238_v7 = vpop.eup %237  ;;  %245 = vrcp.f32 %v130_v44  ;;  %v132_v8 = vadd.f32 1.0, %v236_v3 }
  0x2a   :  { %247 = vrcp.f32 %v131_v6  ;;  %v133_v9 = vadd.f32 1.0, %v238_v7 }
  0x2b   :  { %249 = vrcp.f32 %v132_v8 }
  0x2c   :  { %v240_v10 = vpop.eup %239  ;;  %251 = vrcp.f32 %v133_v9 }
  0x2d   :  { %v242_v11 = vpop.eup %241  ;;  %v159_v13 = vmul.f32 %v240_v10, %v375_v56 }
  0x2e   :  { %v244_v14 = vpop.eup %243  ;;  %v160_v17 = vmul.f32 %v242_v11, %v382_v62 }
  0x2f   :  { %v246_v18 = vpop.eup %245  ;;  %176 = vst.msk [vmem:[%s494_s3 + $0x48] sm:$0xff] %vm166_vm0, %v159_v13  ;;  %v161_v23 = vmul.f32 %v244_v14, %v388_v4 }
  0x30   :  { %v248_v24 = vpop.eup %247  ;;  %177 = vst.msk [vmem:[%s494_s3 + $0x50] sm:$0xff] %vm166_vm0, %v160_v17  ;;  %v162_v27 = vmul.f32 %v246_v18, %v391_v5 }
  0x31   :  { %v250_v56 = vpop.eup %249  ;;  %178 = vst.msk [vmem:[%s494_s3 + $0x58] sm:$0xff] %vm166_vm0, %v161_v23  ;;  %v163_v62 = vmul.f32 %v248_v24, %v396_v12 }
  0x32   :  { %v252_v29 = vpop.eup %251  ;;  %179 = vst.msk [vmem:[%s494_s3 + $0x60] sm:$0xff] %vm166_vm0, %v162_v27  ;;  %v164_v4 = vmul.f32 %v250_v56, %v401_v22 }
  0x33   :  { %180 = vst.msk [vmem:[%s494_s3 + $0x68] sm:$0xff] %vm166_vm0, %v163_v62  ;;  %v165_v5 = vmul.f32 %v252_v29, %v405_v28 }
  0x34   :  { %181 = vst.msk [vmem:[%s494_s3 + $0x70] sm:$0xff] %vm166_vm0, %v164_v4 }
  0x35   :  { %182 = vst.msk [vmem:[%s494_s3 + $0x78] sm:$0xff] %vm166_vm0, %v165_v5 }

// kernel: hierarchical_vae_forward.34
= control target key start
LH: loop header
LB: loop body
LE: loop exit
PB: predicated region body
PF: predicated region fallthrough
CT: control target
= control target key end

     0   :  { %vm110_vm0 = vcmask 654336   ;;  %vm184_vm1 = vcmask 130048   ;;  %v392_v27 = vmov 0.0   ;;  %vm239_vm2 = vcmask 122880   ;;  %s596_s1 = inlined_call_operand.vmem [shape: bf16[80,16], index: 1, kind: input, shape index: {}]   ;;  %s597_s0 = inlined_call_operand.vmem [shape: bf16[128,80], index: 0, kind: input, shape index: {}]   ;;  %s598_s2 = inlined_call_operand.vmem [shape: f32[128,16], index: 2, kind: output, shape index: {0}]   ;;  %s599_s3 = inlined_call_operand.vmem [shape: f32[8,16], index: 3, kind: output, shape index: {1}]  }
   0x1   :  { %v375_v0 = vld [vmem:[%s596_s1 + $0x20] sm:$0xff]  ;;  %v374_v1 = vld [vmem:[%s596_s1 + $0x18] sm:$0xff]  ;;  %v373_v2 = vld [vmem:[%s596_s1 + $0x10] sm:$0xff]  ;;  %201 = vst.msk [vmem:[%s599_s3] sm:$0xff] %vm184_vm1, %v392_v27 }
   0x2   :  { %138 = vmatpush.bf16.msra.mxu0 %v375_v0  ;;  %376 = vmatpush.bf16.msra.mxu1 %v375_v0  ;;  %v372_v3 = vld [vmem:[%s596_s1 + $0x8] sm:$0xff]  ;;  %v371_v4 = vld [vmem:[%s596_s1] sm:$0xff]  ;;  %v365_v6 = vld [vmem:[%s597_s0 + $0x10] sm:$0xff] }
   0x3   :  { %377 = vmatpush.bf16.msra.mxu2 %v375_v0  ;;  %378 = vmatpush.bf16.msra.mxu3 %v375_v0  ;;  %v363_v5 = vld [vmem:[%s597_s0] sm:$0xff]  ;;  %v369_v8 = vld [vmem:[%s597_s0 + $0x30] sm:$0xff]  ;;  %v364_v9 = vld [vmem:[%s597_s0 + $0x8] sm:$0xff] }
   0x4   :  { %v367_v7 = vld [vmem:[%s597_s0 + $0x20] sm:$0xff]  ;;  %v366_v10 = vld [vmem:[%s597_s0 + $0x18] sm:$0xff]  ;;  %v368_v11 = vld [vmem:[%s597_s0 + $0x28] sm:$0xff] }
   0x5   :  { %v370_v12 = vld [vmem:[%s597_s0 + $0x38] sm:$0xff] }
   0x6   :  { %139 = vmatpush.bf16.msra.mxu0 %v374_v1  ;;  %379 = vmatpush.bf16.msra.mxu1 %v374_v1 }
   0x7   :  { %380 = vmatpush.bf16.msra.mxu2 %v374_v1  ;;  %381 = vmatpush.bf16.msra.mxu3 %v374_v1 }
   0xa   :  { %140 = vmatpush.bf16.msra.mxu0 %v373_v2  ;;  %382 = vmatpush.bf16.msra.mxu1 %v373_v2 }
   0xb   :  { %383 = vmatpush.bf16.msra.mxu2 %v373_v2  ;;  %384 = vmatpush.bf16.msra.mxu3 %v373_v2 }
   0xe   :  { %141 = vmatpush.bf16.msra.mxu0 %v372_v3  ;;  %385 = vmatpush.bf16.msra.mxu1 %v372_v3 }
   0xf   :  { %386 = vmatpush.bf16.msra.mxu2 %v372_v3  ;;  %387 = vmatpush.bf16.msra.mxu3 %v372_v3 }
  0x12   :  { %142 = vmatpush.bf16.msra.mxu0 %v371_v4  ;;  %388 = vmatpush.bf16.msra.mxu1 %v371_v4 }
  0x13   :  { %389 = vmatpush.bf16.msra.mxu2 %v371_v4  ;;  %390 = vmatpush.bf16.msra.mxu3 %v371_v4 }
  0x15   :  { %355 = vmatmul.msk.bf16.vlgmr.msra.gmra.mxu0 %vm110_vm0, %v363_v5  ;;  %357 = vmatmul.msk.bf16.vlgmr.msra.gmra.mxu1 %vm110_vm0, %v365_v6 }
  0x16   :  { %359 = vmatmul.msk.bf16.vlgmr.msra.gmra.mxu2 %vm110_vm0, %v367_v7  ;;  %361 = vmatmul.msk.bf16.vlgmr.msra.gmra.mxu3 %vm110_vm0, %v369_v8 }
  0x25   :  { %356 = vmatmul.msk.bf16.gmra.mxu0 %vm110_vm0, %v364_v9  ;;  %358 = vmatmul.msk.bf16.gmra.mxu1 %vm110_vm0, %v366_v10 }
  0x26   :  { %360 = vmatmul.msk.bf16.gmra.mxu2 %vm110_vm0, %v368_v11  ;;  %362 = vmatmul.msk.bf16.gmra.mxu3 %vm110_vm0, %v370_v12 }
  0x92   :  { %v144_v13 = vpop.f32.mrf.mxu0  ;;  %v154_v14 = vpop.f32.mrf.mxu1 }
  0x93   :  { %185 = vst.msk [vmem:[%s598_s2] sm:$0xff] %vm184_vm1, %v144_v13  ;;  %v241_v24 = vmul.f32 %v144_v13, %v144_v13  ;;  %v202_v28 = vsel %vm184_vm1, %v144_v13, 0.0  ;;  %v245_v40 = vmul.f32 %v154_v14, %v154_v14  ;;  %v209_v45 = vsel %vm184_vm1, %v154_v14, 0.0 }
  0x94   :  { %189 = vst.msk [vmem:[%s598_s2 + $0x20] sm:$0xff] %vm184_vm1, %v154_v14 }
  0x95   :  { %v257_v32 = vsel %vm184_vm1, %v241_v24, 0.0  ;;  %v264_v50 = vsel %vm184_vm1, %v245_v40, 0.0 }
  0x99   :  { %v468_v15 = vpop.f32.mrf.mxu2  ;;  %v470_v16 = vpop.f32.mrf.mxu3 }
  0x9a   :  { %v146_v17 = vpop.f32.mrf.mxu0  ;;  %v156_v18 = vpop.f32.mrf.mxu1  ;;  %193 = vst.msk [vmem:[%s598_s2 + $0x40] sm:$0xff] %vm184_vm1, %v468_v15  ;;  %v249_v62 = vmul.f32 %v468_v15, %v468_v15  ;;  %v217_v3 = vsel %vm184_vm1, %v468_v15, 0.0 }
  0x9b   :  { %186 = vst.msk [vmem:[%s598_s2 + $0x8] sm:$0xff] %vm184_vm1, %v146_v17  ;;  %v242_v23 = vmul.f32 %v146_v17, %v146_v17  ;;  %v203_v25 = vsel %vm184_vm1, %v146_v17, 0.0  ;;  %v246_v46 = vmul.f32 %v156_v18, %v156_v18  ;;  %v211_v51 = vsel %vm184_vm1, %v156_v18, 0.0 }
  0x9c   :  { %190 = vst.msk [vmem:[%s598_s2 + $0x28] sm:$0xff] %vm184_vm1, %v156_v18  ;;  %v204_v31 = vadd.f32 %v203_v25, %v202_v28  ;;  %v272_v8 = vsel %vm184_vm1, %v249_v62, 0.0 }
  0x9d   :  { %197 = vst.msk [vmem:[%s598_s2 + $0x60] sm:$0xff] %vm184_vm1, %v470_v16  ;;  %v258_v29 = vsel %vm184_vm1, %v242_v23, 0.0  ;;  %v266_v55 = vsel %vm184_vm1, %v246_v46, 0.0 }
  0x9e   :  { %v259_v36 = vadd.f32 %v258_v29, %v257_v32 }
  0xa1   :  { %v490_v19 = vpop.f32.mrf.mxu2  ;;  %v492_v20 = vpop.f32.mrf.mxu3 }
  0xa2   :  { %v149_v21 = vpop.f32.mrf.mxu0  ;;  %v159_v22 = vpop.f32.mrf.mxu1  ;;  %194 = vst.msk [vmem:[%s598_s2 + $0x48] sm:$0xff] %vm184_vm1, %v490_v19  ;;  %v250_v4 = vmul.f32 %v490_v19, %v490_v19  ;;  %v219_v9 = vsel %vm184_vm1, %v490_v19, 0.0  ;;  %v225_v19 = vsel %vm184_vm1, %v470_v16, 0.0 }
  0xa3   :  { %187 = vst.msk [vmem:[%s598_s2 + $0x10] sm:$0xff] %vm184_vm1, %v149_v21  ;;  %v243_v26 = vmul.f32 %v149_v21, %v149_v21  ;;  %v205_v30 = vsel %vm184_vm1, %v149_v21, 0.0  ;;  %v247_v52 = vmul.f32 %v159_v22, %v159_v22  ;;  %v213_v56 = vsel %vm184_vm1, %v159_v22, 0.0 }
  0xa4   :  { %191 = vst.msk [vmem:[%s598_s2 + $0x30] sm:$0xff] %vm184_vm1, %v159_v22  ;;  %v206_v37 = vadd.f32 %v205_v30, %v204_v31  ;;  %v274_v13 = vsel %vm184_vm1, %v250_v4, 0.0  ;;  %v253_v21 = vmul.f32 %v470_v16, %v470_v16  ;;  %v227_v31 = vsel %vm184_vm1, %v492_v20, 0.0 }
  0xa5   :  { %198 = vst.msk [vmem:[%s598_s2 + $0x68] sm:$0xff] %vm184_vm1, %v492_v20  ;;  %v260_v33 = vsel %vm184_vm1, %v243_v26, 0.0  ;;  %v268_v63 = vsel %vm184_vm1, %v247_v52, 0.0  ;;  %v254_v26 = vmul.f32 %v492_v20, %v492_v20 }
  0xa6   :  { %v261_v43 = vadd.f32 %v260_v33, %v259_v36  ;;  %v280_v30 = vsel %vm184_vm1, %v253_v21, 0.0 }
  0xa7   :  { %v282_v36 = vsel %vm184_vm1, %v254_v26, 0.0 }
  0xa9   :  { %v169_v34 = vpop.f32.mrf.mxu2  ;;  %v522_v35 = vpop.f32.mrf.mxu3 }
  0xaa   :  { %v151_v38 = vpop.f32.mrf.mxu0  ;;  %v161_v39 = vpop.f32.mrf.mxu1  ;;  %195 = vst.msk [vmem:[%s598_s2 + $0x50] sm:$0xff] %vm184_vm1, %v169_v34  ;;  %v251_v10 = vmul.f32 %v169_v34, %v169_v34  ;;  %v221_v14 = vsel %vm184_vm1, %v169_v34, 0.0  ;;  %v255_v32 = vmul.f32 %v522_v35, %v522_v35  ;;  %v229_v16 = vsel %vm184_vm1, %v522_v35, 0.0 }
  0xab   :  { %188 = vst.msk [vmem:[%s598_s2 + $0x18] sm:$0xff] %vm184_vm1, %v151_v38  ;;  %v207_v41 = vsel %vm184_vm1, %v151_v38, 0.0  ;;  %v244_v42 = vmul.f32 %v151_v38, %v151_v38  ;;  %v248_v57 = vmul.f32 %v161_v39, %v161_v39  ;;  %v215_v0 = vsel %vm184_vm1, %v161_v39, 0.0 }
  0xac   :  { %v208_v44 = vadd.f32 %v207_v41, %v206_v37  ;;  %192 = vst.msk [vmem:[%s598_s2 + $0x38] sm:$0xff] %vm184_vm1, %v161_v39  ;;  %v276_v22 = vsel %vm184_vm1, %v251_v10, 0.0  ;;  %v284_v40 = vsel %vm184_vm1, %v255_v32, 0.0 }
  0xad   :  { %v262_v47 = vsel %vm184_vm1, %v244_v42, 0.0  ;;  %199 = vst.msk [vmem:[%s598_s2 + $0x70] sm:$0xff] %vm184_vm1, %v522_v35  ;;  %v270_v5 = vsel %vm184_vm1, %v248_v57, 0.0 }
  0xae   :  { %v210_v48 = vadd.f32 %v209_v45, %v208_v44  ;;  %v263_v49 = vadd.f32 %v262_v47, %v261_v43 }
  0xb0   :  { %v265_v53 = vadd.f32 %v264_v50, %v263_v49  ;;  %v212_v54 = vadd.f32 %v211_v51, %v210_v48 }
  0xb1   :  { %v171_v58 = vpop.f32.mrf.mxu2  ;;  %v181_v59 = vpop.f32.mrf.mxu3 }
  0xb2   :  { %v214_v60 = vadd.f32 %v213_v56, %v212_v54  ;;  %v267_v61 = vadd.f32 %v266_v55, %v265_v53  ;;  %196 = vst.msk [vmem:[%s598_s2 + $0x58] sm:$0xff] %vm184_vm1, %v171_v58  ;;  %v252_v15 = vmul.f32 %v171_v58, %v171_v58  ;;  %v223_v23 = vsel %vm184_vm1, %v171_v58, 0.0 }
  0xb3   :  { %200 = vst.msk [vmem:[%s598_s2 + $0x78] sm:$0xff] %vm184_vm1, %v181_v59  ;;  %v256_v37 = vmul.f32 %v181_v59, %v181_v59  ;;  %v231_v41 = vsel %vm184_vm1, %v181_v59, 0.0 }
  0xb4   :  { %v216_v1 = vadd.f32 %v215_v0, %v214_v60  ;;  %v269_v2 = vadd.f32 %v268_v63, %v267_v61  ;;  %v278_v27 = vsel %vm184_vm1, %v252_v15, 0.0 }
  0xb5   :  { %v286_v20 = vsel %vm184_vm1, %v256_v37, 0.0 }
  0xb6   :  { %v218_v6 = vadd.f32 %v217_v3, %v216_v1  ;;  %v271_v7 = vadd.f32 %v270_v5, %v269_v2 }
  0xb8   :  { %v273_v11 = vadd.f32 %v272_v8, %v271_v7  ;;  %v220_v12 = vadd.f32 %v219_v9, %v218_v6 }
  0xba   :  { %v222_v17 = vadd.f32 %v221_v14, %v220_v12  ;;  %v275_v18 = vadd.f32 %v274_v13, %v273_v11 }
  0xbc   :  { %v277_v24 = vadd.f32 %v276_v22, %v275_v18  ;;  %v224_v25 = vadd.f32 %v223_v23, %v222_v17 }
  0xbe   :  { %v226_v28 = vadd.f32 %v225_v19, %v224_v25  ;;  %v279_v29 = vadd.f32 %v278_v27, %v277_v24 }
  0xc0   :  { %v281_v33 = vadd.f32 %v280_v30, %v279_v29  ;;  %v228_v34 = vadd.f32 %v227_v31, %v226_v28 }
  0xc2   :  { %v230_v38 = vadd.f32 %v229_v16, %v228_v34  ;;  %v283_v39 = vadd.f32 %v282_v36, %v281_v33 }
  0xc4   :  { %v285_v42 = vadd.f32 %v284_v40, %v283_v39  ;;  %v232_v43 = vadd.f32 %v231_v41, %v230_v38 }
  0xc6   :  { %v233_v44 = vrot.slane %v232_v43, 4  ;;  %v287_v45 = vadd.f32 %v286_v20, %v285_v42 }
  0xc8   :  { %v234_v46 = vadd.f32 %v233_v44, %v232_v43  ;;  %v288_v47 = vrot.slane %v287_v45, 4 }
  0xca   :  { %v235_v48 = vrot.slane %v234_v46, 2  ;;  %v289_v49 = vadd.f32 %v288_v47, %v287_v45 }
  0xcc   :  { %v236_v50 = vadd.f32 %v235_v48, %v234_v46  ;;  %v290_v51 = vrot.slane %v289_v49, 2 }
  0xce   :  { %v237_v35 = vrot.slane %v236_v50, 1  ;;  %v291_v52 = vadd.f32 %v290_v51, %v289_v49 }
  0xd0   :  { %v238_v53 = vadd.f32 %v237_v35, %v236_v50  ;;  %v292_v54 = vrot.slane %v291_v52, 1 }
  0xd2   :  { %240 = vst.msk [vmem:[%s599_s3] sm:$0x1] %vm239_vm2, %v238_v53  ;;  %v293_v55 = vadd.f32 %v292_v54, %v291_v52 }
  0xd4   :  { %294 = vst.msk [vmem:[%s599_s3 + $0x1] sm:$0x1] %vm239_vm2, %v293_v55 }

// kernel: hierarchical_vae_forward.36
= control target key start
LH: loop header
LB: loop body
LE: loop exit
PB: predicated region body
PF: predicated region fallthrough
CT: control target
= control target key end

     0   :  { %8 = vsyncpa [#allocation3], 0  ;;  %s980_s15 = smov [#allocation2]   ;;  %s1361_s0 = inlined_call_operand.vmem [shape: bf16[128,400], index: 0, kind: input, shape index: {}]   ;;  %s1362_s1 = inlined_call_operand.vmem [shape: bf16[400,16], index: 1, kind: input, shape index: {}]   ;;  %s1363_s2 = inlined_call_operand.hbm [shape: f32[1,16], index: 2, kind: input, shape index: {}]   ;;  %s1364_s3 = inlined_call_operand.vmem [shape: f32[128,16], index: 3, kind: output, shape index: {}]  }
   0x1   :  { %s18_s14 = sshll.u32 %s1363_s2, 4  ;;  %s20_s16 = sshll.u32 %s980_s15, 4  ;;  %s19_s14 = int_to_ptr.hbm [resolvable:$true] %s18_s14  ;;  %s21_s16 = int_to_ptr.vmem [resolvable:$true] %s20_s16 }
   0x2   :  { %23 = dma.hbm_to_vmem [thread:$0]  %s19_s14, 16, %s21_s16, [#allocation3]  }
   0x3   :  { %978 = dma.done.wait [#allocation3], 16  }
   0x4   :  { %979 = vsyncadd [#allocation3], 4294967280  ;;  %v934_v0 = vld [vmem:[%s1362_s1 + $0x38] sm:$0xff]  ;;  %v933_v3 = vld [vmem:[%s1362_s1 + $0x30] sm:$0xff]  ;;  %vm417_vm0 = vcmask 130048  }
   0x5   :  { %v942_v1 = vld [vmem:[%s1362_s1 + $0x78] sm:$0xff]  ;;  %442 = vmatpush.bf16.msra.mxu0 %v934_v0  ;;  %v941_v4 = vld [vmem:[%s1362_s1 + $0x70] sm:$0xff]  ;;  %v932_v6 = vld [vmem:[%s1362_s1 + $0x28] sm:$0xff] }
   0x6   :  { %v950_v2 = vld [vmem:[%s1362_s1 + $0xb8] sm:$0xff]  ;;  %491 = vmatpush.bf16.msra.mxu1 %v942_v1  ;;  %v949_v5 = vld [vmem:[%s1362_s1 + $0xb0] sm:$0xff]  ;;  %v940_v7 = vld [vmem:[%s1362_s1 + $0x68] sm:$0xff] }
   0x7   :  { %540 = vmatpush.bf16.msra.mxu2 %v950_v2  ;;  %v951_v8 = vld [vmem:[%s1362_s1 + $0xc0] sm:$0xff]  ;;  %v948_v9 = vld [vmem:[%s1362_s1 + $0xa8] sm:$0xff]  ;;  %v671_v11 = vld [vmem:[%s1361_s0 + $0x18] sm:$0xf0] }
   0x8   :  { %v896_v10 = vld [vmem:[%s1361_s0 + $0xc] sm:$0xf]  ;;  %596 = vmatpush.bf16.msra.mxu3 %v951_v8  ;;  %v931_v13 = vld [vmem:[%s1362_s1 + $0x20] sm:$0xff]  ;;  %v930_v16 = vld [vmem:[%s1362_s1 + $0x18] sm:$0xff] }
   0x9   :  { %443 = vmatpush.bf16.msra.mxu0 %v933_v3  ;;  %v674_v12 = vor.u32 %v896_v10, %v671_v11  ;;  %v939_v14 = vld [vmem:[%s1362_s1 + $0x60] sm:$0xff]  ;;  %v938_v17 = vld [vmem:[%s1362_s1 + $0x58] sm:$0xff]  ;;  %v929_v19 = vld [vmem:[%s1362_s1 + $0x10] sm:$0xff] }
   0xa   :  { %492 = vmatpush.bf16.msra.mxu1 %v941_v4  ;;  %v947_v15 = vld [vmem:[%s1362_s1 + $0xa0] sm:$0xff]  ;;  %v946_v18 = vld [vmem:[%s1362_s1 + $0x98] sm:$0xff]  ;;  %v937_v20 = vld [vmem:[%s1362_s1 + $0x50] sm:$0xff] }
   0xb   :  { %541 = vmatpush.bf16.msra.mxu2 %v949_v5  ;;  %887 = vmatmul.msk.bf16.vlgmr.msra.gmra.mxu3 %vm417_vm0, %v674_v12  ;;  %v945_v21 = vld [vmem:[%s1362_s1 + $0x90] sm:$0xff]  ;;  %v900_v22 = vld [vmem:[%s1361_s0 + $0x2c] sm:$0xf]  ;;  %v687_v23 = vld [vmem:[%s1361_s0 + $0x38] sm:$0xf0] }
   0xc   :  { %v928_v24 = vld [vmem:[%s1362_s1 + $0x8] sm:$0xff]  ;;  %v690_v27 = vor.u32 %v900_v22, %v687_v23  ;;  %v927_v28 = vld [vmem:[%s1362_s1] sm:$0xff]  ;;  %v897_v31 = vld [vmem:[%s1361_s0 + $0xc] sm:$0xf0] }
   0xd   :  { %444 = vmatpush.bf16.msra.mxu0 %v932_v6  ;;  %v936_v25 = vld [vmem:[%s1362_s1 + $0x48] sm:$0xff]  ;;  %v935_v29 = vld [vmem:[%s1362_s1 + $0x40] sm:$0xff]  ;;  %v663_v33 = vld [vmem:[%s1361_s0 + $0x10] sm:$0xf0] }
   0xe   :  { %493 = vmatpush.bf16.msra.mxu1 %v940_v7  ;;  %v944_v26 = vld [vmem:[%s1362_s1 + $0x88] sm:$0xff]  ;;  %v661_v30 = vld [vmem:[%s1361_s0] sm:$0xf]  ;;  %v895_v32 = vld [vmem:[%s1361_s0 + $0x4] sm:$0xf] }
   0xf   :  { %542 = vmatpush.bf16.msra.mxu2 %v948_v9  ;;  %v943_v34 = vld [vmem:[%s1362_s1 + $0x80] sm:$0xff]  ;;  %v669_v35 = vld [vmem:[%s1361_s0 + $0x8] sm:$0xf]  ;;  %v898_v36 = vld [vmem:[%s1361_s0 + $0x14] sm:$0xf0]  ;;  %v662_v37 = vor.u32 %v897_v31, %v661_v30  ;;  %v666_v38 = vor.u32 %v895_v32, %v663_v33 }
  0x10   :  { %v670_v39 = vor.u32 %v898_v36, %v669_v35  ;;  %v904_v40 = vld [vmem:[%s1361_s0 + $0x4c] sm:$0xf]  ;;  %v703_v41 = vld [vmem:[%s1361_s0 + $0x58] sm:$0xf0]  ;;  %v677_v43 = vld [vmem:[%s1361_s0 + $0x20] sm:$0xf] }
  0x11   :  { %445 = vmatpush.bf16.msra.mxu0 %v931_v13  ;;  %v706_v42 = vor.u32 %v904_v40, %v703_v41  ;;  %v901_v44 = vld [vmem:[%s1361_s0 + $0x2c] sm:$0xf0]  ;;  %v899_v45 = vld [vmem:[%s1361_s0 + $0x24] sm:$0xf]  ;;  %v679_v46 = vld [vmem:[%s1361_s0 + $0x30] sm:$0xf0] }
  0x12   :  { %494 = vmatpush.bf16.msra.mxu1 %v939_v14  ;;  %v685_v47 = vld [vmem:[%s1361_s0 + $0x28] sm:$0xf]  ;;  %v902_v48 = vld [vmem:[%s1361_s0 + $0x34] sm:$0xf0]  ;;  %v678_v49 = vor.u32 %v901_v44, %v677_v43  ;;  %v682_v50 = vor.u32 %v899_v45, %v679_v46  ;;  %v908_v52 = vld [vmem:[%s1361_s0 + $0x6c] sm:$0xf] }
  0x13   :  { %543 = vmatpush.bf16.msra.mxu2 %v947_v15  ;;  %v686_v51 = vor.u32 %v902_v48, %v685_v47  ;;  %v719_v53 = vld [vmem:[%s1361_s0 + $0x78] sm:$0xf0]  ;;  %v693_v55 = vld [vmem:[%s1361_s0 + $0x40] sm:$0xf]  ;;  %v905_v56 = vld [vmem:[%s1361_s0 + $0x4c] sm:$0xf0] }
  0x14   :  { %v722_v54 = vor.u32 %v908_v52, %v719_v53  ;;  %v903_v57 = vld [vmem:[%s1361_s0 + $0x44] sm:$0xf]  ;;  %v695_v58 = vld [vmem:[%s1361_s0 + $0x50] sm:$0xf0]  ;;  %v701_v59 = vld [vmem:[%s1361_s0 + $0x48] sm:$0xf]  ;;  %v694_v61 = vor.u32 %v905_v56, %v693_v55 }
  0x15   :  { %446 = vmatpush.bf16.msra.mxu0 %v930_v16  ;;  %v906_v60 = vld [vmem:[%s1361_s0 + $0x54] sm:$0xf0]  ;;  %v698_v62 = vor.u32 %v903_v57, %v695_v58  ;;  %v912_v0 = vld [vmem:[%s1361_s0 + $0x8c] sm:$0xf]  ;;  %v735_v1 = vld [vmem:[%s1361_s0 + $0x98] sm:$0xf0] }
  0x16   :  { %495 = vmatpush.bf16.msra.mxu1 %v938_v17  ;;  %v702_v63 = vor.u32 %v906_v60, %v701_v59  ;;  %v738_v2 = vor.u32 %v912_v0, %v735_v1  ;;  %v709_v3 = vld [vmem:[%s1361_s0 + $0x60] sm:$0xf]  ;;  %v909_v4 = vld [vmem:[%s1361_s0 + $0x6c] sm:$0xf0]  ;;  %v907_v5 = vld [vmem:[%s1361_s0 + $0x64] sm:$0xf] }
  0x17   :  { %544 = vmatpush.bf16.msra.mxu2 %v946_v18  ;;  %v711_v6 = vld [vmem:[%s1361_s0 + $0x70] sm:$0xf0]  ;;  %v717_v7 = vld [vmem:[%s1361_s0 + $0x68] sm:$0xf]  ;;  %v910_v8 = vld [vmem:[%s1361_s0 + $0x74] sm:$0xf0]  ;;  %v710_v9 = vor.u32 %v909_v4, %v709_v3 }
  0x18   :  { %v714_v10 = vor.u32 %v907_v5, %v711_v6  ;;  %v718_v11 = vor.u32 %v910_v8, %v717_v7  ;;  %v916_v12 = vld [vmem:[%s1361_s0 + $0xac] sm:$0xf]  ;;  %v751_v13 = vld [vmem:[%s1361_s0 + $0xb8] sm:$0xf0]  ;;  %v725_v15 = vld [vmem:[%s1361_s0 + $0x80] sm:$0xf] }
  0x19   :  { %447 = vmatpush.bf16.msra.mxu0 %v929_v19  ;;  %v754_v14 = vor.u32 %v916_v12, %v751_v13  ;;  %v913_v16 = vld [vmem:[%s1361_s0 + $0x8c] sm:$0xf0]  ;;  %v911_v17 = vld [vmem:[%s1361_s0 + $0x84] sm:$0xf]  ;;  %v727_v18 = vld [vmem:[%s1361_s0 + $0x90] sm:$0xf0] }
  0x1a   :  { %496 = vmatpush.bf16.msra.mxu1 %v937_v20  ;;  %v733_v19 = vld [vmem:[%s1361_s0 + $0x88] sm:$0xf]  ;;  %v914_v20 = vld [vmem:[%s1361_s0 + $0x94] sm:$0xf0]  ;;  %v730_v22 = vor.u32 %v911_v17, %v727_v18  ;;  %v743_v30 = vld [vmem:[%s1361_s0 + $0xb0] sm:$0xf0] }
  0x1b   :  { %545 = vmatpush.bf16.msra.mxu2 %v945_v21  ;;  %888 = vmatmul.msk.bf16.gmra.mxu3 %vm417_vm0, %v690_v27  ;;  %v726_v21 = vor.u32 %v913_v16, %v725_v15  ;;  %v734_v23 = vor.u32 %v914_v20, %v733_v19  ;;  %v741_v27 = vld [vmem:[%s1361_s0 + $0xa0] sm:$0xf]  ;;  %v749_v31 = vld [vmem:[%s1361_s0 + $0xa8] sm:$0xf]  ;;  %v918_v32 = vld [vmem:[%s1361_s0 + $0xb4] sm:$0xf0] }
  0x1c   :  { %v750_v35 = vor.u32 %v918_v32, %v749_v31  ;;  %v924_v36 = vld [vmem:[%s1361_s0 + $0xec] sm:$0xf]  ;;  %v921_v40 = vld [vmem:[%s1361_s0 + $0xcc] sm:$0xf0]  ;;  %v919_v41 = vld [vmem:[%s1361_s0 + $0xc4] sm:$0xf] }
  0x1d   :  { %448 = vmatpush.bf16.msra.mxu0 %v928_v24  ;;  %v920_v24 = vld [vmem:[%s1361_s0 + $0xcc] sm:$0xf]  ;;  %v765_v43 = vld [vmem:[%s1361_s0 + $0xc8] sm:$0xf]  ;;  %v922_v44 = vld [vmem:[%s1361_s0 + $0xd4] sm:$0xf0] }
  0x1e   :  { %497 = vmatpush.bf16.msra.mxu1 %v936_v25  ;;  %v767_v25 = vld [vmem:[%s1361_s0 + $0xd8] sm:$0xf0]  ;;  %v766_v47 = vor.u32 %v922_v44, %v765_v43  ;;  %v773_v48 = vld [vmem:[%s1361_s0 + $0xe0] sm:$0xf]  ;;  %v781_v52 = vld [vmem:[%s1361_s0 + $0xe8] sm:$0xf] }
  0x1f   :  { %546 = vmatpush.bf16.msra.mxu2 %v944_v26  ;;  %v770_v26 = vor.u32 %v920_v24, %v767_v25  ;;  %v926_v53 = vld [vmem:[%s1361_s0 + $0xf4] sm:$0xf0]  ;;  %v1279_v59 = vld [vmem:[#allocation2] ss:$0 sm:$0xff] }
  0x20   :  { %v782_v56 = vor.u32 %v926_v53, %v781_v52 }
  0x21   :  { %449 = vmatpush.bf16.msra.mxu0 %v927_v28  ;;  %v917_v28 = vld [vmem:[%s1361_s0 + $0xac] sm:$0xf0] }
  0x22   :  { %498 = vmatpush.bf16.msra.mxu1 %v935_v29  ;;  %v915_v29 = vld [vmem:[%s1361_s0 + $0xa4] sm:$0xf]  ;;  %v742_v33 = vor.u32 %v917_v28, %v741_v27 }
  0x23   :  { %547 = vmatpush.bf16.msra.mxu2 %v943_v34  ;;  %v746_v34 = vor.u32 %v915_v29, %v743_v30 }
  0x24   :  { %450 = vmatmul.bf16.vlgmr.msra.gmra.mxu0 %v662_v37  ;;  %v783_v37 = vld [vmem:[%s1361_s0 + $0xf8] sm:$0xf0] }
  0x25   :  { %499 = vmatmul.bf16.vlgmr.msra.gmra.mxu1 %v666_v38  ;;  %v786_v38 = vor.u32 %v924_v36, %v783_v37 }
  0x26   :  { %548 = vmatmul.bf16.vlgmr.msra.gmra.mxu2 %v670_v39  ;;  %v757_v39 = vld [vmem:[%s1361_s0 + $0xc0] sm:$0xf] }
  0x27   :  { %v758_v45 = vor.u32 %v921_v40, %v757_v39 }
  0x2b   :  { %889 = vmatmul.msk.bf16.gmra.mxu3 %vm417_vm0, %v706_v42  ;;  %v759_v42 = vld [vmem:[%s1361_s0 + $0xd0] sm:$0xf0] }
  0x2c   :  { %v762_v46 = vor.u32 %v919_v41, %v759_v42 }
  0x34   :  { %455 = vmatmul.bf16.gmra.mxu0 %v678_v49  ;;  %v925_v49 = vld [vmem:[%s1361_s0 + $0xec] sm:$0xf0] }
  0x35   :  { %504 = vmatmul.bf16.gmra.mxu1 %v682_v50  ;;  %v923_v50 = vld [vmem:[%s1361_s0 + $0xe4] sm:$0xf] }
  0x36   :  { %553 = vmatmul.bf16.gmra.mxu2 %v686_v51  ;;  %v775_v51 = vld [vmem:[%s1361_s0 + $0xf0] sm:$0xf0] }
  0x37   :  { %v778_v55 = vor.u32 %v923_v50, %v775_v51 }
  0x3b   :  { %890 = vmatmul.msk.bf16.gmra.mxu3 %vm417_vm0, %v722_v54  ;;  %v774_v54 = vor.u32 %v925_v49, %v773_v48 }
  0x44   :  { %460 = vmatmul.bf16.gmra.mxu0 %v694_v61 }
  0x45   :  { %509 = vmatmul.bf16.gmra.mxu1 %v698_v62 }
  0x46   :  { %558 = vmatmul.bf16.gmra.mxu2 %v702_v63 }
  0x4b   :  { %891 = vmatmul.msk.bf16.gmra.mxu3 %vm417_vm0, %v738_v2 }
  0x54   :  { %465 = vmatmul.bf16.gmra.mxu0 %v710_v9 }
  0x55   :  { %514 = vmatmul.bf16.gmra.mxu1 %v714_v10 }
  0x56   :  { %563 = vmatmul.bf16.gmra.mxu2 %v718_v11 }
  0x5b   :  { %892 = vmatmul.msk.bf16.gmra.mxu3 %vm417_vm0, %v754_v14 }
  0x64   :  { %470 = vmatmul.bf16.gmra.mxu0 %v726_v21 }
  0x65   :  { %519 = vmatmul.bf16.gmra.mxu1 %v730_v22 }
  0x66   :  { %568 = vmatmul.bf16.gmra.mxu2 %v734_v23 }
  0x6b   :  { %893 = vmatmul.msk.bf16.gmra.mxu3 %vm417_vm0, %v770_v26 }
  0x74   :  { %475 = vmatmul.bf16.gmra.mxu0 %v742_v33 }
  0x75   :  { %524 = vmatmul.bf16.gmra.mxu1 %v746_v34 }
  0x76   :  { %573 = vmatmul.bf16.gmra.mxu2 %v750_v35 }
  0x7b   :  { %894 = vmatmul.msk.bf16.gmra.mxu3 %vm417_vm0, %v786_v38 }
  0x84   :  { %480 = vmatmul.bf16.gmra.mxu0 %v758_v45 }
  0x85   :  { %529 = vmatmul.bf16.gmra.mxu1 %v762_v46 }
  0x86   :  { %578 = vmatmul.bf16.gmra.mxu2 %v766_v47 }
  0x8e   :  { %v598_v57 = vpop.f32.mrf.mxu3 }
  0x94   :  { %485 = vmatmul.bf16.gmra.mxu0 %v774_v54 }
  0x95   :  { %534 = vmatmul.bf16.gmra.mxu1 %v778_v55 }
  0x96   :  { %583 = vmatmul.bf16.gmra.mxu2 %v782_v56  ;;  %v600_v58 = vpop.f32.mrf.mxu3 }
  0x9e   :  { %v603_v63 = vpop.f32.mrf.mxu3 }
  0xa1   :  { %v451_v60 = vpop.f32.mrf.mxu0 }
  0xa2   :  { %v500_v61 = vpop.f32.mrf.mxu1  ;;  %v452_v62 = vadd.f32 %v1279_v59, %v451_v60 }
  0xa4   :  { %v501_v0 = vadd.f32 %v500_v61, %v452_v62 }
  0xa6   :  { %v605_v5 = vpop.f32.mrf.mxu3 }
  0xa9   :  { %v549_v1 = vpop.f32.mrf.mxu2  ;;  %v453_v3 = vpop.f32.mrf.mxu0 }
  0xaa   :  { %v550_v2 = vadd.f32 %v549_v1, %v501_v0  ;;  %v502_v4 = vpop.f32.mrf.mxu1  ;;  %v454_v7 = vadd.f32 %v1279_v59, %v453_v3 }
  0xac   :  { %v599_v6 = vadd.f32 %v598_v57, %v550_v2  ;;  %v503_v8 = vadd.f32 %v502_v4, %v454_v7 }
  0xae   :  { %638 = vst.msk [vmem:[%s1364_s3] sm:$0xff] %vm417_vm0, %v599_v6  ;;  %v608_v15 = vpop.f32.mrf.mxu3 }
  0xb1   :  { %v551_v9 = vpop.f32.mrf.mxu2  ;;  %v456_v11 = vpop.f32.mrf.mxu0 }
  0xb2   :  { %v552_v10 = vadd.f32 %v551_v9, %v503_v8  ;;  %v505_v12 = vpop.f32.mrf.mxu1  ;;  %v457_v13 = vadd.f32 %v1279_v59, %v456_v11 }
  0xb4   :  { %v601_v14 = vadd.f32 %v600_v58, %v552_v10  ;;  %v506_v16 = vadd.f32 %v505_v12, %v457_v13 }
  0xb6   :  { %639 = vst.msk [vmem:[%s1364_s3 + $0x8] sm:$0xff] %vm417_vm0, %v601_v14  ;;  %v610_v23 = vpop.f32.mrf.mxu3 }
  0xb9   :  { %v554_v17 = vpop.f32.mrf.mxu2  ;;  %v458_v19 = vpop.f32.mrf.mxu0 }
  0xba   :  { %v555_v18 = vadd.f32 %v554_v17, %v506_v16  ;;  %v507_v20 = vpop.f32.mrf.mxu1  ;;  %v459_v22 = vadd.f32 %v1279_v59, %v458_v19 }
  0xbc   :  { %v604_v21 = vadd.f32 %v603_v63, %v555_v18  ;;  %v508_v24 = vadd.f32 %v507_v20, %v459_v22 }
  0xbe   :  { %640 = vst.msk [vmem:[%s1364_s3 + $0x10] sm:$0xff] %vm417_vm0, %v604_v21  ;;  %v613_v33 = vpop.f32.mrf.mxu3 }
  0xc1   :  { %v556_v25 = vpop.f32.mrf.mxu2  ;;  %v461_v27 = vpop.f32.mrf.mxu0 }
  0xc2   :  { %v557_v26 = vadd.f32 %v556_v25, %v508_v24  ;;  %v510_v28 = vpop.f32.mrf.mxu1  ;;  %v462_v29 = vadd.f32 %v1279_v59, %v461_v27 }
  0xc4   :  { %v606_v30 = vadd.f32 %v605_v5, %v557_v26  ;;  %v511_v31 = vadd.f32 %v510_v28, %v462_v29 }
  0xc6   :  { %641 = vst.msk [vmem:[%s1364_s3 + $0x18] sm:$0xff] %vm417_vm0, %v606_v30  ;;  %v615_v45 = vpop.f32.mrf.mxu3 }
  0xc9   :  { %v559_v32 = vpop.f32.mrf.mxu2  ;;  %v463_v35 = vpop.f32.mrf.mxu0 }
  0xca   :  { %v560_v34 = vadd.f32 %v559_v32, %v511_v31  ;;  %v512_v36 = vpop.f32.mrf.mxu1  ;;  %v464_v38 = vadd.f32 %v1279_v59, %v463_v35 }
  0xcc   :  { %v609_v37 = vadd.f32 %v608_v15, %v560_v34  ;;  %v513_v39 = vadd.f32 %v512_v36, %v464_v38 }
  0xce   :  { %642 = vst.msk [vmem:[%s1364_s3 + $0x20] sm:$0xff] %vm417_vm0, %v609_v37  ;;  %v618_v54 = vpop.f32.mrf.mxu3 }
  0xd1   :  { %v561_v40 = vpop.f32.mrf.mxu2  ;;  %v466_v42 = vpop.f32.mrf.mxu0 }
  0xd2   :  { %v562_v41 = vadd.f32 %v561_v40, %v513_v39  ;;  %v515_v43 = vpop.f32.mrf.mxu1  ;;  %v467_v44 = vadd.f32 %v1279_v59, %v466_v42 }
  0xd4   :  { %v611_v46 = vadd.f32 %v610_v23, %v562_v41  ;;  %v516_v47 = vadd.f32 %v515_v43, %v467_v44 }
  0xd6   :  { %643 = vst.msk [vmem:[%s1364_s3 + $0x28] sm:$0xff] %vm417_vm0, %v611_v46  ;;  %v620_v0 = vpop.f32.mrf.mxu3 }
  0xd9   :  { %v564_v48 = vpop.f32.mrf.mxu2  ;;  %v468_v50 = vpop.f32.mrf.mxu0 }
  0xda   :  { %v565_v49 = vadd.f32 %v564_v48, %v516_v47  ;;  %v517_v51 = vpop.f32.mrf.mxu1  ;;  %v469_v53 = vadd.f32 %v1279_v59, %v468_v50 }
  0xdc   :  { %v614_v52 = vadd.f32 %v613_v33, %v565_v49  ;;  %v518_v55 = vadd.f32 %v517_v51, %v469_v53 }
  0xde   :  { %644 = vst.msk [vmem:[%s1364_s3 + $0x30] sm:$0xff] %vm417_vm0, %v614_v52  ;;  %v623_v9 = vpop.f32.mrf.mxu3 }
  0xe1   :  { %v566_v56 = vpop.f32.mrf.mxu2  ;;  %v471_v58 = vpop.f32.mrf.mxu0 }
  0xe2   :  { %v567_v57 = vadd.f32 %v566_v56, %v518_v55  ;;  %v520_v60 = vpop.f32.mrf.mxu1  ;;  %v472_v61 = vadd.f32 %v1279_v59, %v471_v58 }
  0xe4   :  { %v616_v62 = vadd.f32 %v615_v45, %v567_v57  ;;  %v521_v63 = vadd.f32 %v520_v60, %v472_v61 }
  0xe6   :  { %645 = vst.msk [vmem:[%s1364_s3 + $0x38] sm:$0xff] %vm417_vm0, %v616_v62  ;;  %v625_v20 = vpop.f32.mrf.mxu3 }
  0xe9   :  { %v569_v1 = vpop.f32.mrf.mxu2  ;;  %v473_v3 = vpop.f32.mrf.mxu0 }
  0xea   :  { %v570_v2 = vadd.f32 %v569_v1, %v521_v63  ;;  %v522_v4 = vpop.f32.mrf.mxu1  ;;  %v474_v6 = vadd.f32 %v1279_v59, %v473_v3 }
  0xec   :  { %v619_v5 = vadd.f32 %v618_v54, %v570_v2  ;;  %v523_v7 = vadd.f32 %v522_v4, %v474_v6 }
  0xee   :  { %646 = vst.msk [vmem:[%s1364_s3 + $0x40] sm:$0xff] %vm417_vm0, %v619_v5  ;;  %v628_v30 = vpop.f32.mrf.mxu3 }
  0xf1   :  { %v571_v8 = vpop.f32.mrf.mxu2  ;;  %v476_v11 = vpop.f32.mrf.mxu0 }
  0xf2   :  { %v572_v10 = vadd.f32 %v571_v8, %v523_v7  ;;  %v525_v12 = vpop.f32.mrf.mxu1  ;;  %v477_v13 = vadd.f32 %v1279_v59, %v476_v11 }
  0xf4   :  { %v621_v14 = vadd.f32 %v620_v0, %v572_v10  ;;  %v526_v15 = vadd.f32 %v525_v12, %v477_v13 }
  0xf6   :  { %647 = vst.msk [vmem:[%s1364_s3 + $0x48] sm:$0xff] %vm417_vm0, %v621_v14  ;;  %v630_v38 = vpop.f32.mrf.mxu3 }
  0xf9   :  { %v574_v16 = vpop.f32.mrf.mxu2  ;;  %v478_v18 = vpop.f32.mrf.mxu0 }
  0xfa   :  { %v575_v17 = vadd.f32 %v574_v16, %v526_v15  ;;  %v527_v19 = vpop.f32.mrf.mxu1  ;;  %v479_v22 = vadd.f32 %v1279_v59, %v478_v18 }
  0xfc   :  { %v624_v21 = vadd.f32 %v623_v9, %v575_v17  ;;  %v528_v23 = vadd.f32 %v527_v19, %v479_v22 }
  0xfe   :  { %648 = vst.msk [vmem:[%s1364_s3 + $0x50] sm:$0xff] %vm417_vm0, %v624_v21  ;;  %v633_v47 = vpop.f32.mrf.mxu3 }
 0x101   :  { %v576_v24 = vpop.f32.mrf.mxu2  ;;  %v481_v26 = vpop.f32.mrf.mxu0 }
 0x102   :  { %v577_v25 = vadd.f32 %v576_v24, %v528_v23  ;;  %v530_v27 = vpop.f32.mrf.mxu1  ;;  %v482_v28 = vadd.f32 %v1279_v59, %v481_v26 }
 0x104   :  { %v626_v29 = vadd.f32 %v625_v20, %v577_v25  ;;  %v531_v31 = vadd.f32 %v530_v27, %v482_v28 }
 0x106   :  { %649 = vst.msk [vmem:[%s1364_s3 + $0x58] sm:$0xff] %vm417_vm0, %v626_v29  ;;  %v635_v57 = vpop.f32.mrf.mxu3 }
 0x109   :  { %v579_v32 = vpop.f32.mrf.mxu2  ;;  %v483_v34 = vpop.f32.mrf.mxu0 }
 0x10a   :  { %v580_v33 = vadd.f32 %v579_v32, %v531_v31  ;;  %v532_v35 = vpop.f32.mrf.mxu1  ;;  %v484_v37 = vadd.f32 %v1279_v59, %v483_v34 }
 0x10c   :  { %v629_v36 = vadd.f32 %v628_v30, %v580_v33  ;;  %v533_v39 = vadd.f32 %v532_v35, %v484_v37 }
 0x10e   :  { %650 = vst.msk [vmem:[%s1364_s3 + $0x60] sm:$0xff] %vm417_vm0, %v629_v36 }
 0x111   :  { %v581_v40 = vpop.f32.mrf.mxu2  ;;  %v486_v42 = vpop.f32.mrf.mxu0 }
 0x112   :  { %v582_v41 = vadd.f32 %v581_v40, %v533_v39  ;;  %v487_v43 = vadd.f32 %v1279_v59, %v486_v42  ;;  %v535_v45 = vpop.f32.mrf.mxu1 }
 0x114   :  { %v631_v44 = vadd.f32 %v630_v38, %v582_v41  ;;  %v536_v46 = vadd.f32 %v535_v45, %v487_v43 }
 0x116   :  { %651 = vst.msk [vmem:[%s1364_s3 + $0x68] sm:$0xff] %vm417_vm0, %v631_v44 }
 0x119   :  { %v584_v48 = vpop.f32.mrf.mxu2  ;;  %v488_v50 = vpop.f32.mrf.mxu0 }
 0x11a   :  { %v585_v49 = vadd.f32 %v584_v48, %v536_v46  ;;  %v489_v52 = vadd.f32 %v1279_v59, %v488_v50  ;;  %v537_v53 = vpop.f32.mrf.mxu1 }
 0x11c   :  { %v634_v51 = vadd.f32 %v633_v47, %v585_v49  ;;  %v538_v54 = vadd.f32 %v537_v53, %v489_v52 }
 0x11e   :  { %652 = vst.msk [vmem:[%s1364_s3 + $0x70] sm:$0xff] %vm417_vm0, %v634_v51 }
 0x121   :  { %v586_v55 = vpop.f32.mrf.mxu2 }
 0x122   :  { %v587_v56 = vadd.f32 %v586_v55, %v538_v54 }
 0x124   :  { %v636_v58 = vadd.f32 %v635_v57, %v587_v56 }
 0x126   :  { %653 = vst.msk [vmem:[%s1364_s3 + $0x78] sm:$0xff] %vm417_vm0, %v636_v58 }
 0x127   :  { %658 = vsyncpa [#allocation3], 1 }

// kernel: hierarchical_vae_forward.37
= control target key start
LH: loop header
LB: loop body
LE: loop exit
PB: predicated region body
PF: predicated region fallthrough
CT: control target
= control target key end

     0   :  { %vm78_vm0 = vcmask 130048   ;;  %v327_v23 = vmov 0.0   ;;  %vm206_vm1 = vcmask 122880   ;;  %s519_s1 = inlined_call_operand.vmem [shape: bf16[16,16], index: 1, kind: input, shape index: {}]   ;;  %s520_s0 = inlined_call_operand.vmem [shape: bf16[128,16], index: 0, kind: input, shape index: {}]   ;;  %s521_s2 = inlined_call_operand.vmem [shape: f32[128,16], index: 2, kind: output, shape index: {0}]   ;;  %s522_s3 = inlined_call_operand.vmem [shape: f32[8,16], index: 3, kind: output, shape index: {1}]  }
   0x1   :  { %v322_v0 = vld [vmem:[%s519_s1] sm:$0xff]  ;;  %v316_v2 = vld [vmem:[%s520_s0 + $0x10] sm:$0xff]  ;;  %v315_v5 = vld [vmem:[%s520_s0 + $0x8] sm:$0xff]  ;;  %168 = vst.msk [vmem:[%s522_s3] sm:$0xff] %vm78_vm0, %v327_v23 }
   0x2   :  { %v314_v1 = vld [vmem:[%s520_s0] sm:$0xff]  ;;  %110 = vmatpush.bf16.msra.mxu0 %v322_v0  ;;  %323 = vmatpush.bf16.msra.mxu1 %v322_v0  ;;  %v320_v4 = vld [vmem:[%s520_s0 + $0x30] sm:$0xff]  ;;  %v317_v6 = vld [vmem:[%s520_s0 + $0x18] sm:$0xff] }
   0x3   :  { %v318_v3 = vld [vmem:[%s520_s0 + $0x20] sm:$0xff]  ;;  %324 = vmatpush.bf16.msra.mxu2 %v322_v0  ;;  %325 = vmatpush.bf16.msra.mxu3 %v322_v0  ;;  %v319_v7 = vld [vmem:[%s520_s0 + $0x28] sm:$0xff]  ;;  %v321_v8 = vld [vmem:[%s520_s0 + $0x38] sm:$0xff] }
   0x5   :  { %306 = vmatmul.msk.bf16.vlgmr.msra.gmra.mxu0 %vm78_vm0, %v314_v1  ;;  %308 = vmatmul.msk.bf16.vlgmr.msra.gmra.mxu1 %vm78_vm0, %v316_v2 }
   0x6   :  { %310 = vmatmul.msk.bf16.vlgmr.msra.gmra.mxu2 %vm78_vm0, %v318_v3  ;;  %312 = vmatmul.msk.bf16.vlgmr.msra.gmra.mxu3 %vm78_vm0, %v320_v4 }
  0x15   :  { %307 = vmatmul.msk.bf16.gmra.mxu0 %vm78_vm0, %v315_v5  ;;  %309 = vmatmul.msk.bf16.gmra.mxu1 %vm78_vm0, %v317_v6 }
  0x16   :  { %311 = vmatmul.msk.bf16.gmra.mxu2 %vm78_vm0, %v319_v7  ;;  %313 = vmatmul.msk.bf16.gmra.mxu3 %vm78_vm0, %v321_v8 }
  0x82   :  { %v112_v9 = vpop.f32.mrf.mxu0  ;;  %v122_v10 = vpop.f32.mrf.mxu1 }
  0x83   :  { %152 = vst.msk [vmem:[%s521_s2] sm:$0xff] %vm78_vm0, %v112_v9  ;;  %v208_v20 = vmul.f32 %v112_v9, %v112_v9  ;;  %v169_v24 = vsel %vm78_vm0, %v112_v9, 0.0  ;;  %v212_v36 = vmul.f32 %v122_v10, %v122_v10  ;;  %v176_v41 = vsel %vm78_vm0, %v122_v10, 0.0 }
  0x84   :  { %156 = vst.msk [vmem:[%s521_s2 + $0x20] sm:$0xff] %vm78_vm0, %v122_v10 }
  0x85   :  { %v224_v28 = vsel %vm78_vm0, %v208_v20, 0.0  ;;  %v231_v46 = vsel %vm78_vm0, %v212_v36, 0.0 }
  0x89   :  { %v391_v11 = vpop.f32.mrf.mxu2  ;;  %v393_v12 = vpop.f32.mrf.mxu3 }
  0x8a   :  { %v114_v13 = vpop.f32.mrf.mxu0  ;;  %v124_v14 = vpop.f32.mrf.mxu1  ;;  %160 = vst.msk [vmem:[%s521_s2 + $0x40] sm:$0xff] %vm78_vm0, %v391_v11  ;;  %v216_v58 = vmul.f32 %v391_v11, %v391_v11  ;;  %v184_v63 = vsel %vm78_vm0, %v391_v11, 0.0 }
  0x8b   :  { %153 = vst.msk [vmem:[%s521_s2 + $0x8] sm:$0xff] %vm78_vm0, %v114_v13  ;;  %v209_v19 = vmul.f32 %v114_v13, %v114_v13  ;;  %v170_v21 = vsel %vm78_vm0, %v114_v13, 0.0  ;;  %v213_v42 = vmul.f32 %v124_v14, %v124_v14  ;;  %v178_v47 = vsel %vm78_vm0, %v124_v14, 0.0 }
  0x8c   :  { %157 = vst.msk [vmem:[%s521_s2 + $0x28] sm:$0xff] %vm78_vm0, %v124_v14  ;;  %v171_v27 = vadd.f32 %v170_v21, %v169_v24  ;;  %v239_v4 = vsel %vm78_vm0, %v216_v58, 0.0 }
  0x8d   :  { %164 = vst.msk [vmem:[%s521_s2 + $0x60] sm:$0xff] %vm78_vm0, %v393_v12  ;;  %v225_v25 = vsel %vm78_vm0, %v209_v19, 0.0  ;;  %v233_v51 = vsel %vm78_vm0, %v213_v42, 0.0 }
  0x8e   :  { %v226_v32 = vadd.f32 %v225_v25, %v224_v28 }
  0x91   :  { %v413_v15 = vpop.f32.mrf.mxu2  ;;  %v415_v16 = vpop.f32.mrf.mxu3 }
  0x92   :  { %v117_v17 = vpop.f32.mrf.mxu0  ;;  %v127_v18 = vpop.f32.mrf.mxu1  ;;  %161 = vst.msk [vmem:[%s521_s2 + $0x48] sm:$0xff] %vm78_vm0, %v413_v15  ;;  %v217_v0 = vmul.f32 %v413_v15, %v413_v15  ;;  %v186_v5 = vsel %vm78_vm0, %v413_v15, 0.0  ;;  %v192_v15 = vsel %vm78_vm0, %v393_v12, 0.0 }
  0x93   :  { %154 = vst.msk [vmem:[%s521_s2 + $0x10] sm:$0xff] %vm78_vm0, %v117_v17  ;;  %v210_v22 = vmul.f32 %v117_v17, %v117_v17  ;;  %v172_v26 = vsel %vm78_vm0, %v117_v17, 0.0  ;;  %v214_v48 = vmul.f32 %v127_v18, %v127_v18  ;;  %v180_v52 = vsel %vm78_vm0, %v127_v18, 0.0 }
  0x94   :  { %158 = vst.msk [vmem:[%s521_s2 + $0x30] sm:$0xff] %vm78_vm0, %v127_v18  ;;  %v173_v33 = vadd.f32 %v172_v26, %v171_v27  ;;  %v241_v9 = vsel %vm78_vm0, %v217_v0, 0.0  ;;  %v220_v17 = vmul.f32 %v393_v12, %v393_v12  ;;  %v194_v27 = vsel %vm78_vm0, %v415_v16, 0.0 }
  0x95   :  { %165 = vst.msk [vmem:[%s521_s2 + $0x68] sm:$0xff] %vm78_vm0, %v415_v16  ;;  %v227_v29 = vsel %vm78_vm0, %v210_v22, 0.0  ;;  %v235_v59 = vsel %vm78_vm0, %v214_v48, 0.0  ;;  %v221_v22 = vmul.f32 %v415_v16, %v415_v16 }
  0x96   :  { %v228_v39 = vadd.f32 %v227_v29, %v226_v32  ;;  %v247_v26 = vsel %vm78_vm0, %v220_v17, 0.0 }
  0x97   :  { %v249_v32 = vsel %vm78_vm0, %v221_v22, 0.0 }
  0x99   :  { %v137_v30 = vpop.f32.mrf.mxu2  ;;  %v445_v31 = vpop.f32.mrf.mxu3 }
  0x9a   :  { %v119_v34 = vpop.f32.mrf.mxu0  ;;  %v129_v35 = vpop.f32.mrf.mxu1  ;;  %162 = vst.msk [vmem:[%s521_s2 + $0x50] sm:$0xff] %vm78_vm0, %v137_v30  ;;  %v218_v6 = vmul.f32 %v137_v30, %v137_v30  ;;  %v188_v10 = vsel %vm78_vm0, %v137_v30, 0.0  ;;  %v222_v28 = vmul.f32 %v445_v31, %v445_v31  ;;  %v196_v12 = vsel %vm78_vm0, %v445_v31, 0.0 }
  0x9b   :  { %155 = vst.msk [vmem:[%s521_s2 + $0x18] sm:$0xff] %vm78_vm0, %v119_v34  ;;  %v174_v37 = vsel %vm78_vm0, %v119_v34, 0.0  ;;  %v211_v38 = vmul.f32 %v119_v34, %v119_v34  ;;  %v215_v53 = vmul.f32 %v129_v35, %v129_v35  ;;  %v182_v60 = vsel %vm78_vm0, %v129_v35, 0.0 }
  0x9c   :  { %v175_v40 = vadd.f32 %v174_v37, %v173_v33  ;;  %159 = vst.msk [vmem:[%s521_s2 + $0x38] sm:$0xff] %vm78_vm0, %v129_v35  ;;  %v243_v18 = vsel %vm78_vm0, %v218_v6, 0.0  ;;  %v251_v36 = vsel %vm78_vm0, %v222_v28, 0.0 }
  0x9d   :  { %v229_v43 = vsel %vm78_vm0, %v211_v38, 0.0  ;;  %166 = vst.msk [vmem:[%s521_s2 + $0x70] sm:$0xff] %vm78_vm0, %v445_v31  ;;  %v237_v1 = vsel %vm78_vm0, %v215_v53, 0.0 }
  0x9e   :  { %v177_v44 = vadd.f32 %v176_v41, %v175_v40  ;;  %v230_v45 = vadd.f32 %v229_v43, %v228_v39 }
  0xa0   :  { %v232_v49 = vadd.f32 %v231_v46, %v230_v45  ;;  %v179_v50 = vadd.f32 %v178_v47, %v177_v44 }
  0xa1   :  { %v139_v54 = vpop.f32.mrf.mxu2  ;;  %v149_v55 = vpop.f32.mrf.mxu3 }
  0xa2   :  { %v181_v56 = vadd.f32 %v180_v52, %v179_v50  ;;  %v234_v57 = vadd.f32 %v233_v51, %v232_v49  ;;  %163 = vst.msk [vmem:[%s521_s2 + $0x58] sm:$0xff] %vm78_vm0, %v139_v54  ;;  %v219_v11 = vmul.f32 %v139_v54, %v139_v54  ;;  %v190_v19 = vsel %vm78_vm0, %v139_v54, 0.0 }
  0xa3   :  { %167 = vst.msk [vmem:[%s521_s2 + $0x78] sm:$0xff] %vm78_vm0, %v149_v55  ;;  %v223_v33 = vmul.f32 %v149_v55, %v149_v55  ;;  %v198_v37 = vsel %vm78_vm0, %v149_v55, 0.0 }
  0xa4   :  { %v183_v61 = vadd.f32 %v182_v60, %v181_v56  ;;  %v236_v62 = vadd.f32 %v235_v59, %v234_v57  ;;  %v245_v23 = vsel %vm78_vm0, %v219_v11, 0.0 }
  0xa5   :  { %v253_v16 = vsel %vm78_vm0, %v223_v33, 0.0 }
  0xa6   :  { %v185_v2 = vadd.f32 %v184_v63, %v183_v61  ;;  %v238_v3 = vadd.f32 %v237_v1, %v236_v62 }
  0xa8   :  { %v240_v7 = vadd.f32 %v239_v4, %v238_v3  ;;  %v187_v8 = vadd.f32 %v186_v5, %v185_v2 }
  0xaa   :  { %v189_v13 = vadd.f32 %v188_v10, %v187_v8  ;;  %v242_v14 = vadd.f32 %v241_v9, %v240_v7 }
  0xac   :  { %v244_v20 = vadd.f32 %v243_v18, %v242_v14  ;;  %v191_v21 = vadd.f32 %v190_v19, %v189_v13 }
  0xae   :  { %v193_v24 = vadd.f32 %v192_v15, %v191_v21  ;;  %v246_v25 = vadd.f32 %v245_v23, %v244_v20 }
  0xb0   :  { %v248_v29 = vadd.f32 %v247_v26, %v246_v25  ;;  %v195_v30 = vadd.f32 %v194_v27, %v193_v24 }
  0xb2   :  { %v197_v34 = vadd.f32 %v196_v12, %v195_v30  ;;  %v250_v35 = vadd.f32 %v249_v32, %v248_v29 }
  0xb4   :  { %v252_v38 = vadd.f32 %v251_v36, %v250_v35  ;;  %v199_v39 = vadd.f32 %v198_v37, %v197_v34 }
  0xb6   :  { %v200_v40 = vrot.slane %v199_v39, 4  ;;  %v254_v41 = vadd.f32 %v253_v16, %v252_v38 }
  0xb8   :  { %v201_v42 = vadd.f32 %v200_v40, %v199_v39  ;;  %v255_v43 = vrot.slane %v254_v41, 4 }
  0xba   :  { %v202_v44 = vrot.slane %v201_v42, 2  ;;  %v256_v45 = vadd.f32 %v255_v43, %v254_v41 }
  0xbc   :  { %v203_v46 = vadd.f32 %v202_v44, %v201_v42  ;;  %v257_v47 = vrot.slane %v256_v45, 2 }
  0xbe   :  { %v204_v31 = vrot.slane %v203_v46, 1  ;;  %v258_v48 = vadd.f32 %v257_v47, %v256_v45 }
  0xc0   :  { %v205_v49 = vadd.f32 %v204_v31, %v203_v46  ;;  %v259_v50 = vrot.slane %v258_v48, 1 }
  0xc2   :  { %207 = vst.msk [vmem:[%s522_s3] sm:$0x1] %vm206_vm1, %v205_v49  ;;  %v260_v51 = vadd.f32 %v259_v50, %v258_v48 }
  0xc4   :  { %261 = vst.msk [vmem:[%s522_s3 + $0x1] sm:$0x1] %vm206_vm1, %v260_v51 }

// kernel: mul.334
= control target key start
LH: loop header
LB: loop body
LE: loop exit
PB: predicated region body
PF: predicated region fallthrough
CT: control target
= control target key end

     0   :  { %s118_s0 = inlined_call_operand.vmem [shape: f32[2,16], index: 0, kind: input, shape index: {}]   ;;  %s119_s1 = inlined_call_operand.vmem [shape: f32[2,8,8,16], index: 1, kind: output, shape index: {}]  }
   0x1   :  { %v4_v0 = vld [vmem:[%s118_s0] ss:$0 sm:$0xff]  ;;  %v38_v1 = vld [vmem:[%s118_s0 + $0x1] ss:$0 sm:$0xff] }
   0x2   :  { %5 = vst [vmem:[%s119_s1] sm:$0xff] %v4_v0 }
   0x3   :  { %39 = vst [vmem:[%s119_s1 + $0x40] sm:$0xff] %v38_v1 }
   0x4   :  { %40 = vst [vmem:[%s119_s1 + $0x8] sm:$0xff] %v4_v0 }
   0x5   :  { %41 = vst [vmem:[%s119_s1 + $0x48] sm:$0xff] %v38_v1 }
   0x6   :  { %42 = vst [vmem:[%s119_s1 + $0x10] sm:$0xff] %v4_v0 }
   0x7   :  { %43 = vst [vmem:[%s119_s1 + $0x50] sm:$0xff] %v38_v1 }
   0x8   :  { %44 = vst [vmem:[%s119_s1 + $0x18] sm:$0xff] %v4_v0 }
   0x9   :  { %45 = vst [vmem:[%s119_s1 + $0x58] sm:$0xff] %v38_v1 }
   0xa   :  { %46 = vst [vmem:[%s119_s1 + $0x20] sm:$0xff] %v4_v0 }
   0xb   :  { %47 = vst [vmem:[%s119_s1 + $0x60] sm:$0xff] %v38_v1 }
   0xc   :  { %48 = vst [vmem:[%s119_s1 + $0x28] sm:$0xff] %v4_v0 }
   0xd   :  { %49 = vst [vmem:[%s119_s1 + $0x68] sm:$0xff] %v38_v1 }
   0xe   :  { %50 = vst [vmem:[%s119_s1 + $0x30] sm:$0xff] %v4_v0 }
   0xf   :  { %51 = vst [vmem:[%s119_s1 + $0x70] sm:$0xff] %v38_v1 }
  0x10   :  { %52 = vst [vmem:[%s119_s1 + $0x38] sm:$0xff] %v4_v0 }
  0x11   :  { %53 = vst [vmem:[%s119_s1 + $0x78] sm:$0xff] %v38_v1 }

// kernel: hierarchical_vae_forward.39
= control target key start
LH: loop header
LB: loop body
LE: loop exit
PB: predicated region body
PF: predicated region fallthrough
CT: control target
= control target key end

     0   :  { %8 = vsyncpa [#allocation3], 0  ;;  %s507_s15 = smov [#allocation2]   ;;  %s744_s0 = inlined_call_operand.vmem [shape: bf16[128,144], index: 0, kind: input, shape index: {}]   ;;  %s745_s1 = inlined_call_operand.vmem [shape: bf16[144,16], index: 1, kind: input, shape index: {}]   ;;  %s746_s2 = inlined_call_operand.hbm [shape: f32[1,16], index: 2, kind: input, shape index: {}]   ;;  %s747_s3 = inlined_call_operand.vmem [shape: f32[128,16], index: 3, kind: output, shape index: {}]  }
   0x1   :  { %s18_s14 = sshll.u32 %s746_s2, 4  ;;  %s20_s16 = sshll.u32 %s507_s15, 4  ;;  %s19_s14 = int_to_ptr.hbm [resolvable:$true] %s18_s14  ;;  %s21_s16 = int_to_ptr.vmem [resolvable:$true] %s20_s16 }
   0x2   :  { %23 = dma.hbm_to_vmem [thread:$0]  %s19_s14, 16, %s21_s16, [#allocation3]  }
   0x3   :  { %505 = dma.done.wait [#allocation3], 16  }
   0x4   :  { %506 = vsyncadd [#allocation3], 4294967280  ;;  %v468_v0 = vld [vmem:[%s745_s1 + $0x38] sm:$0xff]  ;;  %v469_v1 = vld [vmem:[%s745_s1 + $0x40] sm:$0xff]  ;;  %vm193_vm0 = vcmask 130048  }
   0x5   :  { %v445_v2 = vld [vmem:[%s744_s0 + $0x4] sm:$0xf]  ;;  %v341_v3 = vld [vmem:[%s744_s0 + $0x8] sm:$0xf0]  ;;  %218 = vmatpush.bf16.msra.mxu0 %v468_v0  ;;  %470 = vmatpush.bf16.msra.mxu2 %v468_v0  ;;  %v467_v5 = vld [vmem:[%s745_s1 + $0x30] sm:$0xff] }
   0x6   :  { %v344_v4 = vor.u32 %v445_v2, %v341_v3  ;;  %274 = vmatpush.bf16.msra.mxu1 %v469_v1  ;;  %478 = vmatpush.bf16.msra.mxu3 %v469_v1  ;;  %v466_v6 = vld [vmem:[%s745_s1 + $0x28] sm:$0xff]  ;;  %v455_v7 = vld [vmem:[%s744_s0 + $0x54] sm:$0xf]  ;;  %v381_v8 = vld [vmem:[%s744_s0 + $0x58] sm:$0xf0] }
   0x7   :  { %v384_v9 = vor.u32 %v455_v7, %v381_v8  ;;  %v465_v10 = vld [vmem:[%s745_s1 + $0x20] sm:$0xff]  ;;  %v464_v11 = vld [vmem:[%s745_s1 + $0x18] sm:$0xff]  ;;  %v447_v12 = vld [vmem:[%s744_s0 + $0x14] sm:$0xf] }
   0x8   :  { %v349_v13 = vld [vmem:[%s744_s0 + $0x18] sm:$0xf0]  ;;  %v463_v15 = vld [vmem:[%s745_s1 + $0x10] sm:$0xff]  ;;  %v462_v16 = vld [vmem:[%s745_s1 + $0x8] sm:$0xff] }
   0x9   :  { %437 = vmatmul.msk.bf16.vlgmr.msra.gmra.mxu1 %vm193_vm0, %v344_v4  ;;  %219 = vmatpush.bf16.msra.mxu0 %v467_v5  ;;  %v352_v14 = vor.u32 %v447_v12, %v349_v13  ;;  %v457_v17 = vld [vmem:[%s744_s0 + $0x64] sm:$0xf]  ;;  %v389_v18 = vld [vmem:[%s744_s0 + $0x68] sm:$0xf0]  ;;  %v339_v21 = vld [vmem:[%s744_s0] sm:$0xf] }
   0xa   :  { %471 = vmatpush.bf16.msra.mxu2 %v467_v5  ;;  %442 = vmatmul.msk.bf16.vlgmr.msra.gmra.mxu3 %vm193_vm0, %v384_v9  ;;  %v392_v19 = vor.u32 %v457_v17, %v389_v18  ;;  %v461_v20 = vld [vmem:[%s745_s1] sm:$0xff]  ;;  %v446_v22 = vld [vmem:[%s744_s0 + $0x4] sm:$0xf0]  ;;  %v357_v28 = vld [vmem:[%s744_s0 + $0x28] sm:$0xf0] }
   0xb   :  { %v371_v23 = vld [vmem:[%s744_s0 + $0x40] sm:$0xf]  ;;  %v454_v24 = vld [vmem:[%s744_s0 + $0x44] sm:$0xf0]  ;;  %v340_v25 = vor.u32 %v446_v22, %v339_v21  ;;  %v449_v27 = vld [vmem:[%s744_s0 + $0x24] sm:$0xf] }
   0xc   :  { %v372_v26 = vor.u32 %v454_v24, %v371_v23  ;;  %v360_v29 = vor.u32 %v449_v27, %v357_v28  ;;  %v459_v30 = vld [vmem:[%s744_s0 + $0x74] sm:$0xf]  ;;  %v397_v31 = vld [vmem:[%s744_s0 + $0x78] sm:$0xf0]  ;;  %v347_v33 = vld [vmem:[%s744_s0 + $0x10] sm:$0xf] }
   0xd   :  { %220 = vmatpush.bf16.msra.mxu0 %v466_v6  ;;  %v400_v32 = vor.u32 %v459_v30, %v397_v31  ;;  %v448_v34 = vld [vmem:[%s744_s0 + $0x14] sm:$0xf0]  ;;  %v379_v35 = vld [vmem:[%s744_s0 + $0x50] sm:$0xf]  ;;  %v451_v39 = vld [vmem:[%s744_s0 + $0x34] sm:$0xf] }
   0xe   :  { %472 = vmatpush.bf16.msra.mxu2 %v466_v6  ;;  %v456_v36 = vld [vmem:[%s744_s0 + $0x54] sm:$0xf0]  ;;  %v348_v37 = vor.u32 %v448_v34, %v347_v33  ;;  %v365_v40 = vld [vmem:[%s744_s0 + $0x38] sm:$0xf0]  ;;  %v355_v42 = vld [vmem:[%s744_s0 + $0x20] sm:$0xf] }
   0xf   :  { %v380_v38 = vor.u32 %v456_v36, %v379_v35  ;;  %v368_v41 = vor.u32 %v451_v39, %v365_v40  ;;  %v450_v43 = vld [vmem:[%s744_s0 + $0x24] sm:$0xf0]  ;;  %v387_v44 = vld [vmem:[%s744_s0 + $0x60] sm:$0xf]  ;;  %v453_v48 = vld [vmem:[%s744_s0 + $0x44] sm:$0xf] }
  0x10   :  { %v458_v45 = vld [vmem:[%s744_s0 + $0x64] sm:$0xf0]  ;;  %v356_v46 = vor.u32 %v450_v43, %v355_v42  ;;  %v373_v49 = vld [vmem:[%s744_s0 + $0x48] sm:$0xf0]  ;;  %v363_v51 = vld [vmem:[%s744_s0 + $0x30] sm:$0xf] }
  0x11   :  { %221 = vmatpush.bf16.msra.mxu0 %v465_v10  ;;  %v388_v47 = vor.u32 %v458_v45, %v387_v44  ;;  %v376_v50 = vor.u32 %v453_v48, %v373_v49  ;;  %v452_v52 = vld [vmem:[%s744_s0 + $0x34] sm:$0xf0]  ;;  %v395_v53 = vld [vmem:[%s744_s0 + $0x70] sm:$0xf]  ;;  %v662_v61 = vld [vmem:[#allocation2] ss:$0 sm:$0xff] }
  0x12   :  { %473 = vmatpush.bf16.msra.mxu2 %v465_v10  ;;  %v460_v54 = vld [vmem:[%s744_s0 + $0x74] sm:$0xf0]  ;;  %v364_v55 = vor.u32 %v452_v52, %v363_v51 }
  0x13   :  { %v396_v56 = vor.u32 %v460_v54, %v395_v53 }
  0x15   :  { %222 = vmatpush.bf16.msra.mxu0 %v464_v11 }
  0x16   :  { %474 = vmatpush.bf16.msra.mxu2 %v464_v11 }
  0x19   :  { %438 = vmatmul.msk.bf16.gmra.mxu1 %vm193_vm0, %v352_v14  ;;  %223 = vmatpush.bf16.msra.mxu0 %v463_v15 }
  0x1a   :  { %475 = vmatpush.bf16.msra.mxu2 %v463_v15  ;;  %443 = vmatmul.msk.bf16.gmra.mxu3 %vm193_vm0, %v392_v19 }
  0x1d   :  { %224 = vmatpush.bf16.msra.mxu0 %v462_v16 }
  0x1e   :  { %476 = vmatpush.bf16.msra.mxu2 %v462_v16 }
  0x21   :  { %225 = vmatpush.bf16.msra.mxu0 %v461_v20 }
  0x22   :  { %477 = vmatpush.bf16.msra.mxu2 %v461_v20 }
  0x24   :  { %226 = vmatmul.bf16.vlgmr.msra.gmra.mxu0 %v340_v25 }
  0x25   :  { %246 = vmatmul.bf16.vlgmr.msra.gmra.mxu2 %v372_v26 }
  0x29   :  { %439 = vmatmul.msk.bf16.gmra.mxu1 %vm193_vm0, %v360_v29 }
  0x2a   :  { %444 = vmatmul.msk.bf16.gmra.mxu3 %vm193_vm0, %v400_v32 }
  0x34   :  { %231 = vmatmul.bf16.gmra.mxu0 %v348_v37 }
  0x35   :  { %251 = vmatmul.bf16.gmra.mxu2 %v380_v38 }
  0x39   :  { %440 = vmatmul.msk.bf16.gmra.mxu1 %vm193_vm0, %v368_v41 }
  0x44   :  { %236 = vmatmul.bf16.gmra.mxu0 %v356_v46 }
  0x45   :  { %256 = vmatmul.bf16.gmra.mxu2 %v388_v47 }
  0x49   :  { %441 = vmatmul.msk.bf16.gmra.mxu1 %vm193_vm0, %v376_v50 }
  0x54   :  { %241 = vmatmul.bf16.gmra.mxu0 %v364_v55 }
  0x55   :  { %261 = vmatmul.bf16.gmra.mxu2 %v396_v56 }
  0x86   :  { %v276_v57 = vpop.f32.mrf.mxu1 }
  0x8d   :  { %v301_v8 = vpop.f32.mrf.mxu3 }
  0x8e   :  { %v278_v58 = vpop.f32.mrf.mxu1 }
  0x95   :  { %v303_v17 = vpop.f32.mrf.mxu3 }
  0x96   :  { %v281_v59 = vpop.f32.mrf.mxu1 }
  0x9d   :  { %v306_v27 = vpop.f32.mrf.mxu3 }
  0x9e   :  { %v283_v60 = vpop.f32.mrf.mxu1 }
  0xa1   :  { %v227_v62 = vpop.f32.mrf.mxu0 }
  0xa2   :  { %v228_v63 = vadd.f32 %v662_v61, %v227_v62 }
  0xa4   :  { %v277_v0 = vadd.f32 %v276_v57, %v228_v63 }
  0xa5   :  { %v308_v38 = vpop.f32.mrf.mxu3 }
  0xa6   :  { %316 = vst.msk [vmem:[%s747_s3] sm:$0xff] %vm193_vm0, %v277_v0  ;;  %v286_v1 = vpop.f32.mrf.mxu1 }
  0xa8   :  { %v247_v2 = vpop.f32.mrf.mxu2 }
  0xa9   :  { %v229_v3 = vpop.f32.mrf.mxu0  ;;  %v248_v28 = vadd.f32 %v662_v61, %v247_v2 }
  0xaa   :  { %v230_v4 = vadd.f32 %v662_v61, %v229_v3 }
  0xac   :  { %v279_v5 = vadd.f32 %v278_v58, %v230_v4 }
  0xad   :  { %v311_v47 = vpop.f32.mrf.mxu3 }
  0xae   :  { %317 = vst.msk [vmem:[%s747_s3 + $0x8] sm:$0xff] %vm193_vm0, %v279_v5  ;;  %v288_v6 = vpop.f32.mrf.mxu1 }
  0xb0   :  { %v249_v7 = vpop.f32.mrf.mxu2 }
  0xb1   :  { %v232_v9 = vpop.f32.mrf.mxu0  ;;  %v250_v37 = vadd.f32 %v662_v61, %v249_v7 }
  0xb2   :  { %v233_v10 = vadd.f32 %v662_v61, %v232_v9 }
  0xb4   :  { %v282_v11 = vadd.f32 %v281_v59, %v233_v10 }
  0xb5   :  { %v313_v56 = vpop.f32.mrf.mxu3 }
  0xb6   :  { %318 = vst.msk [vmem:[%s747_s3 + $0x10] sm:$0xff] %vm193_vm0, %v282_v11  ;;  %v291_v12 = vpop.f32.mrf.mxu1 }
  0xb8   :  { %v252_v13 = vpop.f32.mrf.mxu2 }
  0xb9   :  { %v253_v14 = vadd.f32 %v662_v61, %v252_v13  ;;  %v234_v15 = vpop.f32.mrf.mxu0 }
  0xba   :  { %v235_v16 = vadd.f32 %v662_v61, %v234_v15 }
  0xbb   :  { %v302_v18 = vadd.f32 %v301_v8, %v253_v14 }
  0xbc   :  { %v284_v19 = vadd.f32 %v283_v60, %v235_v16 }
  0xbd   :  { %326 = vst.msk [vmem:[%s747_s3 + $0x50] sm:$0xff] %vm193_vm0, %v302_v18 }
  0xbe   :  { %319 = vst.msk [vmem:[%s747_s3 + $0x18] sm:$0xff] %vm193_vm0, %v284_v19  ;;  %v293_v20 = vpop.f32.mrf.mxu1 }
  0xc0   :  { %v254_v21 = vpop.f32.mrf.mxu2 }
  0xc1   :  { %v255_v22 = vadd.f32 %v662_v61, %v254_v21  ;;  %v237_v23 = vpop.f32.mrf.mxu0 }
  0xc2   :  { %v238_v24 = vadd.f32 %v662_v61, %v237_v23 }
  0xc3   :  { %v304_v25 = vadd.f32 %v303_v17, %v255_v22 }
  0xc4   :  { %v287_v26 = vadd.f32 %v286_v1, %v238_v24 }
  0xc5   :  { %327 = vst.msk [vmem:[%s747_s3 + $0x58] sm:$0xff] %vm193_vm0, %v304_v25 }
  0xc6   :  { %320 = vst.msk [vmem:[%s747_s3 + $0x20] sm:$0xff] %vm193_vm0, %v287_v26  ;;  %v296_v29 = vpop.f32.mrf.mxu1 }
  0xc7   :  { %v297_v30 = vadd.f32 %v296_v29, %v248_v28 }
  0xc8   :  { %v257_v31 = vpop.f32.mrf.mxu2 }
  0xc9   :  { %324 = vst.msk [vmem:[%s747_s3 + $0x40] sm:$0xff] %vm193_vm0, %v297_v30  ;;  %v258_v32 = vadd.f32 %v662_v61, %v257_v31  ;;  %v239_v33 = vpop.f32.mrf.mxu0 }
  0xca   :  { %v240_v34 = vadd.f32 %v662_v61, %v239_v33 }
  0xcb   :  { %v307_v35 = vadd.f32 %v306_v27, %v258_v32 }
  0xcc   :  { %v289_v36 = vadd.f32 %v288_v6, %v240_v34 }
  0xcd   :  { %328 = vst.msk [vmem:[%s747_s3 + $0x60] sm:$0xff] %vm193_vm0, %v307_v35 }
  0xce   :  { %321 = vst.msk [vmem:[%s747_s3 + $0x28] sm:$0xff] %vm193_vm0, %v289_v36  ;;  %v298_v39 = vpop.f32.mrf.mxu1 }
  0xcf   :  { %v299_v40 = vadd.f32 %v298_v39, %v250_v37 }
  0xd0   :  { %v259_v41 = vpop.f32.mrf.mxu2 }
  0xd1   :  { %325 = vst.msk [vmem:[%s747_s3 + $0x48] sm:$0xff] %vm193_vm0, %v299_v40  ;;  %v260_v42 = vadd.f32 %v662_v61, %v259_v41  ;;  %v242_v43 = vpop.f32.mrf.mxu0 }
  0xd2   :  { %v243_v44 = vadd.f32 %v662_v61, %v242_v43 }
  0xd3   :  { %v309_v45 = vadd.f32 %v308_v38, %v260_v42 }
  0xd4   :  { %v292_v46 = vadd.f32 %v291_v12, %v243_v44 }
  0xd5   :  { %329 = vst.msk [vmem:[%s747_s3 + $0x68] sm:$0xff] %vm193_vm0, %v309_v45 }
  0xd6   :  { %322 = vst.msk [vmem:[%s747_s3 + $0x30] sm:$0xff] %vm193_vm0, %v292_v46 }
  0xd8   :  { %v262_v48 = vpop.f32.mrf.mxu2 }
  0xd9   :  { %v263_v49 = vadd.f32 %v662_v61, %v262_v48  ;;  %v244_v50 = vpop.f32.mrf.mxu0 }
  0xda   :  { %v245_v51 = vadd.f32 %v662_v61, %v244_v50 }
  0xdb   :  { %v312_v52 = vadd.f32 %v311_v47, %v263_v49 }
  0xdc   :  { %v294_v53 = vadd.f32 %v293_v20, %v245_v51 }
  0xdd   :  { %330 = vst.msk [vmem:[%s747_s3 + $0x70] sm:$0xff] %vm193_vm0, %v312_v52 }
  0xde   :  { %323 = vst.msk [vmem:[%s747_s3 + $0x38] sm:$0xff] %vm193_vm0, %v294_v53 }
  0xe0   :  { %v264_v54 = vpop.f32.mrf.mxu2 }
  0xe1   :  { %v265_v55 = vadd.f32 %v662_v61, %v264_v54 }
  0xe3   :  { %v314_v57 = vadd.f32 %v313_v56, %v265_v55 }
  0xe5   :  { %331 = vst.msk [vmem:[%s747_s3 + $0x78] sm:$0xff] %vm193_vm0, %v314_v57 }
  0xe6   :  { %336 = vsyncpa [#allocation3], 1 }

// kernel: hierarchical_vae_forward.40
= control target key start
LH: loop header
LB: loop body
LE: loop exit
PB: predicated region body
PF: predicated region fallthrough
CT: control target
= control target key end

     0   :  { %vm179_vm0 = vcmask 130048   ;;  %vm302_vm1 = vcmask 261120   ;;  %s702_s1 = inlined_call_operand.vmem [shape: bf16[144,32], index: 1, kind: input, shape index: {}]   ;;  %s703_s0 = inlined_call_operand.vmem [shape: bf16[128,144], index: 0, kind: input, shape index: {}]   ;;  %s704_s2 = inlined_call_operand.vmem [shape: f32[1,32], index: 2, kind: input, shape index: {}]   ;;  %s705_s3 = inlined_call_operand.vmem [shape: f32[128,32], index: 3, kind: output, shape index: {}]  }
   0x1   :  { %v454_v0 = vld [vmem:[%s702_s1 + $0x38] sm:$0xff]  ;;  %v455_v1 = vld [vmem:[%s702_s1 + $0x40] sm:$0xff]  ;;  %v327_v3 = vld [vmem:[%s703_s0 + $0x8] sm:$0xf0] }
   0x2   :  { %v431_v2 = vld [vmem:[%s703_s0 + $0x4] sm:$0xf]  ;;  %204 = vmatpush.bf16.msra.mxu0 %v454_v0  ;;  %456 = vmatpush.bf16.msra.mxu2 %v454_v0  ;;  %v453_v5 = vld [vmem:[%s702_s1 + $0x30] sm:$0xff]  ;;  %v452_v6 = vld [vmem:[%s702_s1 + $0x28] sm:$0xff] }
   0x3   :  { %v330_v4 = vor.u32 %v431_v2, %v327_v3  ;;  %260 = vmatpush.bf16.msra.mxu1 %v455_v1  ;;  %464 = vmatpush.bf16.msra.mxu3 %v455_v1  ;;  %v441_v7 = vld [vmem:[%s703_s0 + $0x54] sm:$0xf]  ;;  %v367_v8 = vld [vmem:[%s703_s0 + $0x58] sm:$0xf0]  ;;  %v451_v10 = vld [vmem:[%s702_s1 + $0x20] sm:$0xff] }
   0x4   :  { %v370_v9 = vor.u32 %v441_v7, %v367_v8  ;;  %v450_v11 = vld [vmem:[%s702_s1 + $0x18] sm:$0xff]  ;;  %v433_v12 = vld [vmem:[%s703_s0 + $0x14] sm:$0xf]  ;;  %v448_v16 = vld [vmem:[%s702_s1 + $0x8] sm:$0xff] }
   0x5   :  { %v335_v13 = vld [vmem:[%s703_s0 + $0x18] sm:$0xf0]  ;;  %v449_v15 = vld [vmem:[%s702_s1 + $0x10] sm:$0xff]  ;;  %v443_v17 = vld [vmem:[%s703_s0 + $0x64] sm:$0xf] }
   0x6   :  { %423 = vmatmul.msk.bf16.vlgmr.msra.gmra.mxu1 %vm179_vm0, %v330_v4  ;;  %205 = vmatpush.bf16.msra.mxu0 %v453_v5  ;;  %v338_v14 = vor.u32 %v433_v12, %v335_v13  ;;  %v375_v18 = vld [vmem:[%s703_s0 + $0x68] sm:$0xf0]  ;;  %v447_v20 = vld [vmem:[%s702_s1] sm:$0xff]  ;;  %v432_v22 = vld [vmem:[%s703_s0 + $0x4] sm:$0xf0] }
   0x7   :  { %457 = vmatpush.bf16.msra.mxu2 %v453_v5  ;;  %428 = vmatmul.msk.bf16.vlgmr.msra.gmra.mxu3 %vm179_vm0, %v370_v9  ;;  %v378_v19 = vor.u32 %v443_v17, %v375_v18  ;;  %v325_v21 = vld [vmem:[%s703_s0] sm:$0xf]  ;;  %v440_v24 = vld [vmem:[%s703_s0 + $0x44] sm:$0xf0]  ;;  %v435_v27 = vld [vmem:[%s703_s0 + $0x24] sm:$0xf] }
   0x8   :  { %v357_v23 = vld [vmem:[%s703_s0 + $0x40] sm:$0xf]  ;;  %v326_v25 = vor.u32 %v432_v22, %v325_v21  ;;  %v343_v28 = vld [vmem:[%s703_s0 + $0x28] sm:$0xf0]  ;;  %v445_v30 = vld [vmem:[%s703_s0 + $0x74] sm:$0xf] }
   0x9   :  { %v358_v26 = vor.u32 %v440_v24, %v357_v23  ;;  %v346_v29 = vor.u32 %v435_v27, %v343_v28  ;;  %v383_v31 = vld [vmem:[%s703_s0 + $0x78] sm:$0xf0]  ;;  %v333_v33 = vld [vmem:[%s703_s0 + $0x10] sm:$0xf]  ;;  %v434_v34 = vld [vmem:[%s703_s0 + $0x14] sm:$0xf0] }
   0xa   :  { %206 = vmatpush.bf16.msra.mxu0 %v452_v6  ;;  %v386_v32 = vor.u32 %v445_v30, %v383_v31  ;;  %v365_v35 = vld [vmem:[%s703_s0 + $0x50] sm:$0xf]  ;;  %v442_v36 = vld [vmem:[%s703_s0 + $0x54] sm:$0xf0]  ;;  %v334_v37 = vor.u32 %v434_v34, %v333_v33  ;;  %v437_v39 = vld [vmem:[%s703_s0 + $0x34] sm:$0xf] }
   0xb   :  { %458 = vmatpush.bf16.msra.mxu2 %v452_v6  ;;  %v366_v38 = vor.u32 %v442_v36, %v365_v35  ;;  %v351_v40 = vld [vmem:[%s703_s0 + $0x38] sm:$0xf0]  ;;  %v341_v42 = vld [vmem:[%s703_s0 + $0x20] sm:$0xf]  ;;  %v436_v43 = vld [vmem:[%s703_s0 + $0x24] sm:$0xf0] }
   0xc   :  { %v354_v41 = vor.u32 %v437_v39, %v351_v40  ;;  %v373_v44 = vld [vmem:[%s703_s0 + $0x60] sm:$0xf]  ;;  %v444_v45 = vld [vmem:[%s703_s0 + $0x64] sm:$0xf0]  ;;  %v342_v46 = vor.u32 %v436_v43, %v341_v42  ;;  %v439_v48 = vld [vmem:[%s703_s0 + $0x44] sm:$0xf] }
   0xd   :  { %v374_v47 = vor.u32 %v444_v45, %v373_v44  ;;  %v359_v49 = vld [vmem:[%s703_s0 + $0x48] sm:$0xf0]  ;;  %v349_v51 = vld [vmem:[%s703_s0 + $0x30] sm:$0xf]  ;;  %v438_v52 = vld [vmem:[%s703_s0 + $0x34] sm:$0xf0] }
   0xe   :  { %207 = vmatpush.bf16.msra.mxu0 %v451_v10  ;;  %v362_v50 = vor.u32 %v439_v48, %v359_v49  ;;  %v381_v53 = vld [vmem:[%s703_s0 + $0x70] sm:$0xf]  ;;  %v446_v54 = vld [vmem:[%s703_s0 + $0x74] sm:$0xf0]  ;;  %v350_v55 = vor.u32 %v438_v52, %v349_v51  ;;  %v620_v61 = vld [vmem:[%s704_s2] ss:$0 sm:$0xff] }
   0xf   :  { %459 = vmatpush.bf16.msra.mxu2 %v451_v10  ;;  %v382_v56 = vor.u32 %v446_v54, %v381_v53 }
  0x12   :  { %208 = vmatpush.bf16.msra.mxu0 %v450_v11 }
  0x13   :  { %460 = vmatpush.bf16.msra.mxu2 %v450_v11 }
  0x16   :  { %424 = vmatmul.msk.bf16.gmra.mxu1 %vm179_vm0, %v338_v14  ;;  %209 = vmatpush.bf16.msra.mxu0 %v449_v15 }
  0x17   :  { %461 = vmatpush.bf16.msra.mxu2 %v449_v15  ;;  %429 = vmatmul.msk.bf16.gmra.mxu3 %vm179_vm0, %v378_v19 }
  0x1a   :  { %210 = vmatpush.bf16.msra.mxu0 %v448_v16 }
  0x1b   :  { %462 = vmatpush.bf16.msra.mxu2 %v448_v16 }
  0x1e   :  { %211 = vmatpush.bf16.msra.mxu0 %v447_v20 }
  0x1f   :  { %463 = vmatpush.bf16.msra.mxu2 %v447_v20 }
  0x21   :  { %212 = vmatmul.bf16.vlgmr.msra.gmra.mxu0 %v326_v25 }
  0x22   :  { %232 = vmatmul.bf16.vlgmr.msra.gmra.mxu2 %v358_v26 }
  0x26   :  { %425 = vmatmul.msk.bf16.gmra.mxu1 %vm179_vm0, %v346_v29 }
  0x27   :  { %430 = vmatmul.msk.bf16.gmra.mxu3 %vm179_vm0, %v386_v32 }
  0x31   :  { %217 = vmatmul.bf16.gmra.mxu0 %v334_v37 }
  0x32   :  { %237 = vmatmul.bf16.gmra.mxu2 %v366_v38 }
  0x36   :  { %426 = vmatmul.msk.bf16.gmra.mxu1 %vm179_vm0, %v354_v41 }
  0x41   :  { %222 = vmatmul.bf16.gmra.mxu0 %v342_v46 }
  0x42   :  { %242 = vmatmul.bf16.gmra.mxu2 %v374_v47 }
  0x46   :  { %427 = vmatmul.msk.bf16.gmra.mxu1 %vm179_vm0, %v362_v50 }
  0x51   :  { %227 = vmatmul.bf16.gmra.mxu0 %v350_v55 }
  0x52   :  { %247 = vmatmul.bf16.gmra.mxu2 %v382_v56 }
  0x83   :  { %v262_v57 = vpop.f32.mrf.mxu1 }
  0x8a   :  { %v287_v8 = vpop.f32.mrf.mxu3 }
  0x8b   :  { %v264_v58 = vpop.f32.mrf.mxu1 }
  0x92   :  { %v289_v17 = vpop.f32.mrf.mxu3 }
  0x93   :  { %v267_v59 = vpop.f32.mrf.mxu1 }
  0x9a   :  { %v292_v27 = vpop.f32.mrf.mxu3 }
  0x9b   :  { %v269_v60 = vpop.f32.mrf.mxu1 }
  0x9e   :  { %v213_v62 = vpop.f32.mrf.mxu0 }
  0x9f   :  { %v214_v63 = vadd.f32 %v620_v61, %v213_v62 }
  0xa1   :  { %v263_v0 = vadd.f32 %v262_v57, %v214_v63 }
  0xa2   :  { %v294_v38 = vpop.f32.mrf.mxu3 }
  0xa3   :  { %303 = vst.msk [vmem:[%s705_s3] sm:$0xff] %vm302_vm1, %v263_v0  ;;  %v272_v1 = vpop.f32.mrf.mxu1 }
  0xa5   :  { %v233_v2 = vpop.f32.mrf.mxu2 }
  0xa6   :  { %v215_v3 = vpop.f32.mrf.mxu0  ;;  %v234_v28 = vadd.f32 %v620_v61, %v233_v2 }
  0xa7   :  { %v216_v4 = vadd.f32 %v620_v61, %v215_v3 }
  0xa9   :  { %v265_v5 = vadd.f32 %v264_v58, %v216_v4 }
  0xaa   :  { %v297_v47 = vpop.f32.mrf.mxu3 }
  0xab   :  { %304 = vst.msk [vmem:[%s705_s3 + $0x8] sm:$0xff] %vm302_vm1, %v265_v5  ;;  %v274_v6 = vpop.f32.mrf.mxu1 }
  0xad   :  { %v235_v7 = vpop.f32.mrf.mxu2 }
  0xae   :  { %v218_v9 = vpop.f32.mrf.mxu0  ;;  %v236_v37 = vadd.f32 %v620_v61, %v235_v7 }
  0xaf   :  { %v219_v10 = vadd.f32 %v620_v61, %v218_v9 }
  0xb1   :  { %v268_v11 = vadd.f32 %v267_v59, %v219_v10 }
  0xb2   :  { %v299_v56 = vpop.f32.mrf.mxu3 }
  0xb3   :  { %305 = vst.msk [vmem:[%s705_s3 + $0x10] sm:$0xff] %vm302_vm1, %v268_v11  ;;  %v277_v12 = vpop.f32.mrf.mxu1 }
  0xb5   :  { %v238_v13 = vpop.f32.mrf.mxu2 }
  0xb6   :  { %v239_v14 = vadd.f32 %v620_v61, %v238_v13  ;;  %v220_v15 = vpop.f32.mrf.mxu0 }
  0xb7   :  { %v221_v16 = vadd.f32 %v620_v61, %v220_v15 }
  0xb8   :  { %v288_v18 = vadd.f32 %v287_v8, %v239_v14 }
  0xb9   :  { %v270_v19 = vadd.f32 %v269_v60, %v221_v16 }
  0xba   :  { %313 = vst.msk [vmem:[%s705_s3 + $0x50] sm:$0xff] %vm302_vm1, %v288_v18 }
  0xbb   :  { %306 = vst.msk [vmem:[%s705_s3 + $0x18] sm:$0xff] %vm302_vm1, %v270_v19  ;;  %v279_v20 = vpop.f32.mrf.mxu1 }
  0xbd   :  { %v240_v21 = vpop.f32.mrf.mxu2 }
  0xbe   :  { %v241_v22 = vadd.f32 %v620_v61, %v240_v21  ;;  %v223_v23 = vpop.f32.mrf.mxu0 }
  0xbf   :  { %v224_v24 = vadd.f32 %v620_v61, %v223_v23 }
  0xc0   :  { %v290_v25 = vadd.f32 %v289_v17, %v241_v22 }
  0xc1   :  { %v273_v26 = vadd.f32 %v272_v1, %v224_v24 }
  0xc2   :  { %314 = vst.msk [vmem:[%s705_s3 + $0x58] sm:$0xff] %vm302_vm1, %v290_v25 }
  0xc3   :  { %307 = vst.msk [vmem:[%s705_s3 + $0x20] sm:$0xff] %vm302_vm1, %v273_v26  ;;  %v282_v29 = vpop.f32.mrf.mxu1 }
  0xc4   :  { %v283_v30 = vadd.f32 %v282_v29, %v234_v28 }
  0xc5   :  { %v243_v31 = vpop.f32.mrf.mxu2 }
  0xc6   :  { %311 = vst.msk [vmem:[%s705_s3 + $0x40] sm:$0xff] %vm302_vm1, %v283_v30  ;;  %v244_v32 = vadd.f32 %v620_v61, %v243_v31  ;;  %v225_v33 = vpop.f32.mrf.mxu0 }
  0xc7   :  { %v226_v34 = vadd.f32 %v620_v61, %v225_v33 }
  0xc8   :  { %v293_v35 = vadd.f32 %v292_v27, %v244_v32 }
  0xc9   :  { %v275_v36 = vadd.f32 %v274_v6, %v226_v34 }
  0xca   :  { %315 = vst.msk [vmem:[%s705_s3 + $0x60] sm:$0xff] %vm302_vm1, %v293_v35 }
  0xcb   :  { %308 = vst.msk [vmem:[%s705_s3 + $0x28] sm:$0xff] %vm302_vm1, %v275_v36  ;;  %v284_v39 = vpop.f32.mrf.mxu1 }
  0xcc   :  { %v285_v40 = vadd.f32 %v284_v39, %v236_v37 }
  0xcd   :  { %v245_v41 = vpop.f32.mrf.mxu2 }
  0xce   :  { %312 = vst.msk [vmem:[%s705_s3 + $0x48] sm:$0xff] %vm302_vm1, %v285_v40  ;;  %v246_v42 = vadd.f32 %v620_v61, %v245_v41  ;;  %v228_v43 = vpop.f32.mrf.mxu0 }
  0xcf   :  { %v229_v44 = vadd.f32 %v620_v61, %v228_v43 }
  0xd0   :  { %v295_v45 = vadd.f32 %v294_v38, %v246_v42 }
  0xd1   :  { %v278_v46 = vadd.f32 %v277_v12, %v229_v44 }
  0xd2   :  { %316 = vst.msk [vmem:[%s705_s3 + $0x68] sm:$0xff] %vm302_vm1, %v295_v45 }
  0xd3   :  { %309 = vst.msk [vmem:[%s705_s3 + $0x30] sm:$0xff] %vm302_vm1, %v278_v46 }
  0xd5   :  { %v248_v48 = vpop.f32.mrf.mxu2 }
  0xd6   :  { %v249_v49 = vadd.f32 %v620_v61, %v248_v48  ;;  %v230_v50 = vpop.f32.mrf.mxu0 }
  0xd7   :  { %v231_v51 = vadd.f32 %v620_v61, %v230_v50 }
  0xd8   :  { %v298_v52 = vadd.f32 %v297_v47, %v249_v49 }
  0xd9   :  { %v280_v53 = vadd.f32 %v279_v20, %v231_v51 }
  0xda   :  { %317 = vst.msk [vmem:[%s705_s3 + $0x70] sm:$0xff] %vm302_vm1, %v298_v52 }
  0xdb   :  { %310 = vst.msk [vmem:[%s705_s3 + $0x38] sm:$0xff] %vm302_vm1, %v280_v53 }
  0xdd   :  { %v250_v54 = vpop.f32.mrf.mxu2 }
  0xde   :  { %v251_v55 = vadd.f32 %v620_v61, %v250_v54 }
  0xe0   :  { %v300_v57 = vadd.f32 %v299_v56, %v251_v55 }
  0xe2   :  { %318 = vst.msk [vmem:[%s705_s3 + $0x78] sm:$0xff] %vm302_vm1, %v300_v57 }

// kernel: hierarchical_vae_forward.41
= control target key start
LH: loop header
LB: loop body
LE: loop exit
PB: predicated region body
PF: predicated region fallthrough
CT: control target
= control target key end

     0   :  { %vm86_vm0 = vcmask 261120   ;;  %vm160_vm1 = vcmask 130048   ;;  %v344_v24 = vmov 0.0   ;;  %vm215_vm2 = vcmask 122880   ;;  %s539_s1 = inlined_call_operand.vmem [shape: bf16[32,16], index: 1, kind: input, shape index: {}]   ;;  %s540_s0 = inlined_call_operand.vmem [shape: bf16[128,32], index: 0, kind: input, shape index: {}]   ;;  %s541_s2 = inlined_call_operand.vmem [shape: f32[128,16], index: 2, kind: output, shape index: {0}]   ;;  %s542_s3 = inlined_call_operand.vmem [shape: f32[8,16], index: 3, kind: output, shape index: {1}]  }
   0x1   :  { %v336_v0 = vld [vmem:[%s539_s1 + $0x8] sm:$0xff]  ;;  %v335_v1 = vld [vmem:[%s539_s1] sm:$0xff]  ;;  %v329_v3 = vld [vmem:[%s540_s0 + $0x10] sm:$0xff]  ;;  %177 = vst.msk [vmem:[%s542_s3] sm:$0xff] %vm160_vm1, %v344_v24 }
   0x2   :  { %117 = vmatpush.bf16.msra.mxu0 %v336_v0  ;;  %337 = vmatpush.bf16.msra.mxu1 %v336_v0  ;;  %v327_v2 = vld [vmem:[%s540_s0] sm:$0xff]  ;;  %v333_v5 = vld [vmem:[%s540_s0 + $0x30] sm:$0xff]  ;;  %v328_v6 = vld [vmem:[%s540_s0 + $0x8] sm:$0xff] }
   0x3   :  { %338 = vmatpush.bf16.msra.mxu2 %v336_v0  ;;  %339 = vmatpush.bf16.msra.mxu3 %v336_v0  ;;  %v331_v4 = vld [vmem:[%s540_s0 + $0x20] sm:$0xff]  ;;  %v330_v7 = vld [vmem:[%s540_s0 + $0x18] sm:$0xff]  ;;  %v332_v8 = vld [vmem:[%s540_s0 + $0x28] sm:$0xff] }
   0x4   :  { %v334_v9 = vld [vmem:[%s540_s0 + $0x38] sm:$0xff] }
   0x6   :  { %118 = vmatpush.bf16.msra.mxu0 %v335_v1  ;;  %340 = vmatpush.bf16.msra.mxu1 %v335_v1 }
   0x7   :  { %341 = vmatpush.bf16.msra.mxu2 %v335_v1  ;;  %342 = vmatpush.bf16.msra.mxu3 %v335_v1 }
   0x9   :  { %319 = vmatmul.msk.bf16.vlgmr.msra.gmra.mxu0 %vm86_vm0, %v327_v2  ;;  %321 = vmatmul.msk.bf16.vlgmr.msra.gmra.mxu1 %vm86_vm0, %v329_v3 }
   0xa   :  { %323 = vmatmul.msk.bf16.vlgmr.msra.gmra.mxu2 %vm86_vm0, %v331_v4  ;;  %325 = vmatmul.msk.bf16.vlgmr.msra.gmra.mxu3 %vm86_vm0, %v333_v5 }
  0x19   :  { %320 = vmatmul.msk.bf16.gmra.mxu0 %vm86_vm0, %v328_v6  ;;  %322 = vmatmul.msk.bf16.gmra.mxu1 %vm86_vm0, %v330_v7 }
  0x1a   :  { %324 = vmatmul.msk.bf16.gmra.mxu2 %vm86_vm0, %v332_v8  ;;  %326 = vmatmul.msk.bf16.gmra.mxu3 %vm86_vm0, %v334_v9 }
  0x86   :  { %v120_v10 = vpop.f32.mrf.mxu0  ;;  %v130_v11 = vpop.f32.mrf.mxu1 }
  0x87   :  { %161 = vst.msk [vmem:[%s541_s2] sm:$0xff] %vm160_vm1, %v120_v10  ;;  %v217_v21 = vmul.f32 %v120_v10, %v120_v10  ;;  %v178_v25 = vsel %vm160_vm1, %v120_v10, 0.0  ;;  %v221_v37 = vmul.f32 %v130_v11, %v130_v11  ;;  %v185_v42 = vsel %vm160_vm1, %v130_v11, 0.0 }
  0x88   :  { %165 = vst.msk [vmem:[%s541_s2 + $0x20] sm:$0xff] %vm160_vm1, %v130_v11 }
  0x89   :  { %v233_v29 = vsel %vm160_vm1, %v217_v21, 0.0  ;;  %v240_v47 = vsel %vm160_vm1, %v221_v37, 0.0 }
  0x8d   :  { %v411_v12 = vpop.f32.mrf.mxu2  ;;  %v413_v13 = vpop.f32.mrf.mxu3 }
  0x8e   :  { %v122_v14 = vpop.f32.mrf.mxu0  ;;  %v132_v15 = vpop.f32.mrf.mxu1  ;;  %169 = vst.msk [vmem:[%s541_s2 + $0x40] sm:$0xff] %vm160_vm1, %v411_v12  ;;  %v225_v59 = vmul.f32 %v411_v12, %v411_v12  ;;  %v193_v0 = vsel %vm160_vm1, %v411_v12, 0.0 }
  0x8f   :  { %162 = vst.msk [vmem:[%s541_s2 + $0x8] sm:$0xff] %vm160_vm1, %v122_v14  ;;  %v218_v20 = vmul.f32 %v122_v14, %v122_v14  ;;  %v179_v22 = vsel %vm160_vm1, %v122_v14, 0.0  ;;  %v222_v43 = vmul.f32 %v132_v15, %v132_v15  ;;  %v187_v48 = vsel %vm160_vm1, %v132_v15, 0.0 }
  0x90   :  { %166 = vst.msk [vmem:[%s541_s2 + $0x28] sm:$0xff] %vm160_vm1, %v132_v15  ;;  %v180_v28 = vadd.f32 %v179_v22, %v178_v25  ;;  %v248_v5 = vsel %vm160_vm1, %v225_v59, 0.0 }
  0x91   :  { %173 = vst.msk [vmem:[%s541_s2 + $0x60] sm:$0xff] %vm160_vm1, %v413_v13  ;;  %v234_v26 = vsel %vm160_vm1, %v218_v20, 0.0  ;;  %v242_v52 = vsel %vm160_vm1, %v222_v43, 0.0 }
  0x92   :  { %v235_v33 = vadd.f32 %v234_v26, %v233_v29 }
  0x95   :  { %v433_v16 = vpop.f32.mrf.mxu2  ;;  %v435_v17 = vpop.f32.mrf.mxu3 }
  0x96   :  { %v125_v18 = vpop.f32.mrf.mxu0  ;;  %v135_v19 = vpop.f32.mrf.mxu1  ;;  %170 = vst.msk [vmem:[%s541_s2 + $0x48] sm:$0xff] %vm160_vm1, %v433_v16  ;;  %v226_v1 = vmul.f32 %v433_v16, %v433_v16  ;;  %v195_v6 = vsel %vm160_vm1, %v433_v16, 0.0  ;;  %v201_v16 = vsel %vm160_vm1, %v413_v13, 0.0 }
  0x97   :  { %163 = vst.msk [vmem:[%s541_s2 + $0x10] sm:$0xff] %vm160_vm1, %v125_v18  ;;  %v219_v23 = vmul.f32 %v125_v18, %v125_v18  ;;  %v181_v27 = vsel %vm160_vm1, %v125_v18, 0.0  ;;  %v223_v49 = vmul.f32 %v135_v19, %v135_v19  ;;  %v189_v53 = vsel %vm160_vm1, %v135_v19, 0.0 }
  0x98   :  { %167 = vst.msk [vmem:[%s541_s2 + $0x30] sm:$0xff] %vm160_vm1, %v135_v19  ;;  %v182_v34 = vadd.f32 %v181_v27, %v180_v28  ;;  %v250_v10 = vsel %vm160_vm1, %v226_v1, 0.0  ;;  %v229_v18 = vmul.f32 %v413_v13, %v413_v13  ;;  %v203_v28 = vsel %vm160_vm1, %v435_v17, 0.0 }
  0x99   :  { %174 = vst.msk [vmem:[%s541_s2 + $0x68] sm:$0xff] %vm160_vm1, %v435_v17  ;;  %v236_v30 = vsel %vm160_vm1, %v219_v23, 0.0  ;;  %v244_v60 = vsel %vm160_vm1, %v223_v49, 0.0  ;;  %v230_v23 = vmul.f32 %v435_v17, %v435_v17 }
  0x9a   :  { %v237_v40 = vadd.f32 %v236_v30, %v235_v33  ;;  %v256_v27 = vsel %vm160_vm1, %v229_v18, 0.0 }
  0x9b   :  { %v258_v33 = vsel %vm160_vm1, %v230_v23, 0.0 }
  0x9d   :  { %v145_v31 = vpop.f32.mrf.mxu2  ;;  %v465_v32 = vpop.f32.mrf.mxu3 }
  0x9e   :  { %v127_v35 = vpop.f32.mrf.mxu0  ;;  %v137_v36 = vpop.f32.mrf.mxu1  ;;  %171 = vst.msk [vmem:[%s541_s2 + $0x50] sm:$0xff] %vm160_vm1, %v145_v31  ;;  %v227_v7 = vmul.f32 %v145_v31, %v145_v31  ;;  %v197_v11 = vsel %vm160_vm1, %v145_v31, 0.0  ;;  %v231_v29 = vmul.f32 %v465_v32, %v465_v32  ;;  %v205_v13 = vsel %vm160_vm1, %v465_v32, 0.0 }
  0x9f   :  { %164 = vst.msk [vmem:[%s541_s2 + $0x18] sm:$0xff] %vm160_vm1, %v127_v35  ;;  %v183_v38 = vsel %vm160_vm1, %v127_v35, 0.0  ;;  %v220_v39 = vmul.f32 %v127_v35, %v127_v35  ;;  %v224_v54 = vmul.f32 %v137_v36, %v137_v36  ;;  %v191_v61 = vsel %vm160_vm1, %v137_v36, 0.0 }
  0xa0   :  { %v184_v41 = vadd.f32 %v183_v38, %v182_v34  ;;  %168 = vst.msk [vmem:[%s541_s2 + $0x38] sm:$0xff] %vm160_vm1, %v137_v36  ;;  %v252_v19 = vsel %vm160_vm1, %v227_v7, 0.0  ;;  %v260_v37 = vsel %vm160_vm1, %v231_v29, 0.0 }
  0xa1   :  { %v238_v44 = vsel %vm160_vm1, %v220_v39, 0.0  ;;  %175 = vst.msk [vmem:[%s541_s2 + $0x70] sm:$0xff] %vm160_vm1, %v465_v32  ;;  %v246_v2 = vsel %vm160_vm1, %v224_v54, 0.0 }
  0xa2   :  { %v186_v45 = vadd.f32 %v185_v42, %v184_v41  ;;  %v239_v46 = vadd.f32 %v238_v44, %v237_v40 }
  0xa4   :  { %v241_v50 = vadd.f32 %v240_v47, %v239_v46  ;;  %v188_v51 = vadd.f32 %v187_v48, %v186_v45 }
  0xa5   :  { %v147_v55 = vpop.f32.mrf.mxu2  ;;  %v157_v56 = vpop.f32.mrf.mxu3 }
  0xa6   :  { %v190_v57 = vadd.f32 %v189_v53, %v188_v51  ;;  %v243_v58 = vadd.f32 %v242_v52, %v241_v50  ;;  %172 = vst.msk [vmem:[%s541_s2 + $0x58] sm:$0xff] %vm160_vm1, %v147_v55  ;;  %v228_v12 = vmul.f32 %v147_v55, %v147_v55  ;;  %v199_v20 = vsel %vm160_vm1, %v147_v55, 0.0 }
  0xa7   :  { %176 = vst.msk [vmem:[%s541_s2 + $0x78] sm:$0xff] %vm160_vm1, %v157_v56  ;;  %v232_v34 = vmul.f32 %v157_v56, %v157_v56  ;;  %v207_v38 = vsel %vm160_vm1, %v157_v56, 0.0 }
  0xa8   :  { %v192_v62 = vadd.f32 %v191_v61, %v190_v57  ;;  %v245_v63 = vadd.f32 %v244_v60, %v243_v58  ;;  %v254_v24 = vsel %vm160_vm1, %v228_v12, 0.0 }
  0xa9   :  { %v262_v17 = vsel %vm160_vm1, %v232_v34, 0.0 }
  0xaa   :  { %v194_v3 = vadd.f32 %v193_v0, %v192_v62  ;;  %v247_v4 = vadd.f32 %v246_v2, %v245_v63 }
  0xac   :  { %v249_v8 = vadd.f32 %v248_v5, %v247_v4  ;;  %v196_v9 = vadd.f32 %v195_v6, %v194_v3 }
  0xae   :  { %v198_v14 = vadd.f32 %v197_v11, %v196_v9  ;;  %v251_v15 = vadd.f32 %v250_v10, %v249_v8 }
  0xb0   :  { %v253_v21 = vadd.f32 %v252_v19, %v251_v15  ;;  %v200_v22 = vadd.f32 %v199_v20, %v198_v14 }
  0xb2   :  { %v202_v25 = vadd.f32 %v201_v16, %v200_v22  ;;  %v255_v26 = vadd.f32 %v254_v24, %v253_v21 }
  0xb4   :  { %v257_v30 = vadd.f32 %v256_v27, %v255_v26  ;;  %v204_v31 = vadd.f32 %v203_v28, %v202_v25 }
  0xb6   :  { %v206_v35 = vadd.f32 %v205_v13, %v204_v31  ;;  %v259_v36 = vadd.f32 %v258_v33, %v257_v30 }
  0xb8   :  { %v261_v39 = vadd.f32 %v260_v37, %v259_v36  ;;  %v208_v40 = vadd.f32 %v207_v38, %v206_v35 }
  0xba   :  { %v209_v41 = vrot.slane %v208_v40, 4  ;;  %v263_v42 = vadd.f32 %v262_v17, %v261_v39 }
  0xbc   :  { %v210_v43 = vadd.f32 %v209_v41, %v208_v40  ;;  %v264_v44 = vrot.slane %v263_v42, 4 }
  0xbe   :  { %v211_v45 = vrot.slane %v210_v43, 2  ;;  %v265_v46 = vadd.f32 %v264_v44, %v263_v42 }
  0xc0   :  { %v212_v47 = vadd.f32 %v211_v45, %v210_v43  ;;  %v266_v48 = vrot.slane %v265_v46, 2 }
  0xc2   :  { %v213_v32 = vrot.slane %v212_v47, 1  ;;  %v267_v49 = vadd.f32 %v266_v48, %v265_v46 }
  0xc4   :  { %v214_v50 = vadd.f32 %v213_v32, %v212_v47  ;;  %v268_v51 = vrot.slane %v267_v49, 1 }
  0xc6   :  { %216 = vst.msk [vmem:[%s542_s3] sm:$0x1] %vm215_vm2, %v214_v50  ;;  %v269_v52 = vadd.f32 %v268_v51, %v267_v49 }
  0xc8   :  { %270 = vst.msk [vmem:[%s542_s3 + $0x1] sm:$0x1] %vm215_vm2, %v269_v52 }

// kernel: mul.373
= control target key start
LH: loop header
LB: loop body
LE: loop exit
PB: predicated region body
PF: predicated region fallthrough
CT: control target
= control target key end

     0   :  { %s46_s0 = inlined_call_operand.vmem [shape: f32[2,64], index: 0, kind: input, shape index: {}]   ;;  %s47_s1 = inlined_call_operand.vmem [shape: f32[2,2,2,64], index: 1, kind: output, shape index: {}]  }
   0x1   :  { %v4_v0 = vld [vmem:[%s46_s0] ss:$0 sm:$0xff]  ;;  %v14_v1 = vld [vmem:[%s46_s0 + $0x1] ss:$0 sm:$0xff] }
   0x2   :  { %5 = vst [vmem:[%s47_s1] sm:$0x3] %v4_v0 }
   0x3   :  { %15 = vst [vmem:[%s47_s1 + $0x4] sm:$0x3] %v14_v1 }
   0x4   :  { %16 = vst [vmem:[%s47_s1 + $0x2] sm:$0x3] %v4_v0 }
   0x5   :  { %17 = vst [vmem:[%s47_s1 + $0x6] sm:$0x3] %v14_v1 }

// kernel: tile.57
= control target key start
LH: loop header
LB: loop body
LE: loop exit
PB: predicated region body
PF: predicated region fallthrough
CT: control target
= control target key end

     0   :  { %s22_s0 = inlined_call_operand.vmem [shape: f32[64], index: 0, kind: input, shape index: {}]   ;;  %s23_s1 = inlined_call_operand.vmem [shape: f32[4,64], index: 1, kind: output, shape index: {}]  }
   0x1   :  { %v4_v0 = vld [vmem:[%s22_s0] ss:$0 sm:$0xff] }
   0x2   :  { %5 = vst [vmem:[%s23_s1] sm:$0xf] %v4_v0 }

// kernel: tile.67
= control target key start
LH: loop header
LB: loop body
LE: loop exit
PB: predicated region body
PF: predicated region fallthrough
CT: control target
= control target key end

     0   :  { %s22_s0 = inlined_call_operand.vmem [shape: f32[32], index: 0, kind: input, shape index: {}]   ;;  %s23_s1 = inlined_call_operand.vmem [shape: f32[4,32], index: 1, kind: output, shape index: {}]  }
   0x1   :  { %v4_v0 = vld [vmem:[%s22_s0] ss:$0 sm:$0xff] }
   0x2   :  { %5 = vst [vmem:[%s23_s1] sm:$0xf] %v4_v0 }

// kernel: tile.77
= control target key start
LH: loop header
LB: loop body
LE: loop exit
PB: predicated region body
PF: predicated region fallthrough
CT: control target
= control target key end

     0   :  { %s22_s0 = inlined_call_operand.vmem [shape: f32[16], index: 0, kind: input, shape index: {}]   ;;  %s23_s1 = inlined_call_operand.vmem [shape: f32[4,16], index: 1, kind: output, shape index: {}]  }
   0x1   :  { %v4_v0 = vld [vmem:[%s22_s0] ss:$0 sm:$0xff] }
   0x2   :  { %5 = vst [vmem:[%s23_s1] sm:$0xf] %v4_v0 }

// kernel: hierarchical_vae_forward.43
= control target key start
LH: loop header
LB: loop body
LE: loop exit
PB: predicated region body
PF: predicated region fallthrough
CT: control target
= control target key end

     0   :  { %9 = vsyncpa [#allocation3], 0  ;;  %s374_s15 = smov [#allocation2]   ;;  %s375_s17 = smov 64   ;;  %s569_s0 = inlined_call_operand.vmem [shape: bf16[128,16], index: 0, kind: input, shape index: {}]   ;;  %s570_s1 = inlined_call_operand.hbm [shape: bf16[16,32], index: 1, kind: input, shape index: {}]   ;;  %s571_s2 = inlined_call_operand.vmem [shape: f32[128,32], index: 2, kind: output, shape index: {0}]   ;;  %s572_s3 = inlined_call_operand.vmem [shape: f32[8,32], index: 3, kind: output, shape index: {1}]  }
   0x1   :  { %s16_s14 = sshll.u32 %s570_s1, 4  ;;  %s18_s16 = sshll.u32 %s374_s15, 4  ;;  %s17_s14 = int_to_ptr.hbm [resolvable:$true] %s16_s14  ;;  %s19_s16 = int_to_ptr.vmem [resolvable:$true] %s18_s16 }
   0x2   :  { %s376_s18 = smov 4  }
   0x3   :  { %24 = dma.hbm_to_vmem [thread:$0]  %s17_s14, 128, %s19_s16, [#allocation3], %s375_s17, %s375_s17, %s376_s18  }
   0x4   :  { %372 = dma.done.wait [#allocation3], 128  }
   0x5   :  { %373 = vsyncadd [#allocation3], 4294967168  ;;  %v340_v0 = vld [vmem:[#allocation2] sm:$0xff]  ;;  %v334_v2 = vld [vmem:[%s569_s0 + $0x10] sm:$0xff]  ;;  %vm94_vm0 = vcmask 130048   ;;  %vm168_vm1 = vcmask 261120  }
   0x6   :  { %v332_v1 = vld [vmem:[%s569_s0] sm:$0xff]  ;;  %126 = vmatpush.bf16.msra.mxu0 %v340_v0  ;;  %341 = vmatpush.bf16.msra.mxu1 %v340_v0  ;;  %v338_v4 = vld [vmem:[%s569_s0 + $0x30] sm:$0xff]  ;;  %v333_v5 = vld [vmem:[%s569_s0 + $0x8] sm:$0xff]  ;;  %v377_v23 = vmov 0.0   ;;  %vm223_vm2 = vcmask 253952  }
   0x7   :  { %v336_v3 = vld [vmem:[%s569_s0 + $0x20] sm:$0xff]  ;;  %342 = vmatpush.bf16.msra.mxu2 %v340_v0  ;;  %343 = vmatpush.bf16.msra.mxu3 %v340_v0  ;;  %v335_v6 = vld [vmem:[%s569_s0 + $0x18] sm:$0xff]  ;;  %v337_v7 = vld [vmem:[%s569_s0 + $0x28] sm:$0xff]  ;;  %185 = vst.msk [vmem:[%s572_s3] sm:$0xff] %vm168_vm1, %v377_v23 }
   0x8   :  { %v339_v8 = vld [vmem:[%s569_s0 + $0x38] sm:$0xff] }
   0x9   :  { %324 = vmatmul.msk.bf16.vlgmr.msra.gmra.mxu0 %vm94_vm0, %v332_v1  ;;  %326 = vmatmul.msk.bf16.vlgmr.msra.gmra.mxu1 %vm94_vm0, %v334_v2 }
   0xa   :  { %328 = vmatmul.msk.bf16.vlgmr.msra.gmra.mxu2 %vm94_vm0, %v336_v3  ;;  %330 = vmatmul.msk.bf16.vlgmr.msra.gmra.mxu3 %vm94_vm0, %v338_v4 }
  0x19   :  { %325 = vmatmul.msk.bf16.gmra.mxu0 %vm94_vm0, %v333_v5  ;;  %327 = vmatmul.msk.bf16.gmra.mxu1 %vm94_vm0, %v335_v6 }
  0x1a   :  { %329 = vmatmul.msk.bf16.gmra.mxu2 %vm94_vm0, %v337_v7  ;;  %331 = vmatmul.msk.bf16.gmra.mxu3 %vm94_vm0, %v339_v8 }
  0x86   :  { %v128_v9 = vpop.f32.mrf.mxu0  ;;  %v138_v10 = vpop.f32.mrf.mxu1 }
  0x87   :  { %169 = vst.msk [vmem:[%s571_s2] sm:$0xff] %vm168_vm1, %v128_v9  ;;  %v225_v20 = vmul.f32 %v128_v9, %v128_v9  ;;  %v186_v24 = vsel %vm168_vm1, %v128_v9, 0.0  ;;  %v229_v36 = vmul.f32 %v138_v10, %v138_v10  ;;  %v193_v41 = vsel %vm168_vm1, %v138_v10, 0.0 }
  0x88   :  { %173 = vst.msk [vmem:[%s571_s2 + $0x20] sm:$0xff] %vm168_vm1, %v138_v10 }
  0x89   :  { %v241_v28 = vsel %vm168_vm1, %v225_v20, 0.0  ;;  %v248_v46 = vsel %vm168_vm1, %v229_v36, 0.0 }
  0x8d   :  { %v441_v11 = vpop.f32.mrf.mxu2  ;;  %v443_v12 = vpop.f32.mrf.mxu3 }
  0x8e   :  { %v130_v13 = vpop.f32.mrf.mxu0  ;;  %v140_v14 = vpop.f32.mrf.mxu1  ;;  %177 = vst.msk [vmem:[%s571_s2 + $0x40] sm:$0xff] %vm168_vm1, %v441_v11  ;;  %v233_v58 = vmul.f32 %v441_v11, %v441_v11  ;;  %v201_v63 = vsel %vm168_vm1, %v441_v11, 0.0 }
  0x8f   :  { %170 = vst.msk [vmem:[%s571_s2 + $0x8] sm:$0xff] %vm168_vm1, %v130_v13  ;;  %v226_v19 = vmul.f32 %v130_v13, %v130_v13  ;;  %v187_v21 = vsel %vm168_vm1, %v130_v13, 0.0  ;;  %v230_v42 = vmul.f32 %v140_v14, %v140_v14  ;;  %v195_v47 = vsel %vm168_vm1, %v140_v14, 0.0 }
  0x90   :  { %174 = vst.msk [vmem:[%s571_s2 + $0x28] sm:$0xff] %vm168_vm1, %v140_v14  ;;  %v188_v27 = vadd.f32 %v187_v21, %v186_v24  ;;  %v256_v4 = vsel %vm168_vm1, %v233_v58, 0.0 }
  0x91   :  { %181 = vst.msk [vmem:[%s571_s2 + $0x60] sm:$0xff] %vm168_vm1, %v443_v12  ;;  %v242_v25 = vsel %vm168_vm1, %v226_v19, 0.0  ;;  %v250_v51 = vsel %vm168_vm1, %v230_v42, 0.0 }
  0x92   :  { %v243_v32 = vadd.f32 %v242_v25, %v241_v28 }
  0x95   :  { %v463_v15 = vpop.f32.mrf.mxu2  ;;  %v465_v16 = vpop.f32.mrf.mxu3 }
  0x96   :  { %v133_v17 = vpop.f32.mrf.mxu0  ;;  %v143_v18 = vpop.f32.mrf.mxu1  ;;  %178 = vst.msk [vmem:[%s571_s2 + $0x48] sm:$0xff] %vm168_vm1, %v463_v15  ;;  %v234_v0 = vmul.f32 %v463_v15, %v463_v15  ;;  %v203_v5 = vsel %vm168_vm1, %v463_v15, 0.0  ;;  %v209_v15 = vsel %vm168_vm1, %v443_v12, 0.0 }
  0x97   :  { %171 = vst.msk [vmem:[%s571_s2 + $0x10] sm:$0xff] %vm168_vm1, %v133_v17  ;;  %v227_v22 = vmul.f32 %v133_v17, %v133_v17  ;;  %v189_v26 = vsel %vm168_vm1, %v133_v17, 0.0  ;;  %v231_v48 = vmul.f32 %v143_v18, %v143_v18  ;;  %v197_v52 = vsel %vm168_vm1, %v143_v18, 0.0 }
  0x98   :  { %175 = vst.msk [vmem:[%s571_s2 + $0x30] sm:$0xff] %vm168_vm1, %v143_v18  ;;  %v190_v33 = vadd.f32 %v189_v26, %v188_v27  ;;  %v258_v9 = vsel %vm168_vm1, %v234_v0, 0.0  ;;  %v237_v17 = vmul.f32 %v443_v12, %v443_v12  ;;  %v211_v27 = vsel %vm168_vm1, %v465_v16, 0.0 }
  0x99   :  { %182 = vst.msk [vmem:[%s571_s2 + $0x68] sm:$0xff] %vm168_vm1, %v465_v16  ;;  %v244_v29 = vsel %vm168_vm1, %v227_v22, 0.0  ;;  %v252_v59 = vsel %vm168_vm1, %v231_v48, 0.0  ;;  %v238_v22 = vmul.f32 %v465_v16, %v465_v16 }
  0x9a   :  { %v245_v39 = vadd.f32 %v244_v29, %v243_v32  ;;  %v264_v26 = vsel %vm168_vm1, %v237_v17, 0.0 }
  0x9b   :  { %v266_v32 = vsel %vm168_vm1, %v238_v22, 0.0 }
  0x9d   :  { %v153_v30 = vpop.f32.mrf.mxu2  ;;  %v495_v31 = vpop.f32.mrf.mxu3 }
  0x9e   :  { %v135_v34 = vpop.f32.mrf.mxu0  ;;  %v145_v35 = vpop.f32.mrf.mxu1  ;;  %179 = vst.msk [vmem:[%s571_s2 + $0x50] sm:$0xff] %vm168_vm1, %v153_v30  ;;  %v235_v6 = vmul.f32 %v153_v30, %v153_v30  ;;  %v205_v10 = vsel %vm168_vm1, %v153_v30, 0.0  ;;  %v239_v28 = vmul.f32 %v495_v31, %v495_v31  ;;  %v213_v12 = vsel %vm168_vm1, %v495_v31, 0.0 }
  0x9f   :  { %172 = vst.msk [vmem:[%s571_s2 + $0x18] sm:$0xff] %vm168_vm1, %v135_v34  ;;  %v191_v37 = vsel %vm168_vm1, %v135_v34, 0.0  ;;  %v228_v38 = vmul.f32 %v135_v34, %v135_v34  ;;  %v232_v53 = vmul.f32 %v145_v35, %v145_v35  ;;  %v199_v60 = vsel %vm168_vm1, %v145_v35, 0.0 }
  0xa0   :  { %v192_v40 = vadd.f32 %v191_v37, %v190_v33  ;;  %176 = vst.msk [vmem:[%s571_s2 + $0x38] sm:$0xff] %vm168_vm1, %v145_v35  ;;  %v260_v18 = vsel %vm168_vm1, %v235_v6, 0.0  ;;  %v268_v36 = vsel %vm168_vm1, %v239_v28, 0.0 }
  0xa1   :  { %v246_v43 = vsel %vm168_vm1, %v228_v38, 0.0  ;;  %183 = vst.msk [vmem:[%s571_s2 + $0x70] sm:$0xff] %vm168_vm1, %v495_v31  ;;  %v254_v1 = vsel %vm168_vm1, %v232_v53, 0.0 }
  0xa2   :  { %v194_v44 = vadd.f32 %v193_v41, %v192_v40  ;;  %v247_v45 = vadd.f32 %v246_v43, %v245_v39 }
  0xa4   :  { %v249_v49 = vadd.f32 %v248_v46, %v247_v45  ;;  %v196_v50 = vadd.f32 %v195_v47, %v194_v44 }
  0xa5   :  { %v155_v54 = vpop.f32.mrf.mxu2  ;;  %v165_v55 = vpop.f32.mrf.mxu3 }
  0xa6   :  { %v198_v56 = vadd.f32 %v197_v52, %v196_v50  ;;  %v251_v57 = vadd.f32 %v250_v51, %v249_v49  ;;  %180 = vst.msk [vmem:[%s571_s2 + $0x58] sm:$0xff] %vm168_vm1, %v155_v54  ;;  %v236_v11 = vmul.f32 %v155_v54, %v155_v54  ;;  %v207_v19 = vsel %vm168_vm1, %v155_v54, 0.0 }
  0xa7   :  { %184 = vst.msk [vmem:[%s571_s2 + $0x78] sm:$0xff] %vm168_vm1, %v165_v55  ;;  %v240_v33 = vmul.f32 %v165_v55, %v165_v55  ;;  %v215_v37 = vsel %vm168_vm1, %v165_v55, 0.0 }
  0xa8   :  { %v200_v61 = vadd.f32 %v199_v60, %v198_v56  ;;  %v253_v62 = vadd.f32 %v252_v59, %v251_v57  ;;  %v262_v23 = vsel %vm168_vm1, %v236_v11, 0.0 }
  0xa9   :  { %v270_v16 = vsel %vm168_vm1, %v240_v33, 0.0 }
  0xaa   :  { %v202_v2 = vadd.f32 %v201_v63, %v200_v61  ;;  %v255_v3 = vadd.f32 %v254_v1, %v253_v62 }
  0xac   :  { %v257_v7 = vadd.f32 %v256_v4, %v255_v3  ;;  %v204_v8 = vadd.f32 %v203_v5, %v202_v2 }
  0xae   :  { %v206_v13 = vadd.f32 %v205_v10, %v204_v8  ;;  %v259_v14 = vadd.f32 %v258_v9, %v257_v7 }
  0xb0   :  { %v261_v20 = vadd.f32 %v260_v18, %v259_v14  ;;  %v208_v21 = vadd.f32 %v207_v19, %v206_v13 }
  0xb2   :  { %v210_v24 = vadd.f32 %v209_v15, %v208_v21  ;;  %v263_v25 = vadd.f32 %v262_v23, %v261_v20 }
  0xb4   :  { %v265_v29 = vadd.f32 %v264_v26, %v263_v25  ;;  %v212_v30 = vadd.f32 %v211_v27, %v210_v24 }
  0xb6   :  { %v214_v34 = vadd.f32 %v213_v12, %v212_v30  ;;  %v267_v35 = vadd.f32 %v266_v32, %v265_v29 }
  0xb8   :  { %v269_v38 = vadd.f32 %v268_v36, %v267_v35  ;;  %v216_v39 = vadd.f32 %v215_v37, %v214_v34 }
  0xba   :  { %v217_v40 = vrot.slane %v216_v39, 4  ;;  %v271_v41 = vadd.f32 %v270_v16, %v269_v38 }
  0xbc   :  { %v218_v42 = vadd.f32 %v217_v40, %v216_v39  ;;  %v272_v43 = vrot.slane %v271_v41, 4 }
  0xbe   :  { %v219_v44 = vrot.slane %v218_v42, 2  ;;  %v273_v45 = vadd.f32 %v272_v43, %v271_v41 }
  0xc0   :  { %v220_v46 = vadd.f32 %v219_v44, %v218_v42  ;;  %v274_v47 = vrot.slane %v273_v45, 2 }
  0xc2   :  { %v221_v31 = vrot.slane %v220_v46, 1  ;;  %v275_v48 = vadd.f32 %v274_v47, %v273_v45 }
  0xc4   :  { %v222_v49 = vadd.f32 %v221_v31, %v220_v46  ;;  %v276_v50 = vrot.slane %v275_v48, 1 }
  0xc6   :  { %224 = vst.msk [vmem:[%s572_s3] sm:$0x1] %vm223_vm2, %v222_v49  ;;  %v277_v51 = vadd.f32 %v276_v50, %v275_v48 }
  0xc8   :  { %278 = vst.msk [vmem:[%s572_s3 + $0x1] sm:$0x1] %vm223_vm2, %v277_v51 }
  0xc9   :  { %287 = vsyncpa [#allocation3], 1 }

// kernel: hierarchical_vae_forward.44
= control target key start
LH: loop header
LB: loop body
LE: loop exit
PB: predicated region body
PF: predicated region fallthrough
CT: control target
= control target key end

     0   :  { %vm166_vm0 = vcmask 261120   ;;  %s491_s0 = inlined_call_operand.vmem [shape: f32[128,32], index: 0, kind: input, shape index: {}]   ;;  %s492_s1 = inlined_call_operand.vmem [shape: f32[1,32], index: 1, kind: input, shape index: {}]   ;;  %s493_s2 = inlined_call_operand.vmem [shape: f32[1,32], index: 2, kind: input, shape index: {}]   ;;  %s494_s3 = inlined_call_operand.vmem [shape: f32[128,32], index: 3, kind: output, shape index: {}]  }
   0x1   :  { %v14_v0 = vld [vmem:[%s491_s0] sm:$0xff]  ;;  %v15_v3 = vld [vmem:[%s491_s0 + $0x8] sm:$0xff]  ;;  %v16_v6 = vld [vmem:[%s491_s0 + $0x10] sm:$0xff] }
   0x2   :  { %v279_v1 = vld [vmem:[%s492_s1] ss:$0 sm:$0xff]  ;;  %v17_v7 = vld [vmem:[%s491_s0 + $0x18] sm:$0xff]  ;;  %v19_v12 = vld [vmem:[%s491_s0 + $0x28] sm:$0xff] }
   0x3   :  { %v284_v2 = vld [vmem:[%s493_s2] ss:$0 sm:$0xff]  ;;  %v34_v4 = vmul.f32 %v279_v1, %v14_v0  ;;  %v35_v5 = vmul.f32 %v279_v1, %v15_v3  ;;  %v36_v9 = vmul.f32 %v279_v1, %v16_v6  ;;  %v37_v10 = vmul.f32 %v279_v1, %v17_v7  ;;  %v20_v13 = vld [vmem:[%s491_s0 + $0x30] sm:$0xff]  ;;  %v21_v14 = vld [vmem:[%s491_s0 + $0x38] sm:$0xff] }
   0x4   :  { %v18_v8 = vld [vmem:[%s491_s0 + $0x20] sm:$0xff]  ;;  %v39_v17 = vmul.f32 %v279_v1, %v19_v12  ;;  %v40_v18 = vmul.f32 %v279_v1, %v20_v13  ;;  %v41_v22 = vmul.f32 %v279_v1, %v21_v14  ;;  %v23_v32 = vld [vmem:[%s491_s0 + $0x48] sm:$0xff]  ;;  %v24_v42 = vld [vmem:[%s491_s0 + $0x50] sm:$0xff] }
   0x5   :  { %v38_v11 = vmul.f32 %v279_v1, %v18_v8  ;;  %v313_v15 = vadd.f32 %v284_v2, %v34_v4  ;;  %v316_v16 = vadd.f32 %v284_v2, %v35_v5  ;;  %v321_v19 = vadd.f32 %v284_v2, %v36_v9  ;;  %v22_v27 = vld [vmem:[%s491_s0 + $0x40] sm:$0xff]  ;;  %v25_v46 = vld [vmem:[%s491_s0 + $0x58] sm:$0xff]  ;;  %v27_v52 = vld [vmem:[%s491_s0 + $0x68] sm:$0xff] }
   0x6   :  { %v324_v20 = vadd.f32 %v284_v2, %v37_v10  ;;  %v333_v25 = vadd.f32 %v284_v2, %v39_v17  ;;  %v336_v26 = vadd.f32 %v284_v2, %v40_v18  ;;  %v345_v31 = vadd.f32 %v284_v2, %v41_v22  ;;  %v26_v47 = vld [vmem:[%s491_s0 + $0x60] sm:$0xff]  ;;  %v28_v59 = vld [vmem:[%s491_s0 + $0x70] sm:$0xff]  ;;  %v29_v63 = vld [vmem:[%s491_s0 + $0x78] sm:$0xff] }
   0x7   :  { %v327_v21 = vadd.f32 %v284_v2, %v38_v11  ;;  %v70_v23 = vsub.f32 0.0, %v313_v15  ;;  %v71_v24 = vsub.f32 0.0, %v316_v16  ;;  %v72_v28 = vsub.f32 0.0, %v321_v19 }
   0x8   :  { %v73_v29 = vsub.f32 0.0, %v324_v20  ;;  %v75_v35 = vsub.f32 0.0, %v333_v25  ;;  %v76_v36 = vsub.f32 0.0, %v336_v26  ;;  %v42_v39 = vmul.f32 %v279_v1, %v22_v27 }
   0x9   :  { %v74_v30 = vsub.f32 0.0, %v327_v21  ;;  %v86_v33 = vmul.f32 1.442695, %v70_v23  ;;  %v88_v34 = vmul.f32 1.442695, %v71_v24  ;;  %v77_v41 = vsub.f32 0.0, %v345_v31 }
   0xa   :  { %v90_v37 = vmul.f32 1.442695, %v72_v28  ;;  %v92_v38 = vmul.f32 1.442695, %v73_v29  ;;  %v96_v43 = vmul.f32 1.442695, %v75_v35  ;;  %v358_v44 = vadd.f32 %v284_v2, %v42_v39 }
   0xb   :  { %189 = vpow2.f32 %v86_v33  ;;  %v94_v40 = vmul.f32 1.442695, %v74_v30  ;;  %v43_v45 = vmul.f32 %v279_v1, %v23_v32  ;;  %v98_v48 = vmul.f32 1.442695, %v76_v36 }
   0xc   :  { %191 = vpow2.f32 %v88_v34  ;;  %v100_v49 = vmul.f32 1.442695, %v77_v41  ;;  %v78_v50 = vsub.f32 0.0, %v358_v44  ;;  %v44_v51 = vmul.f32 %v279_v1, %v24_v42 }
   0xd   :  { %193 = vpow2.f32 %v90_v37  ;;  %v45_v53 = vmul.f32 %v279_v1, %v25_v46  ;;  %v46_v54 = vmul.f32 %v279_v1, %v26_v47  ;;  %v375_v56 = vadd.f32 %v284_v2, %v43_v45 }
   0xe   :  { %195 = vpow2.f32 %v92_v38  ;;  %v102_v55 = vmul.f32 1.442695, %v78_v50  ;;  %v47_v58 = vmul.f32 %v279_v1, %v27_v52  ;;  %v382_v62 = vadd.f32 %v284_v2, %v44_v51 }
   0xf   :  { %197 = vpow2.f32 %v94_v40  ;;  %v388_v4 = vadd.f32 %v284_v2, %v45_v53  ;;  %v391_v5 = vadd.f32 %v284_v2, %v46_v54  ;;  %v79_v8 = vsub.f32 0.0, %v375_v56 }
  0x10   :  { %199 = vpow2.f32 %v96_v43  ;;  %v48_v9 = vmul.f32 %v279_v1, %v28_v59  ;;  %v396_v12 = vadd.f32 %v284_v2, %v47_v58  ;;  %v49_v13 = vmul.f32 %v279_v1, %v29_v63 }
  0x11   :  { %v190_v57 = vpop.eup %189  ;;  %201 = vpow2.f32 %v98_v48  ;;  %v80_v18 = vsub.f32 0.0, %v382_v62  ;;  %v81_v27 = vsub.f32 0.0, %v388_v4  ;;  %v82_v30 = vsub.f32 0.0, %v391_v5 }
  0x12   :  { %v192_v60 = vpop.eup %191  ;;  %v118_v61 = vadd.f32 1.0, %v190_v57  ;;  %203 = vpow2.f32 %v100_v49  ;;  %v401_v22 = vadd.f32 %v284_v2, %v48_v9  ;;  %v405_v28 = vadd.f32 %v284_v2, %v49_v13 }
  0x13   :  { %v194_v0 = vpop.eup %193  ;;  %v119_v3 = vadd.f32 1.0, %v192_v60  ;;  %205 = vpow2.f32 %v102_v55  ;;  %v104_v34 = vmul.f32 1.442695, %v79_v8  ;;  %v83_v35 = vsub.f32 0.0, %v396_v12 }
  0x14   :  { %v196_v6 = vpop.eup %195  ;;  %207 = vrcp.f32 %v118_v61  ;;  %v120_v7 = vadd.f32 1.0, %v194_v0  ;;  %v106_v38 = vmul.f32 1.442695, %v80_v18  ;;  %v84_v39 = vsub.f32 0.0, %v401_v22 }
  0x15   :  { %v198_v10 = vpop.eup %197  ;;  %209 = vrcp.f32 %v119_v3  ;;  %v121_v11 = vadd.f32 1.0, %v196_v6  ;;  %v108_v41 = vmul.f32 1.442695, %v81_v27  ;;  %v85_v42 = vsub.f32 0.0, %v405_v28 }
  0x16   :  { %v200_v14 = vpop.eup %199  ;;  %211 = vrcp.f32 %v120_v7  ;;  %v122_v17 = vadd.f32 1.0, %v198_v10  ;;  %v110_v46 = vmul.f32 1.442695, %v82_v30  ;;  %v112_v49 = vmul.f32 1.442695, %v83_v35 }
  0x17   :  { %v202_v23 = vpop.eup %201  ;;  %213 = vrcp.f32 %v121_v11  ;;  %v123_v24 = vadd.f32 1.0, %v200_v14  ;;  %v114_v50 = vmul.f32 1.442695, %v84_v39  ;;  %v116_v52 = vmul.f32 1.442695, %v85_v42 }
  0x18   :  { %v204_v29 = vpop.eup %203  ;;  %215 = vrcp.f32 %v122_v17  ;;  %v124_v1 = vadd.f32 1.0, %v202_v23 }
  0x19   :  { %v206_v32 = vpop.eup %205  ;;  %217 = vrcp.f32 %v123_v24  ;;  %v125_v33 = vadd.f32 1.0, %v204_v29 }
  0x1a   :  { %v208_v36 = vpop.eup %207  ;;  %219 = vrcp.f32 %v124_v1  ;;  %v126_v37 = vadd.f32 1.0, %v206_v32 }
  0x1b   :  { %v210_v2 = vpop.eup %209  ;;  %v150_v40 = vmul.f32 %v208_v36, %v313_v15  ;;  %221 = vrcp.f32 %v125_v33 }
  0x1c   :  { %v212_v43 = vpop.eup %211  ;;  %v151_v45 = vmul.f32 %v210_v2, %v316_v16  ;;  %223 = vrcp.f32 %v126_v37 }
  0x1d   :  { %v214_v47 = vpop.eup %213  ;;  %167 = vst.msk [vmem:[%s494_s3] sm:$0xff] %vm166_vm0, %v150_v40  ;;  %v152_v48 = vmul.f32 %v212_v43, %v321_v19  ;;  %225 = vpow2.f32 %v104_v34 }
  0x1e   :  { %v216_v15 = vpop.eup %215  ;;  %168 = vst.msk [vmem:[%s494_s3 + $0x8] sm:$0xff] %vm166_vm0, %v151_v45  ;;  %v153_v16 = vmul.f32 %v214_v47, %v324_v20  ;;  %227 = vpow2.f32 %v106_v38 }
  0x1f   :  { %v218_v51 = vpop.eup %217  ;;  %169 = vst.msk [vmem:[%s494_s3 + $0x10] sm:$0xff] %vm166_vm0, %v152_v48  ;;  %v154_v19 = vmul.f32 %v216_v15, %v327_v21  ;;  %229 = vpow2.f32 %v108_v41 }
  0x20   :  { %v220_v53 = vpop.eup %219  ;;  %170 = vst.msk [vmem:[%s494_s3 + $0x18] sm:$0xff] %vm166_vm0, %v153_v16  ;;  %v155_v20 = vmul.f32 %v218_v51, %v333_v25  ;;  %231 = vpow2.f32 %v110_v46 }
  0x21   :  { %v222_v54 = vpop.eup %221  ;;  %171 = vst.msk [vmem:[%s494_s3 + $0x20] sm:$0xff] %vm166_vm0, %v154_v19  ;;  %v156_v55 = vmul.f32 %v220_v53, %v336_v26  ;;  %233 = vpow2.f32 %v112_v49 }
  0x22   :  { %v224_v21 = vpop.eup %223  ;;  %172 = vst.msk [vmem:[%s494_s3 + $0x28] sm:$0xff] %vm166_vm0, %v155_v20  ;;  %v157_v57 = vmul.f32 %v222_v54, %v345_v31  ;;  %235 = vpow2.f32 %v114_v50 }
  0x23   :  { %v226_v25 = vpop.eup %225  ;;  %173 = vst.msk [vmem:[%s494_s3 + $0x30] sm:$0xff] %vm166_vm0, %v156_v55  ;;  %v158_v58 = vmul.f32 %v224_v21, %v358_v44  ;;  %237 = vpow2.f32 %v116_v52 }
  0x24   :  { %v228_v26 = vpop.eup %227  ;;  %174 = vst.msk [vmem:[%s494_s3 + $0x38] sm:$0xff] %vm166_vm0, %v157_v57  ;;  %v127_v59 = vadd.f32 1.0, %v226_v25 }
  0x25   :  { %v230_v60 = vpop.eup %229  ;;  %175 = vst.msk [vmem:[%s494_s3 + $0x40] sm:$0xff] %vm166_vm0, %v158_v58  ;;  %v128_v31 = vadd.f32 1.0, %v228_v26 }
  0x26   :  { %v232_v61 = vpop.eup %231  ;;  %239 = vrcp.f32 %v127_v59  ;;  %v129_v63 = vadd.f32 1.0, %v230_v60 }
  0x27   :  { %v234_v0 = vpop.eup %233  ;;  %241 = vrcp.f32 %v128_v31  ;;  %v130_v44 = vadd.f32 1.0, %v232_v61 }
  0x28   :  { %v236_v3 = vpop.eup %235  ;;  %243 = vrcp.f32 %v129_v63  ;;  %v131_v6 = vadd.f32 1.0, %v234_v0 }
  0x29   :  { %v238_v7 = vpop.eup %237  ;;  %245 = vrcp.f32 %v130_v44  ;;  %v132_v8 = vadd.f32 1.0, %v236_v3 }
  0x2a   :  { %247 = vrcp.f32 %v131_v6  ;;  %v133_v9 = vadd.f32 1.0, %v238_v7 }
  0x2b   :  { %249 = vrcp.f32 %v132_v8 }
  0x2c   :  { %v240_v10 = vpop.eup %239  ;;  %251 = vrcp.f32 %v133_v9 }
  0x2d   :  { %v242_v11 = vpop.eup %241  ;;  %v159_v13 = vmul.f32 %v240_v10, %v375_v56 }
  0x2e   :  { %v244_v14 = vpop.eup %243  ;;  %v160_v17 = vmul.f32 %v242_v11, %v382_v62 }
  0x2f   :  { %v246_v18 = vpop.eup %245  ;;  %176 = vst.msk [vmem:[%s494_s3 + $0x48] sm:$0xff] %vm166_vm0, %v159_v13  ;;  %v161_v23 = vmul.f32 %v244_v14, %v388_v4 }
  0x30   :  { %v248_v24 = vpop.eup %247  ;;  %177 = vst.msk [vmem:[%s494_s3 + $0x50] sm:$0xff] %vm166_vm0, %v160_v17  ;;  %v162_v27 = vmul.f32 %v246_v18, %v391_v5 }
  0x31   :  { %v250_v56 = vpop.eup %249  ;;  %178 = vst.msk [vmem:[%s494_s3 + $0x58] sm:$0xff] %vm166_vm0, %v161_v23  ;;  %v163_v62 = vmul.f32 %v248_v24, %v396_v12 }
  0x32   :  { %v252_v29 = vpop.eup %251  ;;  %179 = vst.msk [vmem:[%s494_s3 + $0x60] sm:$0xff] %vm166_vm0, %v162_v27  ;;  %v164_v4 = vmul.f32 %v250_v56, %v401_v22 }
  0x33   :  { %180 = vst.msk [vmem:[%s494_s3 + $0x68] sm:$0xff] %vm166_vm0, %v163_v62  ;;  %v165_v5 = vmul.f32 %v252_v29, %v405_v28 }
  0x34   :  { %181 = vst.msk [vmem:[%s494_s3 + $0x70] sm:$0xff] %vm166_vm0, %v164_v4 }
  0x35   :  { %182 = vst.msk [vmem:[%s494_s3 + $0x78] sm:$0xff] %vm166_vm0, %v165_v5 }

// kernel: hierarchical_vae_forward.48
= control target key start
LH: loop header
LB: loop body
LE: loop exit
PB: predicated region body
PF: predicated region fallthrough
CT: control target
= control target key end

     0   :  { %vm70_vm0 = vcmask 130048   ;;  %s231_s0 = inlined_call_operand.vmem [shape: f32[128,16], index: 0, kind: input, shape index: {}]   ;;  %s232_s1 = inlined_call_operand.vmem [shape: f32[1,16], index: 1, kind: input, shape index: {}]   ;;  %s233_s2 = inlined_call_operand.vmem [shape: f32[1,16], index: 2, kind: input, shape index: {}]   ;;  %s234_s3 = inlined_call_operand.vmem [shape: f32[128,16], index: 3, kind: output, shape index: {}]  }
   0x1   :  { %v14_v0 = vld [vmem:[%s231_s0] sm:$0xff]  ;;  %v15_v3 = vld [vmem:[%s231_s0 + $0x8] sm:$0xff]  ;;  %v16_v6 = vld [vmem:[%s231_s0 + $0x10] sm:$0xff] }
   0x2   :  { %v91_v1 = vld [vmem:[%s232_s1] ss:$0 sm:$0xff]  ;;  %v17_v7 = vld [vmem:[%s231_s0 + $0x18] sm:$0xff]  ;;  %v19_v12 = vld [vmem:[%s231_s0 + $0x28] sm:$0xff] }
   0x3   :  { %v92_v2 = vld [vmem:[%s233_s2] ss:$0 sm:$0xff]  ;;  %v34_v4 = vmul.f32 %v91_v1, %v14_v0  ;;  %v35_v5 = vmul.f32 %v91_v1, %v15_v3  ;;  %v36_v9 = vmul.f32 %v91_v1, %v16_v6  ;;  %v37_v10 = vmul.f32 %v91_v1, %v17_v7  ;;  %v20_v13 = vld [vmem:[%s231_s0 + $0x30] sm:$0xff]  ;;  %v21_v14 = vld [vmem:[%s231_s0 + $0x38] sm:$0xff] }
   0x4   :  { %v18_v8 = vld [vmem:[%s231_s0 + $0x20] sm:$0xff]  ;;  %v39_v17 = vmul.f32 %v91_v1, %v19_v12  ;;  %v40_v18 = vmul.f32 %v91_v1, %v20_v13  ;;  %v23_v20 = vld [vmem:[%s231_s0 + $0x48] sm:$0xff]  ;;  %v41_v23 = vmul.f32 %v91_v1, %v21_v14  ;;  %v24_v24 = vld [vmem:[%s231_s0 + $0x50] sm:$0xff] }
   0x5   :  { %v38_v11 = vmul.f32 %v91_v1, %v18_v8  ;;  %v54_v15 = vadd.f32 %v92_v2, %v34_v4  ;;  %v55_v16 = vadd.f32 %v92_v2, %v35_v5  ;;  %v22_v19 = vld [vmem:[%s231_s0 + $0x40] sm:$0xff]  ;;  %v56_v21 = vadd.f32 %v92_v2, %v36_v9  ;;  %v25_v27 = vld [vmem:[%s231_s0 + $0x58] sm:$0xff]  ;;  %v27_v33 = vld [vmem:[%s231_s0 + $0x68] sm:$0xff] }
   0x6   :  { %v57_v22 = vadd.f32 %v92_v2, %v37_v10  ;;  %v42_v26 = vmul.f32 %v91_v1, %v22_v19  ;;  %v59_v28 = vadd.f32 %v92_v2, %v39_v17  ;;  %v43_v29 = vmul.f32 %v91_v1, %v23_v20  ;;  %v26_v30 = vld [vmem:[%s231_s0 + $0x60] sm:$0xff]  ;;  %v28_v36 = vld [vmem:[%s231_s0 + $0x70] sm:$0xff]  ;;  %v29_v39 = vld [vmem:[%s231_s0 + $0x78] sm:$0xff] }
   0x7   :  { %71 = vst.msk [vmem:[%s234_s3] sm:$0xff] %vm70_vm0, %v54_v15  ;;  %v58_v25 = vadd.f32 %v92_v2, %v38_v11  ;;  %v60_v31 = vadd.f32 %v92_v2, %v40_v18  ;;  %v44_v32 = vmul.f32 %v91_v1, %v24_v24  ;;  %v61_v34 = vadd.f32 %v92_v2, %v41_v23 }
   0x8   :  { %72 = vst.msk [vmem:[%s234_s3 + $0x8] sm:$0xff] %vm70_vm0, %v55_v16  ;;  %v45_v35 = vmul.f32 %v91_v1, %v25_v27  ;;  %v62_v37 = vadd.f32 %v92_v2, %v42_v26  ;;  %v46_v38 = vmul.f32 %v91_v1, %v26_v30  ;;  %v63_v40 = vadd.f32 %v92_v2, %v43_v29 }
   0x9   :  { %73 = vst.msk [vmem:[%s234_s3 + $0x10] sm:$0xff] %vm70_vm0, %v56_v21  ;;  %v47_v41 = vmul.f32 %v91_v1, %v27_v33  ;;  %v64_v42 = vadd.f32 %v92_v2, %v44_v32  ;;  %v48_v43 = vmul.f32 %v91_v1, %v28_v36  ;;  %v49_v45 = vmul.f32 %v91_v1, %v29_v39 }
   0xa   :  { %74 = vst.msk [vmem:[%s234_s3 + $0x18] sm:$0xff] %vm70_vm0, %v57_v22  ;;  %v65_v44 = vadd.f32 %v92_v2, %v45_v35  ;;  %v66_v46 = vadd.f32 %v92_v2, %v46_v38 }
   0xb   :  { %75 = vst.msk [vmem:[%s234_s3 + $0x20] sm:$0xff] %vm70_vm0, %v58_v25  ;;  %v67_v47 = vadd.f32 %v92_v2, %v47_v41  ;;  %v68_v48 = vadd.f32 %v92_v2, %v48_v43  ;;  %v69_v49 = vadd.f32 %v92_v2, %v49_v45 }
   0xc   :  { %76 = vst.msk [vmem:[%s234_s3 + $0x28] sm:$0xff] %vm70_vm0, %v59_v28 }
   0xd   :  { %77 = vst.msk [vmem:[%s234_s3 + $0x30] sm:$0xff] %vm70_vm0, %v60_v31 }
   0xe   :  { %78 = vst.msk [vmem:[%s234_s3 + $0x38] sm:$0xff] %vm70_vm0, %v61_v34 }
   0xf   :  { %79 = vst.msk [vmem:[%s234_s3 + $0x40] sm:$0xff] %vm70_vm0, %v62_v37 }
  0x10   :  { %80 = vst.msk [vmem:[%s234_s3 + $0x48] sm:$0xff] %vm70_vm0, %v63_v40 }
  0x11   :  { %81 = vst.msk [vmem:[%s234_s3 + $0x50] sm:$0xff] %vm70_vm0, %v64_v42 }
  0x12   :  { %82 = vst.msk [vmem:[%s234_s3 + $0x58] sm:$0xff] %vm70_vm0, %v65_v44 }
  0x13   :  { %83 = vst.msk [vmem:[%s234_s3 + $0x60] sm:$0xff] %vm70_vm0, %v66_v46 }
  0x14   :  { %84 = vst.msk [vmem:[%s234_s3 + $0x68] sm:$0xff] %vm70_vm0, %v67_v47 }
  0x15   :  { %85 = vst.msk [vmem:[%s234_s3 + $0x70] sm:$0xff] %vm70_vm0, %v68_v48 }
  0x16   :  { %86 = vst.msk [vmem:[%s234_s3 + $0x78] sm:$0xff] %vm70_vm0, %v69_v49 }

// kernel: hierarchical_vae_forward.45
= control target key start
LH: loop header
LB: loop body
LE: loop exit
PB: predicated region body
PF: predicated region fallthrough
CT: control target
= control target key end

     0   :  { %vm758_vm0 = vcmask 261120   ;;  %vm1180_vm1 = vcmask 253952   ;;  %s2552_s1 = inlined_call_operand.vmem [shape: bf16[800,32], index: 1, kind: input, shape index: {}]   ;;  %s2553_s0 = inlined_call_operand.vmem [shape: bf16[128,800], index: 0, kind: input, shape index: {}]   ;;  %s2554_s2 = inlined_call_operand.vmem [shape: f32[128,32], index: 2, kind: output, shape index: {0}]   ;;  %s2555_s3 = inlined_call_operand.vmem [shape: f32[8,32], index: 3, kind: output, shape index: {1}]  }
   0x1   :  { %v1739_v0 = vld [vmem:[%s2552_s1 + $0x38] sm:$0xff]  ;;  %v1738_v3 = vld [vmem:[%s2552_s1 + $0x30] sm:$0xff]  ;;  %v1737_v6 = vld [vmem:[%s2552_s1 + $0x28] sm:$0xff] }
   0x2   :  { %v1834_v1 = vld [vmem:[%s2552_s1 + $0xb8] sm:$0xff]  ;;  %783 = vmatpush.bf16.msra.mxu0 %v1739_v0  ;;  %1782 = vmatpush.bf16.msra.mxu3 %v1739_v0  ;;  %v1849_v4 = vld [vmem:[%s2552_s1 + $0xb0] sm:$0xff]  ;;  %v1864_v7 = vld [vmem:[%s2552_s1 + $0xa8] sm:$0xff] }
   0x3   :  { %v1839_v2 = vld [vmem:[%s2552_s1 + $0x78] sm:$0xff]  ;;  %1798 = vmatpush.bf16.msra.mxu2 %v1834_v1  ;;  %v1854_v5 = vld [vmem:[%s2552_s1 + $0x70] sm:$0xff]  ;;  %v1869_v8 = vld [vmem:[%s2552_s1 + $0x68] sm:$0xff] }
   0x4   :  { %1790 = vmatpush.bf16.msra.mxu1 %v1839_v2  ;;  %v1736_v9 = vld [vmem:[%s2552_s1 + $0x20] sm:$0xff]  ;;  %v1735_v12 = vld [vmem:[%s2552_s1 + $0x18] sm:$0xff]  ;;  %v1734_v15 = vld [vmem:[%s2552_s1 + $0x10] sm:$0xff] }
   0x5   :  { %v1879_v10 = vld [vmem:[%s2552_s1 + $0xa0] sm:$0xff]  ;;  %v1894_v13 = vld [vmem:[%s2552_s1 + $0x98] sm:$0xff]  ;;  %v1909_v16 = vld [vmem:[%s2552_s1 + $0x90] sm:$0xff] }
   0x6   :  { %784 = vmatpush.bf16.msra.mxu0 %v1738_v3  ;;  %1783 = vmatpush.bf16.msra.mxu3 %v1738_v3  ;;  %v1884_v11 = vld [vmem:[%s2552_s1 + $0x60] sm:$0xff]  ;;  %v1899_v14 = vld [vmem:[%s2552_s1 + $0x58] sm:$0xff]  ;;  %v1914_v17 = vld [vmem:[%s2552_s1 + $0x50] sm:$0xff] }
   0x7   :  { %1799 = vmatpush.bf16.msra.mxu2 %v1849_v4  ;;  %v1733_v18 = vld [vmem:[%s2552_s1 + $0x8] sm:$0xff]  ;;  %v1732_v21 = vld [vmem:[%s2552_s1] sm:$0xff]  ;;  %v1679_v25 = vld [vmem:[%s2553_s0 + $0x18] sm:$0xf0] }
   0x8   :  { %1791 = vmatpush.bf16.msra.mxu1 %v1854_v5  ;;  %v1924_v19 = vld [vmem:[%s2552_s1 + $0x88] sm:$0xff]  ;;  %v1937_v22 = vld [vmem:[%s2552_s1 + $0x80] sm:$0xff]  ;;  %v1302_v26 = vld [vmem:[%s2553_s0 + $0x70] sm:$0xf] }
   0x9   :  { %v1929_v20 = vld [vmem:[%s2552_s1 + $0x48] sm:$0xff]  ;;  %v1942_v23 = vld [vmem:[%s2552_s1 + $0x40] sm:$0xff]  ;;  %v1310_v28 = vld [vmem:[%s2553_s0 + $0x78] sm:$0xf] }
   0xa   :  { %785 = vmatpush.bf16.msra.mxu0 %v1737_v6  ;;  %1784 = vmatpush.bf16.msra.mxu3 %v1737_v6  ;;  %v1246_v24 = vld [vmem:[%s2553_s0] sm:$0xf]  ;;  %v1693_v27 = vld [vmem:[%s2553_s0 + $0x88] sm:$0xf0]  ;;  %v1694_v29 = vld [vmem:[%s2553_s0 + $0x90] sm:$0xf0] }
   0xb   :  { %1800 = vmatpush.bf16.msra.mxu2 %v1864_v7  ;;  %v1690_v30 = vld [vmem:[%s2553_s0 + $0x74] sm:$0xf]  ;;  %v1304_v31 = vld [vmem:[%s2553_s0 + $0x8c] sm:$0xf0]  ;;  %v1763_v32 = vld [vmem:[%s2552_s1 + $0xf8] sm:$0xff]  ;;  %v1247_v33 = vor.u32 %v1679_v25, %v1246_v24  ;;  %v1303_v34 = vor.u32 %v1693_v27, %v1302_v26  ;;  %v1311_v35 = vor.u32 %v1694_v29, %v1310_v28 }
   0xc   :  { %1792 = vmatpush.bf16.msra.mxu1 %v1869_v8  ;;  %v1307_v36 = vor.u32 %v1690_v30, %v1304_v31  ;;  %v1781_v37 = vld [vmem:[%s2552_s1 + $0x188] sm:$0xff]  ;;  %v1779_v38 = vld [vmem:[%s2552_s1 + $0x178] sm:$0xff]  ;;  %v1762_v39 = vld [vmem:[%s2552_s1 + $0xf0] sm:$0xff] }
   0xd   :  { %v1778_v40 = vld [vmem:[%s2552_s1 + $0x170] sm:$0xff]  ;;  %v1761_v41 = vld [vmem:[%s2552_s1 + $0xe8] sm:$0xff]  ;;  %v1760_v43 = vld [vmem:[%s2552_s1 + $0xe0] sm:$0xff] }
   0xe   :  { %786 = vmatpush.bf16.msra.mxu0 %v1736_v9  ;;  %1785 = vmatpush.bf16.msra.mxu3 %v1736_v9  ;;  %v1777_v42 = vld [vmem:[%s2552_s1 + $0x168] sm:$0xff]  ;;  %v1274_v44 = vld [vmem:[%s2553_s0 + $0x38] sm:$0xf]  ;;  %v1686_v45 = vld [vmem:[%s2553_s0 + $0x50] sm:$0xf0] }
   0xf   :  { %1801 = vmatpush.bf16.msra.mxu2 %v1879_v10  ;;  %v1330_v46 = vld [vmem:[%s2553_s0 + $0xa8] sm:$0xf]  ;;  %v1700_v47 = vld [vmem:[%s2553_s0 + $0xc0] sm:$0xf0]  ;;  %v1338_v48 = vld [vmem:[%s2553_s0 + $0xb0] sm:$0xf]  ;;  %v1275_v53 = vor.u32 %v1686_v45, %v1274_v44 }
  0x10   :  { %1793 = vmatpush.bf16.msra.mxu1 %v1884_v11  ;;  %v1701_v49 = vld [vmem:[%s2553_s0 + $0xc8] sm:$0xf0]  ;;  %v1332_v51 = vld [vmem:[%s2553_s0 + $0xc4] sm:$0xf0]  ;;  %v1776_v52 = vld [vmem:[%s2552_s1 + $0x160] sm:$0xff]  ;;  %v1331_v54 = vor.u32 %v1700_v47, %v1330_v46 }
  0x11   :  { %v1697_v50 = vld [vmem:[%s2553_s0 + $0xac] sm:$0xf]  ;;  %v1339_v55 = vor.u32 %v1701_v49, %v1338_v48  ;;  %v1759_v57 = vld [vmem:[%s2552_s1 + $0xd8] sm:$0xff]  ;;  %v1780_v58 = vld [vmem:[%s2552_s1 + $0x180] sm:$0xff] }
  0x12   :  { %787 = vmatpush.bf16.msra.mxu0 %v1735_v12  ;;  %1786 = vmatpush.bf16.msra.mxu3 %v1735_v12  ;;  %v1335_v56 = vor.u32 %v1697_v50, %v1332_v51  ;;  %v1775_v59 = vld [vmem:[%s2552_s1 + $0x158] sm:$0xff]  ;;  %v1758_v60 = vld [vmem:[%s2552_s1 + $0xd0] sm:$0xff]  ;;  %v1358_v61 = vld [vmem:[%s2553_s0 + $0xe0] sm:$0xf] }
  0x13   :  { %1802 = vmatpush.bf16.msra.mxu2 %v1894_v13  ;;  %v1707_v62 = vld [vmem:[%s2553_s0 + $0xf8] sm:$0xf0]  ;;  %v1676_v63 = vld [vmem:[%s2553_s0 + $0x4] sm:$0xf]  ;;  %v1248_v0 = vld [vmem:[%s2553_s0 + $0x1c] sm:$0xf0] }
  0x14   :  { %1794 = vmatpush.bf16.msra.mxu1 %v1899_v14  ;;  %v1708_v3 = vld [vmem:[%s2553_s0 + $0x100] sm:$0xf0]  ;;  %v1360_v6 = vld [vmem:[%s2553_s0 + $0xfc] sm:$0xf0]  ;;  %v1251_v9 = vor.u32 %v1676_v63, %v1248_v0  ;;  %v1414_v30 = vld [vmem:[%s2553_s0 + $0x150] sm:$0xf] }
  0x15   :  { %v1756_v28 = vld [vmem:[%s2552_s1 + $0xc0] sm:$0xff]  ;;  %v1687_v46 = vld [vmem:[%s2553_s0 + $0x58] sm:$0xf0]  ;;  %v1450_v47 = vld [vmem:[%s2553_s0 + $0x190] sm:$0xf] }
  0x16   :  { %788 = vmatpush.bf16.msra.mxu0 %v1734_v15  ;;  %1787 = vmatpush.bf16.msra.mxu3 %v1734_v15  ;;  %v1757_v15 = vld [vmem:[%s2552_s1 + $0xc8] sm:$0xff]  ;;  %v1772_v29 = vld [vmem:[%s2552_s1 + $0x140] sm:$0xff]  ;;  %v1766_v51 = vld [vmem:[%s2552_s1 + $0x110] sm:$0xff] }
  0x17   :  { %1803 = vmatpush.bf16.msra.mxu2 %v1909_v16  ;;  %v1680_v31 = vld [vmem:[%s2553_s0 + $0x20] sm:$0xf0]  ;;  %v1282_v45 = vld [vmem:[%s2553_s0 + $0x40] sm:$0xf]  ;;  %v1729_v48 = vld [vmem:[%s2553_s0 + $0x1a8] sm:$0xf0] }
  0x18   :  { %1795 = vmatpush.bf16.msra.mxu1 %v1914_v17  ;;  %v1728_v44 = vld [vmem:[%s2553_s0 + $0x1a0] sm:$0xf0]  ;;  %v1725_v49 = vld [vmem:[%s2553_s0 + $0x18c] sm:$0xf]  ;;  %v1444_v50 = vld [vmem:[%s2553_s0 + $0x1a4] sm:$0xf0] }
  0x19   :  { %v1682_v63 = vld [vmem:[%s2553_s0 + $0x30] sm:$0xf0] }
  0x1a   :  { %789 = vmatpush.bf16.msra.mxu0 %v1733_v18  ;;  %1788 = vmatpush.bf16.msra.mxu3 %v1733_v18  ;;  %v1683_v18 = vld [vmem:[%s2553_s0 + $0x3c] sm:$0xf]  ;;  %v1678_v0 = vld [vmem:[%s2553_s0 + $0x14] sm:$0xf] }
  0x1b   :  { %1804 = vmatpush.bf16.msra.mxu2 %v1924_v19 }
  0x1c   :  { %1796 = vmatpush.bf16.msra.mxu1 %v1929_v20 }
  0x1e   :  { %790 = vmatpush.bf16.msra.mxu0 %v1732_v21  ;;  %1789 = vmatpush.bf16.msra.mxu3 %v1732_v21  ;;  %v1711_v21 = vld [vmem:[%s2553_s0 + $0x11c] sm:$0xf] }
  0x1f   :  { %1805 = vmatpush.bf16.msra.mxu2 %v1937_v22 }
  0x20   :  { %1797 = vmatpush.bf16.msra.mxu1 %v1942_v23 }
  0x21   :  { %791 = vmatmul.bf16.vlgmr.msra.gmra.mxu0 %v1247_v33  ;;  %801 = vmatmul.bf16.vlgmr.msra.gmra.mxu3 %v1303_v34  ;;  %v1722_v33 = vld [vmem:[%s2553_s0 + $0x170] sm:$0xf0] }
  0x22   :  { %930 = vmatpush.bf16.msrb.mxu3 %v1763_v32  ;;  %832 = vmatpush.bf16.msrb.mxu0 %v1839_v2  ;;  %v1366_v2 = vld [vmem:[%s2553_s0 + $0xe8] sm:$0xf]  ;;  %v1422_v32 = vld [vmem:[%s2553_s0 + $0x158] sm:$0xf]  ;;  %v1718_v34 = vld [vmem:[%s2553_s0 + $0x154] sm:$0xf] }
  0x23   :  { %899 = vmatmul.bf16.vlgmr.msra.gmra.mxu2 %v1311_v35  ;;  %850 = vmatmul.bf16.vlgmr.msra.gmra.mxu1 %v1307_v36  ;;  %v1416_v35 = vld [vmem:[%s2553_s0 + $0x16c] sm:$0xf0] }
  0x24   :  { %1083 = vmatpush.bf16.msrb.mxu2 %v1781_v37  ;;  %1028 = vmatpush.bf16.msrb.mxu1 %v1779_v38  ;;  %v1770_v36 = vld [vmem:[%s2552_s1 + $0x130] sm:$0xff] }
  0x26   :  { %833 = vmatpush.bf16.msrb.mxu0 %v1854_v5  ;;  %931 = vmatpush.bf16.msrb.mxu3 %v1762_v39  ;;  %v1704_v5 = vld [vmem:[%s2553_s0 + $0xe4] sm:$0xf]  ;;  %v1419_v39 = vor.u32 %v1718_v34, %v1416_v35 }
  0x27   :  { %v1363_v12 = vor.u32 %v1704_v5, %v1360_v6 }
  0x28   :  { %1029 = vmatpush.bf16.msrb.mxu1 %v1778_v40  ;;  %1084 = vmatpush.bf16.msrb.mxu2 %v1780_v58  ;;  %v1769_v40 = vld [vmem:[%s2552_s1 + $0x128] sm:$0xff] }
  0x29   :  { %v1677_v58 = vld [vmem:[%s2553_s0 + $0xc] sm:$0xf] }
  0x2a   :  { %834 = vmatpush.bf16.msrb.mxu0 %v1869_v8  ;;  %932 = vmatpush.bf16.msrb.mxu3 %v1761_v41  ;;  %v1359_v8 = vor.u32 %v1707_v62, %v1358_v61  ;;  %v1768_v41 = vld [vmem:[%s2552_s1 + $0x120] sm:$0xff]  ;;  %v1681_v61 = vld [vmem:[%s2553_s0 + $0x28] sm:$0xf0]  ;;  %v1270_v62 = vld [vmem:[%s2553_s0 + $0x18] sm:$0xf] }
  0x2b   :  { %v1271_v6 = vor.u32 %v1682_v63, %v1270_v62  ;;  %v1705_v62 = vld [vmem:[%s2553_s0 + $0xec] sm:$0xf]  ;;  %v1368_v63 = vld [vmem:[%s2553_s0 + $0x104] sm:$0xf0] }
  0x2c   :  { %1030 = vmatpush.bf16.msrb.mxu1 %v1777_v42  ;;  %v1767_v42 = vld [vmem:[%s2552_s1 + $0x118] sm:$0xff] }
  0x2e   :  { %835 = vmatpush.bf16.msrb.mxu0 %v1884_v11  ;;  %933 = vmatpush.bf16.msrb.mxu3 %v1760_v43  ;;  %v1367_v11 = vor.u32 %v1708_v3, %v1366_v2  ;;  %v1442_v43 = vld [vmem:[%s2553_s0 + $0x188] sm:$0xf]  ;;  %v1264_v2 = vld [vmem:[%s2553_s0 + $0x2c] sm:$0xf0] }
  0x30   :  { %1031 = vmatpush.bf16.msrb.mxu1 %v1776_v52  ;;  %v1443_v52 = vor.u32 %v1728_v44, %v1442_v43  ;;  %v1703_v43 = vld [vmem:[%s2553_s0 + $0xd8] sm:$0xf0] }
  0x31   :  { %796 = vmatmul.bf16.gmra.mxu0 %v1275_v53  ;;  %806 = vmatmul.bf16.gmra.mxu3 %v1331_v54  ;;  %v1283_v53 = vor.u32 %v1687_v46, %v1282_v45  ;;  %v1451_v54 = vor.u32 %v1729_v48, %v1450_v47  ;;  %v1699_v44 = vld [vmem:[%s2553_s0 + $0xbc] sm:$0xf]  ;;  %v1348_v45 = vld [vmem:[%s2553_s0 + $0xd4] sm:$0xf0] }
  0x32   :  { %836 = vmatpush.bf16.msrb.mxu0 %v1899_v14  ;;  %934 = vmatpush.bf16.msrb.mxu3 %v1759_v57  ;;  %v1774_v14 = vld [vmem:[%s2552_s1 + $0x150] sm:$0xff]  ;;  %v1764_v57 = vld [vmem:[%s2552_s1 + $0x100] sm:$0xff] }
  0x33   :  { %904 = vmatmul.bf16.gmra.mxu2 %v1339_v55  ;;  %855 = vmatmul.bf16.gmra.mxu1 %v1335_v56  ;;  %v1447_v55 = vor.u32 %v1725_v49, %v1444_v50  ;;  %v1765_v56 = vld [vmem:[%s2552_s1 + $0x108] sm:$0xff] }
  0x34   :  { %1032 = vmatpush.bf16.msrb.mxu1 %v1775_v59  ;;  %v1256_v59 = vld [vmem:[%s2553_s0 + $0x24] sm:$0xf0] }
  0x35   :  { %v1259_v3 = vor.u32 %v1677_v58, %v1256_v59 }
  0x36   :  { %837 = vmatpush.bf16.msrb.mxu0 %v1914_v17  ;;  %935 = vmatpush.bf16.msrb.mxu3 %v1758_v60  ;;  %v1714_v17 = vld [vmem:[%s2553_s0 + $0x130] sm:$0xf0]  ;;  %v1262_v60 = vld [vmem:[%s2553_s0 + $0x10] sm:$0xf] }
  0x37   :  { %v1263_v5 = vor.u32 %v1681_v61, %v1262_v60 }
  0x38   :  { %1033 = vmatpush.bf16.msrb.mxu1 %v1774_v14  ;;  %v1688_v14 = vld [vmem:[%s2553_s0 + $0x60] sm:$0xf0] }
  0x3a   :  { %838 = vmatpush.bf16.msrb.mxu0 %v1929_v20  ;;  %936 = vmatpush.bf16.msrb.mxu3 %v1757_v15  ;;  %v1715_v20 = vld [vmem:[%s2553_s0 + $0x138] sm:$0xf0]  ;;  %v1298_v15 = vld [vmem:[%s2553_s0 + $0x50] sm:$0xf] }
  0x3e   :  { %839 = vmatpush.bf16.msrb.mxu0 %v1942_v23  ;;  %v1388_v23 = vld [vmem:[%s2553_s0 + $0x134] sm:$0xf0]  ;;  %937 = vmatpush.bf16.msrb.mxu3 %v1756_v28  ;;  %v1692_v28 = vld [vmem:[%s2553_s0 + $0x84] sm:$0xf] }
  0x3f   :  { %v1391_v27 = vor.u32 %v1711_v21, %v1388_v23  ;;  %v1691_v23 = vld [vmem:[%s2553_s0 + $0x7c] sm:$0xf] }
  0x41   :  { %811 = vmatmul.bf16.gmra.mxu3 %v1359_v8  ;;  %840 = vmatmul.bf16.vlgmr.msrb.gmra.mxu0 %v1251_v9  ;;  %v1267_v8 = vor.u32 %v1678_v0, %v1264_v2  ;;  %v1684_v9 = vld [vmem:[%s2553_s0 + $0x44] sm:$0xf]  ;;  %v1374_v0 = vld [vmem:[%s2553_s0 + $0xf0] sm:$0xf]  ;;  %v1709_v2 = vld [vmem:[%s2553_s0 + $0x108] sm:$0xf0] }
  0x42   :  { %881 = vmatpush.bf16.msra.mxu0 %v1834_v1  ;;  %v1386_v1 = vld [vmem:[%s2553_s0 + $0x118] sm:$0xf] }
  0x43   :  { %909 = vmatmul.bf16.gmra.mxu2 %v1367_v11  ;;  %860 = vmatmul.bf16.gmra.mxu1 %v1363_v12  ;;  %v1387_v24 = vor.u32 %v1714_v17, %v1386_v1  ;;  %v1284_v11 = vld [vmem:[%s2553_s0 + $0x5c] sm:$0xf0]  ;;  %v1290_v12 = vld [vmem:[%s2553_s0 + $0x48] sm:$0xf]  ;;  %v1689_v1 = vld [vmem:[%s2553_s0 + $0x68] sm:$0xf0] }
  0x44   :  { %v1685_v17 = vld [vmem:[%s2553_s0 + $0x4c] sm:$0xf] }
  0x46   :  { %882 = vmatpush.bf16.msra.mxu0 %v1849_v4  ;;  %v1276_v4 = vld [vmem:[%s2553_s0 + $0x54] sm:$0xf0] }
  0x47   :  { %v1279_v25 = vor.u32 %v1683_v18, %v1276_v4  ;;  %v1292_v18 = vld [vmem:[%s2553_s0 + $0x64] sm:$0xf0]  ;;  %v1287_v4 = vor.u32 %v1684_v9, %v1284_v11 }
  0x48   :  { %v1295_v21 = vor.u32 %v1685_v17, %v1292_v18 }
  0x4a   :  { %883 = vmatpush.bf16.msra.mxu0 %v1864_v7  ;;  %v1394_v7 = vld [vmem:[%s2553_s0 + $0x120] sm:$0xf] }
  0x4b   :  { %v1395_v26 = vor.u32 %v1715_v20, %v1394_v7  ;;  %v1291_v7 = vor.u32 %v1688_v14, %v1290_v12  ;;  %v1299_v20 = vor.u32 %v1689_v1, %v1298_v15  ;;  %v1371_v14 = vor.u32 %v1705_v62, %v1368_v63 }
  0x4c   :  { %v1375_v15 = vor.u32 %v1709_v2, %v1374_v0 }
  0x4e   :  { %884 = vmatpush.bf16.msra.mxu0 %v1879_v10  ;;  %v1773_v10 = vld [vmem:[%s2552_s1 + $0x148] sm:$0xff] }
  0x4f   :  { %1034 = vmatpush.bf16.msrb.mxu1 %v1773_v10  ;;  %v1696_v10 = vld [vmem:[%s2553_s0 + $0xa0] sm:$0xf0] }
  0x51   :  { %816 = vmatmul.bf16.gmra.mxu3 %v1387_v24  ;;  %845 = vmatmul.bf16.gmra.mxu0 %v1279_v25  ;;  %v1312_v24 = vld [vmem:[%s2553_s0 + $0x94] sm:$0xf0]  ;;  %v1318_v25 = vld [vmem:[%s2553_s0 + $0x80] sm:$0xf] }
  0x52   :  { %885 = vmatpush.bf16.msra.mxu0 %v1894_v13  ;;  %v1771_v13 = vld [vmem:[%s2552_s1 + $0x138] sm:$0xff] }
  0x53   :  { %914 = vmatmul.bf16.gmra.mxu2 %v1395_v26  ;;  %865 = vmatmul.bf16.gmra.mxu1 %v1391_v27  ;;  %v1695_v26 = vld [vmem:[%s2553_s0 + $0x98] sm:$0xf0]  ;;  %v1326_v27 = vld [vmem:[%s2553_s0 + $0x88] sm:$0xf] }
  0x54   :  { %1035 = vmatpush.bf16.msrb.mxu1 %v1772_v29  ;;  %v1315_v29 = vor.u32 %v1691_v23, %v1312_v24 }
  0x56   :  { %886 = vmatpush.bf16.msra.mxu0 %v1909_v16  ;;  %v1721_v16 = vld [vmem:[%s2553_s0 + $0x168] sm:$0xf0] }
  0x57   :  { %v1415_v37 = vor.u32 %v1721_v16, %v1414_v30  ;;  %v1319_v30 = vor.u32 %v1695_v26, %v1318_v25 }
  0x5a   :  { %887 = vmatpush.bf16.msra.mxu0 %v1924_v19  ;;  %v1254_v19 = vld [vmem:[%s2553_s0 + $0x8] sm:$0xf] }
  0x5b   :  { %v1255_v38 = vor.u32 %v1680_v31, %v1254_v19  ;;  %v1327_v19 = vor.u32 %v1696_v10, %v1326_v27  ;;  %v1712_v27 = vld [vmem:[%s2553_s0 + $0x124] sm:$0xf]  ;;  %v1396_v10 = vld [vmem:[%s2553_s0 + $0x13c] sm:$0xf0] }
  0x5e   :  { %888 = vmatpush.bf16.msra.mxu0 %v1937_v22  ;;  %v1423_v22 = vor.u32 %v1722_v33, %v1422_v32 }
  0x61   :  { %821 = vmatmul.bf16.gmra.mxu3 %v1415_v37  ;;  %889 = vmatmul.bf16.vlgmr.msra.gmra.mxu0 %v1255_v38 }
  0x62   :  { %979 = vmatpush.bf16.msrb.mxu0 %v1771_v13  ;;  %v1320_v13 = vld [vmem:[%s2553_s0 + $0x9c] sm:$0xf0] }
  0x63   :  { %919 = vmatmul.bf16.gmra.mxu2 %v1423_v22  ;;  %870 = vmatmul.bf16.gmra.mxu1 %v1419_v39  ;;  %v1323_v31 = vor.u32 %v1692_v28, %v1320_v13  ;;  %v1698_v22 = vld [vmem:[%s2553_s0 + $0xb4] sm:$0xf]  ;;  %v1340_v39 = vld [vmem:[%s2553_s0 + $0xcc] sm:$0xf0]  ;;  %v1402_v28 = vld [vmem:[%s2553_s0 + $0x128] sm:$0xf] }
  0x64   :  { %v1343_v49 = vor.u32 %v1698_v22, %v1340_v39  ;;  %v1716_v13 = vld [vmem:[%s2553_s0 + $0x140] sm:$0xf0] }
  0x66   :  { %980 = vmatpush.bf16.msrb.mxu0 %v1770_v36 }
  0x6a   :  { %981 = vmatpush.bf16.msrb.mxu0 %v1769_v40  ;;  %v1346_v40 = vld [vmem:[%s2553_s0 + $0xb8] sm:$0xf] }
  0x6e   :  { %982 = vmatpush.bf16.msrb.mxu0 %v1768_v41  ;;  %v1702_v41 = vld [vmem:[%s2553_s0 + $0xd0] sm:$0xf0] }
  0x6f   :  { %v1347_v50 = vor.u32 %v1702_v41, %v1346_v40 }
  0x71   :  { %826 = vmatmul.bf16.gmra.mxu3 %v1443_v52  ;;  %894 = vmatmul.bf16.gmra.mxu0 %v1283_v53  ;;  %v1351_v53 = vor.u32 %v1699_v44, %v1348_v45 }
  0x72   :  { %983 = vmatpush.bf16.msrb.mxu0 %v1767_v42  ;;  %v1354_v42 = vld [vmem:[%s2553_s0 + $0xc0] sm:$0xf] }
  0x73   :  { %924 = vmatmul.bf16.gmra.mxu2 %v1451_v54  ;;  %875 = vmatmul.bf16.gmra.mxu1 %v1447_v55  ;;  %v1355_v52 = vor.u32 %v1703_v43, %v1354_v42 }
  0x76   :  { %984 = vmatpush.bf16.msrb.mxu0 %v1766_v51 }
  0x7a   :  { %985 = vmatpush.bf16.msrb.mxu0 %v1765_v56 }
  0x7e   :  { %986 = vmatpush.bf16.msrb.mxu0 %v1764_v57 }
  0x81   :  { %938 = vmatmul.bf16.vlgmr.msrb.gmra.mxu3 %v1259_v3  ;;  %987 = vmatmul.bf16.vlgmr.msrb.gmra.mxu0 %v1263_v5  ;;  %v1382_v3 = vld [vmem:[%s2553_s0 + $0xf8] sm:$0xf]  ;;  %v1710_v5 = vld [vmem:[%s2553_s0 + $0x110] sm:$0xf0] }
  0x82   :  { %v1383_v17 = vor.u32 %v1710_v5, %v1382_v3 }
  0x83   :  { %1668 = vmatmul.msk.bf16.vlgmr.msrb.gmra.mxu2 %vm758_vm0, %v1271_v6  ;;  %1036 = vmatmul.bf16.vlgmr.msrb.gmra.mxu1 %v1267_v8  ;;  %v1706_v6 = vld [vmem:[%s2553_s0 + $0xf4] sm:$0xf]  ;;  %v1376_v8 = vld [vmem:[%s2553_s0 + $0x10c] sm:$0xf0] }
  0x84   :  { %v1379_v18 = vor.u32 %v1706_v6, %v1376_v8 }
  0x91   :  { %943 = vmatmul.bf16.gmra.mxu3 %v1287_v4  ;;  %992 = vmatmul.bf16.gmra.mxu0 %v1291_v7 }
  0x93   :  { %1669 = vmatmul.msk.bf16.gmra.mxu2 %vm758_vm0, %v1299_v20  ;;  %1041 = vmatmul.bf16.gmra.mxu1 %v1295_v21 }
  0x9e   :  { %v2260_v16 = vpop.f32.mrf.mxu0 }
  0xa0   :  { %v851_v32 = vpop.f32.mrf.mxu1 }
  0xa1   :  { %948 = vmatmul.bf16.gmra.mxu3 %v1315_v29  ;;  %997 = vmatmul.bf16.gmra.mxu0 %v1319_v30  ;;  %v1410_v29 = vld [vmem:[%s2553_s0 + $0x130] sm:$0xf]  ;;  %v1717_v30 = vld [vmem:[%s2553_s0 + $0x148] sm:$0xf0] }
  0xa2   :  { %v1411_v39 = vor.u32 %v1717_v30, %v1410_v29 }
  0xa3   :  { %1670 = vmatmul.msk.bf16.gmra.mxu2 %vm758_vm0, %v1327_v19  ;;  %1046 = vmatmul.bf16.gmra.mxu1 %v1323_v31  ;;  %v1713_v19 = vld [vmem:[%s2553_s0 + $0x12c] sm:$0xf]  ;;  %v1404_v31 = vld [vmem:[%s2553_s0 + $0x144] sm:$0xf0] }
  0xa4   :  { %v802_v33 = vpop.f32.mrf.mxu3  ;;  %v1407_v40 = vor.u32 %v1713_v19, %v1404_v31 }
  0xa5   :  { %v852_v34 = vadd.f32 %v851_v32, %v802_v33 }
  0xa6   :  { %v900_v35 = vpop.f32.mrf.mxu2  ;;  %v2263_v36 = vpop.f32.mrf.mxu0 }
  0xa7   :  { %v2265_v37 = vadd.f32 %v900_v35, %v852_v34  ;;  %v1399_v35 = vor.u32 %v1712_v27, %v1396_v10  ;;  %v1731_v27 = vld [vmem:[%s2553_s0 + $0x1b8] sm:$0xf0] }
  0xa8   :  { %v853_v38 = vpop.f32.mrf.mxu1  ;;  %v1727_v10 = vld [vmem:[%s2553_s0 + $0x19c] sm:$0xf] }
  0xac   :  { %v804_v46 = vpop.f32.mrf.mxu3 }
  0xad   :  { %v854_v47 = vadd.f32 %v853_v38, %v804_v46  ;;  %v1403_v38 = vor.u32 %v1716_v13, %v1402_v28  ;;  %v1460_v28 = vld [vmem:[%s2553_s0 + $0x1b4] sm:$0xf0] }
  0xae   :  { %v902_v48 = vpop.f32.mrf.mxu2  ;;  %v2291_v51 = vpop.f32.mrf.mxu0 }
  0xaf   :  { %v2293_v54 = vadd.f32 %v902_v48, %v854_v47 }
  0xb0   :  { %v856_v55 = vpop.f32.mrf.mxu1 }
  0xb1   :  { %953 = vmatmul.bf16.gmra.mxu3 %v1343_v49  ;;  %1002 = vmatmul.bf16.gmra.mxu0 %v1347_v50  ;;  %v1719_v49 = vld [vmem:[%s2553_s0 + $0x15c] sm:$0xf]  ;;  %v1424_v50 = vld [vmem:[%s2553_s0 + $0x174] sm:$0xf0] }
  0xb2   :  { %v1427_v0 = vor.u32 %v1719_v49, %v1424_v50 }
  0xb3   :  { %1671 = vmatmul.msk.bf16.gmra.mxu2 %vm758_vm0, %v1355_v52  ;;  %1051 = vmatmul.bf16.gmra.mxu1 %v1351_v53  ;;  %v1430_v52 = vld [vmem:[%s2553_s0 + $0x160] sm:$0xf]  ;;  %v1723_v53 = vld [vmem:[%s2553_s0 + $0x178] sm:$0xf0] }
  0xb4   :  { %v807_v56 = vpop.f32.mrf.mxu3  ;;  %v1431_v2 = vor.u32 %v1723_v53, %v1430_v52 }
  0xb5   :  { %v857_v57 = vadd.f32 %v856_v55, %v807_v56  ;;  %v1438_v55 = vld [vmem:[%s2553_s0 + $0x168] sm:$0xf]  ;;  %v1724_v56 = vld [vmem:[%s2553_s0 + $0x180] sm:$0xf0] }
  0xb6   :  { %v905_v58 = vpop.f32.mrf.mxu2  ;;  %v2296_v59 = vpop.f32.mrf.mxu0  ;;  %v1439_v5 = vor.u32 %v1724_v56, %v1438_v55 }
  0xb7   :  { %v2298_v60 = vadd.f32 %v905_v58, %v857_v57  ;;  %v1720_v57 = vld [vmem:[%s2553_s0 + $0x164] sm:$0xf]  ;;  %v1432_v58 = vld [vmem:[%s2553_s0 + $0x17c] sm:$0xf0] }
  0xb8   :  { %v858_v61 = vpop.f32.mrf.mxu1  ;;  %v1435_v6 = vor.u32 %v1720_v57, %v1432_v58 }
  0xbc   :  { %v809_v9 = vpop.f32.mrf.mxu3 }
  0xbd   :  { %v859_v11 = vadd.f32 %v858_v61, %v809_v9 }
  0xbe   :  { %v907_v12 = vpop.f32.mrf.mxu2  ;;  %v2324_v1 = vpop.f32.mrf.mxu0 }
  0xbf   :  { %v2326_v4 = vadd.f32 %v907_v12, %v859_v11  ;;  %v842_v56 = vadd.f32 %v2324_v1, %v2260_v16 }
  0xc0   :  { %v861_v7 = vpop.f32.mrf.mxu1 }
  0xc1   :  { %958 = vmatmul.bf16.gmra.mxu3 %v1371_v14  ;;  %1007 = vmatmul.bf16.gmra.mxu0 %v1375_v15 }
  0xc3   :  { %1672 = vmatmul.msk.bf16.gmra.mxu2 %vm758_vm0, %v1383_v17  ;;  %1056 = vmatmul.bf16.gmra.mxu1 %v1379_v18 }
  0xc4   :  { %v812_v20 = vpop.f32.mrf.mxu3 }
  0xc5   :  { %v862_v21 = vadd.f32 %v861_v7, %v812_v20  ;;  %v1726_v7 = vld [vmem:[%s2553_s0 + $0x194] sm:$0xf]  ;;  %v1452_v20 = vld [vmem:[%s2553_s0 + $0x1ac] sm:$0xf0] }
  0xc6   :  { %v910_v23 = vpop.f32.mrf.mxu2  ;;  %v2329_v24 = vpop.f32.mrf.mxu0  ;;  %v1455_v19 = vor.u32 %v1726_v7, %v1452_v20 }
  0xc7   :  { %v2331_v25 = vadd.f32 %v910_v23, %v862_v21  ;;  %v1458_v21 = vld [vmem:[%s2553_s0 + $0x198] sm:$0xf]  ;;  %v1730_v23 = vld [vmem:[%s2553_s0 + $0x1b0] sm:$0xf0] }
  0xc8   :  { %v863_v26 = vpop.f32.mrf.mxu1  ;;  %v1459_v31 = vor.u32 %v1730_v23, %v1458_v21 }
  0xcc   :  { %v814_v32 = vpop.f32.mrf.mxu3 }
  0xcd   :  { %v864_v33 = vadd.f32 %v863_v26, %v814_v32  ;;  %v1466_v26 = vld [vmem:[%s2553_s0 + $0x1a0] sm:$0xf] }
  0xce   :  { %v912_v34 = vpop.f32.mrf.mxu2  ;;  %v2357_v22 = vpop.f32.mrf.mxu0 }
  0xcf   :  { %v2359_v41 = vadd.f32 %v912_v34, %v864_v33  ;;  %v1467_v33 = vor.u32 %v1731_v27, %v1466_v26  ;;  %v1463_v34 = vor.u32 %v1727_v10, %v1460_v28  ;;  %v847_v7 = vadd.f32 %v2357_v22, %v2291_v51 }
  0xd0   :  { %v866_v42 = vpop.f32.mrf.mxu1 }
  0xd1   :  { %963 = vmatmul.bf16.gmra.mxu3 %v1399_v35  ;;  %1012 = vmatmul.bf16.gmra.mxu0 %v1403_v38 }
  0xd3   :  { %1673 = vmatmul.msk.bf16.gmra.mxu2 %vm758_vm0, %v1411_v39  ;;  %1061 = vmatmul.bf16.gmra.mxu1 %v1407_v40 }
  0xd4   :  { %v817_v43 = vpop.f32.mrf.mxu3 }
  0xd5   :  { %v867_v44 = vadd.f32 %v866_v42, %v817_v43 }
  0xd6   :  { %v915_v45 = vpop.f32.mrf.mxu2  ;;  %v2362_v46 = vpop.f32.mrf.mxu0 }
  0xd7   :  { %v2364_v47 = vadd.f32 %v915_v45, %v867_v44 }
  0xd8   :  { %v868_v48 = vpop.f32.mrf.mxu1 }
  0xdc   :  { %v819_v61 = vpop.f32.mrf.mxu3 }
  0xdd   :  { %v869_v62 = vadd.f32 %v868_v48, %v819_v61 }
  0xde   :  { %v917_v63 = vpop.f32.mrf.mxu2  ;;  %v890_v3 = vpop.f32.mrf.mxu0 }
  0xdf   :  { %v2390_v8 = vadd.f32 %v917_v63, %v869_v62  ;;  %v891_v57 = vadd.f32 %v890_v3, %v842_v56 }
  0xe0   :  { %v871_v9 = vpop.f32.mrf.mxu1 }
  0xe1   :  { %968 = vmatmul.bf16.gmra.mxu3 %v1427_v0  ;;  %1017 = vmatmul.bf16.gmra.mxu0 %v1431_v2 }
  0xe3   :  { %1674 = vmatmul.msk.bf16.gmra.mxu2 %vm758_vm0, %v1439_v5  ;;  %1066 = vmatmul.bf16.gmra.mxu1 %v1435_v6  ;;  %v844_v5 = vadd.f32 %v2329_v24, %v2263_v36 }
  0xe4   :  { %v822_v11 = vpop.f32.mrf.mxu3 }
  0xe5   :  { %v872_v12 = vadd.f32 %v871_v9, %v822_v11 }
  0xe6   :  { %v920_v14 = vpop.f32.mrf.mxu2  ;;  %v892_v15 = vpop.f32.mrf.mxu0 }
  0xe7   :  { %v2393_v17 = vadd.f32 %v920_v14, %v872_v12  ;;  %v893_v9 = vadd.f32 %v892_v15, %v844_v5 }
  0xe8   :  { %v873_v18 = vpop.f32.mrf.mxu1 }
  0xec   :  { %v824_v13 = vpop.f32.mrf.mxu3 }
  0xed   :  { %v874_v29 = vadd.f32 %v873_v18, %v824_v13 }
  0xee   :  { %v922_v30 = vpop.f32.mrf.mxu2  ;;  %v895_v32 = vpop.f32.mrf.mxu0 }
  0xef   :  { %v2419_v35 = vadd.f32 %v922_v30, %v874_v29  ;;  %v896_v21 = vadd.f32 %v895_v32, %v847_v7  ;;  %v849_v32 = vadd.f32 %v2362_v46, %v2296_v59 }
  0xf0   :  { %v876_v38 = vpop.f32.mrf.mxu1 }
  0xf1   :  { %973 = vmatmul.bf16.gmra.mxu3 %v1455_v19  ;;  %1022 = vmatmul.bf16.gmra.mxu0 %v1459_v31 }
  0xf3   :  { %1675 = vmatmul.msk.bf16.gmra.mxu2 %vm758_vm0, %v1467_v33  ;;  %1071 = vmatmul.bf16.gmra.mxu1 %v1463_v34 }
  0xf4   :  { %v827_v39 = vpop.f32.mrf.mxu3 }
  0xf5   :  { %v877_v40 = vadd.f32 %v876_v38, %v827_v39 }
  0xf6   :  { %v925_v42 = vpop.f32.mrf.mxu2  ;;  %v897_v43 = vpop.f32.mrf.mxu0 }
  0xf7   :  { %v2422_v44 = vadd.f32 %v925_v42, %v877_v40  ;;  %v898_v34 = vadd.f32 %v897_v43, %v849_v32 }
  0xf8   :  { %v878_v45 = vpop.f32.mrf.mxu1 }
  0xfc   :  { %v829_v48 = vpop.f32.mrf.mxu3 }
  0xfd   :  { %v879_v49 = vadd.f32 %v878_v45, %v829_v48 }
  0xfe   :  { %v927_v50 = vpop.f32.mrf.mxu2  ;;  %v988_v52 = vpop.f32.mrf.mxu0 }
  0xff   :  { %v2424_v53 = vadd.f32 %v927_v50, %v879_v49 }
 0x100   :  { %v1037_v55 = vpop.f32.mrf.mxu1 }
 0x104   :  { %v939_v58 = vpop.f32.mrf.mxu3 }
 0x105   :  { %v940_v61 = vadd.f32 %v939_v58, %v891_v57 }
 0x106   :  { %v1086_v62 = vpop.f32.mrf.mxu2  ;;  %v990_v63 = vpop.f32.mrf.mxu0 }
 0x107   :  { %v989_v0 = vadd.f32 %v988_v52, %v940_v61 }
 0x108   :  { %v1039_v2 = vpop.f32.mrf.mxu1 }
 0x109   :  { %v1038_v6 = vadd.f32 %v1037_v55, %v989_v0 }
 0x10b   :  { %v1087_v11 = vadd.f32 %v1086_v62, %v1038_v6 }
 0x10c   :  { %v941_v12 = vpop.f32.mrf.mxu3 }
 0x10d   :  { %1126 = vst.msk [vmem:[%s2554_s2] sm:$0xff] %vm758_vm0, %v1087_v11  ;;  %v942_v16 = vadd.f32 %v941_v12, %v893_v9  ;;  %v1182_v36 = vmul.f32 %v1087_v11, %v1087_v11  ;;  %v1143_v23 = vsel %vm758_vm0, %v1087_v11, 0.0 }
 0x10e   :  { %v1088_v1 = vpop.f32.mrf.mxu2  ;;  %v993_v3 = vpop.f32.mrf.mxu0 }
 0x10f   :  { %v991_v14 = vadd.f32 %v990_v63, %v942_v16  ;;  %v1198_v51 = vsel %vm758_vm0, %v1182_v36, 0.0 }
 0x110   :  { %v1042_v18 = vpop.f32.mrf.mxu1 }
 0x111   :  { %v1040_v20 = vadd.f32 %v1039_v2, %v991_v14 }
 0x113   :  { %v1089_v24 = vadd.f32 %v1088_v1, %v1040_v20 }
 0x114   :  { %v944_v15 = vpop.f32.mrf.mxu3 }
 0x115   :  { %1127 = vst.msk [vmem:[%s2554_s2 + $0x8] sm:$0xff] %vm758_vm0, %v1089_v24  ;;  %v1144_v26 = vsel %vm758_vm0, %v1089_v24, 0.0  ;;  %v1183_v27 = vmul.f32 %v1089_v24, %v1089_v24  ;;  %v945_v10 = vadd.f32 %v944_v15, %v896_v21 }
 0x116   :  { %v1091_v28 = vpop.f32.mrf.mxu2  ;;  %v1145_v13 = vadd.f32 %v1144_v26, %v1143_v23  ;;  %v995_v29 = vpop.f32.mrf.mxu0 }
 0x117   :  { %v1199_v22 = vsel %vm758_vm0, %v1183_v27, 0.0  ;;  %v994_v30 = vadd.f32 %v993_v3, %v945_v10 }
 0x118   :  { %v1044_v19 = vpop.f32.mrf.mxu1  ;;  %v1200_v31 = vadd.f32 %v1199_v22, %v1198_v51 }
 0x119   :  { %v1043_v33 = vadd.f32 %v1042_v18, %v994_v30 }
 0x11b   :  { %v1092_v38 = vadd.f32 %v1091_v28, %v1043_v33 }
 0x11c   :  { %v946_v39 = vpop.f32.mrf.mxu3 }
 0x11d   :  { %1128 = vst.msk [vmem:[%s2554_s2 + $0x10] sm:$0xff] %vm758_vm0, %v1092_v38  ;;  %v1146_v40 = vsel %vm758_vm0, %v1092_v38, 0.0  ;;  %v1184_v42 = vmul.f32 %v1092_v38, %v1092_v38  ;;  %v947_v45 = vadd.f32 %v946_v39, %v898_v34 }
 0x11e   :  { %v1093_v48 = vpop.f32.mrf.mxu2  ;;  %v1147_v49 = vadd.f32 %v1146_v40, %v1145_v13  ;;  %v998_v50 = vpop.f32.mrf.mxu0 }
 0x11f   :  { %v1201_v52 = vsel %vm758_vm0, %v1184_v42, 0.0  ;;  %v996_v55 = vadd.f32 %v995_v29, %v947_v45 }
 0x120   :  { %v1047_v59 = vpop.f32.mrf.mxu1  ;;  %v1202_v46 = vadd.f32 %v1201_v52, %v1200_v31 }
 0x121   :  { %v1045_v43 = vadd.f32 %v1044_v19, %v996_v55 }
 0x123   :  { %v1094_v56 = vadd.f32 %v1093_v48, %v1045_v43 }
 0x124   :  { %v949_v57 = vpop.f32.mrf.mxu3 }
 0x125   :  { %1129 = vst.msk [vmem:[%s2554_s2 + $0x18] sm:$0xff] %vm758_vm0, %v1094_v56  ;;  %v1148_v58 = vsel %vm758_vm0, %v1094_v56, 0.0  ;;  %v1185_v61 = vmul.f32 %v1094_v56, %v1094_v56  ;;  %v950_v62 = vadd.f32 %v949_v57, %v2265_v37 }
 0x126   :  { %v1096_v63 = vpop.f32.mrf.mxu2  ;;  %v1149_v0 = vadd.f32 %v1148_v58, %v1147_v49  ;;  %v1000_v2 = vpop.f32.mrf.mxu0 }
 0x127   :  { %v1203_v5 = vsel %vm758_vm0, %v1185_v61, 0.0  ;;  %v999_v6 = vadd.f32 %v998_v50, %v950_v62 }
 0x128   :  { %v1049_v9 = vpop.f32.mrf.mxu1  ;;  %v1204_v11 = vadd.f32 %v1203_v5, %v1202_v46 }
 0x129   :  { %v1048_v12 = vadd.f32 %v1047_v59, %v999_v6 }
 0x12b   :  { %v1097_v16 = vadd.f32 %v1096_v63, %v1048_v12 }
 0x12c   :  { %v951_v1 = vpop.f32.mrf.mxu3 }
 0x12d   :  { %1130 = vst.msk [vmem:[%s2554_s2 + $0x20] sm:$0xff] %vm758_vm0, %v1097_v16  ;;  %v1150_v3 = vsel %vm758_vm0, %v1097_v16, 0.0  ;;  %v1186_v14 = vmul.f32 %v1097_v16, %v1097_v16  ;;  %v952_v37 = vadd.f32 %v951_v1, %v2293_v54 }
 0x12e   :  { %v1098_v18 = vpop.f32.mrf.mxu2  ;;  %v1151_v7 = vadd.f32 %v1150_v3, %v1149_v0  ;;  %v1003_v20 = vpop.f32.mrf.mxu0 }
 0x12f   :  { %v1205_v21 = vsel %vm758_vm0, %v1186_v14, 0.0  ;;  %v1001_v36 = vadd.f32 %v1000_v2, %v952_v37 }
 0x130   :  { %v1052_v24 = vpop.f32.mrf.mxu1  ;;  %v1206_v15 = vadd.f32 %v1205_v21, %v1204_v11 }
 0x131   :  { %v1050_v23 = vadd.f32 %v1049_v9, %v1001_v36 }
 0x133   :  { %v1099_v26 = vadd.f32 %v1098_v18, %v1050_v23 }
 0x134   :  { %v954_v27 = vpop.f32.mrf.mxu3 }
 0x135   :  { %1131 = vst.msk [vmem:[%s2554_s2 + $0x28] sm:$0xff] %vm758_vm0, %v1099_v26  ;;  %v1152_v10 = vsel %vm758_vm0, %v1099_v26, 0.0  ;;  %v1187_v28 = vmul.f32 %v1099_v26, %v1099_v26  ;;  %v955_v54 = vadd.f32 %v954_v27, %v2298_v60 }
 0x136   :  { %v1101_v13 = vpop.f32.mrf.mxu2  ;;  %v1153_v29 = vadd.f32 %v1152_v10, %v1151_v7  ;;  %v1005_v51 = vpop.f32.mrf.mxu0 }
 0x137   :  { %v1207_v22 = vsel %vm758_vm0, %v1187_v28, 0.0  ;;  %v1004_v30 = vadd.f32 %v1003_v20, %v955_v54 }
 0x138   :  { %v1054_v19 = vpop.f32.mrf.mxu1  ;;  %v1208_v31 = vadd.f32 %v1207_v22, %v1206_v15 }
 0x139   :  { %v1053_v32 = vadd.f32 %v1052_v24, %v1004_v30 }
 0x13b   :  { %v1102_v33 = vadd.f32 %v1101_v13, %v1053_v32 }
 0x13c   :  { %v956_v34 = vpop.f32.mrf.mxu3 }
 0x13d   :  { %1132 = vst.msk [vmem:[%s2554_s2 + $0x30] sm:$0xff] %vm758_vm0, %v1102_v33  ;;  %v1154_v38 = vsel %vm758_vm0, %v1102_v33, 0.0  ;;  %v1188_v39 = vmul.f32 %v1102_v33, %v1102_v33  ;;  %v957_v60 = vadd.f32 %v956_v34, %v2326_v4 }
 0x13e   :  { %v1103_v40 = vpop.f32.mrf.mxu2  ;;  %v1155_v42 = vadd.f32 %v1154_v38, %v1153_v29  ;;  %v1008_v45 = vpop.f32.mrf.mxu0 }
 0x13f   :  { %v1209_v48 = vsel %vm758_vm0, %v1188_v39, 0.0  ;;  %v1006_v49 = vadd.f32 %v1005_v51, %v957_v60 }
 0x140   :  { %v1057_v50 = vpop.f32.mrf.mxu1  ;;  %v1210_v52 = vadd.f32 %v1209_v48, %v1208_v31 }
 0x141   :  { %v1055_v55 = vadd.f32 %v1054_v19, %v1006_v49 }
 0x143   :  { %v1104_v59 = vadd.f32 %v1103_v40, %v1055_v55  ;;  %v1807_v55 = vmov 0.0  }
 0x144   :  { %v959_v46 = vpop.f32.mrf.mxu3  ;;  %1142 = vst.msk [vmem:[%s2555_s3] sm:$0xff] %vm758_vm0, %v1807_v55 }
 0x145   :  { %1133 = vst.msk [vmem:[%s2554_s2 + $0x38] sm:$0xff] %vm758_vm0, %v1104_v59  ;;  %v1156_v43 = vsel %vm758_vm0, %v1104_v59, 0.0  ;;  %v1189_v56 = vmul.f32 %v1104_v59, %v1104_v59  ;;  %v960_v4 = vadd.f32 %v959_v46, %v2331_v25 }
 0x146   :  { %v1106_v57 = vpop.f32.mrf.mxu2  ;;  %v1157_v58 = vadd.f32 %v1156_v43, %v1155_v42  ;;  %v1010_v61 = vpop.f32.mrf.mxu0 }
 0x147   :  { %v1211_v62 = vsel %vm758_vm0, %v1189_v56, 0.0  ;;  %v1009_v63 = vadd.f32 %v1008_v45, %v960_v4 }
 0x148   :  { %v1059_v0 = vpop.f32.mrf.mxu1  ;;  %v1212_v2 = vadd.f32 %v1211_v62, %v1210_v52 }
 0x149   :  { %v1058_v5 = vadd.f32 %v1057_v50, %v1009_v63 }
 0x14b   :  { %v1107_v6 = vadd.f32 %v1106_v57, %v1058_v5 }
 0x14c   :  { %v961_v9 = vpop.f32.mrf.mxu3 }
 0x14d   :  { %1134 = vst.msk [vmem:[%s2554_s2 + $0x40] sm:$0xff] %vm758_vm0, %v1107_v6  ;;  %v1158_v11 = vsel %vm758_vm0, %v1107_v6, 0.0  ;;  %v1190_v12 = vmul.f32 %v1107_v6, %v1107_v6  ;;  %v962_v25 = vadd.f32 %v961_v9, %v2359_v41 }
 0x14e   :  { %v1108_v16 = vpop.f32.mrf.mxu2  ;;  %v1159_v1 = vadd.f32 %v1158_v11, %v1157_v58  ;;  %v1013_v3 = vpop.f32.mrf.mxu0 }
 0x14f   :  { %v1213_v14 = vsel %vm758_vm0, %v1190_v12, 0.0  ;;  %v1011_v37 = vadd.f32 %v1010_v61, %v962_v25 }
 0x150   :  { %v1062_v18 = vpop.f32.mrf.mxu1  ;;  %v1214_v7 = vadd.f32 %v1213_v14, %v1212_v2 }
 0x151   :  { %v1060_v20 = vadd.f32 %v1059_v0, %v1011_v37 }
 0x153   :  { %v1109_v21 = vadd.f32 %v1108_v16, %v1060_v20 }
 0x154   :  { %v964_v36 = vpop.f32.mrf.mxu3 }
 0x155   :  { %1135 = vst.msk [vmem:[%s2554_s2 + $0x48] sm:$0xff] %vm758_vm0, %v1109_v21  ;;  %v1160_v24 = vsel %vm758_vm0, %v1109_v21, 0.0  ;;  %v1191_v15 = vmul.f32 %v1109_v21, %v1109_v21  ;;  %v965_v41 = vadd.f32 %v964_v36, %v2364_v47 }
 0x156   :  { %v1111_v23 = vpop.f32.mrf.mxu2  ;;  %v1161_v26 = vadd.f32 %v1160_v24, %v1159_v1  ;;  %v1015_v27 = vpop.f32.mrf.mxu0 }
 0x157   :  { %v1215_v10 = vsel %vm758_vm0, %v1191_v15, 0.0  ;;  %v1014_v28 = vadd.f32 %v1013_v3, %v965_v41 }
 0x158   :  { %v1216_v54 = vadd.f32 %v1215_v10, %v1214_v7  ;;  %v1064_v13 = vpop.f32.mrf.mxu1 }
 0x159   :  { %v1063_v29 = vadd.f32 %v1062_v18, %v1014_v28 }
 0x15b   :  { %v1112_v51 = vadd.f32 %v1111_v23, %v1063_v29 }
 0x15c   :  { %v966_v22 = vpop.f32.mrf.mxu3 }
 0x15d   :  { %1136 = vst.msk [vmem:[%s2554_s2 + $0x50] sm:$0xff] %vm758_vm0, %v1112_v51  ;;  %v1162_v30 = vsel %vm758_vm0, %v1112_v51, 0.0  ;;  %v1192_v19 = vmul.f32 %v1112_v51, %v1112_v51  ;;  %v967_v47 = vadd.f32 %v966_v22, %v2390_v8 }
 0x15e   :  { %v1113_v31 = vpop.f32.mrf.mxu2  ;;  %v1163_v32 = vadd.f32 %v1162_v30, %v1161_v26  ;;  %v1018_v39 = vpop.f32.mrf.mxu0 }
 0x15f   :  { %v1217_v33 = vsel %vm758_vm0, %v1192_v19, 0.0  ;;  %v1016_v34 = vadd.f32 %v1015_v27, %v967_v47 }
 0x160   :  { %v1218_v38 = vadd.f32 %v1217_v33, %v1216_v54  ;;  %v1067_v40 = vpop.f32.mrf.mxu1 }
 0x161   :  { %v1065_v60 = vadd.f32 %v1064_v13, %v1016_v34 }
 0x163   :  { %v1114_v42 = vadd.f32 %v1113_v31, %v1065_v60 }
 0x164   :  { %v969_v45 = vpop.f32.mrf.mxu3 }
 0x165   :  { %1137 = vst.msk [vmem:[%s2554_s2 + $0x58] sm:$0xff] %vm758_vm0, %v1114_v42  ;;  %v1164_v48 = vsel %vm758_vm0, %v1114_v42, 0.0  ;;  %v1193_v49 = vmul.f32 %v1114_v42, %v1114_v42  ;;  %v970_v8 = vadd.f32 %v969_v45, %v2393_v17 }
 0x166   :  { %v1116_v50 = vpop.f32.mrf.mxu2  ;;  %v1165_v52 = vadd.f32 %v1164_v48, %v1163_v32  ;;  %v1020_v4 = vpop.f32.mrf.mxu0 }
 0x167   :  { %v1219_v59 = vsel %vm758_vm0, %v1193_v49, 0.0  ;;  %v1019_v46 = vadd.f32 %v1018_v39, %v970_v8 }
 0x168   :  { %v1220_v43 = vadd.f32 %v1219_v59, %v1218_v38  ;;  %v1069_v58 = vpop.f32.mrf.mxu1 }
 0x169   :  { %v1068_v56 = vadd.f32 %v1067_v40, %v1019_v46 }
 0x16b   :  { %v1117_v57 = vadd.f32 %v1116_v50, %v1068_v56 }
 0x16c   :  { %v971_v61 = vpop.f32.mrf.mxu3 }
 0x16d   :  { %1138 = vst.msk [vmem:[%s2554_s2 + $0x60] sm:$0xff] %vm758_vm0, %v1117_v57  ;;  %v1166_v17 = vsel %vm758_vm0, %v1117_v57, 0.0  ;;  %v1194_v62 = vmul.f32 %v1117_v57, %v1117_v57  ;;  %v972_v63 = vadd.f32 %v971_v61, %v2419_v35 }
 0x16e   :  { %v1167_v0 = vadd.f32 %v1166_v17, %v1165_v52  ;;  %v1118_v2 = vpop.f32.mrf.mxu2  ;;  %v1023_v25 = vpop.f32.mrf.mxu0 }
 0x16f   :  { %v1221_v5 = vsel %vm758_vm0, %v1194_v62, 0.0  ;;  %v1021_v6 = vadd.f32 %v1020_v4, %v972_v63 }
 0x170   :  { %v1222_v9 = vadd.f32 %v1221_v5, %v1220_v43  ;;  %v1072_v37 = vpop.f32.mrf.mxu1 }
 0x171   :  { %v1070_v11 = vadd.f32 %v1069_v58, %v1021_v6 }
 0x173   :  { %v1119_v12 = vadd.f32 %v1118_v2, %v1070_v11 }
 0x174   :  { %v974_v16 = vpop.f32.mrf.mxu3 }
 0x175   :  { %1139 = vst.msk [vmem:[%s2554_s2 + $0x68] sm:$0xff] %vm758_vm0, %v1119_v12  ;;  %v1168_v1 = vsel %vm758_vm0, %v1119_v12, 0.0  ;;  %v1195_v3 = vmul.f32 %v1119_v12, %v1119_v12  ;;  %v975_v35 = vadd.f32 %v974_v16, %v2422_v44 }
 0x176   :  { %v1169_v14 = vadd.f32 %v1168_v1, %v1167_v0  ;;  %v1121_v21 = vpop.f32.mrf.mxu2  ;;  %v1025_v27 = vpop.f32.mrf.mxu0 }
 0x177   :  { %v1223_v18 = vsel %vm758_vm0, %v1195_v3, 0.0  ;;  %v1024_v7 = vadd.f32 %v1023_v25, %v975_v35 }
 0x178   :  { %v1224_v20 = vadd.f32 %v1223_v18, %v1222_v9  ;;  %v1074_v13 = vpop.f32.mrf.mxu1 }
 0x179   :  { %v1073_v36 = vadd.f32 %v1072_v37, %v1024_v7 }
 0x17b   :  { %v1122_v24 = vadd.f32 %v1121_v21, %v1073_v36 }
 0x17c   :  { %v976_v15 = vpop.f32.mrf.mxu3 }
 0x17d   :  { %1140 = vst.msk [vmem:[%s2554_s2 + $0x70] sm:$0xff] %vm758_vm0, %v1122_v24  ;;  %v1170_v41 = vsel %vm758_vm0, %v1122_v24, 0.0  ;;  %v1196_v23 = vmul.f32 %v1122_v24, %v1122_v24  ;;  %v977_v44 = vadd.f32 %v976_v15, %v2424_v53 }
 0x17e   :  { %v1171_v26 = vadd.f32 %v1170_v41, %v1169_v14  ;;  %v1123_v51 = vpop.f32.mrf.mxu2 }
 0x17f   :  { %v1225_v10 = vsel %vm758_vm0, %v1196_v23, 0.0  ;;  %v1026_v28 = vadd.f32 %v1025_v27, %v977_v44 }
 0x180   :  { %v1226_v54 = vadd.f32 %v1225_v10, %v1224_v20 }
 0x181   :  { %v1075_v29 = vadd.f32 %v1074_v13, %v1026_v28 }
 0x183   :  { %v1124_v22 = vadd.f32 %v1123_v51, %v1075_v29 }
 0x185   :  { %1141 = vst.msk [vmem:[%s2554_s2 + $0x78] sm:$0xff] %vm758_vm0, %v1124_v22  ;;  %v1172_v30 = vsel %vm758_vm0, %v1124_v22, 0.0  ;;  %v1197_v19 = vmul.f32 %v1124_v22, %v1124_v22 }
 0x186   :  { %v1173_v47 = vadd.f32 %v1172_v30, %v1171_v26 }
 0x187   :  { %v1227_v53 = vsel %vm758_vm0, %v1197_v19, 0.0 }
 0x188   :  { %v1174_v31 = vrot.slane %v1173_v47, 4  ;;  %v1228_v32 = vadd.f32 %v1227_v53, %v1226_v54 }
 0x18a   :  { %v1175_v33 = vadd.f32 %v1174_v31, %v1173_v47  ;;  %v1229_v34 = vrot.slane %v1228_v32, 4 }
 0x18c   :  { %v1176_v38 = vrot.slane %v1175_v33, 2  ;;  %v1230_v39 = vadd.f32 %v1229_v34, %v1228_v32 }
 0x18e   :  { %v1177_v60 = vadd.f32 %v1176_v38, %v1175_v33  ;;  %v1231_v40 = vrot.slane %v1230_v39, 2 }
 0x190   :  { %v1178_v42 = vrot.slane %v1177_v60, 1  ;;  %v1232_v45 = vadd.f32 %v1231_v40, %v1230_v39 }
 0x192   :  { %v1179_v48 = vadd.f32 %v1178_v42, %v1177_v60  ;;  %v1233_v49 = vrot.slane %v1232_v45, 1 }
 0x194   :  { %1181 = vst.msk [vmem:[%s2555_s3] sm:$0x1] %vm1180_vm1, %v1179_v48  ;;  %v1234_v8 = vadd.f32 %v1233_v49, %v1232_v45 }
 0x196   :  { %1235 = vst.msk [vmem:[%s2555_s3 + $0x1] sm:$0x1] %vm1180_vm1, %v1234_v8 }

// kernel: hierarchical_vae_forward.54
= control target key start
LH: loop header
LB: loop body
LE: loop exit
PB: predicated region body
PF: predicated region fallthrough
CT: control target
= control target key end

     0   :  { %vm763_vm0 = vcmask 261120   ;;  %s2437_s1 = inlined_call_operand.vmem [shape: bf16[800,32], index: 1, kind: input, shape index: {}]   ;;  %s2438_s2 = inlined_call_operand.vmem [shape: f32[1,32], index: 2, kind: input, shape index: {}]   ;;  %s2439_s0 = inlined_call_operand.vmem [shape: bf16[128,800], index: 0, kind: input, shape index: {}]   ;;  %s2440_s3 = inlined_call_operand.vmem [shape: f32[128,32], index: 3, kind: output, shape index: {}]  }
   0x1   :  { %v1646_v0 = vld [vmem:[%s2437_s1 + $0x38] sm:$0xff]  ;;  %v1645_v3 = vld [vmem:[%s2437_s1 + $0x30] sm:$0xff]  ;;  %v1644_v6 = vld [vmem:[%s2437_s1 + $0x28] sm:$0xff] }
   0x2   :  { %v1740_v1 = vld [vmem:[%s2437_s1 + $0xb8] sm:$0xff]  ;;  %788 = vmatpush.bf16.msra.mxu0 %v1646_v0  ;;  %1689 = vmatpush.bf16.msra.mxu3 %v1646_v0  ;;  %v1755_v4 = vld [vmem:[%s2437_s1 + $0xb0] sm:$0xff]  ;;  %v1770_v7 = vld [vmem:[%s2437_s1 + $0xa8] sm:$0xff] }
   0x3   :  { %v1745_v2 = vld [vmem:[%s2437_s1 + $0x78] sm:$0xff]  ;;  %1705 = vmatpush.bf16.msra.mxu2 %v1740_v1  ;;  %v1760_v5 = vld [vmem:[%s2437_s1 + $0x70] sm:$0xff]  ;;  %v1775_v8 = vld [vmem:[%s2437_s1 + $0x68] sm:$0xff] }
   0x4   :  { %1697 = vmatpush.bf16.msra.mxu1 %v1745_v2  ;;  %v1643_v9 = vld [vmem:[%s2437_s1 + $0x20] sm:$0xff]  ;;  %v1642_v12 = vld [vmem:[%s2437_s1 + $0x18] sm:$0xff]  ;;  %v1641_v15 = vld [vmem:[%s2437_s1 + $0x10] sm:$0xff] }
   0x5   :  { %v1785_v10 = vld [vmem:[%s2437_s1 + $0xa0] sm:$0xff]  ;;  %v1800_v13 = vld [vmem:[%s2437_s1 + $0x98] sm:$0xff]  ;;  %v1815_v16 = vld [vmem:[%s2437_s1 + $0x90] sm:$0xff] }
   0x6   :  { %789 = vmatpush.bf16.msra.mxu0 %v1645_v3  ;;  %1690 = vmatpush.bf16.msra.mxu3 %v1645_v3  ;;  %v1790_v11 = vld [vmem:[%s2437_s1 + $0x60] sm:$0xff]  ;;  %v1805_v14 = vld [vmem:[%s2437_s1 + $0x58] sm:$0xff]  ;;  %v1820_v17 = vld [vmem:[%s2437_s1 + $0x50] sm:$0xff] }
   0x7   :  { %1706 = vmatpush.bf16.msra.mxu2 %v1755_v4  ;;  %v1640_v18 = vld [vmem:[%s2437_s1 + $0x8] sm:$0xff]  ;;  %v1639_v21 = vld [vmem:[%s2437_s1] sm:$0xff]  ;;  %v1586_v25 = vld [vmem:[%s2439_s0 + $0x18] sm:$0xf0] }
   0x8   :  { %1698 = vmatpush.bf16.msra.mxu1 %v1760_v5  ;;  %v1830_v19 = vld [vmem:[%s2437_s1 + $0x88] sm:$0xff]  ;;  %v1843_v22 = vld [vmem:[%s2437_s1 + $0x80] sm:$0xff]  ;;  %v1209_v26 = vld [vmem:[%s2439_s0 + $0x70] sm:$0xf] }
   0x9   :  { %v1835_v20 = vld [vmem:[%s2437_s1 + $0x48] sm:$0xff]  ;;  %v1848_v23 = vld [vmem:[%s2437_s1 + $0x40] sm:$0xff]  ;;  %v1217_v28 = vld [vmem:[%s2439_s0 + $0x78] sm:$0xf] }
   0xa   :  { %790 = vmatpush.bf16.msra.mxu0 %v1644_v6  ;;  %1691 = vmatpush.bf16.msra.mxu3 %v1644_v6  ;;  %v1153_v24 = vld [vmem:[%s2439_s0] sm:$0xf]  ;;  %v1600_v27 = vld [vmem:[%s2439_s0 + $0x88] sm:$0xf0]  ;;  %v1601_v29 = vld [vmem:[%s2439_s0 + $0x90] sm:$0xf0] }
   0xb   :  { %1707 = vmatpush.bf16.msra.mxu2 %v1770_v7  ;;  %v1597_v30 = vld [vmem:[%s2439_s0 + $0x74] sm:$0xf]  ;;  %v1211_v31 = vld [vmem:[%s2439_s0 + $0x8c] sm:$0xf0]  ;;  %v1670_v32 = vld [vmem:[%s2437_s1 + $0xf8] sm:$0xff]  ;;  %v1154_v33 = vor.u32 %v1586_v25, %v1153_v24  ;;  %v1210_v34 = vor.u32 %v1600_v27, %v1209_v26  ;;  %v1218_v35 = vor.u32 %v1601_v29, %v1217_v28 }
   0xc   :  { %1699 = vmatpush.bf16.msra.mxu1 %v1775_v8  ;;  %v1214_v36 = vor.u32 %v1597_v30, %v1211_v31  ;;  %v1688_v37 = vld [vmem:[%s2437_s1 + $0x188] sm:$0xff]  ;;  %v1686_v38 = vld [vmem:[%s2437_s1 + $0x178] sm:$0xff]  ;;  %v1669_v39 = vld [vmem:[%s2437_s1 + $0xf0] sm:$0xff] }
   0xd   :  { %v1685_v40 = vld [vmem:[%s2437_s1 + $0x170] sm:$0xff]  ;;  %v1668_v41 = vld [vmem:[%s2437_s1 + $0xe8] sm:$0xff]  ;;  %v1667_v43 = vld [vmem:[%s2437_s1 + $0xe0] sm:$0xff] }
   0xe   :  { %791 = vmatpush.bf16.msra.mxu0 %v1643_v9  ;;  %1692 = vmatpush.bf16.msra.mxu3 %v1643_v9  ;;  %v1684_v42 = vld [vmem:[%s2437_s1 + $0x168] sm:$0xff]  ;;  %v1181_v44 = vld [vmem:[%s2439_s0 + $0x38] sm:$0xf]  ;;  %v1593_v45 = vld [vmem:[%s2439_s0 + $0x50] sm:$0xf0] }
   0xf   :  { %1708 = vmatpush.bf16.msra.mxu2 %v1785_v10  ;;  %v1237_v46 = vld [vmem:[%s2439_s0 + $0xa8] sm:$0xf]  ;;  %v1607_v47 = vld [vmem:[%s2439_s0 + $0xc0] sm:$0xf0]  ;;  %v1245_v48 = vld [vmem:[%s2439_s0 + $0xb0] sm:$0xf]  ;;  %v1182_v53 = vor.u32 %v1593_v45, %v1181_v44 }
  0x10   :  { %1700 = vmatpush.bf16.msra.mxu1 %v1790_v11  ;;  %v1608_v49 = vld [vmem:[%s2439_s0 + $0xc8] sm:$0xf0]  ;;  %v1239_v51 = vld [vmem:[%s2439_s0 + $0xc4] sm:$0xf0]  ;;  %v1683_v52 = vld [vmem:[%s2437_s1 + $0x160] sm:$0xff]  ;;  %v1238_v54 = vor.u32 %v1607_v47, %v1237_v46 }
  0x11   :  { %v1604_v50 = vld [vmem:[%s2439_s0 + $0xac] sm:$0xf]  ;;  %v1246_v55 = vor.u32 %v1608_v49, %v1245_v48  ;;  %v1666_v57 = vld [vmem:[%s2437_s1 + $0xd8] sm:$0xff]  ;;  %v1687_v58 = vld [vmem:[%s2437_s1 + $0x180] sm:$0xff] }
  0x12   :  { %792 = vmatpush.bf16.msra.mxu0 %v1642_v12  ;;  %1693 = vmatpush.bf16.msra.mxu3 %v1642_v12  ;;  %v1242_v56 = vor.u32 %v1604_v50, %v1239_v51  ;;  %v1682_v59 = vld [vmem:[%s2437_s1 + $0x158] sm:$0xff]  ;;  %v1665_v60 = vld [vmem:[%s2437_s1 + $0xd0] sm:$0xff]  ;;  %v1265_v61 = vld [vmem:[%s2439_s0 + $0xe0] sm:$0xf] }
  0x13   :  { %1709 = vmatpush.bf16.msra.mxu2 %v1800_v13  ;;  %v1614_v62 = vld [vmem:[%s2439_s0 + $0xf8] sm:$0xf0]  ;;  %v1583_v63 = vld [vmem:[%s2439_s0 + $0x4] sm:$0xf]  ;;  %v1155_v0 = vld [vmem:[%s2439_s0 + $0x1c] sm:$0xf0] }
  0x14   :  { %1701 = vmatpush.bf16.msra.mxu1 %v1805_v14  ;;  %v1615_v3 = vld [vmem:[%s2439_s0 + $0x100] sm:$0xf0]  ;;  %v1267_v6 = vld [vmem:[%s2439_s0 + $0xfc] sm:$0xf0]  ;;  %v1158_v9 = vor.u32 %v1583_v63, %v1155_v0  ;;  %v1321_v30 = vld [vmem:[%s2439_s0 + $0x150] sm:$0xf] }
  0x15   :  { %v1663_v28 = vld [vmem:[%s2437_s1 + $0xc0] sm:$0xff]  ;;  %v1594_v46 = vld [vmem:[%s2439_s0 + $0x58] sm:$0xf0]  ;;  %v1357_v47 = vld [vmem:[%s2439_s0 + $0x190] sm:$0xf] }
  0x16   :  { %793 = vmatpush.bf16.msra.mxu0 %v1641_v15  ;;  %1694 = vmatpush.bf16.msra.mxu3 %v1641_v15  ;;  %v1664_v15 = vld [vmem:[%s2437_s1 + $0xc8] sm:$0xff]  ;;  %v1679_v29 = vld [vmem:[%s2437_s1 + $0x140] sm:$0xff]  ;;  %v1673_v51 = vld [vmem:[%s2437_s1 + $0x110] sm:$0xff] }
  0x17   :  { %1710 = vmatpush.bf16.msra.mxu2 %v1815_v16  ;;  %v1587_v31 = vld [vmem:[%s2439_s0 + $0x20] sm:$0xf0]  ;;  %v1189_v45 = vld [vmem:[%s2439_s0 + $0x40] sm:$0xf]  ;;  %v1636_v48 = vld [vmem:[%s2439_s0 + $0x1a8] sm:$0xf0] }
  0x18   :  { %1702 = vmatpush.bf16.msra.mxu1 %v1820_v17  ;;  %v1635_v44 = vld [vmem:[%s2439_s0 + $0x1a0] sm:$0xf0]  ;;  %v1632_v49 = vld [vmem:[%s2439_s0 + $0x18c] sm:$0xf]  ;;  %v1351_v50 = vld [vmem:[%s2439_s0 + $0x1a4] sm:$0xf0] }
  0x19   :  { %v1589_v63 = vld [vmem:[%s2439_s0 + $0x30] sm:$0xf0] }
  0x1a   :  { %794 = vmatpush.bf16.msra.mxu0 %v1640_v18  ;;  %1695 = vmatpush.bf16.msra.mxu3 %v1640_v18  ;;  %v1590_v18 = vld [vmem:[%s2439_s0 + $0x3c] sm:$0xf]  ;;  %v1585_v0 = vld [vmem:[%s2439_s0 + $0x14] sm:$0xf] }
  0x1b   :  { %1711 = vmatpush.bf16.msra.mxu2 %v1830_v19 }
  0x1c   :  { %1703 = vmatpush.bf16.msra.mxu1 %v1835_v20 }
  0x1e   :  { %795 = vmatpush.bf16.msra.mxu0 %v1639_v21  ;;  %1696 = vmatpush.bf16.msra.mxu3 %v1639_v21  ;;  %v1618_v21 = vld [vmem:[%s2439_s0 + $0x11c] sm:$0xf] }
  0x1f   :  { %1712 = vmatpush.bf16.msra.mxu2 %v1843_v22 }
  0x20   :  { %1704 = vmatpush.bf16.msra.mxu1 %v1848_v23 }
  0x21   :  { %796 = vmatmul.bf16.vlgmr.msra.gmra.mxu0 %v1154_v33  ;;  %806 = vmatmul.bf16.vlgmr.msra.gmra.mxu3 %v1210_v34  ;;  %v1629_v33 = vld [vmem:[%s2439_s0 + $0x170] sm:$0xf0] }
  0x22   :  { %935 = vmatpush.bf16.msrb.mxu3 %v1670_v32  ;;  %837 = vmatpush.bf16.msrb.mxu0 %v1745_v2  ;;  %v1273_v2 = vld [vmem:[%s2439_s0 + $0xe8] sm:$0xf]  ;;  %v1329_v32 = vld [vmem:[%s2439_s0 + $0x158] sm:$0xf]  ;;  %v1625_v34 = vld [vmem:[%s2439_s0 + $0x154] sm:$0xf] }
  0x23   :  { %904 = vmatmul.bf16.vlgmr.msra.gmra.mxu2 %v1218_v35  ;;  %855 = vmatmul.bf16.vlgmr.msra.gmra.mxu1 %v1214_v36  ;;  %v1323_v35 = vld [vmem:[%s2439_s0 + $0x16c] sm:$0xf0] }
  0x24   :  { %1088 = vmatpush.bf16.msrb.mxu2 %v1688_v37  ;;  %1033 = vmatpush.bf16.msrb.mxu1 %v1686_v38  ;;  %v1677_v36 = vld [vmem:[%s2437_s1 + $0x130] sm:$0xff] }
  0x26   :  { %838 = vmatpush.bf16.msrb.mxu0 %v1760_v5  ;;  %936 = vmatpush.bf16.msrb.mxu3 %v1669_v39  ;;  %v1611_v5 = vld [vmem:[%s2439_s0 + $0xe4] sm:$0xf]  ;;  %v1326_v39 = vor.u32 %v1625_v34, %v1323_v35 }
  0x27   :  { %v1270_v12 = vor.u32 %v1611_v5, %v1267_v6 }
  0x28   :  { %1034 = vmatpush.bf16.msrb.mxu1 %v1685_v40  ;;  %1089 = vmatpush.bf16.msrb.mxu2 %v1687_v58  ;;  %v1676_v40 = vld [vmem:[%s2437_s1 + $0x128] sm:$0xff] }
  0x29   :  { %v1584_v58 = vld [vmem:[%s2439_s0 + $0xc] sm:$0xf] }
  0x2a   :  { %839 = vmatpush.bf16.msrb.mxu0 %v1775_v8  ;;  %937 = vmatpush.bf16.msrb.mxu3 %v1668_v41  ;;  %v1266_v8 = vor.u32 %v1614_v62, %v1265_v61  ;;  %v1675_v41 = vld [vmem:[%s2437_s1 + $0x120] sm:$0xff]  ;;  %v1588_v61 = vld [vmem:[%s2439_s0 + $0x28] sm:$0xf0]  ;;  %v1177_v62 = vld [vmem:[%s2439_s0 + $0x18] sm:$0xf] }
  0x2b   :  { %v1178_v6 = vor.u32 %v1589_v63, %v1177_v62 }
  0x2c   :  { %1035 = vmatpush.bf16.msrb.mxu1 %v1684_v42  ;;  %v1674_v42 = vld [vmem:[%s2437_s1 + $0x118] sm:$0xff] }
  0x2e   :  { %840 = vmatpush.bf16.msrb.mxu0 %v1790_v11  ;;  %938 = vmatpush.bf16.msrb.mxu3 %v1667_v43  ;;  %v1274_v11 = vor.u32 %v1615_v3, %v1273_v2  ;;  %v1349_v43 = vld [vmem:[%s2439_s0 + $0x188] sm:$0xf]  ;;  %v1171_v2 = vld [vmem:[%s2439_s0 + $0x2c] sm:$0xf0] }
  0x30   :  { %1036 = vmatpush.bf16.msrb.mxu1 %v1683_v52  ;;  %v1350_v52 = vor.u32 %v1635_v44, %v1349_v43  ;;  %v1609_v43 = vld [vmem:[%s2439_s0 + $0xd0] sm:$0xf0]  ;;  %v1261_v44 = vld [vmem:[%s2439_s0 + $0xc0] sm:$0xf] }
  0x31   :  { %801 = vmatmul.bf16.gmra.mxu0 %v1182_v53  ;;  %811 = vmatmul.bf16.gmra.mxu3 %v1238_v54  ;;  %v1190_v53 = vor.u32 %v1594_v46, %v1189_v45  ;;  %v1358_v54 = vor.u32 %v1636_v48, %v1357_v47  ;;  %v1610_v45 = vld [vmem:[%s2439_s0 + $0xd8] sm:$0xf0]  ;;  %v1255_v47 = vld [vmem:[%s2439_s0 + $0xd4] sm:$0xf0] }
  0x32   :  { %841 = vmatpush.bf16.msrb.mxu0 %v1805_v14  ;;  %939 = vmatpush.bf16.msrb.mxu3 %v1666_v57  ;;  %v1681_v14 = vld [vmem:[%s2437_s1 + $0x150] sm:$0xff]  ;;  %v1671_v57 = vld [vmem:[%s2437_s1 + $0x100] sm:$0xff]  ;;  %v1606_v46 = vld [vmem:[%s2439_s0 + $0xbc] sm:$0xf] }
  0x33   :  { %909 = vmatmul.bf16.gmra.mxu2 %v1246_v55  ;;  %860 = vmatmul.bf16.gmra.mxu1 %v1242_v56  ;;  %v1354_v55 = vor.u32 %v1632_v49, %v1351_v50  ;;  %v1672_v56 = vld [vmem:[%s2437_s1 + $0x108] sm:$0xff] }
  0x34   :  { %1037 = vmatpush.bf16.msrb.mxu1 %v1682_v59  ;;  %v1163_v59 = vld [vmem:[%s2439_s0 + $0x24] sm:$0xf0] }
  0x35   :  { %v1166_v3 = vor.u32 %v1584_v58, %v1163_v59 }
  0x36   :  { %842 = vmatpush.bf16.msrb.mxu0 %v1820_v17  ;;  %940 = vmatpush.bf16.msrb.mxu3 %v1665_v60  ;;  %v1621_v17 = vld [vmem:[%s2439_s0 + $0x130] sm:$0xf0]  ;;  %v1169_v60 = vld [vmem:[%s2439_s0 + $0x10] sm:$0xf] }
  0x37   :  { %v1170_v5 = vor.u32 %v1588_v61, %v1169_v60 }
  0x38   :  { %1038 = vmatpush.bf16.msrb.mxu1 %v1681_v14  ;;  %v1595_v14 = vld [vmem:[%s2439_s0 + $0x60] sm:$0xf0] }
  0x3a   :  { %843 = vmatpush.bf16.msrb.mxu0 %v1835_v20  ;;  %941 = vmatpush.bf16.msrb.mxu3 %v1664_v15  ;;  %v1622_v20 = vld [vmem:[%s2439_s0 + $0x138] sm:$0xf0]  ;;  %v1205_v15 = vld [vmem:[%s2439_s0 + $0x50] sm:$0xf] }
  0x3e   :  { %844 = vmatpush.bf16.msrb.mxu0 %v1848_v23  ;;  %v1295_v23 = vld [vmem:[%s2439_s0 + $0x134] sm:$0xf0]  ;;  %942 = vmatpush.bf16.msrb.mxu3 %v1663_v28  ;;  %v1599_v28 = vld [vmem:[%s2439_s0 + $0x84] sm:$0xf] }
  0x3f   :  { %v1298_v27 = vor.u32 %v1618_v21, %v1295_v23  ;;  %v1598_v23 = vld [vmem:[%s2439_s0 + $0x7c] sm:$0xf] }
  0x41   :  { %816 = vmatmul.bf16.gmra.mxu3 %v1266_v8  ;;  %845 = vmatmul.bf16.vlgmr.msrb.gmra.mxu0 %v1158_v9  ;;  %v1174_v8 = vor.u32 %v1585_v0, %v1171_v2  ;;  %v1591_v9 = vld [vmem:[%s2439_s0 + $0x44] sm:$0xf] }
  0x42   :  { %886 = vmatpush.bf16.msra.mxu0 %v1740_v1  ;;  %v1293_v1 = vld [vmem:[%s2439_s0 + $0x118] sm:$0xf] }
  0x43   :  { %914 = vmatmul.bf16.gmra.mxu2 %v1274_v11  ;;  %865 = vmatmul.bf16.gmra.mxu1 %v1270_v12  ;;  %v1294_v24 = vor.u32 %v1621_v17, %v1293_v1  ;;  %v1191_v11 = vld [vmem:[%s2439_s0 + $0x5c] sm:$0xf0]  ;;  %v1197_v12 = vld [vmem:[%s2439_s0 + $0x48] sm:$0xf]  ;;  %v1596_v1 = vld [vmem:[%s2439_s0 + $0x68] sm:$0xf0] }
  0x44   :  { %v1592_v17 = vld [vmem:[%s2439_s0 + $0x4c] sm:$0xf] }
  0x46   :  { %887 = vmatpush.bf16.msra.mxu0 %v1755_v4  ;;  %v1183_v4 = vld [vmem:[%s2439_s0 + $0x54] sm:$0xf0] }
  0x47   :  { %v1186_v25 = vor.u32 %v1590_v18, %v1183_v4  ;;  %v1199_v18 = vld [vmem:[%s2439_s0 + $0x64] sm:$0xf0]  ;;  %v1194_v4 = vor.u32 %v1591_v9, %v1191_v11  ;;  %v1289_v9 = vld [vmem:[%s2439_s0 + $0xf8] sm:$0xf]  ;;  %v1617_v11 = vld [vmem:[%s2439_s0 + $0x110] sm:$0xf0] }
  0x48   :  { %v1202_v21 = vor.u32 %v1592_v17, %v1199_v18 }
  0x4a   :  { %888 = vmatpush.bf16.msra.mxu0 %v1770_v7  ;;  %v1301_v7 = vld [vmem:[%s2439_s0 + $0x120] sm:$0xf] }
  0x4b   :  { %v1302_v26 = vor.u32 %v1622_v20, %v1301_v7  ;;  %v1198_v7 = vor.u32 %v1595_v14, %v1197_v12  ;;  %v1206_v20 = vor.u32 %v1596_v1, %v1205_v15  ;;  %v1613_v12 = vld [vmem:[%s2439_s0 + $0xf4] sm:$0xf]  ;;  %v1283_v14 = vld [vmem:[%s2439_s0 + $0x10c] sm:$0xf0] }
  0x4e   :  { %889 = vmatpush.bf16.msra.mxu0 %v1785_v10  ;;  %v1680_v10 = vld [vmem:[%s2437_s1 + $0x148] sm:$0xff] }
  0x4f   :  { %1039 = vmatpush.bf16.msrb.mxu1 %v1680_v10  ;;  %v1603_v10 = vld [vmem:[%s2439_s0 + $0xa0] sm:$0xf0] }
  0x51   :  { %821 = vmatmul.bf16.gmra.mxu3 %v1294_v24  ;;  %850 = vmatmul.bf16.gmra.mxu0 %v1186_v25  ;;  %v1219_v24 = vld [vmem:[%s2439_s0 + $0x94] sm:$0xf0]  ;;  %v1225_v25 = vld [vmem:[%s2439_s0 + $0x80] sm:$0xf] }
  0x52   :  { %890 = vmatpush.bf16.msra.mxu0 %v1800_v13  ;;  %v1678_v13 = vld [vmem:[%s2437_s1 + $0x138] sm:$0xff] }
  0x53   :  { %919 = vmatmul.bf16.gmra.mxu2 %v1302_v26  ;;  %870 = vmatmul.bf16.gmra.mxu1 %v1298_v27  ;;  %v1602_v26 = vld [vmem:[%s2439_s0 + $0x98] sm:$0xf0]  ;;  %v1233_v27 = vld [vmem:[%s2439_s0 + $0x88] sm:$0xf] }
  0x54   :  { %1040 = vmatpush.bf16.msrb.mxu1 %v1679_v29  ;;  %v1222_v29 = vor.u32 %v1598_v23, %v1219_v24 }
  0x56   :  { %891 = vmatpush.bf16.msra.mxu0 %v1815_v16  ;;  %v1628_v16 = vld [vmem:[%s2439_s0 + $0x168] sm:$0xf0] }
  0x57   :  { %v1322_v37 = vor.u32 %v1628_v16, %v1321_v30  ;;  %v1226_v30 = vor.u32 %v1602_v26, %v1225_v25 }
  0x5a   :  { %892 = vmatpush.bf16.msra.mxu0 %v1830_v19  ;;  %v1161_v19 = vld [vmem:[%s2439_s0 + $0x8] sm:$0xf] }
  0x5b   :  { %v1162_v38 = vor.u32 %v1587_v31, %v1161_v19  ;;  %v1234_v19 = vor.u32 %v1603_v10, %v1233_v27 }
  0x5e   :  { %893 = vmatpush.bf16.msra.mxu0 %v1843_v22  ;;  %v1330_v22 = vor.u32 %v1629_v33, %v1329_v32  ;;  %v2171_v33 = vld [vmem:[%s2438_s2] ss:$0 sm:$0xff] }
  0x61   :  { %826 = vmatmul.bf16.gmra.mxu3 %v1322_v37  ;;  %894 = vmatmul.bf16.vlgmr.msra.gmra.mxu0 %v1162_v38 }
  0x62   :  { %984 = vmatpush.bf16.msrb.mxu0 %v1678_v13  ;;  %v1227_v13 = vld [vmem:[%s2439_s0 + $0x9c] sm:$0xf0] }
  0x63   :  { %924 = vmatmul.bf16.gmra.mxu2 %v1330_v22  ;;  %875 = vmatmul.bf16.gmra.mxu1 %v1326_v39  ;;  %v1230_v31 = vor.u32 %v1599_v28, %v1227_v13 }
  0x66   :  { %985 = vmatpush.bf16.msrb.mxu0 %v1677_v36 }
  0x6a   :  { %986 = vmatpush.bf16.msrb.mxu0 %v1676_v40  ;;  %v1605_v40 = vld [vmem:[%s2439_s0 + $0xb4] sm:$0xf] }
  0x6e   :  { %987 = vmatpush.bf16.msrb.mxu0 %v1675_v41  ;;  %v1247_v41 = vld [vmem:[%s2439_s0 + $0xcc] sm:$0xf0] }
  0x71   :  { %831 = vmatmul.bf16.gmra.mxu3 %v1350_v52  ;;  %899 = vmatmul.bf16.gmra.mxu0 %v1190_v53 }
  0x72   :  { %988 = vmatpush.bf16.msrb.mxu0 %v1674_v42  ;;  %v1253_v42 = vld [vmem:[%s2439_s0 + $0xb8] sm:$0xf] }
  0x73   :  { %929 = vmatmul.bf16.gmra.mxu2 %v1358_v54  ;;  %880 = vmatmul.bf16.gmra.mxu1 %v1354_v55  ;;  %v1254_v52 = vor.u32 %v1609_v43, %v1253_v42  ;;  %v1262_v54 = vor.u32 %v1610_v45, %v1261_v44  ;;  %v1258_v55 = vor.u32 %v1606_v46, %v1255_v47 }
  0x76   :  { %989 = vmatpush.bf16.msrb.mxu0 %v1673_v51  ;;  %v1250_v51 = vor.u32 %v1605_v40, %v1247_v41 }
  0x7a   :  { %990 = vmatpush.bf16.msrb.mxu0 %v1672_v56 }
  0x7e   :  { %991 = vmatpush.bf16.msrb.mxu0 %v1671_v57 }
  0x81   :  { %943 = vmatmul.bf16.vlgmr.msrb.gmra.mxu3 %v1166_v3  ;;  %992 = vmatmul.bf16.vlgmr.msrb.gmra.mxu0 %v1170_v5  ;;  %v1612_v3 = vld [vmem:[%s2439_s0 + $0xec] sm:$0xf]  ;;  %v1275_v5 = vld [vmem:[%s2439_s0 + $0x104] sm:$0xf0] }
  0x82   :  { %v1278_v18 = vor.u32 %v1612_v3, %v1275_v5  ;;  %v1345_v3 = vld [vmem:[%s2439_s0 + $0x168] sm:$0xf]  ;;  %v1631_v5 = vld [vmem:[%s2439_s0 + $0x180] sm:$0xf0] }
  0x83   :  { %1575 = vmatmul.msk.bf16.vlgmr.msrb.gmra.mxu2 %vm763_vm0, %v1178_v6  ;;  %1041 = vmatmul.bf16.vlgmr.msrb.gmra.mxu1 %v1174_v8  ;;  %v1281_v6 = vld [vmem:[%s2439_s0 + $0xf0] sm:$0xf]  ;;  %v1616_v8 = vld [vmem:[%s2439_s0 + $0x108] sm:$0xf0] }
  0x91   :  { %948 = vmatmul.bf16.gmra.mxu3 %v1194_v4  ;;  %997 = vmatmul.bf16.gmra.mxu0 %v1198_v7  ;;  %v1282_v4 = vor.u32 %v1616_v8, %v1281_v6  ;;  %v1627_v6 = vld [vmem:[%s2439_s0 + $0x164] sm:$0xf]  ;;  %v1339_v8 = vld [vmem:[%s2439_s0 + $0x17c] sm:$0xf0] }
  0x93   :  { %1576 = vmatmul.msk.bf16.gmra.mxu2 %vm763_vm0, %v1206_v20  ;;  %1046 = vmatmul.bf16.gmra.mxu1 %v1202_v21  ;;  %v1290_v20 = vor.u32 %v1617_v11, %v1289_v9  ;;  %v1286_v21 = vor.u32 %v1613_v12, %v1283_v14 }
  0x9e   :  { %v2166_v16 = vpop.f32.mrf.mxu0 }
  0xa0   :  { %v856_v32 = vpop.f32.mrf.mxu1 }
  0xa1   :  { %953 = vmatmul.bf16.gmra.mxu3 %v1222_v29  ;;  %1002 = vmatmul.bf16.gmra.mxu0 %v1226_v30 }
  0xa3   :  { %1577 = vmatmul.msk.bf16.gmra.mxu2 %vm763_vm0, %v1234_v19  ;;  %1051 = vmatmul.bf16.gmra.mxu1 %v1230_v31  ;;  %v1619_v19 = vld [vmem:[%s2439_s0 + $0x124] sm:$0xf]  ;;  %v1303_v31 = vld [vmem:[%s2439_s0 + $0x13c] sm:$0xf0] }
  0xa4   :  { %v807_v34 = vpop.f32.mrf.mxu3  ;;  %v1306_v43 = vor.u32 %v1619_v19, %v1303_v31  ;;  %v1633_v19 = vld [vmem:[%s2439_s0 + $0x194] sm:$0xf]  ;;  %v1359_v31 = vld [vmem:[%s2439_s0 + $0x1ac] sm:$0xf0] }
  0xa5   :  { %v808_v35 = vadd.f32 %v2171_v33, %v807_v34  ;;  %v1623_v34 = vld [vmem:[%s2439_s0 + $0x140] sm:$0xf0] }
  0xa6   :  { %v905_v36 = vpop.f32.mrf.mxu2  ;;  %v2175_v37 = vpop.f32.mrf.mxu0 }
  0xa7   :  { %v857_v38 = vadd.f32 %v856_v32, %v808_v35  ;;  %v1309_v32 = vld [vmem:[%s2439_s0 + $0x128] sm:$0xf]  ;;  %v1317_v35 = vld [vmem:[%s2439_s0 + $0x130] sm:$0xf] }
  0xa8   :  { %v858_v22 = vpop.f32.mrf.mxu1  ;;  %v1310_v44 = vor.u32 %v1623_v34, %v1309_v32  ;;  %v1365_v32 = vld [vmem:[%s2439_s0 + $0x198] sm:$0xf]  ;;  %v1637_v34 = vld [vmem:[%s2439_s0 + $0x1b0] sm:$0xf0] }
  0xa9   :  { %v2177_v39 = vadd.f32 %v905_v36, %v857_v38  ;;  %v1624_v36 = vld [vmem:[%s2439_s0 + $0x148] sm:$0xf0] }
  0xaa   :  { %v1620_v38 = vld [vmem:[%s2439_s0 + $0x12c] sm:$0xf]  ;;  %v1318_v46 = vor.u32 %v1624_v36, %v1317_v35  ;;  %v1373_v35 = vld [vmem:[%s2439_s0 + $0x1a0] sm:$0xf]  ;;  %v1638_v36 = vld [vmem:[%s2439_s0 + $0x1b8] sm:$0xf0] }
  0xac   :  { %v809_v48 = vpop.f32.mrf.mxu3 }
  0xad   :  { %v810_v49 = vadd.f32 %v2171_v33, %v809_v48 }
  0xae   :  { %v907_v50 = vpop.f32.mrf.mxu2  ;;  %v2204_v53 = vpop.f32.mrf.mxu0 }
  0xaf   :  { %v859_v56 = vadd.f32 %v858_v22, %v810_v49  ;;  %v1311_v22 = vld [vmem:[%s2439_s0 + $0x144] sm:$0xf0] }
  0xb0   :  { %v861_v57 = vpop.f32.mrf.mxu1  ;;  %v1314_v47 = vor.u32 %v1620_v38, %v1311_v22  ;;  %v1634_v38 = vld [vmem:[%s2439_s0 + $0x19c] sm:$0xf]  ;;  %v1367_v22 = vld [vmem:[%s2439_s0 + $0x1b4] sm:$0xf0] }
  0xb1   :  { %v2206_v58 = vadd.f32 %v907_v50, %v859_v56  ;;  %958 = vmatmul.bf16.gmra.mxu3 %v1250_v51  ;;  %1007 = vmatmul.bf16.gmra.mxu0 %v1254_v52 }
  0xb3   :  { %1578 = vmatmul.msk.bf16.gmra.mxu2 %vm763_vm0, %v1262_v54  ;;  %1056 = vmatmul.bf16.gmra.mxu1 %v1258_v55 }
  0xb4   :  { %v812_v59 = vpop.f32.mrf.mxu3 }
  0xb5   :  { %v813_v60 = vadd.f32 %v2171_v33, %v812_v59 }
  0xb6   :  { %v910_v61 = vpop.f32.mrf.mxu2  ;;  %v2210_v62 = vpop.f32.mrf.mxu0 }
  0xb7   :  { %v862_v63 = vadd.f32 %v861_v57, %v813_v60  ;;  %v1626_v60 = vld [vmem:[%s2439_s0 + $0x15c] sm:$0xf] }
  0xb8   :  { %v863_v0 = vpop.f32.mrf.mxu1 }
  0xb9   :  { %v2212_v2 = vadd.f32 %v910_v61, %v862_v63  ;;  %v1331_v61 = vld [vmem:[%s2439_s0 + $0x174] sm:$0xf0]  ;;  %v1337_v63 = vld [vmem:[%s2439_s0 + $0x160] sm:$0xf] }
  0xba   :  { %v1334_v14 = vor.u32 %v1626_v60, %v1331_v61 }
  0xbc   :  { %v814_v15 = vpop.f32.mrf.mxu3 }
  0xbd   :  { %v815_v1 = vadd.f32 %v2171_v33, %v814_v15 }
  0xbe   :  { %v912_v17 = vpop.f32.mrf.mxu2  ;;  %v2239_v7 = vpop.f32.mrf.mxu0 }
  0xbf   :  { %v864_v23 = vadd.f32 %v863_v0, %v815_v1  ;;  %v1630_v0 = vld [vmem:[%s2439_s0 + $0x178] sm:$0xf0] }
  0xc0   :  { %v866_v24 = vpop.f32.mrf.mxu1  ;;  %v1338_v15 = vor.u32 %v1630_v0, %v1337_v63 }
  0xc1   :  { %v2241_v25 = vadd.f32 %v912_v17, %v864_v23  ;;  %963 = vmatmul.bf16.gmra.mxu3 %v1278_v18  ;;  %1012 = vmatmul.bf16.gmra.mxu0 %v1282_v4  ;;  %v1346_v17 = vor.u32 %v1631_v5, %v1345_v3  ;;  %v1342_v18 = vor.u32 %v1627_v6, %v1339_v8 }
  0xc3   :  { %1579 = vmatmul.msk.bf16.gmra.mxu2 %vm763_vm0, %v1290_v20  ;;  %1061 = vmatmul.bf16.gmra.mxu1 %v1286_v21 }
  0xc4   :  { %v817_v26 = vpop.f32.mrf.mxu3 }
  0xc5   :  { %v818_v27 = vadd.f32 %v2171_v33, %v817_v26 }
  0xc6   :  { %v915_v10 = vpop.f32.mrf.mxu2  ;;  %v2245_v28 = vpop.f32.mrf.mxu0 }
  0xc7   :  { %v867_v13 = vadd.f32 %v866_v24, %v818_v27 }
  0xc8   :  { %v868_v29 = vpop.f32.mrf.mxu1 }
  0xc9   :  { %v2247_v30 = vadd.f32 %v915_v10, %v867_v13 }
  0xcc   :  { %v819_v40 = vpop.f32.mrf.mxu3 }
  0xcd   :  { %v820_v41 = vadd.f32 %v2171_v33, %v819_v40 }
  0xce   :  { %v917_v42 = vpop.f32.mrf.mxu2  ;;  %v2274_v45 = vpop.f32.mrf.mxu0 }
  0xcf   :  { %v869_v48 = vadd.f32 %v868_v29, %v820_v41 }
  0xd0   :  { %v871_v49 = vpop.f32.mrf.mxu1 }
  0xd1   :  { %v2276_v50 = vadd.f32 %v917_v42, %v869_v48  ;;  %968 = vmatmul.bf16.gmra.mxu3 %v1306_v43  ;;  %1017 = vmatmul.bf16.gmra.mxu0 %v1310_v44  ;;  %v1362_v43 = vor.u32 %v1633_v19, %v1359_v31  ;;  %v1366_v44 = vor.u32 %v1637_v34, %v1365_v32 }
  0xd2   :  { %v1370_v48 = vor.u32 %v1634_v38, %v1367_v22 }
  0xd3   :  { %1580 = vmatmul.msk.bf16.gmra.mxu2 %vm763_vm0, %v1318_v46  ;;  %1066 = vmatmul.bf16.gmra.mxu1 %v1314_v47  ;;  %v1374_v47 = vor.u32 %v1638_v36, %v1373_v35  ;;  %v803_v35 = vadd.f32 %v2171_v33, %v2204_v53 }
  0xd4   :  { %v822_v51 = vpop.f32.mrf.mxu3 }
  0xd5   :  { %v823_v52 = vadd.f32 %v2171_v33, %v822_v51  ;;  %v852_v38 = vadd.f32 %v2274_v45, %v803_v35 }
  0xd6   :  { %v920_v54 = vpop.f32.mrf.mxu2  ;;  %v2280_v55 = vpop.f32.mrf.mxu0 }
  0xd7   :  { %v872_v56 = vadd.f32 %v871_v49, %v823_v52 }
  0xd8   :  { %v873_v57 = vpop.f32.mrf.mxu1 }
  0xd9   :  { %v2282_v59 = vadd.f32 %v920_v54, %v872_v56 }
  0xdc   :  { %v824_v9 = vpop.f32.mrf.mxu3 }
  0xdd   :  { %v825_v11 = vadd.f32 %v2171_v33, %v824_v9  ;;  %v798_v9 = vadd.f32 %v2171_v33, %v2166_v16 }
  0xde   :  { %v922_v12 = vpop.f32.mrf.mxu2  ;;  %v895_v1 = vpop.f32.mrf.mxu0 }
  0xdf   :  { %v874_v4 = vadd.f32 %v873_v57, %v825_v11 }
  0xe0   :  { %v876_v20 = vpop.f32.mrf.mxu1 }
  0xe1   :  { %v2309_v21 = vadd.f32 %v922_v12, %v874_v4  ;;  %973 = vmatmul.bf16.gmra.mxu3 %v1334_v14  ;;  %1022 = vmatmul.bf16.gmra.mxu0 %v1338_v15  ;;  %v847_v14 = vadd.f32 %v2239_v7, %v798_v9 }
  0xe3   :  { %1581 = vmatmul.msk.bf16.gmra.mxu2 %vm763_vm0, %v1346_v17  ;;  %1071 = vmatmul.bf16.gmra.mxu1 %v1342_v18  ;;  %v896_v17 = vadd.f32 %v895_v1, %v847_v14 }
  0xe4   :  { %v827_v23 = vpop.f32.mrf.mxu3 }
  0xe5   :  { %v828_v24 = vadd.f32 %v2171_v33, %v827_v23 }
  0xe6   :  { %v925_v26 = vpop.f32.mrf.mxu2  ;;  %v897_v27 = vpop.f32.mrf.mxu0 }
  0xe7   :  { %v877_v10 = vadd.f32 %v876_v20, %v828_v24  ;;  %v800_v24 = vadd.f32 %v2171_v33, %v2175_v37 }
  0xe8   :  { %v878_v13 = vpop.f32.mrf.mxu1 }
  0xe9   :  { %v2313_v29 = vadd.f32 %v925_v26, %v877_v10 }
  0xec   :  { %v829_v40 = vpop.f32.mrf.mxu3 }
  0xed   :  { %v830_v41 = vadd.f32 %v2171_v33, %v829_v40 }
  0xee   :  { %v927_v42 = vpop.f32.mrf.mxu2  ;;  %v900_v46 = vpop.f32.mrf.mxu0 }
  0xef   :  { %v879_v49 = vadd.f32 %v878_v13, %v830_v41  ;;  %v849_v13 = vadd.f32 %v2245_v28, %v800_v24  ;;  %v901_v22 = vadd.f32 %v900_v46, %v852_v38 }
  0xf0   :  { %v881_v51 = vpop.f32.mrf.mxu1 }
  0xf1   :  { %v2340_v52 = vadd.f32 %v927_v42, %v879_v49  ;;  %978 = vmatmul.bf16.gmra.mxu3 %v1362_v43  ;;  %1027 = vmatmul.bf16.gmra.mxu0 %v1366_v44  ;;  %v898_v16 = vadd.f32 %v897_v27, %v849_v13  ;;  %v805_v44 = vadd.f32 %v2171_v33, %v2210_v62 }
  0xf3   :  { %1582 = vmatmul.msk.bf16.gmra.mxu2 %vm763_vm0, %v1374_v47  ;;  %1076 = vmatmul.bf16.gmra.mxu1 %v1370_v48  ;;  %v854_v48 = vadd.f32 %v2280_v55, %v805_v44 }
  0xf4   :  { %v832_v54 = vpop.f32.mrf.mxu3 }
  0xf5   :  { %v833_v56 = vadd.f32 %v2171_v33, %v832_v54 }
  0xf6   :  { %v930_v57 = vpop.f32.mrf.mxu2  ;;  %v902_v60 = vpop.f32.mrf.mxu0 }
  0xf7   :  { %v882_v61 = vadd.f32 %v881_v51, %v833_v56  ;;  %v903_v49 = vadd.f32 %v902_v60, %v854_v48 }
  0xf8   :  { %v883_v63 = vpop.f32.mrf.mxu1 }
  0xf9   :  { %v2344_v0 = vadd.f32 %v930_v57, %v882_v61 }
  0xfc   :  { %v834_v3 = vpop.f32.mrf.mxu3 }
  0xfd   :  { %v835_v5 = vadd.f32 %v2171_v33, %v834_v3 }
  0xfe   :  { %v932_v6 = vpop.f32.mrf.mxu2  ;;  %v993_v8 = vpop.f32.mrf.mxu0 }
  0xff   :  { %v884_v11 = vadd.f32 %v883_v63, %v835_v5 }
 0x100   :  { %v1042_v12 = vpop.f32.mrf.mxu1 }
 0x101   :  { %v2350_v15 = vadd.f32 %v932_v6, %v884_v11 }
 0x104   :  { %v944_v18 = vpop.f32.mrf.mxu3 }
 0x105   :  { %v945_v4 = vadd.f32 %v944_v18, %v896_v17 }
 0x106   :  { %v1091_v20 = vpop.f32.mrf.mxu2  ;;  %v995_v23 = vpop.f32.mrf.mxu0 }
 0x107   :  { %v994_v26 = vadd.f32 %v993_v8, %v945_v4 }
 0x108   :  { %v1044_v10 = vpop.f32.mrf.mxu1 }
 0x109   :  { %v1043_v19 = vadd.f32 %v1042_v12, %v994_v26 }
 0x10b   :  { %v1092_v31 = vadd.f32 %v1091_v20, %v1043_v19 }
 0x10c   :  { %v946_v32 = vpop.f32.mrf.mxu3 }
 0x10d   :  { %1131 = vst.msk [vmem:[%s2440_s3] sm:$0xff] %vm763_vm0, %v1092_v31  ;;  %v947_v7 = vadd.f32 %v946_v32, %v898_v16 }
 0x10e   :  { %v1093_v1 = vpop.f32.mrf.mxu2  ;;  %v998_v34 = vpop.f32.mrf.mxu0 }
 0x10f   :  { %v996_v37 = vadd.f32 %v995_v23, %v947_v7 }
 0x110   :  { %v1047_v36 = vpop.f32.mrf.mxu1 }
 0x111   :  { %v1045_v28 = vadd.f32 %v1044_v10, %v996_v37 }
 0x113   :  { %v1094_v27 = vadd.f32 %v1093_v1, %v1045_v28 }
 0x114   :  { %v949_v40 = vpop.f32.mrf.mxu3 }
 0x115   :  { %1132 = vst.msk [vmem:[%s2440_s3 + $0x8] sm:$0xff] %vm763_vm0, %v1094_v27  ;;  %v950_v41 = vadd.f32 %v949_v40, %v901_v22 }
 0x116   :  { %v1096_v42 = vpop.f32.mrf.mxu2  ;;  %v1000_v43 = vpop.f32.mrf.mxu0 }
 0x117   :  { %v999_v53 = vadd.f32 %v998_v34, %v950_v41 }
 0x118   :  { %v1049_v47 = vpop.f32.mrf.mxu1 }
 0x119   :  { %v1048_v45 = vadd.f32 %v1047_v36, %v999_v53 }
 0x11b   :  { %v1097_v46 = vadd.f32 %v1096_v42, %v1048_v45 }
 0x11c   :  { %v951_v51 = vpop.f32.mrf.mxu3 }
 0x11d   :  { %1133 = vst.msk [vmem:[%s2440_s3 + $0x10] sm:$0xff] %vm763_vm0, %v1097_v46  ;;  %v952_v54 = vadd.f32 %v951_v51, %v903_v49 }
 0x11e   :  { %v1098_v56 = vpop.f32.mrf.mxu2  ;;  %v1003_v57 = vpop.f32.mrf.mxu0 }
 0x11f   :  { %v1001_v61 = vadd.f32 %v1000_v43, %v952_v54 }
 0x120   :  { %v1052_v63 = vpop.f32.mrf.mxu1 }
 0x121   :  { %v1050_v3 = vadd.f32 %v1049_v47, %v1001_v61 }
 0x123   :  { %v1099_v33 = vadd.f32 %v1098_v56, %v1050_v3 }
 0x124   :  { %v954_v62 = vpop.f32.mrf.mxu3 }
 0x125   :  { %1134 = vst.msk [vmem:[%s2440_s3 + $0x18] sm:$0xff] %vm763_vm0, %v1099_v33  ;;  %v955_v55 = vadd.f32 %v954_v62, %v2177_v39 }
 0x126   :  { %v1101_v60 = vpop.f32.mrf.mxu2  ;;  %v1005_v5 = vpop.f32.mrf.mxu0 }
 0x127   :  { %v1004_v6 = vadd.f32 %v1003_v57, %v955_v55 }
 0x128   :  { %v1054_v8 = vpop.f32.mrf.mxu1 }
 0x129   :  { %v1053_v9 = vadd.f32 %v1052_v63, %v1004_v6 }
 0x12b   :  { %v1102_v11 = vadd.f32 %v1101_v60, %v1053_v9 }
 0x12c   :  { %v956_v12 = vpop.f32.mrf.mxu3 }
 0x12d   :  { %1135 = vst.msk [vmem:[%s2440_s3 + $0x20] sm:$0xff] %vm763_vm0, %v1102_v11  ;;  %v957_v14 = vadd.f32 %v956_v12, %v2206_v58 }
 0x12e   :  { %v1103_v17 = vpop.f32.mrf.mxu2  ;;  %v1008_v18 = vpop.f32.mrf.mxu0 }
 0x12f   :  { %v1006_v4 = vadd.f32 %v1005_v5, %v957_v14 }
 0x130   :  { %v1057_v20 = vpop.f32.mrf.mxu1 }
 0x131   :  { %v1055_v23 = vadd.f32 %v1054_v8, %v1006_v4 }
 0x133   :  { %v1104_v39 = vadd.f32 %v1103_v17, %v1055_v23 }
 0x134   :  { %v959_v24 = vpop.f32.mrf.mxu3 }
 0x135   :  { %1136 = vst.msk [vmem:[%s2440_s3 + $0x28] sm:$0xff] %vm763_vm0, %v1104_v39  ;;  %v960_v26 = vadd.f32 %v959_v24, %v2212_v2 }
 0x136   :  { %v1106_v10 = vpop.f32.mrf.mxu2  ;;  %v1010_v13 = vpop.f32.mrf.mxu0 }
 0x137   :  { %v1009_v19 = vadd.f32 %v1008_v18, %v960_v26 }
 0x138   :  { %v1059_v16 = vpop.f32.mrf.mxu1 }
 0x139   :  { %v1058_v31 = vadd.f32 %v1057_v20, %v1009_v19 }
 0x13b   :  { %v1107_v58 = vadd.f32 %v1106_v10, %v1058_v31 }
 0x13c   :  { %v961_v32 = vpop.f32.mrf.mxu3 }
 0x13d   :  { %1137 = vst.msk [vmem:[%s2440_s3 + $0x30] sm:$0xff] %vm763_vm0, %v1107_v58  ;;  %v962_v7 = vadd.f32 %v961_v32, %v2241_v25 }
 0x13e   :  { %v1108_v1 = vpop.f32.mrf.mxu2  ;;  %v1013_v34 = vpop.f32.mrf.mxu0 }
 0x13f   :  { %v1011_v35 = vadd.f32 %v1010_v13, %v962_v7 }
 0x140   :  { %v1062_v37 = vpop.f32.mrf.mxu1 }
 0x141   :  { %v1060_v36 = vadd.f32 %v1059_v16, %v1011_v35 }
 0x143   :  { %v1109_v2 = vadd.f32 %v1108_v1, %v1060_v36 }
 0x144   :  { %v964_v38 = vpop.f32.mrf.mxu3 }
 0x145   :  { %1138 = vst.msk [vmem:[%s2440_s3 + $0x38] sm:$0xff] %vm763_vm0, %v1109_v2  ;;  %v965_v28 = vadd.f32 %v964_v38, %v2247_v30 }
 0x146   :  { %v1111_v22 = vpop.f32.mrf.mxu2  ;;  %v1015_v27 = vpop.f32.mrf.mxu0 }
 0x147   :  { %v1014_v40 = vadd.f32 %v1013_v34, %v965_v28 }
 0x148   :  { %v1064_v41 = vpop.f32.mrf.mxu1 }
 0x149   :  { %v1063_v42 = vadd.f32 %v1062_v37, %v1014_v40 }
 0x14b   :  { %v1112_v25 = vadd.f32 %v1111_v22, %v1063_v42 }
 0x14c   :  { %v966_v43 = vpop.f32.mrf.mxu3 }
 0x14d   :  { %1139 = vst.msk [vmem:[%s2440_s3 + $0x40] sm:$0xff] %vm763_vm0, %v1112_v25  ;;  %v967_v44 = vadd.f32 %v966_v43, %v2276_v50 }
 0x14e   :  { %v1113_v53 = vpop.f32.mrf.mxu2  ;;  %v1018_v47 = vpop.f32.mrf.mxu0 }
 0x14f   :  { %v1016_v48 = vadd.f32 %v1015_v27, %v967_v44 }
 0x150   :  { %v1067_v45 = vpop.f32.mrf.mxu1 }
 0x151   :  { %v1065_v49 = vadd.f32 %v1064_v41, %v1016_v48 }
 0x153   :  { %v1114_v30 = vadd.f32 %v1113_v53, %v1065_v49 }
 0x154   :  { %v969_v46 = vpop.f32.mrf.mxu3 }
 0x155   :  { %1140 = vst.msk [vmem:[%s2440_s3 + $0x48] sm:$0xff] %vm763_vm0, %v1114_v30  ;;  %v970_v51 = vadd.f32 %v969_v46, %v2282_v59 }
 0x156   :  { %v1116_v54 = vpop.f32.mrf.mxu2  ;;  %v1020_v56 = vpop.f32.mrf.mxu0 }
 0x157   :  { %v1019_v57 = vadd.f32 %v1018_v47, %v970_v51 }
 0x158   :  { %v1069_v61 = vpop.f32.mrf.mxu1 }
 0x159   :  { %v1068_v63 = vadd.f32 %v1067_v45, %v1019_v57 }
 0x15b   :  { %v1117_v50 = vadd.f32 %v1116_v54, %v1068_v63 }
 0x15c   :  { %v971_v3 = vpop.f32.mrf.mxu3 }
 0x15d   :  { %1141 = vst.msk [vmem:[%s2440_s3 + $0x50] sm:$0xff] %vm763_vm0, %v1117_v50  ;;  %v972_v33 = vadd.f32 %v971_v3, %v2309_v21 }
 0x15e   :  { %v1118_v62 = vpop.f32.mrf.mxu2  ;;  %v1023_v60 = vpop.f32.mrf.mxu0 }
 0x15f   :  { %v1021_v55 = vadd.f32 %v1020_v56, %v972_v33 }
 0x160   :  { %v1072_v6 = vpop.f32.mrf.mxu1 }
 0x161   :  { %v1070_v5 = vadd.f32 %v1069_v61, %v1021_v55 }
 0x163   :  { %v1119_v59 = vadd.f32 %v1118_v62, %v1070_v5 }
 0x164   :  { %v974_v8 = vpop.f32.mrf.mxu3 }
 0x165   :  { %1142 = vst.msk [vmem:[%s2440_s3 + $0x58] sm:$0xff] %vm763_vm0, %v1119_v59  ;;  %v975_v9 = vadd.f32 %v974_v8, %v2313_v29 }
 0x166   :  { %v1121_v11 = vpop.f32.mrf.mxu2  ;;  %v1025_v17 = vpop.f32.mrf.mxu0 }
 0x167   :  { %v1024_v12 = vadd.f32 %v1023_v60, %v975_v9 }
 0x168   :  { %v1074_v21 = vpop.f32.mrf.mxu1 }
 0x169   :  { %v1073_v14 = vadd.f32 %v1072_v6, %v1024_v12 }
 0x16b   :  { %v1122_v18 = vadd.f32 %v1121_v11, %v1073_v14 }
 0x16c   :  { %v976_v4 = vpop.f32.mrf.mxu3 }
 0x16d   :  { %1143 = vst.msk [vmem:[%s2440_s3 + $0x60] sm:$0xff] %vm763_vm0, %v1122_v18  ;;  %v977_v20 = vadd.f32 %v976_v4, %v2340_v52 }
 0x16e   :  { %v1123_v23 = vpop.f32.mrf.mxu2  ;;  %v1028_v10 = vpop.f32.mrf.mxu0 }
 0x16f   :  { %v1026_v39 = vadd.f32 %v1025_v17, %v977_v20 }
 0x170   :  { %v1077_v19 = vpop.f32.mrf.mxu1 }
 0x171   :  { %v1075_v24 = vadd.f32 %v1074_v21, %v1026_v39 }
 0x173   :  { %v1124_v26 = vadd.f32 %v1123_v23, %v1075_v24 }
 0x174   :  { %v979_v29 = vpop.f32.mrf.mxu3 }
 0x175   :  { %1144 = vst.msk [vmem:[%s2440_s3 + $0x68] sm:$0xff] %vm763_vm0, %v1124_v26  ;;  %v980_v13 = vadd.f32 %v979_v29, %v2344_v0 }
 0x176   :  { %v1126_v31 = vpop.f32.mrf.mxu2  ;;  %v1030_v1 = vpop.f32.mrf.mxu0 }
 0x177   :  { %v1029_v16 = vadd.f32 %v1028_v10, %v980_v13 }
 0x178   :  { %v1079_v35 = vpop.f32.mrf.mxu1 }
 0x179   :  { %v1078_v58 = vadd.f32 %v1077_v19, %v1029_v16 }
 0x17b   :  { %v1127_v32 = vadd.f32 %v1126_v31, %v1078_v58 }
 0x17c   :  { %v981_v7 = vpop.f32.mrf.mxu3 }
 0x17d   :  { %1145 = vst.msk [vmem:[%s2440_s3 + $0x70] sm:$0xff] %vm763_vm0, %v1127_v32  ;;  %v982_v52 = vadd.f32 %v981_v7, %v2350_v15 }
 0x17e   :  { %v1128_v36 = vpop.f32.mrf.mxu2 }
 0x17f   :  { %v1031_v34 = vadd.f32 %v1030_v1, %v982_v52 }
 0x181   :  { %v1080_v37 = vadd.f32 %v1079_v35, %v1031_v34 }
 0x183   :  { %v1129_v2 = vadd.f32 %v1128_v36, %v1080_v37 }
 0x185   :  { %1146 = vst.msk [vmem:[%s2440_s3 + $0x78] sm:$0xff] %vm763_vm0, %v1129_v2 }

// kernel: hierarchical_vae_forward.55
= control target key start
LH: loop header
LB: loop body
LE: loop exit
PB: predicated region body
PF: predicated region fallthrough
CT: control target
= control target key end

     0   :  { %vm86_vm0 = vcmask 261120   ;;  %v343_v24 = vmov 0.0   ;;  %vm214_vm1 = vcmask 253952   ;;  %s538_s1 = inlined_call_operand.vmem [shape: bf16[32,32], index: 1, kind: input, shape index: {}]   ;;  %s539_s0 = inlined_call_operand.vmem [shape: bf16[128,32], index: 0, kind: input, shape index: {}]   ;;  %s540_s2 = inlined_call_operand.vmem [shape: f32[128,32], index: 2, kind: output, shape index: {0}]   ;;  %s541_s3 = inlined_call_operand.vmem [shape: f32[8,32], index: 3, kind: output, shape index: {1}]  }
   0x1   :  { %v335_v0 = vld [vmem:[%s538_s1 + $0x8] sm:$0xff]  ;;  %v334_v1 = vld [vmem:[%s538_s1] sm:$0xff]  ;;  %v328_v3 = vld [vmem:[%s539_s0 + $0x10] sm:$0xff]  ;;  %176 = vst.msk [vmem:[%s541_s3] sm:$0xff] %vm86_vm0, %v343_v24 }
   0x2   :  { %117 = vmatpush.bf16.msra.mxu0 %v335_v0  ;;  %336 = vmatpush.bf16.msra.mxu1 %v335_v0  ;;  %v326_v2 = vld [vmem:[%s539_s0] sm:$0xff]  ;;  %v332_v5 = vld [vmem:[%s539_s0 + $0x30] sm:$0xff]  ;;  %v327_v6 = vld [vmem:[%s539_s0 + $0x8] sm:$0xff] }
   0x3   :  { %337 = vmatpush.bf16.msra.mxu2 %v335_v0  ;;  %338 = vmatpush.bf16.msra.mxu3 %v335_v0  ;;  %v330_v4 = vld [vmem:[%s539_s0 + $0x20] sm:$0xff]  ;;  %v329_v7 = vld [vmem:[%s539_s0 + $0x18] sm:$0xff]  ;;  %v331_v8 = vld [vmem:[%s539_s0 + $0x28] sm:$0xff] }
   0x4   :  { %v333_v9 = vld [vmem:[%s539_s0 + $0x38] sm:$0xff] }
   0x6   :  { %118 = vmatpush.bf16.msra.mxu0 %v334_v1  ;;  %339 = vmatpush.bf16.msra.mxu1 %v334_v1 }
   0x7   :  { %340 = vmatpush.bf16.msra.mxu2 %v334_v1  ;;  %341 = vmatpush.bf16.msra.mxu3 %v334_v1 }
   0x9   :  { %318 = vmatmul.msk.bf16.vlgmr.msra.gmra.mxu0 %vm86_vm0, %v326_v2  ;;  %320 = vmatmul.msk.bf16.vlgmr.msra.gmra.mxu1 %vm86_vm0, %v328_v3 }
   0xa   :  { %322 = vmatmul.msk.bf16.vlgmr.msra.gmra.mxu2 %vm86_vm0, %v330_v4  ;;  %324 = vmatmul.msk.bf16.vlgmr.msra.gmra.mxu3 %vm86_vm0, %v332_v5 }
  0x19   :  { %319 = vmatmul.msk.bf16.gmra.mxu0 %vm86_vm0, %v327_v6  ;;  %321 = vmatmul.msk.bf16.gmra.mxu1 %vm86_vm0, %v329_v7 }
  0x1a   :  { %323 = vmatmul.msk.bf16.gmra.mxu2 %vm86_vm0, %v331_v8  ;;  %325 = vmatmul.msk.bf16.gmra.mxu3 %vm86_vm0, %v333_v9 }
  0x86   :  { %v120_v10 = vpop.f32.mrf.mxu0  ;;  %v130_v11 = vpop.f32.mrf.mxu1 }
  0x87   :  { %160 = vst.msk [vmem:[%s540_s2] sm:$0xff] %vm86_vm0, %v120_v10  ;;  %v216_v21 = vmul.f32 %v120_v10, %v120_v10  ;;  %v177_v25 = vsel %vm86_vm0, %v120_v10, 0.0  ;;  %v220_v37 = vmul.f32 %v130_v11, %v130_v11  ;;  %v184_v42 = vsel %vm86_vm0, %v130_v11, 0.0 }
  0x88   :  { %164 = vst.msk [vmem:[%s540_s2 + $0x20] sm:$0xff] %vm86_vm0, %v130_v11 }
  0x89   :  { %v232_v29 = vsel %vm86_vm0, %v216_v21, 0.0  ;;  %v239_v47 = vsel %vm86_vm0, %v220_v37, 0.0 }
  0x8d   :  { %v410_v12 = vpop.f32.mrf.mxu2  ;;  %v412_v13 = vpop.f32.mrf.mxu3 }
  0x8e   :  { %v122_v14 = vpop.f32.mrf.mxu0  ;;  %v132_v15 = vpop.f32.mrf.mxu1  ;;  %168 = vst.msk [vmem:[%s540_s2 + $0x40] sm:$0xff] %vm86_vm0, %v410_v12  ;;  %v224_v59 = vmul.f32 %v410_v12, %v410_v12  ;;  %v192_v0 = vsel %vm86_vm0, %v410_v12, 0.0 }
  0x8f   :  { %161 = vst.msk [vmem:[%s540_s2 + $0x8] sm:$0xff] %vm86_vm0, %v122_v14  ;;  %v217_v20 = vmul.f32 %v122_v14, %v122_v14  ;;  %v178_v22 = vsel %vm86_vm0, %v122_v14, 0.0  ;;  %v221_v43 = vmul.f32 %v132_v15, %v132_v15  ;;  %v186_v48 = vsel %vm86_vm0, %v132_v15, 0.0 }
  0x90   :  { %165 = vst.msk [vmem:[%s540_s2 + $0x28] sm:$0xff] %vm86_vm0, %v132_v15  ;;  %v179_v28 = vadd.f32 %v178_v22, %v177_v25  ;;  %v247_v5 = vsel %vm86_vm0, %v224_v59, 0.0 }
  0x91   :  { %172 = vst.msk [vmem:[%s540_s2 + $0x60] sm:$0xff] %vm86_vm0, %v412_v13  ;;  %v233_v26 = vsel %vm86_vm0, %v217_v20, 0.0  ;;  %v241_v52 = vsel %vm86_vm0, %v221_v43, 0.0 }
  0x92   :  { %v234_v33 = vadd.f32 %v233_v26, %v232_v29 }
  0x95   :  { %v432_v16 = vpop.f32.mrf.mxu2  ;;  %v434_v17 = vpop.f32.mrf.mxu3 }
  0x96   :  { %v125_v18 = vpop.f32.mrf.mxu0  ;;  %v135_v19 = vpop.f32.mrf.mxu1  ;;  %169 = vst.msk [vmem:[%s540_s2 + $0x48] sm:$0xff] %vm86_vm0, %v432_v16  ;;  %v225_v1 = vmul.f32 %v432_v16, %v432_v16  ;;  %v194_v6 = vsel %vm86_vm0, %v432_v16, 0.0  ;;  %v200_v16 = vsel %vm86_vm0, %v412_v13, 0.0 }
  0x97   :  { %162 = vst.msk [vmem:[%s540_s2 + $0x10] sm:$0xff] %vm86_vm0, %v125_v18  ;;  %v218_v23 = vmul.f32 %v125_v18, %v125_v18  ;;  %v180_v27 = vsel %vm86_vm0, %v125_v18, 0.0  ;;  %v222_v49 = vmul.f32 %v135_v19, %v135_v19  ;;  %v188_v53 = vsel %vm86_vm0, %v135_v19, 0.0 }
  0x98   :  { %166 = vst.msk [vmem:[%s540_s2 + $0x30] sm:$0xff] %vm86_vm0, %v135_v19  ;;  %v181_v34 = vadd.f32 %v180_v27, %v179_v28  ;;  %v249_v10 = vsel %vm86_vm0, %v225_v1, 0.0  ;;  %v228_v18 = vmul.f32 %v412_v13, %v412_v13  ;;  %v202_v28 = vsel %vm86_vm0, %v434_v17, 0.0 }
  0x99   :  { %173 = vst.msk [vmem:[%s540_s2 + $0x68] sm:$0xff] %vm86_vm0, %v434_v17  ;;  %v235_v30 = vsel %vm86_vm0, %v218_v23, 0.0  ;;  %v243_v60 = vsel %vm86_vm0, %v222_v49, 0.0  ;;  %v229_v23 = vmul.f32 %v434_v17, %v434_v17 }
  0x9a   :  { %v236_v40 = vadd.f32 %v235_v30, %v234_v33  ;;  %v255_v27 = vsel %vm86_vm0, %v228_v18, 0.0 }
  0x9b   :  { %v257_v33 = vsel %vm86_vm0, %v229_v23, 0.0 }
  0x9d   :  { %v145_v31 = vpop.f32.mrf.mxu2  ;;  %v464_v32 = vpop.f32.mrf.mxu3 }
  0x9e   :  { %v127_v35 = vpop.f32.mrf.mxu0  ;;  %v137_v36 = vpop.f32.mrf.mxu1  ;;  %170 = vst.msk [vmem:[%s540_s2 + $0x50] sm:$0xff] %vm86_vm0, %v145_v31  ;;  %v226_v7 = vmul.f32 %v145_v31, %v145_v31  ;;  %v196_v11 = vsel %vm86_vm0, %v145_v31, 0.0  ;;  %v230_v29 = vmul.f32 %v464_v32, %v464_v32  ;;  %v204_v13 = vsel %vm86_vm0, %v464_v32, 0.0 }
  0x9f   :  { %163 = vst.msk [vmem:[%s540_s2 + $0x18] sm:$0xff] %vm86_vm0, %v127_v35  ;;  %v182_v38 = vsel %vm86_vm0, %v127_v35, 0.0  ;;  %v219_v39 = vmul.f32 %v127_v35, %v127_v35  ;;  %v223_v54 = vmul.f32 %v137_v36, %v137_v36  ;;  %v190_v61 = vsel %vm86_vm0, %v137_v36, 0.0 }
  0xa0   :  { %v183_v41 = vadd.f32 %v182_v38, %v181_v34  ;;  %167 = vst.msk [vmem:[%s540_s2 + $0x38] sm:$0xff] %vm86_vm0, %v137_v36  ;;  %v251_v19 = vsel %vm86_vm0, %v226_v7, 0.0  ;;  %v259_v37 = vsel %vm86_vm0, %v230_v29, 0.0 }
  0xa1   :  { %v237_v44 = vsel %vm86_vm0, %v219_v39, 0.0  ;;  %174 = vst.msk [vmem:[%s540_s2 + $0x70] sm:$0xff] %vm86_vm0, %v464_v32  ;;  %v245_v2 = vsel %vm86_vm0, %v223_v54, 0.0 }
  0xa2   :  { %v185_v45 = vadd.f32 %v184_v42, %v183_v41  ;;  %v238_v46 = vadd.f32 %v237_v44, %v236_v40 }
  0xa4   :  { %v240_v50 = vadd.f32 %v239_v47, %v238_v46  ;;  %v187_v51 = vadd.f32 %v186_v48, %v185_v45 }
  0xa5   :  { %v147_v55 = vpop.f32.mrf.mxu2  ;;  %v157_v56 = vpop.f32.mrf.mxu3 }
  0xa6   :  { %v189_v57 = vadd.f32 %v188_v53, %v187_v51  ;;  %v242_v58 = vadd.f32 %v241_v52, %v240_v50  ;;  %171 = vst.msk [vmem:[%s540_s2 + $0x58] sm:$0xff] %vm86_vm0, %v147_v55  ;;  %v227_v12 = vmul.f32 %v147_v55, %v147_v55  ;;  %v198_v20 = vsel %vm86_vm0, %v147_v55, 0.0 }
  0xa7   :  { %175 = vst.msk [vmem:[%s540_s2 + $0x78] sm:$0xff] %vm86_vm0, %v157_v56  ;;  %v231_v34 = vmul.f32 %v157_v56, %v157_v56  ;;  %v206_v38 = vsel %vm86_vm0, %v157_v56, 0.0 }
  0xa8   :  { %v191_v62 = vadd.f32 %v190_v61, %v189_v57  ;;  %v244_v63 = vadd.f32 %v243_v60, %v242_v58  ;;  %v253_v24 = vsel %vm86_vm0, %v227_v12, 0.0 }
  0xa9   :  { %v261_v17 = vsel %vm86_vm0, %v231_v34, 0.0 }
  0xaa   :  { %v193_v3 = vadd.f32 %v192_v0, %v191_v62  ;;  %v246_v4 = vadd.f32 %v245_v2, %v244_v63 }
  0xac   :  { %v248_v8 = vadd.f32 %v247_v5, %v246_v4  ;;  %v195_v9 = vadd.f32 %v194_v6, %v193_v3 }
  0xae   :  { %v197_v14 = vadd.f32 %v196_v11, %v195_v9  ;;  %v250_v15 = vadd.f32 %v249_v10, %v248_v8 }
  0xb0   :  { %v252_v21 = vadd.f32 %v251_v19, %v250_v15  ;;  %v199_v22 = vadd.f32 %v198_v20, %v197_v14 }
  0xb2   :  { %v201_v25 = vadd.f32 %v200_v16, %v199_v22  ;;  %v254_v26 = vadd.f32 %v253_v24, %v252_v21 }
  0xb4   :  { %v256_v30 = vadd.f32 %v255_v27, %v254_v26  ;;  %v203_v31 = vadd.f32 %v202_v28, %v201_v25 }
  0xb6   :  { %v205_v35 = vadd.f32 %v204_v13, %v203_v31  ;;  %v258_v36 = vadd.f32 %v257_v33, %v256_v30 }
  0xb8   :  { %v260_v39 = vadd.f32 %v259_v37, %v258_v36  ;;  %v207_v40 = vadd.f32 %v206_v38, %v205_v35 }
  0xba   :  { %v208_v41 = vrot.slane %v207_v40, 4  ;;  %v262_v42 = vadd.f32 %v261_v17, %v260_v39 }
  0xbc   :  { %v209_v43 = vadd.f32 %v208_v41, %v207_v40  ;;  %v263_v44 = vrot.slane %v262_v42, 4 }
  0xbe   :  { %v210_v45 = vrot.slane %v209_v43, 2  ;;  %v264_v46 = vadd.f32 %v263_v44, %v262_v42 }
  0xc0   :  { %v211_v47 = vadd.f32 %v210_v45, %v209_v43  ;;  %v265_v48 = vrot.slane %v264_v46, 2 }
  0xc2   :  { %v212_v32 = vrot.slane %v211_v47, 1  ;;  %v266_v49 = vadd.f32 %v265_v48, %v264_v46 }
  0xc4   :  { %v213_v50 = vadd.f32 %v212_v32, %v211_v47  ;;  %v267_v51 = vrot.slane %v266_v49, 1 }
  0xc6   :  { %215 = vst.msk [vmem:[%s541_s3] sm:$0x1] %vm214_vm1, %v213_v50  ;;  %v268_v52 = vadd.f32 %v267_v51, %v266_v49 }
  0xc8   :  { %269 = vst.msk [vmem:[%s541_s3 + $0x1] sm:$0x1] %vm214_vm1, %v268_v52 }

// kernel: hierarchical_vae_forward.57
= control target key start
LH: loop header
LB: loop body
LE: loop exit
PB: predicated region body
PF: predicated region fallthrough
CT: control target
= control target key end

     0   :  { %vm315_vm0 = vcmask 261120   ;;  %s1053_s1 = inlined_call_operand.vmem [shape: bf16[288,32], index: 1, kind: input, shape index: {}]   ;;  %s1054_s0 = inlined_call_operand.vmem [shape: bf16[128,288], index: 0, kind: input, shape index: {}]   ;;  %s1055_s2 = inlined_call_operand.vmem [shape: f32[1,32], index: 2, kind: input, shape index: {}]   ;;  %s1056_s3 = inlined_call_operand.vmem [shape: f32[128,32], index: 3, kind: output, shape index: {}]  }
   0x1   :  { %v714_v0 = vld [vmem:[%s1053_s1 + $0x38] sm:$0xff]  ;;  %v724_v1 = vld [vmem:[%s1053_s1 + $0x88] sm:$0xff]  ;;  %v713_v3 = vld [vmem:[%s1053_s1 + $0x30] sm:$0xff] }
   0x2   :  { %v722_v2 = vld [vmem:[%s1053_s1 + $0x78] sm:$0xff]  ;;  %340 = vmatpush.bf16.msra.mxu0 %v714_v0  ;;  %725 = vmatpush.bf16.msra.mxu3 %v714_v0  ;;  %v723_v4 = vld [vmem:[%s1053_s1 + $0x80] sm:$0xff]  ;;  %v721_v5 = vld [vmem:[%s1053_s1 + $0x70] sm:$0xff] }
   0x3   :  { %444 = vmatpush.bf16.msra.mxu2 %v724_v1  ;;  %389 = vmatpush.bf16.msra.mxu1 %v722_v2  ;;  %v517_v6 = vld [vmem:[%s1054_s0 + $0x8] sm:$0xf]  ;;  %v685_v7 = vld [vmem:[%s1054_s0 + $0x10] sm:$0xf0]  ;;  %v711_v11 = vld [vmem:[%s1053_s1 + $0x20] sm:$0xff] }
   0x4   :  { %v518_v8 = vor.u32 %v685_v7, %v517_v6  ;;  %v712_v9 = vld [vmem:[%s1053_s1 + $0x28] sm:$0xff]  ;;  %v719_v12 = vld [vmem:[%s1053_s1 + $0x60] sm:$0xff]  ;;  %v710_v13 = vld [vmem:[%s1053_s1 + $0x18] sm:$0xff] }
   0x5   :  { %v720_v10 = vld [vmem:[%s1053_s1 + $0x68] sm:$0xff]  ;;  %v718_v14 = vld [vmem:[%s1053_s1 + $0x58] sm:$0xff]  ;;  %v709_v15 = vld [vmem:[%s1053_s1 + $0x10] sm:$0xff] }
   0x6   :  { %341 = vmatpush.bf16.msra.mxu0 %v713_v3  ;;  %726 = vmatpush.bf16.msra.mxu3 %v713_v3  ;;  %v717_v16 = vld [vmem:[%s1053_s1 + $0x50] sm:$0xff]  ;;  %v529_v17 = vld [vmem:[%s1054_s0 + $0x20] sm:$0xf]  ;;  %v688_v18 = vld [vmem:[%s1054_s0 + $0x28] sm:$0xf0] }
   0x7   :  { %445 = vmatpush.bf16.msra.mxu2 %v723_v4  ;;  %390 = vmatpush.bf16.msra.mxu1 %v721_v5  ;;  %v530_v19 = vor.u32 %v688_v18, %v529_v17  ;;  %v708_v20 = vld [vmem:[%s1053_s1 + $0x8] sm:$0xff]  ;;  %v707_v22 = vld [vmem:[%s1053_s1] sm:$0xff]  ;;  %v581_v26 = vld [vmem:[%s1054_s0 + $0x90] sm:$0xf] }
   0x8   :  { %v716_v21 = vld [vmem:[%s1053_s1 + $0x48] sm:$0xff]  ;;  %v715_v23 = vld [vmem:[%s1053_s1 + $0x40] sm:$0xff]  ;;  %v702_v27 = vld [vmem:[%s1054_s0 + $0x98] sm:$0xf0] }
   0x9   :  { %v509_v24 = vld [vmem:[%s1054_s0] sm:$0xf]  ;;  %v684_v25 = vld [vmem:[%s1054_s0 + $0x8] sm:$0xf0]  ;;  %v683_v28 = vld [vmem:[%s1054_s0 + $0x4] sm:$0xf]  ;;  %v582_v31 = vor.u32 %v702_v27, %v581_v26 }
   0xa   :  { %675 = vmatmul.msk.bf16.vlgmr.msra.gmra.mxu2 %vm315_vm0, %v518_v8  ;;  %342 = vmatpush.bf16.msra.mxu0 %v712_v9  ;;  %v511_v29 = vld [vmem:[%s1054_s0 + $0xc] sm:$0xf0]  ;;  %v510_v30 = vor.u32 %v684_v25, %v509_v24  ;;  %v541_v33 = vld [vmem:[%s1054_s0 + $0x38] sm:$0xf]  ;;  %v691_v34 = vld [vmem:[%s1054_s0 + $0x40] sm:$0xf0] }
   0xb   :  { %727 = vmatpush.bf16.msra.mxu3 %v712_v9  ;;  %391 = vmatpush.bf16.msra.mxu1 %v720_v10  ;;  %v514_v32 = vor.u32 %v683_v28, %v511_v29  ;;  %v542_v35 = vor.u32 %v691_v34, %v541_v33  ;;  %v521_v36 = vld [vmem:[%s1054_s0 + $0x18] sm:$0xf]  ;;  %v687_v37 = vld [vmem:[%s1054_s0 + $0x20] sm:$0xf0]  ;;  %v593_v38 = vld [vmem:[%s1054_s0 + $0xa8] sm:$0xf] }
   0xc   :  { %v705_v39 = vld [vmem:[%s1054_s0 + $0xb0] sm:$0xf0]  ;;  %v686_v40 = vld [vmem:[%s1054_s0 + $0x1c] sm:$0xf]  ;;  %v523_v41 = vld [vmem:[%s1054_s0 + $0x24] sm:$0xf0]  ;;  %v522_v42 = vor.u32 %v687_v37, %v521_v36 }
   0xd   :  { %v594_v43 = vor.u32 %v705_v39, %v593_v38  ;;  %v526_v44 = vor.u32 %v686_v40, %v523_v41  ;;  %v553_v45 = vld [vmem:[%s1054_s0 + $0x50] sm:$0xf]  ;;  %v694_v46 = vld [vmem:[%s1054_s0 + $0x58] sm:$0xf0]  ;;  %v701_v50 = vld [vmem:[%s1054_s0 + $0x94] sm:$0xf] }
   0xe   :  { %343 = vmatpush.bf16.msra.mxu0 %v711_v11  ;;  %v554_v47 = vor.u32 %v694_v46, %v553_v45  ;;  %v533_v48 = vld [vmem:[%s1054_s0 + $0x30] sm:$0xf]  ;;  %v690_v49 = vld [vmem:[%s1054_s0 + $0x38] sm:$0xf0]  ;;  %v583_v51 = vld [vmem:[%s1054_s0 + $0x9c] sm:$0xf0] }
   0xf   :  { %728 = vmatpush.bf16.msra.mxu3 %v711_v11  ;;  %392 = vmatpush.bf16.msra.mxu1 %v719_v12  ;;  %v689_v52 = vld [vmem:[%s1054_s0 + $0x34] sm:$0xf]  ;;  %v535_v53 = vld [vmem:[%s1054_s0 + $0x3c] sm:$0xf0]  ;;  %v534_v54 = vor.u32 %v690_v49, %v533_v48  ;;  %v586_v55 = vor.u32 %v701_v50, %v583_v51  ;;  %v565_v57 = vld [vmem:[%s1054_s0 + $0x68] sm:$0xf] }
  0x10   :  { %v538_v56 = vor.u32 %v689_v52, %v535_v53  ;;  %v697_v58 = vld [vmem:[%s1054_s0 + $0x70] sm:$0xf0]  ;;  %v545_v60 = vld [vmem:[%s1054_s0 + $0x48] sm:$0xf]  ;;  %v704_v62 = vld [vmem:[%s1054_s0 + $0xac] sm:$0xf] }
  0x11   :  { %v566_v59 = vor.u32 %v697_v58, %v565_v57  ;;  %v693_v61 = vld [vmem:[%s1054_s0 + $0x50] sm:$0xf0]  ;;  %v595_v63 = vld [vmem:[%s1054_s0 + $0xb4] sm:$0xf0]  ;;  %v692_v0 = vld [vmem:[%s1054_s0 + $0x4c] sm:$0xf] }
  0x12   :  { %344 = vmatpush.bf16.msra.mxu0 %v710_v13  ;;  %v547_v1 = vld [vmem:[%s1054_s0 + $0x54] sm:$0xf0]  ;;  %v598_v3 = vor.u32 %v704_v62, %v595_v63  ;;  %v700_v6 = vld [vmem:[%s1054_s0 + $0x88] sm:$0xf0]  ;;  %v557_v8 = vld [vmem:[%s1054_s0 + $0x60] sm:$0xf] }
  0x13   :  { %729 = vmatpush.bf16.msra.mxu3 %v710_v13  ;;  %393 = vmatpush.bf16.msra.mxu1 %v718_v14  ;;  %v550_v4 = vor.u32 %v692_v0, %v547_v1  ;;  %v696_v9 = vld [vmem:[%s1054_s0 + $0x68] sm:$0xf0]  ;;  %v559_v11 = vld [vmem:[%s1054_s0 + $0x6c] sm:$0xf0]  ;;  %v569_v17 = vld [vmem:[%s1054_s0 + $0x78] sm:$0xf] }
  0x14   :  { %v699_v18 = vld [vmem:[%s1054_s0 + $0x80] sm:$0xf0]  ;;  %v706_v24 = vld [vmem:[%s1054_s0 + $0xb8] sm:$0xf0]  ;;  %v971_v28 = vld [vmem:[%s1055_s2] ss:$0 sm:$0xff] }
  0x16   :  { %345 = vmatpush.bf16.msra.mxu0 %v709_v15 }
  0x17   :  { %730 = vmatpush.bf16.msra.mxu3 %v709_v15  ;;  %394 = vmatpush.bf16.msra.mxu1 %v717_v16  ;;  %v703_v15 = vld [vmem:[%s1054_s0 + $0xa0] sm:$0xf0] }
  0x1a   :  { %676 = vmatmul.msk.bf16.gmra.mxu2 %vm315_vm0, %v530_v19  ;;  %346 = vmatpush.bf16.msra.mxu0 %v708_v20  ;;  %v698_v19 = vld [vmem:[%s1054_s0 + $0x7c] sm:$0xf] }
  0x1b   :  { %731 = vmatpush.bf16.msra.mxu3 %v708_v20  ;;  %395 = vmatpush.bf16.msra.mxu1 %v716_v21  ;;  %v571_v20 = vld [vmem:[%s1054_s0 + $0x84] sm:$0xf0] }
  0x1e   :  { %347 = vmatpush.bf16.msra.mxu0 %v707_v22 }
  0x1f   :  { %732 = vmatpush.bf16.msra.mxu3 %v707_v22  ;;  %396 = vmatpush.bf16.msra.mxu1 %v715_v23  ;;  %v574_v22 = vor.u32 %v698_v19, %v571_v20 }
  0x21   :  { %348 = vmatmul.bf16.vlgmr.msra.gmra.mxu0 %v510_v30 }
  0x22   :  { %378 = vmatmul.bf16.vlgmr.msra.gmra.mxu3 %v582_v31  ;;  %397 = vmatmul.bf16.vlgmr.msra.gmra.mxu1 %v514_v32 }
  0x23   :  { %733 = vmatpush.bf16.msrb.mxu3 %v722_v2  ;;  %v546_v2 = vor.u32 %v693_v61, %v545_v60 }
  0x27   :  { %734 = vmatpush.bf16.msrb.mxu3 %v721_v5  ;;  %v577_v5 = vld [vmem:[%s1054_s0 + $0x80] sm:$0xf] }
  0x28   :  { %v578_v7 = vor.u32 %v700_v6, %v577_v5 }
  0x2a   :  { %677 = vmatmul.msk.bf16.gmra.mxu2 %vm315_vm0, %v542_v35 }
  0x2b   :  { %735 = vmatpush.bf16.msrb.mxu3 %v720_v10  ;;  %v695_v10 = vld [vmem:[%s1054_s0 + $0x64] sm:$0xf] }
  0x2c   :  { %v562_v13 = vor.u32 %v695_v10, %v559_v11 }
  0x2f   :  { %736 = vmatpush.bf16.msrb.mxu3 %v719_v12  ;;  %v558_v12 = vor.u32 %v696_v9, %v557_v8 }
  0x31   :  { %353 = vmatmul.bf16.gmra.mxu0 %v522_v42 }
  0x32   :  { %383 = vmatmul.bf16.gmra.mxu3 %v594_v43  ;;  %402 = vmatmul.bf16.gmra.mxu1 %v526_v44 }
  0x33   :  { %737 = vmatpush.bf16.msrb.mxu3 %v718_v14  ;;  %v589_v14 = vld [vmem:[%s1054_s0 + $0x98] sm:$0xf] }
  0x37   :  { %738 = vmatpush.bf16.msrb.mxu3 %v717_v16  ;;  %v590_v16 = vor.u32 %v703_v15, %v589_v14 }
  0x3a   :  { %678 = vmatmul.msk.bf16.gmra.mxu2 %vm315_vm0, %v554_v47 }
  0x3b   :  { %739 = vmatpush.bf16.msrb.mxu3 %v716_v21  ;;  %v570_v21 = vor.u32 %v699_v18, %v569_v17 }
  0x3f   :  { %740 = vmatpush.bf16.msrb.mxu3 %v715_v23  ;;  %v601_v23 = vld [vmem:[%s1054_s0 + $0xb0] sm:$0xf] }
  0x40   :  { %v602_v25 = vor.u32 %v706_v24, %v601_v23 }
  0x41   :  { %358 = vmatmul.bf16.gmra.mxu0 %v534_v54 }
  0x42   :  { %427 = vmatmul.bf16.vlgmr.msrb.gmra.mxu3 %v586_v55  ;;  %407 = vmatmul.bf16.gmra.mxu1 %v538_v56 }
  0x4a   :  { %679 = vmatmul.msk.bf16.gmra.mxu2 %vm315_vm0, %v566_v59 }
  0x51   :  { %363 = vmatmul.bf16.gmra.mxu0 %v546_v2 }
  0x52   :  { %432 = vmatmul.bf16.gmra.mxu3 %v598_v3  ;;  %412 = vmatmul.bf16.gmra.mxu1 %v550_v4 }
  0x5a   :  { %680 = vmatmul.msk.bf16.gmra.mxu2 %vm315_vm0, %v578_v7 }
  0x61   :  { %368 = vmatmul.bf16.gmra.mxu0 %v558_v12 }
  0x62   :  { %417 = vmatmul.bf16.gmra.mxu1 %v562_v13 }
  0x6a   :  { %681 = vmatmul.msk.bf16.gmra.mxu2 %vm315_vm0, %v590_v16 }
  0x71   :  { %373 = vmatmul.bf16.gmra.mxu0 %v570_v21 }
  0x72   :  { %422 = vmatmul.bf16.gmra.mxu1 %v574_v22 }
  0x7a   :  { %682 = vmatmul.msk.bf16.gmra.mxu2 %vm315_vm0, %v602_v25 }
  0x8d   :  { %v447_v26 = vpop.f32.mrf.mxu2 }
  0x95   :  { %v449_v27 = vpop.f32.mrf.mxu2 }
  0x9d   :  { %v452_v29 = vpop.f32.mrf.mxu2 }
  0x9e   :  { %v349_v30 = vpop.f32.mrf.mxu0 }
  0x9f   :  { %v350_v31 = vadd.f32 %v971_v28, %v349_v30  ;;  %v398_v32 = vpop.f32.mrf.mxu1 }
  0xa1   :  { %v399_v33 = vadd.f32 %v398_v32, %v350_v31 }
  0xa3   :  { %v448_v34 = vadd.f32 %v447_v26, %v399_v33 }
  0xa5   :  { %487 = vst.msk [vmem:[%s1056_s3] sm:$0xff] %vm315_vm0, %v448_v34  ;;  %v454_v35 = vpop.f32.mrf.mxu2  ;;  %v379_v52 = vpop.f32.mrf.mxu3 }
  0xa6   :  { %v351_v36 = vpop.f32.mrf.mxu0 }
  0xa7   :  { %v352_v37 = vadd.f32 %v971_v28, %v351_v36  ;;  %v400_v38 = vpop.f32.mrf.mxu1 }
  0xa9   :  { %v401_v39 = vadd.f32 %v400_v38, %v352_v37 }
  0xab   :  { %v450_v40 = vadd.f32 %v449_v27, %v401_v39 }
  0xad   :  { %488 = vst.msk [vmem:[%s1056_s3 + $0x8] sm:$0xff] %vm315_vm0, %v450_v40  ;;  %v457_v41 = vpop.f32.mrf.mxu2  ;;  %v381_v60 = vpop.f32.mrf.mxu3 }
  0xae   :  { %v354_v42 = vpop.f32.mrf.mxu0  ;;  %v382_v39 = vadd.f32 %v971_v28, %v381_v60 }
  0xaf   :  { %v355_v43 = vadd.f32 %v971_v28, %v354_v42  ;;  %v403_v44 = vpop.f32.mrf.mxu1 }
  0xb1   :  { %v404_v45 = vadd.f32 %v403_v44, %v355_v43 }
  0xb3   :  { %v453_v46 = vadd.f32 %v452_v29, %v404_v45  ;;  %v380_v29 = vadd.f32 %v971_v28, %v379_v52 }
  0xb5   :  { %489 = vst.msk [vmem:[%s1056_s3 + $0x10] sm:$0xff] %vm315_vm0, %v453_v46  ;;  %v459_v47 = vpop.f32.mrf.mxu2  ;;  %v384_v5 = vpop.f32.mrf.mxu3 }
  0xb6   :  { %v356_v48 = vpop.f32.mrf.mxu0 }
  0xb7   :  { %v357_v49 = vadd.f32 %v971_v28, %v356_v48  ;;  %v405_v50 = vpop.f32.mrf.mxu1 }
  0xb9   :  { %v406_v51 = vadd.f32 %v405_v50, %v357_v49  ;;  %v385_v49 = vadd.f32 %v971_v28, %v384_v5 }
  0xbb   :  { %v455_v53 = vadd.f32 %v454_v35, %v406_v51 }
  0xbd   :  { %490 = vst.msk [vmem:[%s1056_s3 + $0x18] sm:$0xff] %vm315_vm0, %v455_v53  ;;  %v462_v54 = vpop.f32.mrf.mxu2  ;;  %v386_v14 = vpop.f32.mrf.mxu3 }
  0xbe   :  { %v359_v55 = vpop.f32.mrf.mxu0 }
  0xbf   :  { %v360_v56 = vadd.f32 %v971_v28, %v359_v55  ;;  %v408_v57 = vpop.f32.mrf.mxu1  ;;  %v387_v55 = vadd.f32 %v971_v28, %v386_v14 }
  0xc1   :  { %v409_v58 = vadd.f32 %v408_v57, %v360_v56 }
  0xc3   :  { %v458_v59 = vadd.f32 %v457_v41, %v409_v58 }
  0xc5   :  { %491 = vst.msk [vmem:[%s1056_s3 + $0x20] sm:$0xff] %vm315_vm0, %v458_v59  ;;  %v464_v61 = vpop.f32.mrf.mxu2  ;;  %v428_v22 = vpop.f32.mrf.mxu3 }
  0xc6   :  { %v361_v62 = vpop.f32.mrf.mxu0  ;;  %v429_v32 = vadd.f32 %v428_v22, %v380_v29 }
  0xc7   :  { %v362_v63 = vadd.f32 %v971_v28, %v361_v62  ;;  %v410_v0 = vpop.f32.mrf.mxu1 }
  0xc9   :  { %v411_v1 = vadd.f32 %v410_v0, %v362_v63 }
  0xcb   :  { %v460_v2 = vadd.f32 %v459_v47, %v411_v1 }
  0xcd   :  { %492 = vst.msk [vmem:[%s1056_s3 + $0x28] sm:$0xff] %vm315_vm0, %v460_v2  ;;  %v467_v3 = vpop.f32.mrf.mxu2  ;;  %v430_v33 = vpop.f32.mrf.mxu3 }
  0xce   :  { %v364_v4 = vpop.f32.mrf.mxu0  ;;  %v431_v42 = vadd.f32 %v430_v33, %v382_v39 }
  0xcf   :  { %v365_v6 = vadd.f32 %v971_v28, %v364_v4  ;;  %v413_v7 = vpop.f32.mrf.mxu1 }
  0xd1   :  { %v414_v8 = vadd.f32 %v413_v7, %v365_v6 }
  0xd3   :  { %v463_v9 = vadd.f32 %v462_v54, %v414_v8 }
  0xd5   :  { %493 = vst.msk [vmem:[%s1056_s3 + $0x30] sm:$0xff] %vm315_vm0, %v463_v9  ;;  %v469_v10 = vpop.f32.mrf.mxu2  ;;  %v433_v46 = vpop.f32.mrf.mxu3 }
  0xd6   :  { %v366_v11 = vpop.f32.mrf.mxu0  ;;  %v434_v52 = vadd.f32 %v433_v46, %v385_v49 }
  0xd7   :  { %v367_v12 = vadd.f32 %v971_v28, %v366_v11  ;;  %v415_v13 = vpop.f32.mrf.mxu1 }
  0xd9   :  { %v416_v15 = vadd.f32 %v415_v13, %v367_v12 }
  0xdb   :  { %v465_v16 = vadd.f32 %v464_v61, %v416_v15 }
  0xdd   :  { %494 = vst.msk [vmem:[%s1056_s3 + $0x38] sm:$0xff] %vm315_vm0, %v465_v16  ;;  %v472_v17 = vpop.f32.mrf.mxu2  ;;  %v435_v56 = vpop.f32.mrf.mxu3 }
  0xde   :  { %v369_v18 = vpop.f32.mrf.mxu0  ;;  %v436_v57 = vadd.f32 %v435_v56, %v387_v55 }
  0xdf   :  { %v370_v19 = vadd.f32 %v971_v28, %v369_v18  ;;  %v418_v20 = vpop.f32.mrf.mxu1 }
  0xe1   :  { %v419_v21 = vadd.f32 %v418_v20, %v370_v19 }
  0xe3   :  { %v468_v23 = vadd.f32 %v467_v3, %v419_v21 }
  0xe5   :  { %495 = vst.msk [vmem:[%s1056_s3 + $0x40] sm:$0xff] %vm315_vm0, %v468_v23  ;;  %v474_v24 = vpop.f32.mrf.mxu2 }
  0xe6   :  { %v371_v25 = vpop.f32.mrf.mxu0 }
  0xe7   :  { %v372_v26 = vadd.f32 %v971_v28, %v371_v25  ;;  %v420_v27 = vpop.f32.mrf.mxu1 }
  0xe9   :  { %v421_v30 = vadd.f32 %v420_v27, %v372_v26 }
  0xeb   :  { %v470_v31 = vadd.f32 %v469_v10, %v421_v30 }
  0xed   :  { %496 = vst.msk [vmem:[%s1056_s3 + $0x48] sm:$0xff] %vm315_vm0, %v470_v31  ;;  %v477_v34 = vpop.f32.mrf.mxu2 }
  0xee   :  { %v478_v35 = vadd.f32 %v477_v34, %v429_v32  ;;  %v374_v36 = vpop.f32.mrf.mxu0 }
  0xef   :  { %v375_v37 = vadd.f32 %v971_v28, %v374_v36  ;;  %v423_v38 = vpop.f32.mrf.mxu1 }
  0xf0   :  { %499 = vst.msk [vmem:[%s1056_s3 + $0x60] sm:$0xff] %vm315_vm0, %v478_v35 }
  0xf1   :  { %v424_v40 = vadd.f32 %v423_v38, %v375_v37 }
  0xf3   :  { %v473_v41 = vadd.f32 %v472_v17, %v424_v40 }
  0xf5   :  { %497 = vst.msk [vmem:[%s1056_s3 + $0x50] sm:$0xff] %vm315_vm0, %v473_v41  ;;  %v479_v43 = vpop.f32.mrf.mxu2 }
  0xf6   :  { %v480_v44 = vadd.f32 %v479_v43, %v431_v42  ;;  %v376_v45 = vpop.f32.mrf.mxu0 }
  0xf7   :  { %v377_v47 = vadd.f32 %v971_v28, %v376_v45  ;;  %v425_v48 = vpop.f32.mrf.mxu1 }
  0xf8   :  { %500 = vst.msk [vmem:[%s1056_s3 + $0x68] sm:$0xff] %vm315_vm0, %v480_v44 }
  0xf9   :  { %v426_v50 = vadd.f32 %v425_v48, %v377_v47 }
  0xfb   :  { %v475_v51 = vadd.f32 %v474_v24, %v426_v50 }
  0xfd   :  { %498 = vst.msk [vmem:[%s1056_s3 + $0x58] sm:$0xff] %vm315_vm0, %v475_v51  ;;  %v482_v53 = vpop.f32.mrf.mxu2 }
  0xfe   :  { %v483_v54 = vadd.f32 %v482_v53, %v434_v52 }
 0x100   :  { %501 = vst.msk [vmem:[%s1056_s3 + $0x70] sm:$0xff] %vm315_vm0, %v483_v54 }
 0x105   :  { %v484_v58 = vpop.f32.mrf.mxu2 }
 0x106   :  { %v485_v59 = vadd.f32 %v484_v58, %v436_v57 }
 0x108   :  { %502 = vst.msk [vmem:[%s1056_s3 + $0x78] sm:$0xff] %vm315_vm0, %v485_v59 }

// kernel: hierarchical_vae_forward.52
= control target key start
LH: loop header
LB: loop body
LE: loop exit
PB: predicated region body
PF: predicated region fallthrough
CT: control target
= control target key end

     0   :  { %vm179_vm0 = vcmask 130048   ;;  %s701_s1 = inlined_call_operand.vmem [shape: bf16[144,16], index: 1, kind: input, shape index: {}]   ;;  %s702_s0 = inlined_call_operand.vmem [shape: bf16[128,144], index: 0, kind: input, shape index: {}]   ;;  %s703_s2 = inlined_call_operand.vmem [shape: f32[1,16], index: 2, kind: input, shape index: {}]   ;;  %s704_s3 = inlined_call_operand.vmem [shape: f32[128,16], index: 3, kind: output, shape index: {}]  }
   0x1   :  { %v453_v0 = vld [vmem:[%s701_s1 + $0x38] sm:$0xff]  ;;  %v454_v1 = vld [vmem:[%s701_s1 + $0x40] sm:$0xff]  ;;  %v326_v3 = vld [vmem:[%s702_s0 + $0x8] sm:$0xf0] }
   0x2   :  { %v430_v2 = vld [vmem:[%s702_s0 + $0x4] sm:$0xf]  ;;  %204 = vmatpush.bf16.msra.mxu0 %v453_v0  ;;  %455 = vmatpush.bf16.msra.mxu2 %v453_v0  ;;  %v452_v5 = vld [vmem:[%s701_s1 + $0x30] sm:$0xff]  ;;  %v451_v6 = vld [vmem:[%s701_s1 + $0x28] sm:$0xff] }
   0x3   :  { %v329_v4 = vor.u32 %v430_v2, %v326_v3  ;;  %260 = vmatpush.bf16.msra.mxu1 %v454_v1  ;;  %463 = vmatpush.bf16.msra.mxu3 %v454_v1  ;;  %v440_v7 = vld [vmem:[%s702_s0 + $0x54] sm:$0xf]  ;;  %v366_v8 = vld [vmem:[%s702_s0 + $0x58] sm:$0xf0]  ;;  %v450_v10 = vld [vmem:[%s701_s1 + $0x20] sm:$0xff] }
   0x4   :  { %v369_v9 = vor.u32 %v440_v7, %v366_v8  ;;  %v449_v11 = vld [vmem:[%s701_s1 + $0x18] sm:$0xff]  ;;  %v432_v12 = vld [vmem:[%s702_s0 + $0x14] sm:$0xf]  ;;  %v447_v16 = vld [vmem:[%s701_s1 + $0x8] sm:$0xff] }
   0x5   :  { %v334_v13 = vld [vmem:[%s702_s0 + $0x18] sm:$0xf0]  ;;  %v448_v15 = vld [vmem:[%s701_s1 + $0x10] sm:$0xff]  ;;  %v442_v17 = vld [vmem:[%s702_s0 + $0x64] sm:$0xf] }
   0x6   :  { %422 = vmatmul.msk.bf16.vlgmr.msra.gmra.mxu1 %vm179_vm0, %v329_v4  ;;  %205 = vmatpush.bf16.msra.mxu0 %v452_v5  ;;  %v337_v14 = vor.u32 %v432_v12, %v334_v13  ;;  %v374_v18 = vld [vmem:[%s702_s0 + $0x68] sm:$0xf0]  ;;  %v446_v20 = vld [vmem:[%s701_s1] sm:$0xff]  ;;  %v431_v22 = vld [vmem:[%s702_s0 + $0x4] sm:$0xf0] }
   0x7   :  { %456 = vmatpush.bf16.msra.mxu2 %v452_v5  ;;  %427 = vmatmul.msk.bf16.vlgmr.msra.gmra.mxu3 %vm179_vm0, %v369_v9  ;;  %v377_v19 = vor.u32 %v442_v17, %v374_v18  ;;  %v324_v21 = vld [vmem:[%s702_s0] sm:$0xf]  ;;  %v439_v24 = vld [vmem:[%s702_s0 + $0x44] sm:$0xf0]  ;;  %v434_v27 = vld [vmem:[%s702_s0 + $0x24] sm:$0xf] }
   0x8   :  { %v356_v23 = vld [vmem:[%s702_s0 + $0x40] sm:$0xf]  ;;  %v325_v25 = vor.u32 %v431_v22, %v324_v21  ;;  %v342_v28 = vld [vmem:[%s702_s0 + $0x28] sm:$0xf0]  ;;  %v444_v30 = vld [vmem:[%s702_s0 + $0x74] sm:$0xf] }
   0x9   :  { %v357_v26 = vor.u32 %v439_v24, %v356_v23  ;;  %v345_v29 = vor.u32 %v434_v27, %v342_v28  ;;  %v382_v31 = vld [vmem:[%s702_s0 + $0x78] sm:$0xf0]  ;;  %v332_v33 = vld [vmem:[%s702_s0 + $0x10] sm:$0xf]  ;;  %v433_v34 = vld [vmem:[%s702_s0 + $0x14] sm:$0xf0] }
   0xa   :  { %206 = vmatpush.bf16.msra.mxu0 %v451_v6  ;;  %v385_v32 = vor.u32 %v444_v30, %v382_v31  ;;  %v364_v35 = vld [vmem:[%s702_s0 + $0x50] sm:$0xf]  ;;  %v441_v36 = vld [vmem:[%s702_s0 + $0x54] sm:$0xf0]  ;;  %v333_v37 = vor.u32 %v433_v34, %v332_v33  ;;  %v436_v39 = vld [vmem:[%s702_s0 + $0x34] sm:$0xf] }
   0xb   :  { %457 = vmatpush.bf16.msra.mxu2 %v451_v6  ;;  %v365_v38 = vor.u32 %v441_v36, %v364_v35  ;;  %v350_v40 = vld [vmem:[%s702_s0 + $0x38] sm:$0xf0]  ;;  %v340_v42 = vld [vmem:[%s702_s0 + $0x20] sm:$0xf]  ;;  %v435_v43 = vld [vmem:[%s702_s0 + $0x24] sm:$0xf0] }
   0xc   :  { %v353_v41 = vor.u32 %v436_v39, %v350_v40  ;;  %v372_v44 = vld [vmem:[%s702_s0 + $0x60] sm:$0xf]  ;;  %v443_v45 = vld [vmem:[%s702_s0 + $0x64] sm:$0xf0]  ;;  %v341_v46 = vor.u32 %v435_v43, %v340_v42  ;;  %v438_v48 = vld [vmem:[%s702_s0 + $0x44] sm:$0xf] }
   0xd   :  { %v373_v47 = vor.u32 %v443_v45, %v372_v44  ;;  %v358_v49 = vld [vmem:[%s702_s0 + $0x48] sm:$0xf0]  ;;  %v348_v51 = vld [vmem:[%s702_s0 + $0x30] sm:$0xf]  ;;  %v437_v52 = vld [vmem:[%s702_s0 + $0x34] sm:$0xf0] }
   0xe   :  { %207 = vmatpush.bf16.msra.mxu0 %v450_v10  ;;  %v361_v50 = vor.u32 %v438_v48, %v358_v49  ;;  %v380_v53 = vld [vmem:[%s702_s0 + $0x70] sm:$0xf]  ;;  %v445_v54 = vld [vmem:[%s702_s0 + $0x74] sm:$0xf0]  ;;  %v349_v55 = vor.u32 %v437_v52, %v348_v51  ;;  %v619_v61 = vld [vmem:[%s703_s2] ss:$0 sm:$0xff] }
   0xf   :  { %458 = vmatpush.bf16.msra.mxu2 %v450_v10  ;;  %v381_v56 = vor.u32 %v445_v54, %v380_v53 }
  0x12   :  { %208 = vmatpush.bf16.msra.mxu0 %v449_v11 }
  0x13   :  { %459 = vmatpush.bf16.msra.mxu2 %v449_v11 }
  0x16   :  { %423 = vmatmul.msk.bf16.gmra.mxu1 %vm179_vm0, %v337_v14  ;;  %209 = vmatpush.bf16.msra.mxu0 %v448_v15 }
  0x17   :  { %460 = vmatpush.bf16.msra.mxu2 %v448_v15  ;;  %428 = vmatmul.msk.bf16.gmra.mxu3 %vm179_vm0, %v377_v19 }
  0x1a   :  { %210 = vmatpush.bf16.msra.mxu0 %v447_v16 }
  0x1b   :  { %461 = vmatpush.bf16.msra.mxu2 %v447_v16 }
  0x1e   :  { %211 = vmatpush.bf16.msra.mxu0 %v446_v20 }
  0x1f   :  { %462 = vmatpush.bf16.msra.mxu2 %v446_v20 }
  0x21   :  { %212 = vmatmul.bf16.vlgmr.msra.gmra.mxu0 %v325_v25 }
  0x22   :  { %232 = vmatmul.bf16.vlgmr.msra.gmra.mxu2 %v357_v26 }
  0x26   :  { %424 = vmatmul.msk.bf16.gmra.mxu1 %vm179_vm0, %v345_v29 }
  0x27   :  { %429 = vmatmul.msk.bf16.gmra.mxu3 %vm179_vm0, %v385_v32 }
  0x31   :  { %217 = vmatmul.bf16.gmra.mxu0 %v333_v37 }
  0x32   :  { %237 = vmatmul.bf16.gmra.mxu2 %v365_v38 }
  0x36   :  { %425 = vmatmul.msk.bf16.gmra.mxu1 %vm179_vm0, %v353_v41 }
  0x41   :  { %222 = vmatmul.bf16.gmra.mxu0 %v341_v46 }
  0x42   :  { %242 = vmatmul.bf16.gmra.mxu2 %v373_v47 }
  0x46   :  { %426 = vmatmul.msk.bf16.gmra.mxu1 %vm179_vm0, %v361_v50 }
  0x51   :  { %227 = vmatmul.bf16.gmra.mxu0 %v349_v55 }
  0x52   :  { %247 = vmatmul.bf16.gmra.mxu2 %v381_v56 }
  0x83   :  { %v262_v57 = vpop.f32.mrf.mxu1 }
  0x8a   :  { %v287_v8 = vpop.f32.mrf.mxu3 }
  0x8b   :  { %v264_v58 = vpop.f32.mrf.mxu1 }
  0x92   :  { %v289_v17 = vpop.f32.mrf.mxu3 }
  0x93   :  { %v267_v59 = vpop.f32.mrf.mxu1 }
  0x9a   :  { %v292_v27 = vpop.f32.mrf.mxu3 }
  0x9b   :  { %v269_v60 = vpop.f32.mrf.mxu1 }
  0x9e   :  { %v213_v62 = vpop.f32.mrf.mxu0 }
  0x9f   :  { %v214_v63 = vadd.f32 %v619_v61, %v213_v62 }
  0xa1   :  { %v263_v0 = vadd.f32 %v262_v57, %v214_v63 }
  0xa2   :  { %v294_v38 = vpop.f32.mrf.mxu3 }
  0xa3   :  { %302 = vst.msk [vmem:[%s704_s3] sm:$0xff] %vm179_vm0, %v263_v0  ;;  %v272_v1 = vpop.f32.mrf.mxu1 }
  0xa5   :  { %v233_v2 = vpop.f32.mrf.mxu2 }
  0xa6   :  { %v215_v3 = vpop.f32.mrf.mxu0  ;;  %v234_v28 = vadd.f32 %v619_v61, %v233_v2 }
  0xa7   :  { %v216_v4 = vadd.f32 %v619_v61, %v215_v3 }
  0xa9   :  { %v265_v5 = vadd.f32 %v264_v58, %v216_v4 }
  0xaa   :  { %v297_v47 = vpop.f32.mrf.mxu3 }
  0xab   :  { %303 = vst.msk [vmem:[%s704_s3 + $0x8] sm:$0xff] %vm179_vm0, %v265_v5  ;;  %v274_v6 = vpop.f32.mrf.mxu1 }
  0xad   :  { %v235_v7 = vpop.f32.mrf.mxu2 }
  0xae   :  { %v218_v9 = vpop.f32.mrf.mxu0  ;;  %v236_v37 = vadd.f32 %v619_v61, %v235_v7 }
  0xaf   :  { %v219_v10 = vadd.f32 %v619_v61, %v218_v9 }
  0xb1   :  { %v268_v11 = vadd.f32 %v267_v59, %v219_v10 }
  0xb2   :  { %v299_v56 = vpop.f32.mrf.mxu3 }
  0xb3   :  { %304 = vst.msk [vmem:[%s704_s3 + $0x10] sm:$0xff] %vm179_vm0, %v268_v11  ;;  %v277_v12 = vpop.f32.mrf.mxu1 }
  0xb5   :  { %v238_v13 = vpop.f32.mrf.mxu2 }
  0xb6   :  { %v239_v14 = vadd.f32 %v619_v61, %v238_v13  ;;  %v220_v15 = vpop.f32.mrf.mxu0 }
  0xb7   :  { %v221_v16 = vadd.f32 %v619_v61, %v220_v15 }
  0xb8   :  { %v288_v18 = vadd.f32 %v287_v8, %v239_v14 }
  0xb9   :  { %v270_v19 = vadd.f32 %v269_v60, %v221_v16 }
  0xba   :  { %312 = vst.msk [vmem:[%s704_s3 + $0x50] sm:$0xff] %vm179_vm0, %v288_v18 }
  0xbb   :  { %305 = vst.msk [vmem:[%s704_s3 + $0x18] sm:$0xff] %vm179_vm0, %v270_v19  ;;  %v279_v20 = vpop.f32.mrf.mxu1 }
  0xbd   :  { %v240_v21 = vpop.f32.mrf.mxu2 }
  0xbe   :  { %v241_v22 = vadd.f32 %v619_v61, %v240_v21  ;;  %v223_v23 = vpop.f32.mrf.mxu0 }
  0xbf   :  { %v224_v24 = vadd.f32 %v619_v61, %v223_v23 }
  0xc0   :  { %v290_v25 = vadd.f32 %v289_v17, %v241_v22 }
  0xc1   :  { %v273_v26 = vadd.f32 %v272_v1, %v224_v24 }
  0xc2   :  { %313 = vst.msk [vmem:[%s704_s3 + $0x58] sm:$0xff] %vm179_vm0, %v290_v25 }
  0xc3   :  { %306 = vst.msk [vmem:[%s704_s3 + $0x20] sm:$0xff] %vm179_vm0, %v273_v26  ;;  %v282_v29 = vpop.f32.mrf.mxu1 }
  0xc4   :  { %v283_v30 = vadd.f32 %v282_v29, %v234_v28 }
  0xc5   :  { %v243_v31 = vpop.f32.mrf.mxu2 }
  0xc6   :  { %310 = vst.msk [vmem:[%s704_s3 + $0x40] sm:$0xff] %vm179_vm0, %v283_v30  ;;  %v244_v32 = vadd.f32 %v619_v61, %v243_v31  ;;  %v225_v33 = vpop.f32.mrf.mxu0 }
  0xc7   :  { %v226_v34 = vadd.f32 %v619_v61, %v225_v33 }
  0xc8   :  { %v293_v35 = vadd.f32 %v292_v27, %v244_v32 }
  0xc9   :  { %v275_v36 = vadd.f32 %v274_v6, %v226_v34 }
  0xca   :  { %314 = vst.msk [vmem:[%s704_s3 + $0x60] sm:$0xff] %vm179_vm0, %v293_v35 }
  0xcb   :  { %307 = vst.msk [vmem:[%s704_s3 + $0x28] sm:$0xff] %vm179_vm0, %v275_v36  ;;  %v284_v39 = vpop.f32.mrf.mxu1 }
  0xcc   :  { %v285_v40 = vadd.f32 %v284_v39, %v236_v37 }
  0xcd   :  { %v245_v41 = vpop.f32.mrf.mxu2 }
  0xce   :  { %311 = vst.msk [vmem:[%s704_s3 + $0x48] sm:$0xff] %vm179_vm0, %v285_v40  ;;  %v246_v42 = vadd.f32 %v619_v61, %v245_v41  ;;  %v228_v43 = vpop.f32.mrf.mxu0 }
  0xcf   :  { %v229_v44 = vadd.f32 %v619_v61, %v228_v43 }
  0xd0   :  { %v295_v45 = vadd.f32 %v294_v38, %v246_v42 }
  0xd1   :  { %v278_v46 = vadd.f32 %v277_v12, %v229_v44 }
  0xd2   :  { %315 = vst.msk [vmem:[%s704_s3 + $0x68] sm:$0xff] %vm179_vm0, %v295_v45 }
  0xd3   :  { %308 = vst.msk [vmem:[%s704_s3 + $0x30] sm:$0xff] %vm179_vm0, %v278_v46 }
  0xd5   :  { %v248_v48 = vpop.f32.mrf.mxu2 }
  0xd6   :  { %v249_v49 = vadd.f32 %v619_v61, %v248_v48  ;;  %v230_v50 = vpop.f32.mrf.mxu0 }
  0xd7   :  { %v231_v51 = vadd.f32 %v619_v61, %v230_v50 }
  0xd8   :  { %v298_v52 = vadd.f32 %v297_v47, %v249_v49 }
  0xd9   :  { %v280_v53 = vadd.f32 %v279_v20, %v231_v51 }
  0xda   :  { %316 = vst.msk [vmem:[%s704_s3 + $0x70] sm:$0xff] %vm179_vm0, %v298_v52 }
  0xdb   :  { %309 = vst.msk [vmem:[%s704_s3 + $0x38] sm:$0xff] %vm179_vm0, %v280_v53 }
  0xdd   :  { %v250_v54 = vpop.f32.mrf.mxu2 }
  0xde   :  { %v251_v55 = vadd.f32 %v619_v61, %v250_v54 }
  0xe0   :  { %v300_v57 = vadd.f32 %v299_v56, %v251_v55 }
  0xe2   :  { %317 = vst.msk [vmem:[%s704_s3 + $0x78] sm:$0xff] %vm179_vm0, %v300_v57 }

// kernel: hierarchical_vae_forward.49
= control target key start
LH: loop header
LB: loop body
LE: loop exit
PB: predicated region body
PF: predicated region fallthrough
CT: control target
= control target key end

     0   :  { %vm403_vm0 = vcmask 130048   ;;  %s1318_s1 = inlined_call_operand.vmem [shape: bf16[400,16], index: 1, kind: input, shape index: {}]   ;;  %s1319_s0 = inlined_call_operand.vmem [shape: bf16[128,400], index: 0, kind: input, shape index: {}]   ;;  %s1320_s2 = inlined_call_operand.vmem [shape: f32[1,16], index: 2, kind: input, shape index: {}]   ;;  %s1321_s3 = inlined_call_operand.vmem [shape: f32[128,16], index: 3, kind: output, shape index: {}]  }
   0x1   :  { %v919_v0 = vld [vmem:[%s1318_s1 + $0x38] sm:$0xff]  ;;  %v918_v3 = vld [vmem:[%s1318_s1 + $0x30] sm:$0xff]  ;;  %v917_v6 = vld [vmem:[%s1318_s1 + $0x28] sm:$0xff] }
   0x2   :  { %v927_v1 = vld [vmem:[%s1318_s1 + $0x78] sm:$0xff]  ;;  %428 = vmatpush.bf16.msra.mxu0 %v919_v0  ;;  %v926_v4 = vld [vmem:[%s1318_s1 + $0x70] sm:$0xff]  ;;  %v925_v7 = vld [vmem:[%s1318_s1 + $0x68] sm:$0xff] }
   0x3   :  { %v935_v2 = vld [vmem:[%s1318_s1 + $0xb8] sm:$0xff]  ;;  %477 = vmatpush.bf16.msra.mxu1 %v927_v1  ;;  %v934_v5 = vld [vmem:[%s1318_s1 + $0xb0] sm:$0xff]  ;;  %v936_v8 = vld [vmem:[%s1318_s1 + $0xc0] sm:$0xff] }
   0x4   :  { %526 = vmatpush.bf16.msra.mxu2 %v935_v2  ;;  %v933_v9 = vld [vmem:[%s1318_s1 + $0xa8] sm:$0xff]  ;;  %v656_v11 = vld [vmem:[%s1319_s0 + $0x18] sm:$0xf0]  ;;  %582 = vmatpush.bf16.msra.mxu3 %v936_v8  ;;  %v916_v13 = vld [vmem:[%s1318_s1 + $0x20] sm:$0xff] }
   0x5   :  { %v881_v10 = vld [vmem:[%s1319_s0 + $0xc] sm:$0xf]  ;;  %v924_v14 = vld [vmem:[%s1318_s1 + $0x60] sm:$0xff]  ;;  %v915_v16 = vld [vmem:[%s1318_s1 + $0x18] sm:$0xff] }
   0x6   :  { %429 = vmatpush.bf16.msra.mxu0 %v918_v3  ;;  %v659_v12 = vor.u32 %v881_v10, %v656_v11  ;;  %v932_v15 = vld [vmem:[%s1318_s1 + $0xa0] sm:$0xff]  ;;  %v923_v17 = vld [vmem:[%s1318_s1 + $0x58] sm:$0xff]  ;;  %v914_v19 = vld [vmem:[%s1318_s1 + $0x10] sm:$0xff] }
   0x7   :  { %478 = vmatpush.bf16.msra.mxu1 %v926_v4  ;;  %v931_v18 = vld [vmem:[%s1318_s1 + $0x98] sm:$0xff]  ;;  %v922_v20 = vld [vmem:[%s1318_s1 + $0x50] sm:$0xff]  ;;  %v885_v22 = vld [vmem:[%s1319_s0 + $0x2c] sm:$0xf] }
   0x8   :  { %527 = vmatpush.bf16.msra.mxu2 %v934_v5  ;;  %872 = vmatmul.msk.bf16.vlgmr.msra.gmra.mxu3 %vm403_vm0, %v659_v12  ;;  %v930_v21 = vld [vmem:[%s1318_s1 + $0x90] sm:$0xff]  ;;  %v672_v23 = vld [vmem:[%s1319_s0 + $0x38] sm:$0xf0]  ;;  %v913_v24 = vld [vmem:[%s1318_s1 + $0x8] sm:$0xff] }
   0x9   :  { %v921_v25 = vld [vmem:[%s1318_s1 + $0x48] sm:$0xff]  ;;  %v675_v27 = vor.u32 %v885_v22, %v672_v23  ;;  %v912_v28 = vld [vmem:[%s1318_s1] sm:$0xff]  ;;  %v882_v31 = vld [vmem:[%s1319_s0 + $0xc] sm:$0xf0] }
   0xa   :  { %430 = vmatpush.bf16.msra.mxu0 %v917_v6  ;;  %v929_v26 = vld [vmem:[%s1318_s1 + $0x88] sm:$0xff]  ;;  %v920_v29 = vld [vmem:[%s1318_s1 + $0x40] sm:$0xff]  ;;  %v648_v33 = vld [vmem:[%s1319_s0 + $0x10] sm:$0xf0] }
   0xb   :  { %479 = vmatpush.bf16.msra.mxu1 %v925_v7  ;;  %v646_v30 = vld [vmem:[%s1319_s0] sm:$0xf]  ;;  %v880_v32 = vld [vmem:[%s1319_s0 + $0x4] sm:$0xf]  ;;  %v654_v35 = vld [vmem:[%s1319_s0 + $0x8] sm:$0xf] }
   0xc   :  { %528 = vmatpush.bf16.msra.mxu2 %v933_v9  ;;  %v928_v34 = vld [vmem:[%s1318_s1 + $0x80] sm:$0xff]  ;;  %v883_v36 = vld [vmem:[%s1319_s0 + $0x14] sm:$0xf0]  ;;  %v647_v37 = vor.u32 %v882_v31, %v646_v30  ;;  %v651_v38 = vor.u32 %v880_v32, %v648_v33  ;;  %v889_v40 = vld [vmem:[%s1319_s0 + $0x4c] sm:$0xf] }
   0xd   :  { %v655_v39 = vor.u32 %v883_v36, %v654_v35  ;;  %v688_v41 = vld [vmem:[%s1319_s0 + $0x58] sm:$0xf0]  ;;  %v662_v43 = vld [vmem:[%s1319_s0 + $0x20] sm:$0xf]  ;;  %v886_v44 = vld [vmem:[%s1319_s0 + $0x2c] sm:$0xf0] }
   0xe   :  { %431 = vmatpush.bf16.msra.mxu0 %v916_v13  ;;  %v691_v42 = vor.u32 %v889_v40, %v688_v41  ;;  %v884_v45 = vld [vmem:[%s1319_s0 + $0x24] sm:$0xf]  ;;  %v664_v46 = vld [vmem:[%s1319_s0 + $0x30] sm:$0xf0]  ;;  %v670_v47 = vld [vmem:[%s1319_s0 + $0x28] sm:$0xf]  ;;  %v663_v49 = vor.u32 %v886_v44, %v662_v43 }
   0xf   :  { %480 = vmatpush.bf16.msra.mxu1 %v924_v14  ;;  %v887_v48 = vld [vmem:[%s1319_s0 + $0x34] sm:$0xf0]  ;;  %v667_v50 = vor.u32 %v884_v45, %v664_v46  ;;  %v893_v52 = vld [vmem:[%s1319_s0 + $0x6c] sm:$0xf]  ;;  %v704_v53 = vld [vmem:[%s1319_s0 + $0x78] sm:$0xf0] }
  0x10   :  { %529 = vmatpush.bf16.msra.mxu2 %v932_v15  ;;  %v671_v51 = vor.u32 %v887_v48, %v670_v47  ;;  %v707_v54 = vor.u32 %v893_v52, %v704_v53  ;;  %v678_v55 = vld [vmem:[%s1319_s0 + $0x40] sm:$0xf]  ;;  %v890_v56 = vld [vmem:[%s1319_s0 + $0x4c] sm:$0xf0]  ;;  %v888_v57 = vld [vmem:[%s1319_s0 + $0x44] sm:$0xf] }
  0x11   :  { %v680_v58 = vld [vmem:[%s1319_s0 + $0x50] sm:$0xf0]  ;;  %v686_v59 = vld [vmem:[%s1319_s0 + $0x48] sm:$0xf]  ;;  %v891_v60 = vld [vmem:[%s1319_s0 + $0x54] sm:$0xf0]  ;;  %v679_v61 = vor.u32 %v890_v56, %v678_v55 }
  0x12   :  { %432 = vmatpush.bf16.msra.mxu0 %v915_v16  ;;  %v683_v62 = vor.u32 %v888_v57, %v680_v58  ;;  %v687_v63 = vor.u32 %v891_v60, %v686_v59  ;;  %v897_v0 = vld [vmem:[%s1319_s0 + $0x8c] sm:$0xf]  ;;  %v720_v1 = vld [vmem:[%s1319_s0 + $0x98] sm:$0xf0]  ;;  %v694_v3 = vld [vmem:[%s1319_s0 + $0x60] sm:$0xf] }
  0x13   :  { %481 = vmatpush.bf16.msra.mxu1 %v923_v17  ;;  %v723_v2 = vor.u32 %v897_v0, %v720_v1  ;;  %v894_v4 = vld [vmem:[%s1319_s0 + $0x6c] sm:$0xf0]  ;;  %v892_v5 = vld [vmem:[%s1319_s0 + $0x64] sm:$0xf]  ;;  %v696_v6 = vld [vmem:[%s1319_s0 + $0x70] sm:$0xf0] }
  0x14   :  { %530 = vmatpush.bf16.msra.mxu2 %v931_v18  ;;  %v702_v7 = vld [vmem:[%s1319_s0 + $0x68] sm:$0xf]  ;;  %v895_v8 = vld [vmem:[%s1319_s0 + $0x74] sm:$0xf0]  ;;  %v695_v9 = vor.u32 %v894_v4, %v694_v3  ;;  %v699_v10 = vor.u32 %v892_v5, %v696_v6  ;;  %v901_v12 = vld [vmem:[%s1319_s0 + $0xac] sm:$0xf] }
  0x15   :  { %v703_v11 = vor.u32 %v895_v8, %v702_v7  ;;  %v736_v13 = vld [vmem:[%s1319_s0 + $0xb8] sm:$0xf0]  ;;  %v710_v15 = vld [vmem:[%s1319_s0 + $0x80] sm:$0xf]  ;;  %v898_v16 = vld [vmem:[%s1319_s0 + $0x8c] sm:$0xf0] }
  0x16   :  { %433 = vmatpush.bf16.msra.mxu0 %v914_v19  ;;  %v739_v14 = vor.u32 %v901_v12, %v736_v13  ;;  %v896_v17 = vld [vmem:[%s1319_s0 + $0x84] sm:$0xf]  ;;  %v712_v18 = vld [vmem:[%s1319_s0 + $0x90] sm:$0xf0]  ;;  %v718_v19 = vld [vmem:[%s1319_s0 + $0x88] sm:$0xf] }
  0x17   :  { %482 = vmatpush.bf16.msra.mxu1 %v922_v20  ;;  %v899_v20 = vld [vmem:[%s1319_s0 + $0x94] sm:$0xf0]  ;;  %v715_v22 = vor.u32 %v896_v17, %v712_v18  ;;  %v728_v30 = vld [vmem:[%s1319_s0 + $0xb0] sm:$0xf0]  ;;  %v734_v31 = vld [vmem:[%s1319_s0 + $0xa8] sm:$0xf] }
  0x18   :  { %531 = vmatpush.bf16.msra.mxu2 %v930_v21  ;;  %873 = vmatmul.msk.bf16.gmra.mxu3 %vm403_vm0, %v675_v27  ;;  %v711_v21 = vor.u32 %v898_v16, %v710_v15  ;;  %v719_v23 = vor.u32 %v899_v20, %v718_v19  ;;  %v726_v27 = vld [vmem:[%s1319_s0 + $0xa0] sm:$0xf]  ;;  %v903_v32 = vld [vmem:[%s1319_s0 + $0xb4] sm:$0xf0]  ;;  %v909_v36 = vld [vmem:[%s1319_s0 + $0xec] sm:$0xf] }
  0x19   :  { %v735_v35 = vor.u32 %v903_v32, %v734_v31  ;;  %v906_v40 = vld [vmem:[%s1319_s0 + $0xcc] sm:$0xf0]  ;;  %v904_v41 = vld [vmem:[%s1319_s0 + $0xc4] sm:$0xf]  ;;  %v750_v43 = vld [vmem:[%s1319_s0 + $0xc8] sm:$0xf] }
  0x1a   :  { %434 = vmatpush.bf16.msra.mxu0 %v913_v24  ;;  %v905_v24 = vld [vmem:[%s1319_s0 + $0xcc] sm:$0xf]  ;;  %v907_v44 = vld [vmem:[%s1319_s0 + $0xd4] sm:$0xf0]  ;;  %v758_v48 = vld [vmem:[%s1319_s0 + $0xe0] sm:$0xf] }
  0x1b   :  { %483 = vmatpush.bf16.msra.mxu1 %v921_v25  ;;  %v752_v25 = vld [vmem:[%s1319_s0 + $0xd8] sm:$0xf0]  ;;  %v751_v47 = vor.u32 %v907_v44, %v750_v43  ;;  %v766_v52 = vld [vmem:[%s1319_s0 + $0xe8] sm:$0xf]  ;;  %v911_v53 = vld [vmem:[%s1319_s0 + $0xf4] sm:$0xf0] }
  0x1c   :  { %532 = vmatpush.bf16.msra.mxu2 %v929_v26  ;;  %v755_v26 = vor.u32 %v905_v24, %v752_v25  ;;  %v767_v56 = vor.u32 %v911_v53, %v766_v52  ;;  %v1236_v59 = vld [vmem:[%s1320_s2] ss:$0 sm:$0xff] }
  0x1e   :  { %435 = vmatpush.bf16.msra.mxu0 %v912_v28  ;;  %v902_v28 = vld [vmem:[%s1319_s0 + $0xac] sm:$0xf0] }
  0x1f   :  { %484 = vmatpush.bf16.msra.mxu1 %v920_v29  ;;  %v900_v29 = vld [vmem:[%s1319_s0 + $0xa4] sm:$0xf]  ;;  %v727_v33 = vor.u32 %v902_v28, %v726_v27 }
  0x20   :  { %533 = vmatpush.bf16.msra.mxu2 %v928_v34  ;;  %v731_v34 = vor.u32 %v900_v29, %v728_v30 }
  0x21   :  { %436 = vmatmul.bf16.vlgmr.msra.gmra.mxu0 %v647_v37  ;;  %v768_v37 = vld [vmem:[%s1319_s0 + $0xf8] sm:$0xf0] }
  0x22   :  { %485 = vmatmul.bf16.vlgmr.msra.gmra.mxu1 %v651_v38  ;;  %v771_v38 = vor.u32 %v909_v36, %v768_v37 }
  0x23   :  { %534 = vmatmul.bf16.vlgmr.msra.gmra.mxu2 %v655_v39  ;;  %v742_v39 = vld [vmem:[%s1319_s0 + $0xc0] sm:$0xf] }
  0x24   :  { %v743_v45 = vor.u32 %v906_v40, %v742_v39 }
  0x28   :  { %874 = vmatmul.msk.bf16.gmra.mxu3 %vm403_vm0, %v691_v42  ;;  %v744_v42 = vld [vmem:[%s1319_s0 + $0xd0] sm:$0xf0] }
  0x29   :  { %v747_v46 = vor.u32 %v904_v41, %v744_v42 }
  0x31   :  { %441 = vmatmul.bf16.gmra.mxu0 %v663_v49  ;;  %v910_v49 = vld [vmem:[%s1319_s0 + $0xec] sm:$0xf0] }
  0x32   :  { %490 = vmatmul.bf16.gmra.mxu1 %v667_v50  ;;  %v908_v50 = vld [vmem:[%s1319_s0 + $0xe4] sm:$0xf] }
  0x33   :  { %539 = vmatmul.bf16.gmra.mxu2 %v671_v51  ;;  %v760_v51 = vld [vmem:[%s1319_s0 + $0xf0] sm:$0xf0] }
  0x34   :  { %v763_v55 = vor.u32 %v908_v50, %v760_v51 }
  0x38   :  { %875 = vmatmul.msk.bf16.gmra.mxu3 %vm403_vm0, %v707_v54  ;;  %v759_v54 = vor.u32 %v910_v49, %v758_v48 }
  0x41   :  { %446 = vmatmul.bf16.gmra.mxu0 %v679_v61 }
  0x42   :  { %495 = vmatmul.bf16.gmra.mxu1 %v683_v62 }
  0x43   :  { %544 = vmatmul.bf16.gmra.mxu2 %v687_v63 }
  0x48   :  { %876 = vmatmul.msk.bf16.gmra.mxu3 %vm403_vm0, %v723_v2 }
  0x51   :  { %451 = vmatmul.bf16.gmra.mxu0 %v695_v9 }
  0x52   :  { %500 = vmatmul.bf16.gmra.mxu1 %v699_v10 }
  0x53   :  { %549 = vmatmul.bf16.gmra.mxu2 %v703_v11 }
  0x58   :  { %877 = vmatmul.msk.bf16.gmra.mxu3 %vm403_vm0, %v739_v14 }
  0x61   :  { %456 = vmatmul.bf16.gmra.mxu0 %v711_v21 }
  0x62   :  { %505 = vmatmul.bf16.gmra.mxu1 %v715_v22 }
  0x63   :  { %554 = vmatmul.bf16.gmra.mxu2 %v719_v23 }
  0x68   :  { %878 = vmatmul.msk.bf16.gmra.mxu3 %vm403_vm0, %v755_v26 }
  0x71   :  { %461 = vmatmul.bf16.gmra.mxu0 %v727_v33 }
  0x72   :  { %510 = vmatmul.bf16.gmra.mxu1 %v731_v34 }
  0x73   :  { %559 = vmatmul.bf16.gmra.mxu2 %v735_v35 }
  0x78   :  { %879 = vmatmul.msk.bf16.gmra.mxu3 %vm403_vm0, %v771_v38 }
  0x81   :  { %466 = vmatmul.bf16.gmra.mxu0 %v743_v45 }
  0x82   :  { %515 = vmatmul.bf16.gmra.mxu1 %v747_v46 }
  0x83   :  { %564 = vmatmul.bf16.gmra.mxu2 %v751_v47 }
  0x8b   :  { %v584_v57 = vpop.f32.mrf.mxu3 }
  0x91   :  { %471 = vmatmul.bf16.gmra.mxu0 %v759_v54 }
  0x92   :  { %520 = vmatmul.bf16.gmra.mxu1 %v763_v55 }
  0x93   :  { %569 = vmatmul.bf16.gmra.mxu2 %v767_v56  ;;  %v586_v58 = vpop.f32.mrf.mxu3 }
  0x9b   :  { %v589_v63 = vpop.f32.mrf.mxu3 }
  0x9e   :  { %v437_v60 = vpop.f32.mrf.mxu0 }
  0x9f   :  { %v486_v61 = vpop.f32.mrf.mxu1  ;;  %v438_v62 = vadd.f32 %v1236_v59, %v437_v60 }
  0xa1   :  { %v487_v0 = vadd.f32 %v486_v61, %v438_v62 }
  0xa3   :  { %v591_v5 = vpop.f32.mrf.mxu3 }
  0xa6   :  { %v535_v1 = vpop.f32.mrf.mxu2  ;;  %v439_v3 = vpop.f32.mrf.mxu0 }
  0xa7   :  { %v536_v2 = vadd.f32 %v535_v1, %v487_v0  ;;  %v488_v4 = vpop.f32.mrf.mxu1  ;;  %v440_v7 = vadd.f32 %v1236_v59, %v439_v3 }
  0xa9   :  { %v585_v6 = vadd.f32 %v584_v57, %v536_v2  ;;  %v489_v8 = vadd.f32 %v488_v4, %v440_v7 }
  0xab   :  { %624 = vst.msk [vmem:[%s1321_s3] sm:$0xff] %vm403_vm0, %v585_v6  ;;  %v594_v15 = vpop.f32.mrf.mxu3 }
  0xae   :  { %v537_v9 = vpop.f32.mrf.mxu2  ;;  %v442_v11 = vpop.f32.mrf.mxu0 }
  0xaf   :  { %v538_v10 = vadd.f32 %v537_v9, %v489_v8  ;;  %v491_v12 = vpop.f32.mrf.mxu1  ;;  %v443_v13 = vadd.f32 %v1236_v59, %v442_v11 }
  0xb1   :  { %v587_v14 = vadd.f32 %v586_v58, %v538_v10  ;;  %v492_v16 = vadd.f32 %v491_v12, %v443_v13 }
  0xb3   :  { %625 = vst.msk [vmem:[%s1321_s3 + $0x8] sm:$0xff] %vm403_vm0, %v587_v14  ;;  %v596_v23 = vpop.f32.mrf.mxu3 }
  0xb6   :  { %v540_v17 = vpop.f32.mrf.mxu2  ;;  %v444_v19 = vpop.f32.mrf.mxu0 }
  0xb7   :  { %v541_v18 = vadd.f32 %v540_v17, %v492_v16  ;;  %v493_v20 = vpop.f32.mrf.mxu1  ;;  %v445_v22 = vadd.f32 %v1236_v59, %v444_v19 }
  0xb9   :  { %v590_v21 = vadd.f32 %v589_v63, %v541_v18  ;;  %v494_v24 = vadd.f32 %v493_v20, %v445_v22 }
  0xbb   :  { %626 = vst.msk [vmem:[%s1321_s3 + $0x10] sm:$0xff] %vm403_vm0, %v590_v21  ;;  %v599_v33 = vpop.f32.mrf.mxu3 }
  0xbe   :  { %v542_v25 = vpop.f32.mrf.mxu2  ;;  %v447_v27 = vpop.f32.mrf.mxu0 }
  0xbf   :  { %v543_v26 = vadd.f32 %v542_v25, %v494_v24  ;;  %v496_v28 = vpop.f32.mrf.mxu1  ;;  %v448_v29 = vadd.f32 %v1236_v59, %v447_v27 }
  0xc1   :  { %v592_v30 = vadd.f32 %v591_v5, %v543_v26  ;;  %v497_v31 = vadd.f32 %v496_v28, %v448_v29 }
  0xc3   :  { %627 = vst.msk [vmem:[%s1321_s3 + $0x18] sm:$0xff] %vm403_vm0, %v592_v30  ;;  %v601_v45 = vpop.f32.mrf.mxu3 }
  0xc6   :  { %v545_v32 = vpop.f32.mrf.mxu2  ;;  %v449_v35 = vpop.f32.mrf.mxu0 }
  0xc7   :  { %v546_v34 = vadd.f32 %v545_v32, %v497_v31  ;;  %v498_v36 = vpop.f32.mrf.mxu1  ;;  %v450_v38 = vadd.f32 %v1236_v59, %v449_v35 }
  0xc9   :  { %v595_v37 = vadd.f32 %v594_v15, %v546_v34  ;;  %v499_v39 = vadd.f32 %v498_v36, %v450_v38 }
  0xcb   :  { %628 = vst.msk [vmem:[%s1321_s3 + $0x20] sm:$0xff] %vm403_vm0, %v595_v37  ;;  %v604_v54 = vpop.f32.mrf.mxu3 }
  0xce   :  { %v547_v40 = vpop.f32.mrf.mxu2  ;;  %v452_v42 = vpop.f32.mrf.mxu0 }
  0xcf   :  { %v548_v41 = vadd.f32 %v547_v40, %v499_v39  ;;  %v501_v43 = vpop.f32.mrf.mxu1  ;;  %v453_v44 = vadd.f32 %v1236_v59, %v452_v42 }
  0xd1   :  { %v597_v46 = vadd.f32 %v596_v23, %v548_v41  ;;  %v502_v47 = vadd.f32 %v501_v43, %v453_v44 }
  0xd3   :  { %629 = vst.msk [vmem:[%s1321_s3 + $0x28] sm:$0xff] %vm403_vm0, %v597_v46  ;;  %v606_v0 = vpop.f32.mrf.mxu3 }
  0xd6   :  { %v550_v48 = vpop.f32.mrf.mxu2  ;;  %v454_v50 = vpop.f32.mrf.mxu0 }
  0xd7   :  { %v551_v49 = vadd.f32 %v550_v48, %v502_v47  ;;  %v503_v51 = vpop.f32.mrf.mxu1  ;;  %v455_v53 = vadd.f32 %v1236_v59, %v454_v50 }
  0xd9   :  { %v600_v52 = vadd.f32 %v599_v33, %v551_v49  ;;  %v504_v55 = vadd.f32 %v503_v51, %v455_v53 }
  0xdb   :  { %630 = vst.msk [vmem:[%s1321_s3 + $0x30] sm:$0xff] %vm403_vm0, %v600_v52  ;;  %v609_v9 = vpop.f32.mrf.mxu3 }
  0xde   :  { %v552_v56 = vpop.f32.mrf.mxu2  ;;  %v457_v58 = vpop.f32.mrf.mxu0 }
  0xdf   :  { %v553_v57 = vadd.f32 %v552_v56, %v504_v55  ;;  %v506_v60 = vpop.f32.mrf.mxu1  ;;  %v458_v61 = vadd.f32 %v1236_v59, %v457_v58 }
  0xe1   :  { %v602_v62 = vadd.f32 %v601_v45, %v553_v57  ;;  %v507_v63 = vadd.f32 %v506_v60, %v458_v61 }
  0xe3   :  { %631 = vst.msk [vmem:[%s1321_s3 + $0x38] sm:$0xff] %vm403_vm0, %v602_v62  ;;  %v611_v20 = vpop.f32.mrf.mxu3 }
  0xe6   :  { %v555_v1 = vpop.f32.mrf.mxu2  ;;  %v459_v3 = vpop.f32.mrf.mxu0 }
  0xe7   :  { %v556_v2 = vadd.f32 %v555_v1, %v507_v63  ;;  %v508_v4 = vpop.f32.mrf.mxu1  ;;  %v460_v6 = vadd.f32 %v1236_v59, %v459_v3 }
  0xe9   :  { %v605_v5 = vadd.f32 %v604_v54, %v556_v2  ;;  %v509_v7 = vadd.f32 %v508_v4, %v460_v6 }
  0xeb   :  { %632 = vst.msk [vmem:[%s1321_s3 + $0x40] sm:$0xff] %vm403_vm0, %v605_v5  ;;  %v614_v30 = vpop.f32.mrf.mxu3 }
  0xee   :  { %v557_v8 = vpop.f32.mrf.mxu2  ;;  %v462_v11 = vpop.f32.mrf.mxu0 }
  0xef   :  { %v558_v10 = vadd.f32 %v557_v8, %v509_v7  ;;  %v511_v12 = vpop.f32.mrf.mxu1  ;;  %v463_v13 = vadd.f32 %v1236_v59, %v462_v11 }
  0xf1   :  { %v607_v14 = vadd.f32 %v606_v0, %v558_v10  ;;  %v512_v15 = vadd.f32 %v511_v12, %v463_v13 }
  0xf3   :  { %633 = vst.msk [vmem:[%s1321_s3 + $0x48] sm:$0xff] %vm403_vm0, %v607_v14  ;;  %v616_v38 = vpop.f32.mrf.mxu3 }
  0xf6   :  { %v560_v16 = vpop.f32.mrf.mxu2  ;;  %v464_v18 = vpop.f32.mrf.mxu0 }
  0xf7   :  { %v561_v17 = vadd.f32 %v560_v16, %v512_v15  ;;  %v513_v19 = vpop.f32.mrf.mxu1  ;;  %v465_v22 = vadd.f32 %v1236_v59, %v464_v18 }
  0xf9   :  { %v610_v21 = vadd.f32 %v609_v9, %v561_v17  ;;  %v514_v23 = vadd.f32 %v513_v19, %v465_v22 }
  0xfb   :  { %634 = vst.msk [vmem:[%s1321_s3 + $0x50] sm:$0xff] %vm403_vm0, %v610_v21  ;;  %v619_v47 = vpop.f32.mrf.mxu3 }
  0xfe   :  { %v562_v24 = vpop.f32.mrf.mxu2  ;;  %v467_v26 = vpop.f32.mrf.mxu0 }
  0xff   :  { %v563_v25 = vadd.f32 %v562_v24, %v514_v23  ;;  %v516_v27 = vpop.f32.mrf.mxu1  ;;  %v468_v28 = vadd.f32 %v1236_v59, %v467_v26 }
 0x101   :  { %v612_v29 = vadd.f32 %v611_v20, %v563_v25  ;;  %v517_v31 = vadd.f32 %v516_v27, %v468_v28 }
 0x103   :  { %635 = vst.msk [vmem:[%s1321_s3 + $0x58] sm:$0xff] %vm403_vm0, %v612_v29  ;;  %v621_v57 = vpop.f32.mrf.mxu3 }
 0x106   :  { %v565_v32 = vpop.f32.mrf.mxu2  ;;  %v469_v34 = vpop.f32.mrf.mxu0 }
 0x107   :  { %v566_v33 = vadd.f32 %v565_v32, %v517_v31  ;;  %v518_v35 = vpop.f32.mrf.mxu1  ;;  %v470_v37 = vadd.f32 %v1236_v59, %v469_v34 }
 0x109   :  { %v615_v36 = vadd.f32 %v614_v30, %v566_v33  ;;  %v519_v39 = vadd.f32 %v518_v35, %v470_v37 }
 0x10b   :  { %636 = vst.msk [vmem:[%s1321_s3 + $0x60] sm:$0xff] %vm403_vm0, %v615_v36 }
 0x10e   :  { %v567_v40 = vpop.f32.mrf.mxu2  ;;  %v472_v42 = vpop.f32.mrf.mxu0 }
 0x10f   :  { %v568_v41 = vadd.f32 %v567_v40, %v519_v39  ;;  %v473_v43 = vadd.f32 %v1236_v59, %v472_v42  ;;  %v521_v45 = vpop.f32.mrf.mxu1 }
 0x111   :  { %v617_v44 = vadd.f32 %v616_v38, %v568_v41  ;;  %v522_v46 = vadd.f32 %v521_v45, %v473_v43 }
 0x113   :  { %637 = vst.msk [vmem:[%s1321_s3 + $0x68] sm:$0xff] %vm403_vm0, %v617_v44 }
 0x116   :  { %v570_v48 = vpop.f32.mrf.mxu2  ;;  %v474_v50 = vpop.f32.mrf.mxu0 }
 0x117   :  { %v571_v49 = vadd.f32 %v570_v48, %v522_v46  ;;  %v475_v52 = vadd.f32 %v1236_v59, %v474_v50  ;;  %v523_v53 = vpop.f32.mrf.mxu1 }
 0x119   :  { %v620_v51 = vadd.f32 %v619_v47, %v571_v49  ;;  %v524_v54 = vadd.f32 %v523_v53, %v475_v52 }
 0x11b   :  { %638 = vst.msk [vmem:[%s1321_s3 + $0x70] sm:$0xff] %vm403_vm0, %v620_v51 }
 0x11e   :  { %v572_v55 = vpop.f32.mrf.mxu2 }
 0x11f   :  { %v573_v56 = vadd.f32 %v572_v55, %v524_v54 }
 0x121   :  { %v622_v58 = vadd.f32 %v621_v57, %v573_v56 }
 0x123   :  { %639 = vst.msk [vmem:[%s1321_s3 + $0x78] sm:$0xff] %vm403_vm0, %v622_v58 }

// kernel: hierarchical_vae_forward.59
= control target key start
LH: loop header
LB: loop body
LE: loop exit
PB: predicated region body
PF: predicated region fallthrough
CT: control target
= control target key end

     0   :  { %vm83_vm0 = vcmask 130048   ;;  %vm157_vm1 = vcmask 261120   ;;  %s357_s1 = inlined_call_operand.vmem [shape: bf16[16,32], index: 1, kind: input, shape index: {}]   ;;  %s358_s0 = inlined_call_operand.vmem [shape: bf16[128,16], index: 0, kind: input, shape index: {}]   ;;  %s359_s2 = inlined_call_operand.vmem [shape: f32[1,32], index: 2, kind: input, shape index: {}]   ;;  %s360_s3 = inlined_call_operand.vmem [shape: f32[128,32], index: 3, kind: output, shape index: {}]  }
   0x1   :  { %v230_v0 = vld [vmem:[%s357_s1] sm:$0xff]  ;;  %v224_v2 = vld [vmem:[%s358_s0 + $0x10] sm:$0xff]  ;;  %v223_v5 = vld [vmem:[%s358_s0 + $0x8] sm:$0xff] }
   0x2   :  { %v222_v1 = vld [vmem:[%s358_s0] sm:$0xff]  ;;  %115 = vmatpush.bf16.msra.mxu0 %v230_v0  ;;  %231 = vmatpush.bf16.msra.mxu1 %v230_v0  ;;  %v228_v4 = vld [vmem:[%s358_s0 + $0x30] sm:$0xff]  ;;  %v225_v6 = vld [vmem:[%s358_s0 + $0x18] sm:$0xff] }
   0x3   :  { %v226_v3 = vld [vmem:[%s358_s0 + $0x20] sm:$0xff]  ;;  %232 = vmatpush.bf16.msra.mxu2 %v230_v0  ;;  %233 = vmatpush.bf16.msra.mxu3 %v230_v0  ;;  %v227_v7 = vld [vmem:[%s358_s0 + $0x28] sm:$0xff]  ;;  %v229_v8 = vld [vmem:[%s358_s0 + $0x38] sm:$0xff] }
   0x4   :  { %v234_v9 = vld [vmem:[%s359_s2] ss:$0 sm:$0xff] }
   0x5   :  { %214 = vmatmul.msk.bf16.vlgmr.msra.gmra.mxu0 %vm83_vm0, %v222_v1  ;;  %216 = vmatmul.msk.bf16.vlgmr.msra.gmra.mxu1 %vm83_vm0, %v224_v2 }
   0x6   :  { %218 = vmatmul.msk.bf16.vlgmr.msra.gmra.mxu2 %vm83_vm0, %v226_v3  ;;  %220 = vmatmul.msk.bf16.vlgmr.msra.gmra.mxu3 %vm83_vm0, %v228_v4 }
  0x15   :  { %215 = vmatmul.msk.bf16.gmra.mxu0 %vm83_vm0, %v223_v5  ;;  %217 = vmatmul.msk.bf16.gmra.mxu1 %vm83_vm0, %v225_v6 }
  0x16   :  { %219 = vmatmul.msk.bf16.gmra.mxu2 %vm83_vm0, %v227_v7  ;;  %221 = vmatmul.msk.bf16.gmra.mxu3 %vm83_vm0, %v229_v8 }
  0x82   :  { %v117_v10 = vpop.f32.mrf.mxu0  ;;  %v127_v11 = vpop.f32.mrf.mxu1 }
  0x83   :  { %v118_v12 = vadd.f32 %v234_v9, %v117_v10  ;;  %v128_v13 = vadd.f32 %v234_v9, %v127_v11 }
  0x85   :  { %158 = vst.msk [vmem:[%s360_s3] sm:$0xff] %vm157_vm1, %v118_v12 }
  0x86   :  { %162 = vst.msk [vmem:[%s360_s3 + $0x20] sm:$0xff] %vm157_vm1, %v128_v13 }
  0x89   :  { %v137_v14 = vpop.f32.mrf.mxu2  ;;  %v147_v15 = vpop.f32.mrf.mxu3 }
  0x8a   :  { %v138_v16 = vadd.f32 %v234_v9, %v137_v14  ;;  %v148_v17 = vadd.f32 %v234_v9, %v147_v15  ;;  %v119_v18 = vpop.f32.mrf.mxu0  ;;  %v129_v19 = vpop.f32.mrf.mxu1 }
  0x8b   :  { %v120_v20 = vadd.f32 %v234_v9, %v119_v18  ;;  %v130_v21 = vadd.f32 %v234_v9, %v129_v19 }
  0x8c   :  { %166 = vst.msk [vmem:[%s360_s3 + $0x40] sm:$0xff] %vm157_vm1, %v138_v16 }
  0x8d   :  { %170 = vst.msk [vmem:[%s360_s3 + $0x60] sm:$0xff] %vm157_vm1, %v148_v17 }
  0x8e   :  { %159 = vst.msk [vmem:[%s360_s3 + $0x8] sm:$0xff] %vm157_vm1, %v120_v20 }
  0x8f   :  { %163 = vst.msk [vmem:[%s360_s3 + $0x28] sm:$0xff] %vm157_vm1, %v130_v21 }
  0x91   :  { %v139_v22 = vpop.f32.mrf.mxu2  ;;  %v149_v23 = vpop.f32.mrf.mxu3 }
  0x92   :  { %v140_v24 = vadd.f32 %v234_v9, %v139_v22  ;;  %v150_v25 = vadd.f32 %v234_v9, %v149_v23  ;;  %v122_v26 = vpop.f32.mrf.mxu0  ;;  %v132_v27 = vpop.f32.mrf.mxu1 }
  0x93   :  { %v123_v28 = vadd.f32 %v234_v9, %v122_v26  ;;  %v133_v29 = vadd.f32 %v234_v9, %v132_v27 }
  0x94   :  { %167 = vst.msk [vmem:[%s360_s3 + $0x48] sm:$0xff] %vm157_vm1, %v140_v24 }
  0x95   :  { %171 = vst.msk [vmem:[%s360_s3 + $0x68] sm:$0xff] %vm157_vm1, %v150_v25 }
  0x96   :  { %160 = vst.msk [vmem:[%s360_s3 + $0x10] sm:$0xff] %vm157_vm1, %v123_v28 }
  0x97   :  { %164 = vst.msk [vmem:[%s360_s3 + $0x30] sm:$0xff] %vm157_vm1, %v133_v29 }
  0x99   :  { %v142_v30 = vpop.f32.mrf.mxu2  ;;  %v152_v31 = vpop.f32.mrf.mxu3 }
  0x9a   :  { %v143_v32 = vadd.f32 %v234_v9, %v142_v30  ;;  %v153_v33 = vadd.f32 %v234_v9, %v152_v31  ;;  %v124_v34 = vpop.f32.mrf.mxu0  ;;  %v134_v35 = vpop.f32.mrf.mxu1 }
  0x9b   :  { %v125_v36 = vadd.f32 %v234_v9, %v124_v34  ;;  %v135_v37 = vadd.f32 %v234_v9, %v134_v35 }
  0x9c   :  { %168 = vst.msk [vmem:[%s360_s3 + $0x50] sm:$0xff] %vm157_vm1, %v143_v32 }
  0x9d   :  { %172 = vst.msk [vmem:[%s360_s3 + $0x70] sm:$0xff] %vm157_vm1, %v153_v33 }
  0x9e   :  { %161 = vst.msk [vmem:[%s360_s3 + $0x18] sm:$0xff] %vm157_vm1, %v125_v36 }
  0x9f   :  { %165 = vst.msk [vmem:[%s360_s3 + $0x38] sm:$0xff] %vm157_vm1, %v135_v37 }
  0xa1   :  { %v144_v38 = vpop.f32.mrf.mxu2  ;;  %v154_v39 = vpop.f32.mrf.mxu3 }
  0xa2   :  { %v145_v40 = vadd.f32 %v234_v9, %v144_v38  ;;  %v155_v41 = vadd.f32 %v234_v9, %v154_v39 }
  0xa4   :  { %169 = vst.msk [vmem:[%s360_s3 + $0x58] sm:$0xff] %vm157_vm1, %v145_v40 }
  0xa5   :  { %173 = vst.msk [vmem:[%s360_s3 + $0x78] sm:$0xff] %vm157_vm1, %v155_v41 }

// kernel: hierarchical_vae_forward.58
= control target key start
LH: loop header
LB: loop body
LE: loop exit
PB: predicated region body
PF: predicated region fallthrough
CT: control target
= control target key end

     0   :  { %vm91_vm0 = vcmask 261120   ;;  %vm261_vm1 = vcmask 130048   ;;  %s614_s1 = inlined_call_operand.vmem [shape: bf16[32,16], index: 1, kind: input, shape index: {}]   ;;  %s615_s0 = inlined_call_operand.vmem [shape: bf16[128,32], index: 0, kind: input, shape index: {}]   ;;  %s616_s2 = inlined_call_operand.vmem [shape: f32[1,16], index: 2, kind: input, shape index: {}]   ;;  %s617_s3 = inlined_call_operand.vmem [shape: f32[128,16], index: 3, kind: output, shape index: {}]  }
   0x1   :  { %v339_v0 = vld [vmem:[%s614_s1 + $0x8] sm:$0xff]  ;;  %v338_v1 = vld [vmem:[%s614_s1] sm:$0xff]  ;;  %v332_v3 = vld [vmem:[%s615_s0 + $0x10] sm:$0xff] }
   0x2   :  { %122 = vmatpush.bf16.msra.mxu0 %v339_v0  ;;  %340 = vmatpush.bf16.msra.mxu1 %v339_v0  ;;  %v330_v2 = vld [vmem:[%s615_s0] sm:$0xff]  ;;  %v336_v5 = vld [vmem:[%s615_s0 + $0x30] sm:$0xff]  ;;  %v331_v6 = vld [vmem:[%s615_s0 + $0x8] sm:$0xff] }
   0x3   :  { %341 = vmatpush.bf16.msra.mxu2 %v339_v0  ;;  %342 = vmatpush.bf16.msra.mxu3 %v339_v0  ;;  %v334_v4 = vld [vmem:[%s615_s0 + $0x20] sm:$0xff]  ;;  %v333_v7 = vld [vmem:[%s615_s0 + $0x18] sm:$0xff]  ;;  %v335_v8 = vld [vmem:[%s615_s0 + $0x28] sm:$0xff] }
   0x4   :  { %v337_v9 = vld [vmem:[%s615_s0 + $0x38] sm:$0xff]  ;;  %v472_v10 = vld [vmem:[%s616_s2] ss:$0 sm:$0xff] }
   0x6   :  { %123 = vmatpush.bf16.msra.mxu0 %v338_v1  ;;  %343 = vmatpush.bf16.msra.mxu1 %v338_v1 }
   0x7   :  { %344 = vmatpush.bf16.msra.mxu2 %v338_v1  ;;  %345 = vmatpush.bf16.msra.mxu3 %v338_v1 }
   0x9   :  { %322 = vmatmul.msk.bf16.vlgmr.msra.gmra.mxu0 %vm91_vm0, %v330_v2  ;;  %324 = vmatmul.msk.bf16.vlgmr.msra.gmra.mxu1 %vm91_vm0, %v332_v3 }
   0xa   :  { %326 = vmatmul.msk.bf16.vlgmr.msra.gmra.mxu2 %vm91_vm0, %v334_v4  ;;  %328 = vmatmul.msk.bf16.vlgmr.msra.gmra.mxu3 %vm91_vm0, %v336_v5 }
  0x19   :  { %323 = vmatmul.msk.bf16.gmra.mxu0 %vm91_vm0, %v331_v6  ;;  %325 = vmatmul.msk.bf16.gmra.mxu1 %vm91_vm0, %v333_v7 }
  0x1a   :  { %327 = vmatmul.msk.bf16.gmra.mxu2 %vm91_vm0, %v335_v8  ;;  %329 = vmatmul.msk.bf16.gmra.mxu3 %vm91_vm0, %v337_v9 }
  0x86   :  { %v125_v11 = vpop.f32.mrf.mxu0  ;;  %v135_v12 = vpop.f32.mrf.mxu1 }
  0x87   :  { %v126_v13 = vadd.f32 %v472_v10, %v125_v11  ;;  %v476_v14 = vadd.f32 %v472_v10, %v135_v12 }
  0x89   :  { %v165_v15 = vsub.f32 0.0, %v126_v13  ;;  %v169_v16 = vsub.f32 0.0, %v476_v14 }
  0x8b   :  { %v181_v17 = vmul.f32 1.442695, %v165_v15  ;;  %v189_v18 = vmul.f32 1.442695, %v169_v16 }
  0x8d   :  { %347 = vpow2.f32 %v181_v17  ;;  %v145_v19 = vpop.f32.mrf.mxu2  ;;  %v155_v20 = vpop.f32.mrf.mxu3 }
  0x8e   :  { %349 = vpow2.f32 %v189_v18  ;;  %v480_v21 = vadd.f32 %v472_v10, %v145_v19  ;;  %v483_v22 = vadd.f32 %v472_v10, %v155_v20  ;;  %v127_v23 = vpop.f32.mrf.mxu0  ;;  %v137_v24 = vpop.f32.mrf.mxu1 }
  0x8f   :  { %v486_v25 = vadd.f32 %v472_v10, %v127_v23  ;;  %v489_v26 = vadd.f32 %v472_v10, %v137_v24 }
  0x90   :  { %v173_v27 = vsub.f32 0.0, %v480_v21  ;;  %v177_v28 = vsub.f32 0.0, %v483_v22 }
  0x91   :  { %v166_v29 = vsub.f32 0.0, %v486_v25  ;;  %v170_v30 = vsub.f32 0.0, %v489_v26 }
  0x92   :  { %v197_v31 = vmul.f32 1.442695, %v173_v27  ;;  %v205_v32 = vmul.f32 1.442695, %v177_v28 }
  0x93   :  { %v348_v33 = vpop.eup %347  ;;  %v183_v36 = vmul.f32 1.442695, %v166_v29  ;;  %v191_v38 = vmul.f32 1.442695, %v170_v30 }
  0x94   :  { %v350_v34 = vpop.eup %349  ;;  %v213_v35 = vadd.f32 1.0, %v348_v33  ;;  %351 = vpow2.f32 %v197_v31 }
  0x95   :  { %v217_v37 = vadd.f32 1.0, %v350_v34  ;;  %353 = vpow2.f32 %v205_v32  ;;  %v147_v39 = vpop.f32.mrf.mxu2  ;;  %v157_v40 = vpop.f32.mrf.mxu3 }
  0x96   :  { %355 = vrcp.f32 %v213_v35  ;;  %v496_v41 = vadd.f32 %v472_v10, %v147_v39  ;;  %v499_v42 = vadd.f32 %v472_v10, %v157_v40  ;;  %v130_v43 = vpop.f32.mrf.mxu0  ;;  %v140_v44 = vpop.f32.mrf.mxu1 }
  0x97   :  { %357 = vrcp.f32 %v217_v37  ;;  %v502_v45 = vadd.f32 %v472_v10, %v130_v43  ;;  %v505_v46 = vadd.f32 %v472_v10, %v140_v44 }
  0x98   :  { %359 = vpow2.f32 %v183_v36  ;;  %v174_v47 = vsub.f32 0.0, %v496_v41  ;;  %v178_v48 = vsub.f32 0.0, %v499_v42 }
  0x99   :  { %361 = vpow2.f32 %v191_v38  ;;  %v167_v49 = vsub.f32 0.0, %v502_v45  ;;  %v171_v50 = vsub.f32 0.0, %v505_v46 }
  0x9a   :  { %v352_v51 = vpop.eup %351  ;;  %v199_v52 = vmul.f32 1.442695, %v174_v47  ;;  %v207_v55 = vmul.f32 1.442695, %v178_v48 }
  0x9b   :  { %v354_v53 = vpop.eup %353  ;;  %v221_v54 = vadd.f32 1.0, %v352_v51  ;;  %v185_v58 = vmul.f32 1.442695, %v167_v49  ;;  %v193_v61 = vmul.f32 1.442695, %v171_v50 }
  0x9c   :  { %v356_v56 = vpop.eup %355  ;;  %v225_v57 = vadd.f32 1.0, %v354_v53  ;;  %363 = vpow2.f32 %v199_v52 }
  0x9d   :  { %v358_v59 = vpop.eup %357  ;;  %v245_v60 = vmul.f32 %v356_v56, %v126_v13  ;;  %365 = vrcp.f32 %v221_v54  ;;  %v150_v62 = vpop.f32.mrf.mxu2 }
  0x9e   :  { %v160_v63 = vpop.f32.mrf.mxu3  ;;  %v360_v0 = vpop.eup %359  ;;  %v249_v1 = vmul.f32 %v358_v59, %v476_v14  ;;  %367 = vrcp.f32 %v225_v57  ;;  %v513_v2 = vadd.f32 %v472_v10, %v150_v62 }
  0x9f   :  { %v516_v3 = vadd.f32 %v472_v10, %v160_v63  ;;  %v132_v4 = vpop.f32.mrf.mxu0  ;;  %v142_v5 = vpop.f32.mrf.mxu1  ;;  %262 = vst.msk [vmem:[%s617_s3] sm:$0xff] %vm261_vm1, %v245_v60  ;;  %v214_v7 = vadd.f32 1.0, %v360_v0  ;;  %369 = vpow2.f32 %v207_v55 }
  0xa0   :  { %v362_v6 = vpop.eup %361  ;;  %v523_v8 = vadd.f32 %v472_v10, %v132_v4  ;;  %v526_v9 = vadd.f32 %v472_v10, %v142_v5  ;;  %266 = vst.msk [vmem:[%s617_s3 + $0x20] sm:$0xff] %vm261_vm1, %v249_v1  ;;  %371 = vpow2.f32 %v185_v58  ;;  %v175_v12 = vsub.f32 0.0, %v513_v2 }
  0xa1   :  { %v218_v11 = vadd.f32 1.0, %v362_v6  ;;  %v179_v13 = vsub.f32 0.0, %v516_v3  ;;  %373 = vrcp.f32 %v214_v7 }
  0xa2   :  { %v168_v14 = vsub.f32 0.0, %v523_v8  ;;  %v172_v15 = vsub.f32 0.0, %v526_v9  ;;  %v364_v16 = vpop.eup %363  ;;  %v201_v17 = vmul.f32 1.442695, %v175_v12 }
  0xa3   :  { %375 = vrcp.f32 %v218_v11  ;;  %v209_v18 = vmul.f32 1.442695, %v179_v13  ;;  %v366_v19 = vpop.eup %365  ;;  %v222_v20 = vadd.f32 1.0, %v364_v16 }
  0xa4   :  { %377 = vpow2.f32 %v193_v61  ;;  %v187_v23 = vmul.f32 1.442695, %v168_v14  ;;  %v368_v24 = vpop.eup %367  ;;  %v253_v27 = vmul.f32 %v366_v19, %v480_v21  ;;  %v195_v30 = vmul.f32 1.442695, %v172_v15 }
  0xa5   :  { %379 = vpow2.f32 %v201_v17  ;;  %v370_v28 = vpop.eup %369  ;;  %v257_v29 = vmul.f32 %v368_v24, %v483_v22  ;;  %v152_v31 = vpop.f32.mrf.mxu2 }
  0xa6   :  { %381 = vrcp.f32 %v222_v20  ;;  %v162_v32 = vpop.f32.mrf.mxu3  ;;  %v372_v33 = vpop.eup %371  ;;  %270 = vst.msk [vmem:[%s617_s3 + $0x40] sm:$0xff] %vm261_vm1, %v253_v27  ;;  %v226_v34 = vadd.f32 1.0, %v370_v28  ;;  %v543_v35 = vadd.f32 %v472_v10, %v152_v31 }
  0xa7   :  { %383 = vpow2.f32 %v209_v18  ;;  %v546_v21 = vadd.f32 %v472_v10, %v162_v32  ;;  %v374_v36 = vpop.eup %373  ;;  %274 = vst.msk [vmem:[%s617_s3 + $0x60] sm:$0xff] %vm261_vm1, %v257_v29  ;;  %v215_v22 = vadd.f32 1.0, %v372_v33 }
  0xa8   :  { %385 = vpow2.f32 %v187_v23  ;;  %v246_v38 = vmul.f32 %v374_v36, %v486_v25  ;;  %v176_v39 = vsub.f32 0.0, %v543_v35 }
  0xa9   :  { %v376_v37 = vpop.eup %375  ;;  %387 = vrcp.f32 %v226_v34  ;;  %v180_v10 = vsub.f32 0.0, %v546_v21 }
  0xaa   :  { %v378_v40 = vpop.eup %377  ;;  %v250_v43 = vmul.f32 %v376_v37, %v489_v26  ;;  %389 = vrcp.f32 %v215_v22  ;;  %263 = vst.msk [vmem:[%s617_s3 + $0x8] sm:$0xff] %vm261_vm1, %v246_v38  ;;  %v203_v48 = vmul.f32 1.442695, %v176_v39 }
  0xab   :  { %v380_v44 = vpop.eup %379  ;;  %v219_v47 = vadd.f32 1.0, %v378_v40  ;;  %391 = vpow2.f32 %v195_v30  ;;  %v211_v53 = vmul.f32 1.442695, %v180_v10 }
  0xac   :  { %v382_v49 = vpop.eup %381  ;;  %267 = vst.msk [vmem:[%s617_s3 + $0x28] sm:$0xff] %vm261_vm1, %v250_v43  ;;  %v223_v25 = vadd.f32 1.0, %v380_v44 }
  0xad   :  { %v384_v26 = vpop.eup %383  ;;  %v254_v50 = vmul.f32 %v382_v49, %v496_v41  ;;  %393 = vrcp.f32 %v219_v47 }
  0xae   :  { %v386_v51 = vpop.eup %385  ;;  %395 = vrcp.f32 %v223_v25  ;;  %v227_v52 = vadd.f32 1.0, %v384_v26 }
  0xaf   :  { %v388_v54 = vpop.eup %387  ;;  %271 = vst.msk [vmem:[%s617_s3 + $0x48] sm:$0xff] %vm261_vm1, %v254_v50  ;;  %v216_v55 = vadd.f32 1.0, %v386_v51  ;;  %397 = vpow2.f32 %v203_v48 }
  0xb0   :  { %v390_v56 = vpop.eup %389  ;;  %v258_v57 = vmul.f32 %v388_v54, %v499_v42  ;;  %399 = vrcp.f32 %v227_v52 }
  0xb1   :  { %v392_v58 = vpop.eup %391  ;;  %v247_v41 = vmul.f32 %v390_v56, %v502_v45  ;;  %401 = vrcp.f32 %v216_v55 }
  0xb2   :  { %275 = vst.msk [vmem:[%s617_s3 + $0x68] sm:$0xff] %vm261_vm1, %v258_v57  ;;  %v220_v59 = vadd.f32 1.0, %v392_v58  ;;  %403 = vpow2.f32 %v211_v53 }
  0xb3   :  { %v394_v60 = vpop.eup %393  ;;  %264 = vst.msk [vmem:[%s617_s3 + $0x10] sm:$0xff] %vm261_vm1, %v247_v41 }
  0xb4   :  { %v396_v61 = vpop.eup %395  ;;  %v251_v42 = vmul.f32 %v394_v60, %v505_v46  ;;  %405 = vrcp.f32 %v220_v59 }
  0xb5   :  { %v398_v62 = vpop.eup %397  ;;  %v255_v45 = vmul.f32 %v396_v61, %v513_v2 }
  0xb6   :  { %v400_v63 = vpop.eup %399  ;;  %268 = vst.msk [vmem:[%s617_s3 + $0x30] sm:$0xff] %vm261_vm1, %v251_v42  ;;  %v224_v0 = vadd.f32 1.0, %v398_v62 }
  0xb7   :  { %v402_v1 = vpop.eup %401  ;;  %272 = vst.msk [vmem:[%s617_s3 + $0x50] sm:$0xff] %vm261_vm1, %v255_v45  ;;  %v259_v4 = vmul.f32 %v400_v63, %v516_v3 }
  0xb8   :  { %v404_v46 = vpop.eup %403  ;;  %v248_v5 = vmul.f32 %v402_v1, %v523_v8  ;;  %407 = vrcp.f32 %v224_v0 }
  0xb9   :  { %276 = vst.msk [vmem:[%s617_s3 + $0x70] sm:$0xff] %vm261_vm1, %v259_v4  ;;  %v228_v2 = vadd.f32 1.0, %v404_v46 }
  0xba   :  { %v406_v6 = vpop.eup %405  ;;  %265 = vst.msk [vmem:[%s617_s3 + $0x18] sm:$0xff] %vm261_vm1, %v248_v5 }
  0xbb   :  { %v252_v7 = vmul.f32 %v406_v6, %v526_v9  ;;  %409 = vrcp.f32 %v228_v2 }
  0xbd   :  { %269 = vst.msk [vmem:[%s617_s3 + $0x38] sm:$0xff] %vm261_vm1, %v252_v7 }
  0xbe   :  { %v408_v3 = vpop.eup %407 }
  0xbf   :  { %v256_v8 = vmul.f32 %v408_v3, %v543_v35 }
  0xc1   :  { %v410_v11 = vpop.eup %409  ;;  %273 = vst.msk [vmem:[%s617_s3 + $0x58] sm:$0xff] %vm261_vm1, %v256_v8 }
  0xc2   :  { %v260_v12 = vmul.f32 %v410_v11, %v546_v21 }
  0xc4   :  { %277 = vst.msk [vmem:[%s617_s3 + $0x78] sm:$0xff] %vm261_vm1, %v260_v12 }

// kernel: tile.87
= control target key start
LH: loop header
LB: loop body
LE: loop exit
PB: predicated region body
PF: predicated region fallthrough
CT: control target
= control target key end

     0   :  { %s22_s0 = inlined_call_operand.vmem [shape: f32[8], index: 0, kind: input, shape index: {}]   ;;  %s23_s1 = inlined_call_operand.vmem [shape: f32[4,8], index: 1, kind: output, shape index: {}]  }
   0x1   :  { %v4_v0 = vld [vmem:[%s22_s0] ss:$0 sm:$0xff] }
   0x2   :  { %5 = vst [vmem:[%s23_s1] sm:$0xf] %v4_v0 }

// kernel: tile.89
= control target key start
LH: loop header
LB: loop body
LE: loop exit
PB: predicated region body
PF: predicated region fallthrough
CT: control target
= control target key end

     0   :  { %s37_s8 = smov 8   ;;  %s38_s9 = smov 16   ;;  %vm7_vm0 = vcmask 64512   ;;  %vm13_vm1 = vcmask 261312   ;;  %vm19_vm2 = vcmask 195712   ;;  %vm25_vm3 = vcmask 130112   ;;  %s55_s0 = inlined_call_operand.vmem [shape: f32[4,8], index: 0, kind: input, shape index: {}]   ;;  %s56_s1 = inlined_call_operand.vmem [shape: f32[1,32], index: 1, kind: output, shape index: {}]  }
   0x1   :  { %v4_v0 = vld [vmem:[%s55_s0] sm:$0xf]  ;;  %s36_s0 = smov 24  }
   0x2   :  { %5 = vst [vmem:[#allocation1] sm:$0xf] %v4_v0 }
   0x9   :  { %v10_v1 = vld [vmem:[#allocation1 + $0x3] sm:$0x1]   ;;  %v22_v2 = vld [vmem:[#allocation1 + $0x1] sm:$0x1]   ;;  %v16_v3 = vld [vmem:[#allocation1 + $0x2] sm:$0x1]  }
   0xa   :  { %11 = vrot.lane.b32.xlu0 %v10_v1, %s36_s0  ;;  %23 = vrot.lane.b32.xlu1 %v22_v2, %s37_s8  ;;  %v6_v4 = vld [vmem:[#allocation1] sm:$0x1]  }
   0xb   :  { %8 = vst.msk [vmem:[#allocation0] sm:$0x1] %vm7_vm0, %v6_v4  }
  0x12   :  { %17 = vrot.lane.b32.xlu0 %v16_v3, %s38_s9 }
  0x7c   :  { %v12_v5 = vpop.permute.xlu0 %11   ;;  %v24_v6 = vpop.permute.xlu1 %23  }
  0x7d   :  { %14 = vst.msk [vmem:[#allocation0] sm:$0x1] %vm13_vm1, %v12_v5  }
  0x84   :  { %v18_v7 = vpop.permute.xlu0 %17  }
  0x85   :  { %20 = vst.msk [vmem:[#allocation0] sm:$0x1] %vm19_vm2, %v18_v7  }
  0x86   :  { %26 = vst.msk [vmem:[#allocation0] sm:$0x1] %vm25_vm3, %v24_v6  }
  0x8d   :  { %v29_v8 = vld [vmem:[#allocation0] sm:$0x1] }
  0x8e   :  { %32 = vst [vmem:[%s56_s1] sm:$0x1] %v29_v8 }

// kernel: hierarchical_vae_forward.60
= control target key start
LH: loop header
LB: loop body
LE: loop exit
PB: predicated region body
PF: predicated region fallthrough
CT: control target
= control target key end

     0   :  { %vm190_vm0 = vcmask 261120   ;;  %v414_v30 = vmov 0.0   ;;  %vm245_vm1 = vcmask 253952   ;;  %s619_s1 = inlined_call_operand.vmem [shape: bf16[128,32], index: 1, kind: input, shape index: {}]   ;;  %s620_s0 = inlined_call_operand.vmem [shape: bf16[128,128], index: 0, kind: input, shape index: {}]   ;;  %s621_s2 = inlined_call_operand.vmem [shape: f32[128,32], index: 2, kind: output, shape index: {0}]   ;;  %s622_s3 = inlined_call_operand.vmem [shape: f32[8,32], index: 3, kind: output, shape index: {1}]  }
   0x1   :  { %v388_v0 = vld [vmem:[%s619_s1 + $0x38] sm:$0xff]  ;;  %v387_v1 = vld [vmem:[%s619_s1 + $0x30] sm:$0xff]  ;;  %v386_v2 = vld [vmem:[%s619_s1 + $0x28] sm:$0xff]  ;;  %207 = vst.msk [vmem:[%s622_s3] sm:$0xff] %vm190_vm0, %v414_v30 }
   0x2   :  { %141 = vmatpush.bf16.msra.mxu0 %v388_v0  ;;  %389 = vmatpush.bf16.msra.mxu1 %v388_v0  ;;  %v385_v3 = vld [vmem:[%s619_s1 + $0x20] sm:$0xff]  ;;  %v384_v4 = vld [vmem:[%s619_s1 + $0x18] sm:$0xff]  ;;  %v383_v5 = vld [vmem:[%s619_s1 + $0x10] sm:$0xff] }
   0x3   :  { %390 = vmatpush.bf16.msra.mxu2 %v388_v0  ;;  %391 = vmatpush.bf16.msra.mxu3 %v388_v0  ;;  %v382_v6 = vld [vmem:[%s619_s1 + $0x8] sm:$0xff]  ;;  %v381_v7 = vld [vmem:[%s619_s1] sm:$0xff]  ;;  %v375_v9 = vld [vmem:[%s620_s0 + $0x10] sm:$0xff] }
   0x4   :  { %v373_v8 = vld [vmem:[%s620_s0] sm:$0xff]  ;;  %v379_v11 = vld [vmem:[%s620_s0 + $0x30] sm:$0xff]  ;;  %v374_v12 = vld [vmem:[%s620_s0 + $0x8] sm:$0xff] }
   0x5   :  { %v377_v10 = vld [vmem:[%s620_s0 + $0x20] sm:$0xff]  ;;  %v376_v13 = vld [vmem:[%s620_s0 + $0x18] sm:$0xff]  ;;  %v378_v14 = vld [vmem:[%s620_s0 + $0x28] sm:$0xff] }
   0x6   :  { %142 = vmatpush.bf16.msra.mxu0 %v387_v1  ;;  %392 = vmatpush.bf16.msra.mxu1 %v387_v1  ;;  %v380_v15 = vld [vmem:[%s620_s0 + $0x38] sm:$0xff] }
   0x7   :  { %393 = vmatpush.bf16.msra.mxu2 %v387_v1  ;;  %394 = vmatpush.bf16.msra.mxu3 %v387_v1 }
   0xa   :  { %143 = vmatpush.bf16.msra.mxu0 %v386_v2  ;;  %395 = vmatpush.bf16.msra.mxu1 %v386_v2 }
   0xb   :  { %396 = vmatpush.bf16.msra.mxu2 %v386_v2  ;;  %397 = vmatpush.bf16.msra.mxu3 %v386_v2 }
   0xe   :  { %144 = vmatpush.bf16.msra.mxu0 %v385_v3  ;;  %398 = vmatpush.bf16.msra.mxu1 %v385_v3 }
   0xf   :  { %399 = vmatpush.bf16.msra.mxu2 %v385_v3  ;;  %400 = vmatpush.bf16.msra.mxu3 %v385_v3 }
  0x12   :  { %145 = vmatpush.bf16.msra.mxu0 %v384_v4  ;;  %401 = vmatpush.bf16.msra.mxu1 %v384_v4 }
  0x13   :  { %402 = vmatpush.bf16.msra.mxu2 %v384_v4  ;;  %403 = vmatpush.bf16.msra.mxu3 %v384_v4 }
  0x16   :  { %146 = vmatpush.bf16.msra.mxu0 %v383_v5  ;;  %404 = vmatpush.bf16.msra.mxu1 %v383_v5 }
  0x17   :  { %405 = vmatpush.bf16.msra.mxu2 %v383_v5  ;;  %406 = vmatpush.bf16.msra.mxu3 %v383_v5 }
  0x1a   :  { %147 = vmatpush.bf16.msra.mxu0 %v382_v6  ;;  %407 = vmatpush.bf16.msra.mxu1 %v382_v6 }
  0x1b   :  { %408 = vmatpush.bf16.msra.mxu2 %v382_v6  ;;  %409 = vmatpush.bf16.msra.mxu3 %v382_v6 }
  0x1e   :  { %148 = vmatpush.bf16.msra.mxu0 %v381_v7  ;;  %410 = vmatpush.bf16.msra.mxu1 %v381_v7 }
  0x1f   :  { %411 = vmatpush.bf16.msra.mxu2 %v381_v7  ;;  %412 = vmatpush.bf16.msra.mxu3 %v381_v7 }
  0x21   :  { %149 = vmatmul.bf16.vlgmr.msra.gmra.mxu0 %v373_v8  ;;  %159 = vmatmul.bf16.vlgmr.msra.gmra.mxu1 %v375_v9 }
  0x22   :  { %169 = vmatmul.bf16.vlgmr.msra.gmra.mxu2 %v377_v10  ;;  %179 = vmatmul.bf16.vlgmr.msra.gmra.mxu3 %v379_v11 }
  0x31   :  { %154 = vmatmul.bf16.gmra.mxu0 %v374_v12  ;;  %164 = vmatmul.bf16.gmra.mxu1 %v376_v13 }
  0x32   :  { %174 = vmatmul.bf16.gmra.mxu2 %v378_v14  ;;  %184 = vmatmul.bf16.gmra.mxu3 %v380_v15 }
  0x9e   :  { %v150_v16 = vpop.f32.mrf.mxu0  ;;  %v160_v17 = vpop.f32.mrf.mxu1 }
  0x9f   :  { %191 = vst.msk [vmem:[%s621_s2] sm:$0xff] %vm190_vm0, %v150_v16  ;;  %v247_v27 = vmul.f32 %v150_v16, %v150_v16  ;;  %v208_v31 = vsel %vm190_vm0, %v150_v16, 0.0  ;;  %v251_v43 = vmul.f32 %v160_v17, %v160_v17  ;;  %v215_v48 = vsel %vm190_vm0, %v160_v17, 0.0 }
  0xa0   :  { %195 = vst.msk [vmem:[%s621_s2 + $0x20] sm:$0xff] %vm190_vm0, %v160_v17 }
  0xa1   :  { %v263_v35 = vsel %vm190_vm0, %v247_v27, 0.0  ;;  %v270_v53 = vsel %vm190_vm0, %v251_v43, 0.0 }
  0xa5   :  { %v491_v18 = vpop.f32.mrf.mxu2  ;;  %v493_v19 = vpop.f32.mrf.mxu3 }
  0xa6   :  { %v152_v20 = vpop.f32.mrf.mxu0  ;;  %v162_v21 = vpop.f32.mrf.mxu1  ;;  %199 = vst.msk [vmem:[%s621_s2 + $0x40] sm:$0xff] %vm190_vm0, %v491_v18  ;;  %v255_v1 = vmul.f32 %v491_v18, %v491_v18  ;;  %v223_v6 = vsel %vm190_vm0, %v491_v18, 0.0 }
  0xa7   :  { %192 = vst.msk [vmem:[%s621_s2 + $0x8] sm:$0xff] %vm190_vm0, %v152_v20  ;;  %v248_v26 = vmul.f32 %v152_v20, %v152_v20  ;;  %v209_v28 = vsel %vm190_vm0, %v152_v20, 0.0  ;;  %v252_v49 = vmul.f32 %v162_v21, %v162_v21  ;;  %v217_v54 = vsel %vm190_vm0, %v162_v21, 0.0 }
  0xa8   :  { %196 = vst.msk [vmem:[%s621_s2 + $0x28] sm:$0xff] %vm190_vm0, %v162_v21  ;;  %v210_v34 = vadd.f32 %v209_v28, %v208_v31  ;;  %v278_v11 = vsel %vm190_vm0, %v255_v1, 0.0 }
  0xa9   :  { %203 = vst.msk [vmem:[%s621_s2 + $0x60] sm:$0xff] %vm190_vm0, %v493_v19  ;;  %v264_v32 = vsel %vm190_vm0, %v248_v26, 0.0  ;;  %v272_v58 = vsel %vm190_vm0, %v252_v49, 0.0 }
  0xaa   :  { %v265_v39 = vadd.f32 %v264_v32, %v263_v35 }
  0xad   :  { %v513_v22 = vpop.f32.mrf.mxu2  ;;  %v515_v23 = vpop.f32.mrf.mxu3 }
  0xae   :  { %v155_v24 = vpop.f32.mrf.mxu0  ;;  %v165_v25 = vpop.f32.mrf.mxu1  ;;  %200 = vst.msk [vmem:[%s621_s2 + $0x48] sm:$0xff] %vm190_vm0, %v513_v22  ;;  %v256_v7 = vmul.f32 %v513_v22, %v513_v22  ;;  %v225_v12 = vsel %vm190_vm0, %v513_v22, 0.0  ;;  %v231_v22 = vsel %vm190_vm0, %v493_v19, 0.0 }
  0xaf   :  { %193 = vst.msk [vmem:[%s621_s2 + $0x10] sm:$0xff] %vm190_vm0, %v155_v24  ;;  %v249_v29 = vmul.f32 %v155_v24, %v155_v24  ;;  %v211_v33 = vsel %vm190_vm0, %v155_v24, 0.0  ;;  %v253_v55 = vmul.f32 %v165_v25, %v165_v25  ;;  %v219_v59 = vsel %vm190_vm0, %v165_v25, 0.0 }
  0xb0   :  { %197 = vst.msk [vmem:[%s621_s2 + $0x30] sm:$0xff] %vm190_vm0, %v165_v25  ;;  %v212_v40 = vadd.f32 %v211_v33, %v210_v34  ;;  %v280_v16 = vsel %vm190_vm0, %v256_v7, 0.0  ;;  %v259_v24 = vmul.f32 %v493_v19, %v493_v19  ;;  %v233_v34 = vsel %vm190_vm0, %v515_v23, 0.0 }
  0xb1   :  { %204 = vst.msk [vmem:[%s621_s2 + $0x68] sm:$0xff] %vm190_vm0, %v515_v23  ;;  %v266_v36 = vsel %vm190_vm0, %v249_v29, 0.0  ;;  %v274_v2 = vsel %vm190_vm0, %v253_v55, 0.0  ;;  %v260_v29 = vmul.f32 %v515_v23, %v515_v23 }
  0xb2   :  { %v267_v46 = vadd.f32 %v266_v36, %v265_v39  ;;  %v286_v33 = vsel %vm190_vm0, %v259_v24, 0.0 }
  0xb3   :  { %v288_v39 = vsel %vm190_vm0, %v260_v29, 0.0 }
  0xb5   :  { %v175_v37 = vpop.f32.mrf.mxu2  ;;  %v545_v38 = vpop.f32.mrf.mxu3 }
  0xb6   :  { %v157_v41 = vpop.f32.mrf.mxu0  ;;  %v167_v42 = vpop.f32.mrf.mxu1  ;;  %201 = vst.msk [vmem:[%s621_s2 + $0x50] sm:$0xff] %vm190_vm0, %v175_v37  ;;  %v257_v13 = vmul.f32 %v175_v37, %v175_v37  ;;  %v227_v17 = vsel %vm190_vm0, %v175_v37, 0.0  ;;  %v261_v35 = vmul.f32 %v545_v38, %v545_v38  ;;  %v235_v19 = vsel %vm190_vm0, %v545_v38, 0.0 }
  0xb7   :  { %194 = vst.msk [vmem:[%s621_s2 + $0x18] sm:$0xff] %vm190_vm0, %v157_v41  ;;  %v213_v44 = vsel %vm190_vm0, %v157_v41, 0.0  ;;  %v250_v45 = vmul.f32 %v157_v41, %v157_v41  ;;  %v254_v60 = vmul.f32 %v167_v42, %v167_v42  ;;  %v221_v3 = vsel %vm190_vm0, %v167_v42, 0.0 }
  0xb8   :  { %v214_v47 = vadd.f32 %v213_v44, %v212_v40  ;;  %198 = vst.msk [vmem:[%s621_s2 + $0x38] sm:$0xff] %vm190_vm0, %v167_v42  ;;  %v282_v25 = vsel %vm190_vm0, %v257_v13, 0.0  ;;  %v290_v43 = vsel %vm190_vm0, %v261_v35, 0.0 }
  0xb9   :  { %v268_v50 = vsel %vm190_vm0, %v250_v45, 0.0  ;;  %205 = vst.msk [vmem:[%s621_s2 + $0x70] sm:$0xff] %vm190_vm0, %v545_v38  ;;  %v276_v8 = vsel %vm190_vm0, %v254_v60, 0.0 }
  0xba   :  { %v216_v51 = vadd.f32 %v215_v48, %v214_v47  ;;  %v269_v52 = vadd.f32 %v268_v50, %v267_v46 }
  0xbc   :  { %v271_v56 = vadd.f32 %v270_v53, %v269_v52  ;;  %v218_v57 = vadd.f32 %v217_v54, %v216_v51 }
  0xbd   :  { %v177_v61 = vpop.f32.mrf.mxu2  ;;  %v187_v62 = vpop.f32.mrf.mxu3 }
  0xbe   :  { %v220_v63 = vadd.f32 %v219_v59, %v218_v57  ;;  %v273_v0 = vadd.f32 %v272_v58, %v271_v56  ;;  %202 = vst.msk [vmem:[%s621_s2 + $0x58] sm:$0xff] %vm190_vm0, %v177_v61  ;;  %v258_v18 = vmul.f32 %v177_v61, %v177_v61  ;;  %v229_v26 = vsel %vm190_vm0, %v177_v61, 0.0 }
  0xbf   :  { %206 = vst.msk [vmem:[%s621_s2 + $0x78] sm:$0xff] %vm190_vm0, %v187_v62  ;;  %v262_v40 = vmul.f32 %v187_v62, %v187_v62  ;;  %v237_v44 = vsel %vm190_vm0, %v187_v62, 0.0 }
  0xc0   :  { %v222_v4 = vadd.f32 %v221_v3, %v220_v63  ;;  %v275_v5 = vadd.f32 %v274_v2, %v273_v0  ;;  %v284_v30 = vsel %vm190_vm0, %v258_v18, 0.0 }
  0xc1   :  { %v292_v23 = vsel %vm190_vm0, %v262_v40, 0.0 }
  0xc2   :  { %v224_v9 = vadd.f32 %v223_v6, %v222_v4  ;;  %v277_v10 = vadd.f32 %v276_v8, %v275_v5 }
  0xc4   :  { %v279_v14 = vadd.f32 %v278_v11, %v277_v10  ;;  %v226_v15 = vadd.f32 %v225_v12, %v224_v9 }
  0xc6   :  { %v228_v20 = vadd.f32 %v227_v17, %v226_v15  ;;  %v281_v21 = vadd.f32 %v280_v16, %v279_v14 }
  0xc8   :  { %v283_v27 = vadd.f32 %v282_v25, %v281_v21  ;;  %v230_v28 = vadd.f32 %v229_v26, %v228_v20 }
  0xca   :  { %v232_v31 = vadd.f32 %v231_v22, %v230_v28  ;;  %v285_v32 = vadd.f32 %v284_v30, %v283_v27 }
  0xcc   :  { %v287_v36 = vadd.f32 %v286_v33, %v285_v32  ;;  %v234_v37 = vadd.f32 %v233_v34, %v232_v31 }
  0xce   :  { %v236_v41 = vadd.f32 %v235_v19, %v234_v37  ;;  %v289_v42 = vadd.f32 %v288_v39, %v287_v36 }
  0xd0   :  { %v291_v45 = vadd.f32 %v290_v43, %v289_v42  ;;  %v238_v46 = vadd.f32 %v237_v44, %v236_v41 }
  0xd2   :  { %v239_v47 = vrot.slane %v238_v46, 4  ;;  %v293_v48 = vadd.f32 %v292_v23, %v291_v45 }
  0xd4   :  { %v240_v49 = vadd.f32 %v239_v47, %v238_v46  ;;  %v294_v50 = vrot.slane %v293_v48, 4 }
  0xd6   :  { %v241_v51 = vrot.slane %v240_v49, 2  ;;  %v295_v52 = vadd.f32 %v294_v50, %v293_v48 }
  0xd8   :  { %v242_v53 = vadd.f32 %v241_v51, %v240_v49  ;;  %v296_v54 = vrot.slane %v295_v52, 2 }
  0xda   :  { %v243_v38 = vrot.slane %v242_v53, 1  ;;  %v297_v55 = vadd.f32 %v296_v54, %v295_v52 }
  0xdc   :  { %v244_v56 = vadd.f32 %v243_v38, %v242_v53  ;;  %v298_v57 = vrot.slane %v297_v55, 1 }
  0xde   :  { %246 = vst.msk [vmem:[%s622_s3] sm:$0x1] %vm245_vm1, %v244_v56  ;;  %v299_v58 = vadd.f32 %v298_v57, %v297_v55 }
  0xe0   :  { %300 = vst.msk [vmem:[%s622_s3 + $0x1] sm:$0x1] %vm245_vm1, %v299_v58 }

// kernel: tile.97
= control target key start
LH: loop header
LB: loop body
LE: loop exit
PB: predicated region body
PF: predicated region fallthrough
CT: control target
= control target key end

     0   :  { %s22_s0 = inlined_call_operand.vmem [shape: f32[4], index: 0, kind: input, shape index: {}]   ;;  %s23_s1 = inlined_call_operand.vmem [shape: f32[4,4], index: 1, kind: output, shape index: {}]  }
   0x1   :  { %v4_v0 = vld [vmem:[%s22_s0] ss:$0 sm:$0xff] }
   0x2   :  { %5 = vst [vmem:[%s23_s1] sm:$0xf] %v4_v0 }

// kernel: tile.99
= control target key start
LH: loop header
LB: loop body
LE: loop exit
PB: predicated region body
PF: predicated region fallthrough
CT: control target
= control target key end

     0   :  { %s37_s8 = smov 4   ;;  %s38_s9 = smov 8   ;;  %vm7_vm0 = vcmask 31744   ;;  %vm13_vm1 = vcmask 130144   ;;  %vm19_vm2 = vcmask 97344   ;;  %vm25_vm3 = vcmask 64544   ;;  %s55_s0 = inlined_call_operand.vmem [shape: f32[4,4], index: 0, kind: input, shape index: {}]   ;;  %s56_s1 = inlined_call_operand.vmem [shape: f32[1,16], index: 1, kind: output, shape index: {}]  }
   0x1   :  { %v4_v0 = vld [vmem:[%s55_s0] sm:$0xf]  ;;  %s36_s0 = smov 12  }
   0x2   :  { %5 = vst [vmem:[#allocation1] sm:$0xf] %v4_v0 }
   0x9   :  { %v10_v1 = vld [vmem:[#allocation1 + $0x3] sm:$0x1]   ;;  %v22_v2 = vld [vmem:[#allocation1 + $0x1] sm:$0x1]   ;;  %v16_v3 = vld [vmem:[#allocation1 + $0x2] sm:$0x1]  }
   0xa   :  { %11 = vrot.lane.b32.xlu0 %v10_v1, %s36_s0  ;;  %23 = vrot.lane.b32.xlu1 %v22_v2, %s37_s8  ;;  %v6_v4 = vld [vmem:[#allocation1] sm:$0x1]  }
   0xb   :  { %8 = vst.msk [vmem:[#allocation0] sm:$0x1] %vm7_vm0, %v6_v4  }
  0x12   :  { %17 = vrot.lane.b32.xlu0 %v16_v3, %s38_s9 }
  0x7c   :  { %v12_v5 = vpop.permute.xlu0 %11   ;;  %v24_v6 = vpop.permute.xlu1 %23  }
  0x7d   :  { %14 = vst.msk [vmem:[#allocation0] sm:$0x1] %vm13_vm1, %v12_v5  }
  0x84   :  { %v18_v7 = vpop.permute.xlu0 %17  }
  0x85   :  { %20 = vst.msk [vmem:[#allocation0] sm:$0x1] %vm19_vm2, %v18_v7  }
  0x86   :  { %26 = vst.msk [vmem:[#allocation0] sm:$0x1] %vm25_vm3, %v24_v6  }
  0x8d   :  { %v29_v8 = vld [vmem:[#allocation0] sm:$0x1] }
  0x8e   :  { %32 = vst [vmem:[%s56_s1] sm:$0x1] %v29_v8 }

// kernel: hierarchical_vae_forward.62
= control target key start
LH: loop header
LB: loop body
LE: loop exit
PB: predicated region body
PF: predicated region fallthrough
CT: control target
= control target key end

     0   :  { %s908_s12 = smov 0   ;;  %s1251_s0 = inlined_call_operand.vmem [shape: bf16[512,32], index: 0, kind: input, shape index: {}]   ;;  %s1252_s1 = inlined_call_operand.vmem [shape: bf16[32,16], index: 1, kind: input, shape index: {}]   ;;  %s1253_s2 = inlined_call_operand.vmem [shape: f32[512,16], index: 2, kind: output, shape index: {0}]   ;;  %s1254_s3 = inlined_call_operand.vmem [shape: f32[16,16], index: 3, kind: output, shape index: {1}]  }
   0x1 LB: > { %s914_s13 = sadd.s32 4294967295, %s885_s12   ;;  %p750_p0 = scmp.ge.s32.totalorder %s885_s12, 1  ;;  %s885_s12 = sphi %s908_s12, %s14_s12  }
   0x2   : > { %p141_p1 = scmp.lt.s32.totalorder %s885_s12, 3 }
   0x4   : > { %p142_p2 = pnand %p750_p0, %p141_p1 }
   0x5   : > { %s751_s16 = sshll.u32 (!%p142_p2), %s914_s13, 5  ;;  %p181_p4 = scmp.lt.s32.totalorder (!%p142_p2), %s914_s13, 1 }
   0x6   : > { %145 = sbr.rel (%p142_p2) target bundleno = 267 (0x10b), region = 28  ;;  %p170_p3 = scmp.lt.s32.totalorder (!%p142_p2), %s751_s16, 63 }
   0xb   : > { %v863_v0 = vld [vmem:[%s1252_s1 + $0x8] sm:$0xff]  ;;  %v862_v1 = vld [vmem:[%s1252_s1] sm:$0xff]  ;;  %s1256_s16 = smov (!%p170_p3, %s751_s16), 63  ;;  %vm314_vm0 = vcmask 261120   ;;  %vm452_vm1 = vcmask 130048   ;;  %s1258_s13 = smov (!%p181_p4, %s914_s13), 1 }
   0xc   : > { %369 = vmatpush.bf16.msra.mxu0 %v863_v0  ;;  %864 = vmatpush.bf16.msra.mxu1 %v863_v0  ;;  %s752_s19 = sshll.u32 %s1256_s16, 2  ;;  %s754_s23 = sshll.u32 %s1256_s16, 3  ;;  %vm555_vm2 = vcmask 122880  }
   0xd   : > { %865 = vmatpush.bf16.msra.mxu2 %v863_v0  ;;  %866 = vmatpush.bf16.msra.mxu3 %v863_v0  ;;  %s931_s22 = scalar_lea.vmem %s1251_s0, %s752_s19  ;;  %s969_s26 = scalar_lea.vmem %s1253_s2, %s754_s23 }
   0xe   : > { %v846_v2 = vld [vmem:[%s931_s22] sm:$0xff]  ;;  %v847_v6 = vld [vmem:[%s931_s22 + $0x8] sm:$0xff]  ;;  %v848_v10 = vld [vmem:[%s931_s22 + $0x10] sm:$0xff]  ;;  %s755_s27 = sshll.u32 %s1258_s13, 3 }
   0xf   : > { %v850_v3 = vld [vmem:[%s931_s22 + $0x20] sm:$0xff]  ;;  %v851_v7 = vld [vmem:[%s931_s22 + $0x28] sm:$0xff]  ;;  %v852_v11 = vld [vmem:[%s931_s22 + $0x30] sm:$0xff]  ;;  %s1159_s30 = scalar_lea.vmem %s1254_s3, %s755_s27 }
  0x10   : > { %370 = vmatpush.bf16.msra.mxu0 %v862_v1  ;;  %867 = vmatpush.bf16.msra.mxu1 %v862_v1  ;;  %v854_v4 = vld [vmem:[%s931_s22 + $0x40] sm:$0xff]  ;;  %v855_v8 = vld [vmem:[%s931_s22 + $0x48] sm:$0xff]  ;;  %v856_v12 = vld [vmem:[%s931_s22 + $0x50] sm:$0xff] }
  0x11   : > { %868 = vmatpush.bf16.msra.mxu2 %v862_v1  ;;  %869 = vmatpush.bf16.msra.mxu3 %v862_v1  ;;  %v858_v5 = vld [vmem:[%s931_s22 + $0x60] sm:$0xff]  ;;  %v859_v9 = vld [vmem:[%s931_s22 + $0x68] sm:$0xff]  ;;  %v860_v13 = vld [vmem:[%s931_s22 + $0x70] sm:$0xff] }
  0x12   : > { %v849_v14 = vld [vmem:[%s931_s22 + $0x18] sm:$0xff] }
  0x13   : > { %828 = vmatmul.msk.bf16.vlgmr.msra.gmra.mxu0 %vm314_vm0, %v846_v2  ;;  %832 = vmatmul.msk.bf16.vlgmr.msra.gmra.mxu1 %vm314_vm0, %v850_v3  ;;  %v853_v15 = vld [vmem:[%s931_s22 + $0x38] sm:$0xff] }
  0x14   : > { %836 = vmatmul.msk.bf16.vlgmr.msra.gmra.mxu2 %vm314_vm0, %v854_v4  ;;  %840 = vmatmul.msk.bf16.vlgmr.msra.gmra.mxu3 %vm314_vm0, %v858_v5  ;;  %v857_v16 = vld [vmem:[%s931_s22 + $0x58] sm:$0xff] }
  0x15   : > { %v861_v17 = vld [vmem:[%s931_s22 + $0x78] sm:$0xff] }
  0x23   : > { %829 = vmatmul.msk.bf16.gmra.mxu0 %vm314_vm0, %v847_v6  ;;  %833 = vmatmul.msk.bf16.gmra.mxu1 %vm314_vm0, %v851_v7 }
  0x24   : > { %837 = vmatmul.msk.bf16.gmra.mxu2 %vm314_vm0, %v855_v8  ;;  %841 = vmatmul.msk.bf16.gmra.mxu3 %vm314_vm0, %v859_v9 }
  0x33   : > { %830 = vmatmul.msk.bf16.gmra.mxu0 %vm314_vm0, %v848_v10  ;;  %834 = vmatmul.msk.bf16.gmra.mxu1 %vm314_vm0, %v852_v11 }
  0x34   : > { %838 = vmatmul.msk.bf16.gmra.mxu2 %vm314_vm0, %v856_v12  ;;  %842 = vmatmul.msk.bf16.gmra.mxu3 %vm314_vm0, %v860_v13 }
  0x43   : > { %831 = vmatmul.msk.bf16.gmra.mxu0 %vm314_vm0, %v849_v14  ;;  %835 = vmatmul.msk.bf16.gmra.mxu1 %vm314_vm0, %v853_v15 }
  0x44   : > { %839 = vmatmul.msk.bf16.gmra.mxu2 %vm314_vm0, %v857_v16  ;;  %843 = vmatmul.msk.bf16.gmra.mxu3 %vm314_vm0, %v861_v17 }
  0x90   : > { %v372_v18 = vpop.f32.mrf.mxu0  ;;  %v971_v19 = vpop.f32.mrf.mxu1 }
  0x91   : > { %453 = vst.msk [vmem:[%s969_s26] sm:$0xff] %vm452_vm1, %v372_v18  ;;  %v557_v41 = vmul.f32 %v372_v18, %v372_v18  ;;  %v486_v44 = vsel %vm452_vm1, %v372_v18, 0.0  ;;  %v565_v15 = vmul.f32 %v971_v19, %v971_v19 }
  0x92   : > { %461 = vst.msk [vmem:[%s969_s26 + $0x40] sm:$0xff] %vm452_vm1, %v971_v19 }
  0x93   : > { %v589_v49 = vsel %vm452_vm1, %v557_v41, 0.0 }
  0x97   : > { %v978_v20 = vpop.f32.mrf.mxu2  ;;  %v987_v23 = vpop.f32.mrf.mxu3 }
  0x98   : > { %v374_v21 = vpop.f32.mrf.mxu0  ;;  %v980_v22 = vpop.f32.mrf.mxu1  ;;  %469 = vst.msk [vmem:[%s969_s26 + $0x80] sm:$0xff] %vm452_vm1, %v978_v20 }
  0x99   : > { %454 = vst.msk [vmem:[%s969_s26 + $0x8] sm:$0xff] %vm452_vm1, %v374_v21  ;;  %v558_v39 = vmul.f32 %v374_v21, %v374_v21  ;;  %v487_v42 = vsel %vm452_vm1, %v374_v21, 0.0 }
  0x9a   : > { %462 = vst.msk [vmem:[%s969_s26 + $0x48] sm:$0xff] %vm452_vm1, %v980_v22  ;;  %v488_v48 = vadd.f32 %v487_v42, %v486_v44  ;;  %v604_v42 = vsel %vm452_vm1, %v565_v15, 0.0 }
  0x9b   : > { %477 = vst.msk [vmem:[%s969_s26 + $0xc0] sm:$0xff] %vm452_vm1, %v987_v23  ;;  %v590_v45 = vsel %vm452_vm1, %v558_v39, 0.0 }
  0x9c   : > { %v591_v54 = vadd.f32 %v590_v45, %v589_v49 }
  0x9f   : > { %v995_v24 = vpop.f32.mrf.mxu2  ;;  %v1004_v27 = vpop.f32.mrf.mxu3 }
  0xa0   : > { %v377_v25 = vpop.f32.mrf.mxu0  ;;  %v997_v26 = vpop.f32.mrf.mxu1  ;;  %470 = vst.msk [vmem:[%s969_s26 + $0x88] sm:$0xff] %vm452_vm1, %v995_v24 }
  0xa1   : > { %455 = vst.msk [vmem:[%s969_s26 + $0x10] sm:$0xff] %vm452_vm1, %v377_v25  ;;  %v559_v43 = vmul.f32 %v377_v25, %v377_v25  ;;  %v489_v46 = vsel %vm452_vm1, %v377_v25, 0.0 }
  0xa2   : > { %463 = vst.msk [vmem:[%s969_s26 + $0x50] sm:$0xff] %vm452_vm1, %v997_v26  ;;  %v490_v55 = vadd.f32 %v489_v46, %v488_v48 }
  0xa3   : > { %478 = vst.msk [vmem:[%s969_s26 + $0xc8] sm:$0xff] %vm452_vm1, %v1004_v27  ;;  %v592_v50 = vsel %vm452_vm1, %v559_v43, 0.0  ;;  %v503_v43 = vsel %vm452_vm1, %v980_v22, 0.0 }
  0xa4   : > { %v593_v62 = vadd.f32 %v592_v50, %v591_v54 }
  0xa7   : > { %v1012_v28 = vpop.f32.mrf.mxu2  ;;  %v1021_v31 = vpop.f32.mrf.mxu3 }
  0xa8   : > { %v379_v29 = vpop.f32.mrf.mxu0  ;;  %v1014_v30 = vpop.f32.mrf.mxu1  ;;  %471 = vst.msk [vmem:[%s969_s26 + $0x90] sm:$0xff] %vm452_vm1, %v1012_v28 }
  0xa9   : > { %456 = vst.msk [vmem:[%s969_s26 + $0x18] sm:$0xff] %vm452_vm1, %v379_v29  ;;  %v560_v47 = vmul.f32 %v379_v29, %v379_v29  ;;  %v491_v51 = vsel %vm452_vm1, %v379_v29, 0.0  ;;  %v501_v29 = vsel %vm452_vm1, %v971_v19, 0.0  ;;  %v567_v19 = vmul.f32 %v997_v26, %v997_v26 }
  0xaa   : > { %464 = vst.msk [vmem:[%s969_s26 + $0x58] sm:$0xff] %vm452_vm1, %v1014_v30  ;;  %v492_v63 = vadd.f32 %v491_v51, %v490_v55  ;;  %v568_v48 = vmul.f32 %v1014_v30, %v1014_v30 }
  0xab   : > { %479 = vst.msk [vmem:[%s969_s26 + $0xd0] sm:$0xff] %vm452_vm1, %v1021_v31  ;;  %v594_v58 = vsel %vm452_vm1, %v560_v47, 0.0  ;;  %v505_v47 = vsel %vm452_vm1, %v997_v26, 0.0 }
  0xac   : > { %v595_v3 = vadd.f32 %v594_v58, %v593_v62  ;;  %v610_v58 = vsel %vm452_vm1, %v568_v48, 0.0 }
  0xaf   : > { %v1029_v32 = vpop.f32.mrf.mxu2  ;;  %v1038_v35 = vpop.f32.mrf.mxu3 }
  0xb0   : > { %v382_v33 = vpop.f32.mrf.mxu0  ;;  %v1031_v34 = vpop.f32.mrf.mxu1  ;;  %472 = vst.msk [vmem:[%s969_s26 + $0x98] sm:$0xff] %vm452_vm1, %v1029_v32 }
  0xb1   : > { %457 = vst.msk [vmem:[%s969_s26 + $0x20] sm:$0xff] %vm452_vm1, %v382_v33  ;;  %v561_v52 = vmul.f32 %v382_v33, %v382_v33  ;;  %v493_v59 = vsel %vm452_vm1, %v382_v33, 0.0  ;;  %v566_v33 = vmul.f32 %v980_v22, %v980_v22  ;;  %v608_v22 = vsel %vm452_vm1, %v567_v19, 0.0 }
  0xb2   : > { %465 = vst.msk [vmem:[%s969_s26 + $0x60] sm:$0xff] %vm452_vm1, %v1031_v34  ;;  %v494_v4 = vadd.f32 %v493_v59, %v492_v63  ;;  %v569_v54 = vmul.f32 %v1031_v34, %v1031_v34  ;;  %v509_v59 = vsel %vm452_vm1, %v1031_v34, 0.0 }
  0xb3   : > { %480 = vst.msk [vmem:[%s969_s26 + $0xd8] sm:$0xff] %vm452_vm1, %v1038_v35  ;;  %v596_v0 = vsel %vm452_vm1, %v561_v52, 0.0  ;;  %v606_v46 = vsel %vm452_vm1, %v566_v33, 0.0  ;;  %v507_v52 = vsel %vm452_vm1, %v1014_v30, 0.0 }
  0xb4   : > { %v597_v7 = vadd.f32 %v596_v0, %v595_v3  ;;  %v612_v63 = vsel %vm452_vm1, %v569_v54, 0.0 }
  0xb7   : > { %v1046_v36 = vpop.f32.mrf.mxu2  ;;  %v1055_v40 = vpop.f32.mrf.mxu3 }
  0xb8   : > { %v384_v37 = vpop.f32.mrf.mxu0  ;;  %v1048_v38 = vpop.f32.mrf.mxu1  ;;  %473 = vst.msk [vmem:[%s969_s26 + $0xa0] sm:$0xff] %vm452_vm1, %v1046_v36 }
  0xb9   : > { %458 = vst.msk [vmem:[%s969_s26 + $0x28] sm:$0xff] %vm452_vm1, %v384_v37  ;;  %v562_v60 = vmul.f32 %v384_v37, %v384_v37  ;;  %v495_v1 = vsel %vm452_vm1, %v384_v37, 0.0  ;;  %v511_v0 = vsel %vm452_vm1, %v1048_v38, 0.0 }
  0xba   : > { %466 = vst.msk [vmem:[%s969_s26 + $0x68] sm:$0xff] %vm452_vm1, %v1048_v38  ;;  %v496_v8 = vadd.f32 %v495_v1, %v494_v4 }
  0xbb   : > { %481 = vst.msk [vmem:[%s969_s26 + $0xe0] sm:$0xff] %vm452_vm1, %v1055_v40  ;;  %v598_v5 = vsel %vm452_vm1, %v562_v60, 0.0  ;;  %v570_v60 = vmul.f32 %v1048_v38, %v1048_v38  ;;  %v573_v38 = vmul.f32 %v978_v20, %v978_v20 }
  0xbc   : > { %v599_v11 = vadd.f32 %v598_v5, %v597_v7 }
  0xbd   : > { %v614_v4 = vsel %vm452_vm1, %v570_v60, 0.0 }
  0xbf   : > { %v1070_v53 = vpop.f32.mrf.mxu2  ;;  %v1081_v61 = vpop.f32.mrf.mxu3 }
  0xc0   : > { %v387_v56 = vpop.f32.mrf.mxu0  ;;  %v1072_v57 = vpop.f32.mrf.mxu1  ;;  %474 = vst.msk [vmem:[%s969_s26 + $0xa8] sm:$0xff] %vm452_vm1, %v1070_v53  ;;  %v578_v48 = vmul.f32 %v1070_v53, %v1070_v53 }
  0xc1   : > { %459 = vst.msk [vmem:[%s969_s26 + $0x30] sm:$0xff] %vm452_vm1, %v387_v56  ;;  %v563_v2 = vmul.f32 %v387_v56, %v387_v56  ;;  %v497_v6 = vsel %vm452_vm1, %v387_v56, 0.0  ;;  %v571_v1 = vmul.f32 %v1072_v57, %v1072_v57  ;;  %v513_v34 = vsel %vm452_vm1, %v1072_v57, 0.0 }
  0xc2   : > { %467 = vst.msk [vmem:[%s969_s26 + $0x70] sm:$0xff] %vm452_vm1, %v1072_v57  ;;  %v498_v12 = vadd.f32 %v497_v6, %v496_v8  ;;  %v517_v57 = vsel %vm452_vm1, %v978_v20, 0.0 }
  0xc3   : > { %482 = vst.msk [vmem:[%s969_s26 + $0xe8] sm:$0xff] %vm452_vm1, %v1081_v61  ;;  %v600_v9 = vsel %vm452_vm1, %v563_v2, 0.0  ;;  %v616_v8 = vsel %vm452_vm1, %v571_v1, 0.0  ;;  %v533_v1 = vsel %vm452_vm1, %v987_v23, 0.0 }
  0xc4   : > { %v601_v21 = vadd.f32 %v600_v9, %v599_v11 }
  0xc7   : > { %v1094_v10 = vpop.f32.mrf.mxu2  ;;  %v1104_v18 = vpop.f32.mrf.mxu3 }
  0xc8   : > { %v389_v13 = vpop.f32.mrf.mxu0  ;;  %v409_v14 = vpop.f32.mrf.mxu1  ;;  %475 = vst.msk [vmem:[%s969_s26 + $0xb0] sm:$0xff] %vm452_vm1, %v1094_v10 }
  0xc9   : > { %460 = vst.msk [vmem:[%s969_s26 + $0x38] sm:$0xff] %vm452_vm1, %v389_v13  ;;  %v499_v16 = vsel %vm452_vm1, %v389_v13, 0.0  ;;  %v564_v17 = vmul.f32 %v389_v13, %v389_v13  ;;  %v572_v5 = vmul.f32 %v409_v14, %v409_v14  ;;  %v515_v9 = vsel %vm452_vm1, %v409_v14, 0.0 }
  0xca   : > { %v500_v25 = vadd.f32 %v499_v16, %v498_v12  ;;  %468 = vst.msk [vmem:[%s969_s26 + $0x78] sm:$0xff] %vm452_vm1, %v409_v14  ;;  %v574_v13 = vmul.f32 %v995_v24, %v995_v24  ;;  %v887_v16 = vmov 0.0   ;;  %v519_v14 = vsel %vm452_vm1, %v995_v24, 0.0 }
  0xcb   : > { %v602_v37 = vsel %vm452_vm1, %v564_v17, 0.0  ;;  %483 = vst.msk [vmem:[%s969_s26 + $0xf0] sm:$0xff] %vm452_vm1, %v1104_v18  ;;  %v618_v15 = vsel %vm452_vm1, %v572_v5, 0.0  ;;  %v523_v24 = vsel %vm452_vm1, %v1029_v32, 0.0  ;;  %v535_v5 = vsel %vm452_vm1, %v1004_v27, 0.0 }
  0xcc   : > { %v502_v39 = vadd.f32 %v501_v29, %v500_v25  ;;  %v603_v41 = vadd.f32 %v602_v37, %v601_v21  ;;  %485 = vst.msk [vmem:[%s1159_s30] sm:$0xff] %vm452_vm1, %v887_v16  ;;  %v620_v25 = vsel %vm452_vm1, %v573_v38, 0.0  ;;  %v575_v29 = vmul.f32 %v1012_v28, %v1012_v28 }
  0xcd   : > { %v622_v37 = vsel %vm452_vm1, %v574_v13, 0.0 }
  0xce   : > { %v504_v44 = vadd.f32 %v503_v43, %v502_v39  ;;  %v605_v45 = vadd.f32 %v604_v42, %v603_v41  ;;  %v521_v39 = vsel %vm452_vm1, %v1012_v28, 0.0  ;;  %v576_v41 = vmul.f32 %v1029_v32, %v1029_v32 }
  0xcf   : > { %v1127_v49 = vpop.f32.mrf.mxu2  ;;  %v1138_v26 = vpop.f32.mrf.mxu3  ;;  %v624_v19 = vsel %vm452_vm1, %v575_v29, 0.0  ;;  %v525_v28 = vsel %vm452_vm1, %v1046_v36, 0.0  ;;  %v527_v32 = vsel %vm452_vm1, %v1070_v53, 0.0  ;;  %v587_v29 = vmul.f32 %v1104_v18, %v1104_v18 }
  0xd0   : > { %v506_v50 = vadd.f32 %v505_v47, %v504_v44  ;;  %v607_v51 = vadd.f32 %v606_v46, %v605_v45  ;;  %476 = vst.msk [vmem:[%s969_s26 + $0xb8] sm:$0xff] %vm452_vm1, %v1127_v49  ;;  %v577_v44 = vmul.f32 %v1046_v36, %v1046_v36  ;;  %v626_v47 = vsel %vm452_vm1, %v576_v41, 0.0 }
  0xd1   : > { %484 = vst.msk [vmem:[%s969_s26 + $0xf8] sm:$0xff] %vm452_vm1, %v1138_v26  ;;  %v529_v36 = vsel %vm452_vm1, %v1094_v10, 0.0 }
  0xd2   : > { %v609_v55 = vadd.f32 %v608_v22, %v607_v51  ;;  %v508_v56 = vadd.f32 %v507_v52, %v506_v50  ;;  %v628_v22 = vsel %vm452_vm1, %v577_v44, 0.0  ;;  %v579_v52 = vmul.f32 %v1094_v10, %v1094_v10 }
  0xd3   : > { %v582_v10 = vmul.f32 %v1004_v27, %v1004_v27  ;;  %v539_v27 = vsel %vm452_vm1, %v1038_v35, 0.0 }
  0xd4   : > { %v510_v30 = vadd.f32 %v509_v59, %v508_v56  ;;  %v611_v62 = vadd.f32 %v610_v58, %v609_v55  ;;  %v630_v56 = vsel %vm452_vm1, %v578_v48, 0.0  ;;  %v580_v58 = vmul.f32 %v1127_v49, %v1127_v49 }
  0xd5   : > { %v632_v53 = vsel %vm452_vm1, %v579_v52, 0.0  ;;  %v638_v38 = vsel %vm452_vm1, %v582_v10, 0.0 }
  0xd6   : > { %v512_v2 = vadd.f32 %v511_v0, %v510_v30  ;;  %v613_v3 = vadd.f32 %v612_v63, %v611_v62  ;;  %v581_v30 = vmul.f32 %v987_v23, %v987_v23  ;;  %v531_v62 = vsel %vm452_vm1, %v1127_v49, 0.0 }
  0xd7   : > { %v583_v49 = vmul.f32 %v1021_v31, %v1021_v31  ;;  %v537_v23 = vsel %vm452_vm1, %v1021_v31, 0.0  ;;  %v541_v31 = vsel %vm452_vm1, %v1055_v40, 0.0 }
  0xd8   : > { %v514_v6 = vadd.f32 %v513_v34, %v512_v2  ;;  %v615_v7 = vadd.f32 %v614_v4, %v613_v3  ;;  %v634_v2 = vsel %vm452_vm1, %v580_v58, 0.0  ;;  %v636_v34 = vsel %vm452_vm1, %v581_v30, 0.0 }
  0xda   : > { %v617_v11 = vadd.f32 %v616_v8, %v615_v7  ;;  %v516_v12 = vadd.f32 %v515_v9, %v514_v6  ;;  %v584_v8 = vmul.f32 %v1038_v35, %v1038_v35  ;;  %v543_v35 = vsel %vm452_vm1, %v1081_v61, 0.0 }
  0xdc   : > { %v518_v17 = vadd.f32 %v517_v57, %v516_v12  ;;  %v619_v21 = vadd.f32 %v618_v15, %v617_v11  ;;  %v640_v12 = vsel %vm452_vm1, %v583_v49, 0.0  ;;  %v585_v57 = vmul.f32 %v1055_v40, %v1055_v40 }
  0xdd   : > { %v642_v16 = vsel %vm452_vm1, %v584_v8, 0.0  ;;  %v545_v40 = vsel %vm452_vm1, %v1104_v18, 0.0 }
  0xde   : > { %v520_v33 = vadd.f32 %v519_v14, %v518_v17  ;;  %v621_v20 = vadd.f32 %v620_v25, %v619_v21  ;;  %v586_v17 = vmul.f32 %v1081_v61, %v1081_v61  ;;  %v644_v14 = vsel %vm452_vm1, %v585_v57, 0.0 }
  0xdf   : > { %v547_v61 = vsel %vm452_vm1, %v1138_v26, 0.0 }
  0xe0   : > { %v522_v42 = vadd.f32 %v521_v39, %v520_v33  ;;  %v623_v43 = vadd.f32 %v622_v37, %v621_v20  ;;  %v646_v37 = vsel %vm452_vm1, %v586_v17, 0.0  ;;  %v588_v39 = vmul.f32 %v1138_v26, %v1138_v26 }
  0xe2   : > { %v625_v45 = vadd.f32 %v624_v19, %v623_v43  ;;  %v524_v46 = vadd.f32 %v523_v24, %v522_v42  ;;  %v648_v43 = vsel %vm452_vm1, %v587_v29, 0.0  ;;  %v650_v44 = vsel %vm452_vm1, %v588_v39, 0.0 }
  0xe4   : > { %v526_v50 = vadd.f32 %v525_v28, %v524_v46  ;;  %v627_v51 = vadd.f32 %v626_v47, %v625_v45 }
  0xe6   : > { %v528_v54 = vadd.f32 %v527_v32, %v526_v50  ;;  %v629_v55 = vadd.f32 %v628_v22, %v627_v51 }
  0xe8   : > { %v631_v59 = vadd.f32 %v630_v56, %v629_v55  ;;  %v530_v60 = vadd.f32 %v529_v36, %v528_v54 }
  0xea   : > { %v633_v63 = vadd.f32 %v632_v53, %v631_v59  ;;  %v532_v0 = vadd.f32 %v531_v62, %v530_v60 }
  0xec   : > { %v534_v3 = vadd.f32 %v533_v1, %v532_v0  ;;  %v635_v4 = vadd.f32 %v634_v2, %v633_v63 }
  0xee   : > { %v536_v6 = vadd.f32 %v535_v5, %v534_v3  ;;  %v637_v7 = vadd.f32 %v636_v34, %v635_v4 }
  0xf0   : > { %v538_v9 = vadd.f32 %v537_v23, %v536_v6  ;;  %v639_v11 = vadd.f32 %v638_v38, %v637_v7 }
  0xf2   : > { %v641_v13 = vadd.f32 %v640_v12, %v639_v11  ;;  %v540_v15 = vadd.f32 %v539_v27, %v538_v9 }
  0xf4   : > { %v542_v21 = vadd.f32 %v541_v31, %v540_v15  ;;  %v643_v25 = vadd.f32 %v642_v16, %v641_v13 }
  0xf6   : > { %v544_v33 = vadd.f32 %v543_v35, %v542_v21  ;;  %v645_v20 = vadd.f32 %v644_v14, %v643_v25 }
  0xf8   : > { %v647_v41 = vadd.f32 %v646_v37, %v645_v20  ;;  %v546_v42 = vadd.f32 %v545_v40, %v544_v33 }
  0xfa   : > { %v649_v19 = vadd.f32 %v648_v43, %v647_v41  ;;  %v548_v24 = vadd.f32 %v547_v61, %v546_v42 }
  0xfc   : > { %v549_v45 = vrot.slane %v548_v24, 4  ;;  %v651_v46 = vadd.f32 %v650_v44, %v649_v19 }
  0xfe   : > { %v550_v47 = vadd.f32 %v549_v45, %v548_v24  ;;  %v652_v18 = vrot.slane %v651_v46, 4 }
 0x100   : > { %v551_v28 = vrot.slane %v550_v47, 2  ;;  %v653_v48 = vadd.f32 %v652_v18, %v651_v46 }
 0x102   : > { %v552_v50 = vadd.f32 %v551_v28, %v550_v47  ;;  %v654_v51 = vrot.slane %v653_v48, 2 }
 0x104   : > { %v553_v22 = vrot.slane %v552_v50, 1  ;;  %v655_v32 = vadd.f32 %v654_v51, %v653_v48 }
 0x106   : > { %v554_v52 = vadd.f32 %v553_v22, %v552_v50  ;;  %v656_v54 = vrot.slane %v655_v32, 1 }
 0x108   : > { %556 = vst.msk [vmem:[%s1159_s30] sm:$0x1] %vm555_vm2, %v554_v52  ;;  %v657_v26 = vadd.f32 %v656_v54, %v655_v32 }
 0x10a   : > { %658 = vst.msk [vmem:[%s1159_s30 + $0x1] sm:$0x1] %vm555_vm2, %v657_v26 }
 0x10b PF: > { %s14_s12 = sadd.s32 1, %s885_s12  }
 0x10c   : > { %p11_p5 = scmp.ge.s32.totalorder %s14_s12, 4  }
 0x10e   :  { %13 = sbr.rel (!%p11_p5) target bundleno = 1 (0x1), region = 70 }

// kernel: hierarchical_vae_forward.63
= control target key start
LH: loop header
LB: loop body
LE: loop exit
PB: predicated region body
PF: predicated region fallthrough
CT: control target
= control target key end

     0   :  { %s736_s12 = smov 0   ;;  %s1062_s0 = inlined_call_operand.vmem [shape: f32[512,16], index: 0, kind: input, shape index: {}]   ;;  %s1063_s1 = inlined_call_operand.vmem [shape: f32[1,16], index: 1, kind: input, shape index: {}]   ;;  %s1064_s2 = inlined_call_operand.vmem [shape: f32[1,16], index: 2, kind: input, shape index: {}]   ;;  %s1065_s3 = inlined_call_operand.vmem [shape: f32[512,16], index: 3, kind: output, shape index: {}]  }
   0x1 LB: > { %s559_s13 = sadd.s32 4294967295, %s714_s12   ;;  %p563_p0 = scmp.ge.s32.totalorder %s714_s12, 1  ;;  %s714_s12 = sphi %s736_s12, %s13_s12  }
   0x2   : > { %p138_p1 = scmp.lt.s32.totalorder %s714_s12, 3 }
   0x4   : > { %p139_p2 = pnand %p563_p0, %p138_p1 }
   0x5   : > { %s564_s14 = sshll.u32 (!%p139_p2), %s559_s13, 5 }
   0x6   : > { %142 = sbr.rel (%p139_p2) target bundleno = 100 (0x64), region = 32  ;;  %p163_p3 = scmp.lt.s32.totalorder (!%p139_p2), %s564_s14, 63 }
   0xb   : > { %s1067_s14 = smov (!%p163_p3, %s564_s14), 63  ;;  %v749_v0 = vld [vmem:[%s1063_s1] ss:$0 sm:$0xff]  ;;  %vm470_vm0 = vcmask 130048  }
   0xc   : > { %s565_s17 = sshll.u32 %s1067_s14, 3  ;;  %v762_v1 = vld [vmem:[%s1064_s2] ss:$0 sm:$0xff] }
   0xd   : > { %s757_s20 = scalar_lea.vmem %s1062_s0, %s565_s17  ;;  %s874_s25 = scalar_lea.vmem %s1065_s3, %s565_s17 }
   0xe   : > { %v174_v2 = vld [vmem:[%s757_s20] sm:$0xff]  ;;  %v175_v3 = vld [vmem:[%s757_s20 + $0x8] sm:$0xff]  ;;  %v176_v4 = vld [vmem:[%s757_s20 + $0x10] sm:$0xff] }
   0xf   : > { %v210_v5 = vmul.f32 %v749_v0, %v174_v2  ;;  %v211_v6 = vmul.f32 %v749_v0, %v175_v3  ;;  %v212_v7 = vmul.f32 %v749_v0, %v176_v4  ;;  %v177_v8 = vld [vmem:[%s757_s20 + $0x18] sm:$0xff]  ;;  %v178_v9 = vld [vmem:[%s757_s20 + $0x20] sm:$0xff]  ;;  %v179_v10 = vld [vmem:[%s757_s20 + $0x28] sm:$0xff] }
  0x10   : > { %v213_v11 = vmul.f32 %v749_v0, %v177_v8  ;;  %v214_v12 = vmul.f32 %v749_v0, %v178_v9  ;;  %v215_v13 = vmul.f32 %v749_v0, %v179_v10  ;;  %v180_v14 = vld [vmem:[%s757_s20 + $0x30] sm:$0xff]  ;;  %v181_v15 = vld [vmem:[%s757_s20 + $0x38] sm:$0xff]  ;;  %v182_v24 = vld [vmem:[%s757_s20 + $0x40] sm:$0xff] }
  0x11   : > { %v779_v16 = vadd.f32 %v762_v1, %v210_v5  ;;  %v782_v17 = vadd.f32 %v762_v1, %v211_v6  ;;  %v785_v18 = vadd.f32 %v762_v1, %v212_v7  ;;  %v216_v19 = vmul.f32 %v749_v0, %v180_v14  ;;  %v183_v29 = vld [vmem:[%s757_s20 + $0x48] sm:$0xff]  ;;  %v184_v34 = vld [vmem:[%s757_s20 + $0x50] sm:$0xff]  ;;  %v185_v35 = vld [vmem:[%s757_s20 + $0x58] sm:$0xff] }
  0x12   : > { %v789_v20 = vadd.f32 %v762_v1, %v213_v11  ;;  %v792_v21 = vadd.f32 %v762_v1, %v214_v12  ;;  %v795_v22 = vadd.f32 %v762_v1, %v215_v13  ;;  %v217_v23 = vmul.f32 %v749_v0, %v181_v15  ;;  %v186_v50 = vld [vmem:[%s757_s20 + $0x60] sm:$0xff]  ;;  %v187_v53 = vld [vmem:[%s757_s20 + $0x68] sm:$0xff]  ;;  %v188_v60 = vld [vmem:[%s757_s20 + $0x70] sm:$0xff] }
  0x13   : > { %v278_v25 = vsub.f32 0.0, %v779_v16  ;;  %v279_v26 = vsub.f32 0.0, %v782_v17  ;;  %v280_v27 = vsub.f32 0.0, %v785_v18  ;;  %v803_v28 = vadd.f32 %v762_v1, %v216_v19  ;;  %v189_v3 = vld [vmem:[%s757_s20 + $0x78] sm:$0xff]  ;;  %v190_v15 = vld [vmem:[%s757_s20 + $0x80] sm:$0xff]  ;;  %v191_v19 = vld [vmem:[%s757_s20 + $0x88] sm:$0xff] }
  0x14   : > { %v281_v30 = vsub.f32 0.0, %v789_v20  ;;  %v282_v31 = vsub.f32 0.0, %v792_v21  ;;  %v283_v32 = vsub.f32 0.0, %v795_v22  ;;  %v810_v33 = vadd.f32 %v762_v1, %v217_v23 }
  0x15   : > { %v310_v36 = vmul.f32 1.442695, %v278_v25  ;;  %v312_v37 = vmul.f32 1.442695, %v279_v26  ;;  %v314_v38 = vmul.f32 1.442695, %v280_v27  ;;  %v218_v39 = vmul.f32 %v749_v0, %v182_v24 }
  0x16   : > { %v316_v40 = vmul.f32 1.442695, %v281_v30  ;;  %v318_v41 = vmul.f32 1.442695, %v282_v31  ;;  %v320_v42 = vmul.f32 1.442695, %v283_v32  ;;  %v219_v43 = vmul.f32 %v749_v0, %v183_v29 }
  0x17   : > { %580 = vpow2.f32 %v310_v36  ;;  %v284_v44 = vsub.f32 0.0, %v803_v28  ;;  %v285_v45 = vsub.f32 0.0, %v810_v33  ;;  %v819_v46 = vadd.f32 %v762_v1, %v218_v39 }
  0x18   : > { %582 = vpow2.f32 %v312_v37  ;;  %v822_v47 = vadd.f32 %v762_v1, %v219_v43  ;;  %v220_v48 = vmul.f32 %v749_v0, %v184_v34  ;;  %v221_v49 = vmul.f32 %v749_v0, %v185_v35  ;;  %v192_v37 = vld [vmem:[%s757_s20 + $0x90] sm:$0xff] }
  0x19   : > { %584 = vpow2.f32 %v314_v38  ;;  %v322_v51 = vmul.f32 1.442695, %v284_v44  ;;  %v286_v52 = vsub.f32 0.0, %v819_v46  ;;  %v324_v54 = vmul.f32 1.442695, %v285_v45 }
  0x1a   : > { %586 = vpow2.f32 %v316_v40  ;;  %v830_v55 = vadd.f32 %v762_v1, %v220_v48  ;;  %v833_v56 = vadd.f32 %v762_v1, %v221_v49  ;;  %v287_v58 = vsub.f32 0.0, %v822_v47 }
  0x1b   : > { %588 = vpow2.f32 %v318_v41  ;;  %v326_v57 = vmul.f32 1.442695, %v286_v52  ;;  %v222_v59 = vmul.f32 %v749_v0, %v186_v50  ;;  %v223_v61 = vmul.f32 %v749_v0, %v187_v53 }
  0x1c   : > { %590 = vpow2.f32 %v320_v42  ;;  %v288_v63 = vsub.f32 0.0, %v830_v55  ;;  %v289_v2 = vsub.f32 0.0, %v833_v56  ;;  %v224_v6 = vmul.f32 %v749_v0, %v188_v60 }
  0x1d   : > { %v581_v62 = vpop.eup %580  ;;  %592 = vpow2.f32 %v322_v51  ;;  %v328_v9 = vmul.f32 1.442695, %v287_v58  ;;  %v844_v10 = vadd.f32 %v762_v1, %v222_v59  ;;  %v847_v13 = vadd.f32 %v762_v1, %v223_v61  ;;  %v193_v58 = vld [vmem:[%s757_s20 + $0x98] sm:$0xff] }
  0x1e   : > { %v583_v4 = vpop.eup %582  ;;  %v374_v5 = vadd.f32 1.0, %v581_v62  ;;  %594 = vpow2.f32 %v324_v54  ;;  %v225_v14 = vmul.f32 %v749_v0, %v189_v3  ;;  %v330_v25 = vmul.f32 1.442695, %v288_v63 }
  0x1f   : > { %v585_v7 = vpop.eup %584  ;;  %v375_v8 = vadd.f32 1.0, %v583_v4  ;;  %596 = vpow2.f32 %v326_v57  ;;  %v332_v26 = vmul.f32 1.442695, %v289_v2  ;;  %v853_v30 = vadd.f32 %v762_v1, %v224_v6  ;;  %v194_v4 = vld [vmem:[%s757_s20 + $0xa0] sm:$0xff] }
  0x20   : > { %v587_v11 = vpop.eup %586  ;;  %598 = vrcp.f32 %v374_v5  ;;  %v376_v12 = vadd.f32 1.0, %v585_v7  ;;  %v856_v31 = vadd.f32 %v762_v1, %v225_v14  ;;  %v226_v35 = vmul.f32 %v749_v0, %v190_v15  ;;  %v196_v14 = vld [vmem:[%s757_s20 + $0xb0] sm:$0xff] }
  0x21   : > { %v589_v23 = vpop.eup %588  ;;  %600 = vrcp.f32 %v375_v8  ;;  %v377_v24 = vadd.f32 1.0, %v587_v11  ;;  %v227_v36 = vmul.f32 %v749_v0, %v191_v19  ;;  %v290_v40 = vsub.f32 0.0, %v844_v10  ;;  %v195_v8 = vld [vmem:[%s757_s20 + $0xa8] sm:$0xff] }
  0x22   : > { %v591_v27 = vpop.eup %590  ;;  %602 = vrcp.f32 %v376_v12  ;;  %v378_v29 = vadd.f32 1.0, %v589_v23  ;;  %v291_v41 = vsub.f32 0.0, %v847_v13  ;;  %v864_v44 = vadd.f32 %v762_v1, %v226_v35 }
  0x23   : > { %v593_v32 = vpop.eup %592  ;;  %604 = vrcp.f32 %v377_v24  ;;  %v379_v34 = vadd.f32 1.0, %v591_v27  ;;  %v867_v45 = vadd.f32 %v762_v1, %v227_v36  ;;  %v292_v50 = vsub.f32 0.0, %v853_v30  ;;  %v197_v27 = vld [vmem:[%s757_s20 + $0xb8] sm:$0xff] }
  0x24   : > { %v595_v38 = vpop.eup %594  ;;  %606 = vrcp.f32 %v378_v29  ;;  %v380_v39 = vadd.f32 1.0, %v593_v32  ;;  %v228_v51 = vmul.f32 %v749_v0, %v192_v37  ;;  %v293_v54 = vsub.f32 0.0, %v856_v31 }
  0x25   : > { %v597_v42 = vpop.eup %596  ;;  %608 = vrcp.f32 %v379_v34  ;;  %v381_v43 = vadd.f32 1.0, %v595_v38  ;;  %v294_v57 = vsub.f32 0.0, %v864_v44  ;;  %v334_v61 = vmul.f32 1.442695, %v290_v40  ;;  %v199_v40 = vld [vmem:[%s757_s20 + $0xc8] sm:$0xff] }
  0x26   : > { %v599_v48 = vpop.eup %598  ;;  %610 = vrcp.f32 %v380_v39  ;;  %v382_v49 = vadd.f32 1.0, %v597_v42  ;;  %v295_v62 = vsub.f32 0.0, %v867_v45  ;;  %v336_v2 = vmul.f32 1.442695, %v291_v41  ;;  %v198_v39 = vld [vmem:[%s757_s20 + $0xc0] sm:$0xff] }
  0x27   : > { %v601_v52 = vpop.eup %600  ;;  %v438_v53 = vmul.f32 %v599_v48, %v779_v16  ;;  %612 = vrcp.f32 %v381_v43  ;;  %v888_v3 = vadd.f32 %v762_v1, %v228_v51  ;;  %v338_v6 = vmul.f32 1.442695, %v292_v50 }
  0x28   : > { %v603_v59 = vpop.eup %602  ;;  %v439_v60 = vmul.f32 %v601_v52, %v782_v17  ;;  %614 = vrcp.f32 %v382_v49  ;;  %v229_v7 = vmul.f32 %v749_v0, %v193_v58  ;;  %v340_v11 = vmul.f32 1.442695, %v293_v54  ;;  %v200_v58 = vld [vmem:[%s757_s20 + $0xd0] sm:$0xff] }
  0x29   : > { %v605_v63 = vpop.eup %604  ;;  %471 = vst.msk [vmem:[%s874_s25] sm:$0xff] %vm470_vm0, %v438_v53  ;;  %v440_v16 = vmul.f32 %v603_v59, %v785_v18  ;;  %616 = vpow2.f32 %v328_v9  ;;  %v342_v12 = vmul.f32 1.442695, %v294_v57  ;;  %v344_v19 = vmul.f32 1.442695, %v295_v62 }
  0x2a   : > { %v607_v17 = vpop.eup %606  ;;  %472 = vst.msk [vmem:[%s874_s25 + $0x8] sm:$0xff] %vm470_vm0, %v439_v60  ;;  %v441_v5 = vmul.f32 %v605_v63, %v789_v20  ;;  %618 = vpow2.f32 %v330_v25  ;;  %v230_v23 = vmul.f32 %v749_v0, %v194_v4  ;;  %v296_v25 = vsub.f32 0.0, %v888_v3 }
  0x2b   : > { %v609_v18 = vpop.eup %608  ;;  %473 = vst.msk [vmem:[%s874_s25 + $0x10] sm:$0xff] %vm470_vm0, %v440_v16  ;;  %v442_v9 = vmul.f32 %v607_v17, %v792_v21  ;;  %620 = vpow2.f32 %v332_v26  ;;  %v231_v26 = vmul.f32 %v749_v0, %v195_v8  ;;  %v914_v32 = vadd.f32 %v762_v1, %v229_v7 }
  0x2c   : > { %v611_v15 = vpop.eup %610  ;;  %474 = vst.msk [vmem:[%s874_s25 + $0x18] sm:$0xff] %vm470_vm0, %v441_v5  ;;  %v443_v20 = vmul.f32 %v609_v18, %v795_v22  ;;  %622 = vpow2.f32 %v334_v61  ;;  %v233_v38 = vmul.f32 %v749_v0, %v197_v27  ;;  %v234_v54 = vmul.f32 %v749_v0, %v198_v39  ;;  %v203_v39 = vld [vmem:[%s757_s20 + $0xe8] sm:$0xff] }
  0x2d   : > { %v613_v24 = vpop.eup %612  ;;  %475 = vst.msk [vmem:[%s874_s25 + $0x20] sm:$0xff] %vm470_vm0, %v442_v9  ;;  %v444_v21 = vmul.f32 %v611_v15, %v803_v28  ;;  %624 = vpow2.f32 %v336_v2  ;;  %v232_v28 = vmul.f32 %v749_v0, %v196_v14  ;;  %v931_v43 = vadd.f32 %v762_v1, %v231_v26 }
  0x2e   : > { %v615_v29 = vpop.eup %614  ;;  %476 = vst.msk [vmem:[%s874_s25 + $0x28] sm:$0xff] %vm470_vm0, %v443_v20  ;;  %v445_v22 = vmul.f32 %v613_v24, %v810_v33  ;;  %626 = vpow2.f32 %v338_v6  ;;  %v923_v33 = vadd.f32 %v762_v1, %v230_v23  ;;  %v297_v50 = vsub.f32 0.0, %v914_v32 }
  0x2f   : > { %v617_v34 = vpop.eup %616  ;;  %477 = vst.msk [vmem:[%s874_s25 + $0x30] sm:$0xff] %vm470_vm0, %v444_v21  ;;  %v446_v35 = vmul.f32 %v615_v29, %v819_v46  ;;  %628 = vpow2.f32 %v340_v11  ;;  %v346_v46 = vmul.f32 1.442695, %v296_v25  ;;  %v935_v51 = vadd.f32 %v762_v1, %v232_v28 }
  0x30   : > { %v619_v36 = vpop.eup %618  ;;  %478 = vst.msk [vmem:[%s874_s25 + $0x38] sm:$0xff] %vm470_vm0, %v445_v22  ;;  %v383_v37 = vadd.f32 1.0, %v617_v34  ;;  %630 = vpow2.f32 %v342_v12  ;;  %v235_v57 = vmul.f32 %v749_v0, %v199_v40  ;;  %v298_v61 = vsub.f32 0.0, %v923_v33  ;;  %v201_v22 = vld [vmem:[%s757_s20 + $0xd8] sm:$0xff] }
  0x31   : > { %v621_v41 = vpop.eup %620  ;;  %479 = vst.msk [vmem:[%s874_s25 + $0x40] sm:$0xff] %vm470_vm0, %v446_v35  ;;  %v384_v42 = vadd.f32 1.0, %v619_v36  ;;  %632 = vpow2.f32 %v344_v19  ;;  %v942_v62 = vadd.f32 %v762_v1, %v233_v38  ;;  %v299_v2 = vsub.f32 0.0, %v931_v43  ;;  %v202_v36 = vld [vmem:[%s757_s20 + $0xe0] sm:$0xff] }
  0x32   : > { %v623_v48 = vpop.eup %622  ;;  %634 = vrcp.f32 %v383_v37  ;;  %v385_v49 = vadd.f32 1.0, %v621_v41  ;;  %v946_v4 = vadd.f32 %v762_v1, %v234_v54  ;;  %v949_v6 = vadd.f32 %v762_v1, %v235_v57 }
  0x33   : > { %v625_v52 = vpop.eup %624  ;;  %636 = vrcp.f32 %v384_v42  ;;  %v386_v53 = vadd.f32 1.0, %v623_v48  ;;  %v236_v7 = vmul.f32 %v749_v0, %v200_v58  ;;  %v348_v9 = vmul.f32 1.442695, %v297_v50 }
  0x34   : > { %v627_v59 = vpop.eup %626  ;;  %638 = vrcp.f32 %v385_v49  ;;  %v387_v60 = vadd.f32 1.0, %v625_v52  ;;  %v300_v11 = vsub.f32 0.0, %v935_v51  ;;  %v301_v15 = vsub.f32 0.0, %v942_v62  ;;  %v205_v52 = vld [vmem:[%s757_s20 + $0xf8] sm:$0xff] }
  0x35   : > { %v629_v63 = vpop.eup %628  ;;  %640 = vrcp.f32 %v386_v53  ;;  %v388_v16 = vadd.f32 1.0, %v627_v59  ;;  %v955_v20 = vadd.f32 %v762_v1, %v236_v7  ;;  %v350_v24 = vmul.f32 1.442695, %v298_v61 }
  0x36   : > { %v631_v17 = vpop.eup %630  ;;  %642 = vrcp.f32 %v387_v60  ;;  %v389_v5 = vadd.f32 1.0, %v629_v63  ;;  %v302_v21 = vsub.f32 0.0, %v946_v4  ;;  %v352_v27 = vmul.f32 1.442695, %v299_v2 }
  0x37   : > { %v633_v8 = vpop.eup %632  ;;  %644 = vrcp.f32 %v388_v16  ;;  %v390_v18 = vadd.f32 1.0, %v631_v17  ;;  %v303_v29 = vsub.f32 0.0, %v949_v6  ;;  %v354_v34 = vmul.f32 1.442695, %v300_v11 }
  0x38   : > { %v635_v12 = vpop.eup %634  ;;  %646 = vrcp.f32 %v389_v5  ;;  %v391_v14 = vadd.f32 1.0, %v633_v8  ;;  %v304_v35 = vsub.f32 0.0, %v955_v20  ;;  %v356_v38 = vmul.f32 1.442695, %v301_v15 }
  0x39   : > { %v637_v19 = vpop.eup %636  ;;  %v447_v23 = vmul.f32 %v635_v12, %v822_v47  ;;  %648 = vrcp.f32 %v390_v18  ;;  %v358_v41 = vmul.f32 1.442695, %v302_v21  ;;  %v237_v42 = vmul.f32 %v749_v0, %v201_v22 }
  0x3a   : > { %v639_v25 = vpop.eup %638  ;;  %v448_v26 = vmul.f32 %v637_v19, %v830_v55  ;;  %650 = vrcp.f32 %v391_v14  ;;  %v360_v49 = vmul.f32 1.442695, %v303_v29  ;;  %v238_v50 = vmul.f32 %v749_v0, %v202_v36 }
  0x3b   : > { %v641_v28 = vpop.eup %640  ;;  %480 = vst.msk [vmem:[%s874_s25 + $0x48] sm:$0xff] %vm470_vm0, %v447_v23  ;;  %v449_v47 = vmul.f32 %v639_v25, %v833_v56  ;;  %652 = vpow2.f32 %v346_v46  ;;  %v204_v46 = vld [vmem:[%s757_s20 + $0xf0] sm:$0xff]  ;;  %v362_v54 = vmul.f32 1.442695, %v304_v35  ;;  %v239_v57 = vmul.f32 %v749_v0, %v203_v39 }
  0x3c   : > { %v643_v55 = vpop.eup %642  ;;  %481 = vst.msk [vmem:[%s874_s25 + $0x50] sm:$0xff] %vm470_vm0, %v448_v26  ;;  %v450_v37 = vmul.f32 %v641_v28, %v844_v10  ;;  %654 = vpow2.f32 %v348_v9  ;;  %v240_v59 = vmul.f32 %v749_v0, %v204_v46  ;;  %v241_v63 = vmul.f32 %v749_v0, %v205_v52 }
  0x3d   : > { %v645_v40 = vpop.eup %644  ;;  %482 = vst.msk [vmem:[%s874_s25 + $0x58] sm:$0xff] %vm470_vm0, %v449_v47  ;;  %v451_v56 = vmul.f32 %v643_v55, %v847_v13  ;;  %656 = vpow2.f32 %v350_v24 }
  0x3e   : > { %v647_v48 = vpop.eup %646  ;;  %483 = vst.msk [vmem:[%s874_s25 + $0x60] sm:$0xff] %vm470_vm0, %v450_v37  ;;  %v452_v10 = vmul.f32 %v645_v40, %v853_v30  ;;  %658 = vpow2.f32 %v352_v27  ;;  %v1007_v0 = vadd.f32 %v762_v1, %v240_v59  ;;  %v1011_v12 = vadd.f32 %v762_v1, %v241_v63 }
  0x3f   : > { %v649_v53 = vpop.eup %648  ;;  %484 = vst.msk [vmem:[%s874_s25 + $0x68] sm:$0xff] %vm470_vm0, %v451_v56  ;;  %v453_v13 = vmul.f32 %v647_v48, %v856_v31  ;;  %660 = vpow2.f32 %v354_v34  ;;  %v993_v31 = vadd.f32 %v762_v1, %v237_v42 }
  0x40   : > { %v651_v58 = vpop.eup %650  ;;  %485 = vst.msk [vmem:[%s874_s25 + $0x70] sm:$0xff] %vm470_vm0, %v452_v10  ;;  %v454_v30 = vmul.f32 %v649_v53, %v864_v44  ;;  %662 = vpow2.f32 %v356_v38  ;;  %v999_v44 = vadd.f32 %v762_v1, %v238_v50  ;;  %v308_v27 = vsub.f32 0.0, %v1007_v0 }
  0x41   : > { %v653_v60 = vpop.eup %652  ;;  %486 = vst.msk [vmem:[%s874_s25 + $0x78] sm:$0xff] %vm470_vm0, %v453_v13  ;;  %v455_v61 = vmul.f32 %v651_v58, %v867_v45  ;;  %664 = vpow2.f32 %v358_v41  ;;  %v1004_v45 = vadd.f32 %v762_v1, %v239_v57  ;;  %v305_v11 = vsub.f32 0.0, %v993_v31 }
  0x42   : > { %v655_v16 = vpop.eup %654  ;;  %487 = vst.msk [vmem:[%s874_s25 + $0x80] sm:$0xff] %vm470_vm0, %v454_v30  ;;  %v392_v2 = vadd.f32 1.0, %v653_v60  ;;  %666 = vpow2.f32 %v360_v49  ;;  %v306_v19 = vsub.f32 0.0, %v999_v44  ;;  %v309_v28 = vsub.f32 0.0, %v1011_v12 }
  0x43   : > { %v657_v17 = vpop.eup %656  ;;  %488 = vst.msk [vmem:[%s874_s25 + $0x88] sm:$0xff] %vm470_vm0, %v455_v61  ;;  %v393_v5 = vadd.f32 1.0, %v655_v16  ;;  %668 = vpow2.f32 %v362_v54  ;;  %v307_v21 = vsub.f32 0.0, %v1004_v45  ;;  %v364_v1 = vmul.f32 1.442695, %v305_v11 }
  0x44   : > { %v659_v7 = vpop.eup %658  ;;  %670 = vrcp.f32 %v392_v2  ;;  %v394_v8 = vadd.f32 1.0, %v657_v17  ;;  %v366_v35 = vmul.f32 1.442695, %v306_v19  ;;  %v370_v40 = vmul.f32 1.442695, %v308_v27 }
  0x45   : > { %v661_v18 = vpop.eup %660  ;;  %672 = vrcp.f32 %v393_v5  ;;  %v395_v9 = vadd.f32 1.0, %v659_v7  ;;  %v368_v37 = vmul.f32 1.442695, %v307_v21  ;;  %v372_v42 = vmul.f32 1.442695, %v309_v28 }
  0x46   : > { %v663_v14 = vpop.eup %662  ;;  %674 = vrcp.f32 %v394_v8  ;;  %v396_v15 = vadd.f32 1.0, %v661_v18 }
  0x47   : > { %v665_v23 = vpop.eup %664  ;;  %676 = vrcp.f32 %v395_v9  ;;  %v397_v24 = vadd.f32 1.0, %v663_v14 }
  0x48   : > { %v667_v25 = vpop.eup %666  ;;  %678 = vrcp.f32 %v396_v15  ;;  %v398_v26 = vadd.f32 1.0, %v665_v23 }
  0x49   : > { %v669_v29 = vpop.eup %668  ;;  %680 = vrcp.f32 %v397_v24  ;;  %v399_v22 = vadd.f32 1.0, %v667_v25 }
  0x4a   : > { %v671_v47 = vpop.eup %670  ;;  %682 = vrcp.f32 %v398_v26  ;;  %v400_v34 = vadd.f32 1.0, %v669_v29 }
  0x4b   : > { %v673_v36 = vpop.eup %672  ;;  %v456_v55 = vmul.f32 %v671_v47, %v888_v3  ;;  %684 = vrcp.f32 %v399_v22 }
  0x4c   : > { %v675_v38 = vpop.eup %674  ;;  %v457_v39 = vmul.f32 %v673_v36, %v914_v32  ;;  %686 = vrcp.f32 %v400_v34 }
  0x4d   : > { %v677_v56 = vpop.eup %676  ;;  %489 = vst.msk [vmem:[%s874_s25 + $0x90] sm:$0xff] %vm470_vm0, %v456_v55  ;;  %v458_v41 = vmul.f32 %v675_v38, %v923_v33  ;;  %688 = vpow2.f32 %v364_v1 }
  0x4e   : > { %v679_v46 = vpop.eup %678  ;;  %490 = vst.msk [vmem:[%s874_s25 + $0x98] sm:$0xff] %vm470_vm0, %v457_v39  ;;  %v459_v3 = vmul.f32 %v677_v56, %v931_v43  ;;  %690 = vpow2.f32 %v366_v35 }
  0x4f   : > { %v681_v48 = vpop.eup %680  ;;  %491 = vst.msk [vmem:[%s874_s25 + $0xa0] sm:$0xff] %vm470_vm0, %v458_v41  ;;  %v460_v32 = vmul.f32 %v679_v46, %v935_v51  ;;  %692 = vpow2.f32 %v368_v37 }
  0x50   : > { %v683_v10 = vpop.eup %682  ;;  %492 = vst.msk [vmem:[%s874_s25 + $0xa8] sm:$0xff] %vm470_vm0, %v459_v3  ;;  %v461_v33 = vmul.f32 %v681_v48, %v942_v62  ;;  %694 = vpow2.f32 %v370_v40 }
  0x51   : > { %v685_v49 = vpop.eup %684  ;;  %493 = vst.msk [vmem:[%s874_s25 + $0xb0] sm:$0xff] %vm470_vm0, %v460_v32  ;;  %v462_v43 = vmul.f32 %v683_v10, %v946_v4  ;;  %696 = vpow2.f32 %v372_v42 }
  0x52   : > { %v687_v50 = vpop.eup %686  ;;  %494 = vst.msk [vmem:[%s874_s25 + $0xb8] sm:$0xff] %vm470_vm0, %v461_v33  ;;  %v463_v51 = vmul.f32 %v685_v49, %v949_v6 }
  0x53   : > { %v689_v52 = vpop.eup %688  ;;  %495 = vst.msk [vmem:[%s874_s25 + $0xc0] sm:$0xff] %vm470_vm0, %v462_v43  ;;  %v464_v53 = vmul.f32 %v687_v50, %v955_v20 }
  0x54   : > { %v691_v13 = vpop.eup %690  ;;  %496 = vst.msk [vmem:[%s874_s25 + $0xc8] sm:$0xff] %vm470_vm0, %v463_v51  ;;  %v401_v62 = vadd.f32 1.0, %v689_v52 }
  0x55   : > { %v693_v54 = vpop.eup %692  ;;  %497 = vst.msk [vmem:[%s874_s25 + $0xd0] sm:$0xff] %vm470_vm0, %v464_v53  ;;  %v402_v57 = vadd.f32 1.0, %v691_v13 }
  0x56   : > { %v695_v4 = vpop.eup %694  ;;  %698 = vrcp.f32 %v401_v62  ;;  %v403_v58 = vadd.f32 1.0, %v693_v54 }
  0x57   : > { %v697_v30 = vpop.eup %696  ;;  %700 = vrcp.f32 %v402_v57  ;;  %v404_v6 = vadd.f32 1.0, %v695_v4 }
  0x58   : > { %702 = vrcp.f32 %v403_v58  ;;  %v405_v59 = vadd.f32 1.0, %v697_v30 }
  0x59   : > { %704 = vrcp.f32 %v404_v6 }
  0x5a   : > { %706 = vrcp.f32 %v405_v59 }
  0x5c   : > { %v699_v20 = vpop.eup %698 }
  0x5d   : > { %v701_v60 = vpop.eup %700  ;;  %v465_v61 = vmul.f32 %v699_v20, %v993_v31 }
  0x5e   : > { %v703_v63 = vpop.eup %702  ;;  %v466_v16 = vmul.f32 %v701_v60, %v999_v44 }
  0x5f   : > { %v705_v2 = vpop.eup %704  ;;  %498 = vst.msk [vmem:[%s874_s25 + $0xd8] sm:$0xff] %vm470_vm0, %v465_v61  ;;  %v467_v17 = vmul.f32 %v703_v63, %v1004_v45 }
  0x60   : > { %v707_v5 = vpop.eup %706  ;;  %499 = vst.msk [vmem:[%s874_s25 + $0xe0] sm:$0xff] %vm470_vm0, %v466_v16  ;;  %v468_v7 = vmul.f32 %v705_v2, %v1007_v0 }
  0x61   : > { %500 = vst.msk [vmem:[%s874_s25 + $0xe8] sm:$0xff] %vm470_vm0, %v467_v17  ;;  %v469_v8 = vmul.f32 %v707_v5, %v1011_v12 }
  0x62   : > { %501 = vst.msk [vmem:[%s874_s25 + $0xf0] sm:$0xff] %vm470_vm0, %v468_v7 }
  0x63   : > { %502 = vst.msk [vmem:[%s874_s25 + $0xf8] sm:$0xff] %vm470_vm0, %v469_v8 }
  0x64 PF: > { %s13_s12 = sadd.s32 1, %s714_s12  }
  0x65   : > { %p10_p4 = scmp.ge.s32.totalorder %s13_s12, 4  }
  0x67   :  { %12 = sbr.rel (!%p10_p4) target bundleno = 1 (0x1), region = 62 }

</bundles_post_ra>
